<compile_context>
chip_gen: v7x
topology: tpu7x:2x2x1
jax: 0.10.0
libtpu: 0.0.40
codegen_flags: <defaults>
</compile_context>

<pallas_src>
import functools
import math

import jax
import jax.numpy as jnp
from jax.experimental import pallas as pl
from jax.experimental.pallas import tpu as pltpu

MXU_DTYPE = jnp.bfloat16    # matmul operand dtype inside the kernel (accum stays f32)
MAX_TILE_ROWS = 32          # upper bound on output rows per grid step


def _round_up(x, m):
    return (x + m - 1) // m * m


# ----------------------------------------------------------------------------
# Bilinear 2x upsample (nn.Upsample(scale_factor=2, mode='bilinear',
# align_corners=False)) -- separable, kept in JAX glue.
# TODO(synk): fuse this 2x upsample into the following conv kernel's halo load so the
# 4x-larger upsampled tensor never round-trips HBM.
# ----------------------------------------------------------------------------
def _up2x_axis(x, axis):
    L = x.shape[axis]

    def sl(start, stop):
        idx = [slice(None)] * x.ndim
        idx[axis] = slice(start, stop)
        return x[tuple(idx)]

    left = jnp.concatenate([sl(0, 1), sl(0, L - 1)], axis=axis)   # x[i-1] clamped
    right = jnp.concatenate([sl(1, L), sl(L - 1, L)], axis=axis)  # x[i+1] clamped
    even = 0.75 * x + 0.25 * left
    odd = 0.75 * x + 0.25 * right
    out = jnp.stack([even, odd], axis=axis + 1)
    new_shape = list(x.shape)
    new_shape[axis] = 2 * L
    return out.reshape(new_shape)


def bilinear_upsample2x(x):
    return _up2x_axis(_up2x_axis(x, 1), 2)


# ----------------------------------------------------------------------------
# Stride-2 conv support: space-to-depth phases + weight rearrangement.
# A 3x3/stride-2/pad-1 conv over x equals a 2x2/stride-1 conv (tap offsets {-1,0})
# over the 4-phase space-to-depth tensor with the weights scattered below.
# ----------------------------------------------------------------------------
def _space_to_depth_phases(x):
    """(N,H,W,C) -> (N, ceil(H/2), ceil(W/2), 4C), phase order [ee, eo, oe, oo]."""
    N, H, W, C = x.shape
    Ho, Wo = (H + 1) // 2, (W + 1) // 2
    xp = jnp.pad(x, ((0, 0), (0, 2 * Ho - H), (0, 2 * Wo - W), (0, 0)))
    ee = xp[:, 0::2, 0::2, :]
    eo = xp[:, 0::2, 1::2, :]
    oe = xp[:, 1::2, 0::2, :]
    oo = xp[:, 1::2, 1::2, :]
    return jnp.concatenate([ee, eo, oe, oo], axis=-1)


def _s2d_conv_weights(w):
    """(3,3,C,Cm) stride-2 weights -> (2,2,4C,Cm) stride-1 weights over s2d phases."""
    C, Cm = w.shape[2], w.shape[3]
    eff = jnp.zeros((2, 2, 4, C, Cm), w.dtype)
    # phases: ee=0, eo=1, oe=2, oo=3 ; eff[dy, dx] applies at offset (dy-1, dx-1)
    eff = eff.at[0, 0, 3].set(w[0, 0])
    eff = eff.at[0, 1, 2].set(w[0, 1])
    eff = eff.at[0, 1, 3].set(w[0, 2])
    eff = eff.at[1, 0, 1].set(w[1, 0])
    eff = eff.at[1, 0, 3].set(w[2, 0])
    eff = eff.at[1, 1, 0].set(w[1, 1])
    eff = eff.at[1, 1, 1].set(w[1, 2])
    eff = eff.at[1, 1, 2].set(w[2, 1])
    eff = eff.at[1, 1, 3].set(w[2, 2])
    return eff.reshape(2, 2, 4 * C, Cm)


# ----------------------------------------------------------------------------
# Fused block kernel: PReLU -> conv(k1, stride 1) -> PReLU -> conv(3x3) [+ add]
# ----------------------------------------------------------------------------
def _make_block_kernel(*, k1, TH, HW1, Hm, Wm, Wo, H_out, C1, Cmid, Cout,
                       has_add, mxu_dtype):
    def kernel(a_ref, x_ref, w1_ref, b1_ref, w2_ref, b2_ref, *rest):
        if has_add:
            add_ref, o_ref = rest
        else:
            (o_ref,) = rest

        t = pl.program_id(1)
        r0 = t * TH                     # first output row of this tile
        a1 = a_ref[0]
        a2 = a_ref[1]

        # Halo'd row window of the resident padded image: rows [r0, r0 + HW1).
        start = pl.multiple_of(r0, TH)
        xs = x_ref[0, pl.ds(start, HW1), :, :]          # (HW1, Wzp, C1) f32
        xs = jnp.where(xs >= 0, xs, a1 * xs)            # PReLU #1, once per element
        xs = xs.astype(mxu_dtype)

        # conv1: k1*k1 shifted MXU matmuls -> padded intermediate (Hm, Wm, Cmid).
        mid = None
        for ky in range(k1):
            for kx in range(k1):
                p = xs[ky:ky + Hm, kx:kx + Wm, :].reshape(Hm * Wm, C1)
                d = jnp.dot(p, w1_ref[ky * k1 + kx],
                            preferred_element_type=jnp.float32)
                mid = d if mid is None else mid + d
        mid = mid + b1_ref[...]                          # f32 bias
        mid = mid.reshape(Hm, Wm, Cmid)

        # Zero everything outside the real intermediate map: this implements conv2's
        # zero padding and the tile / width-rounding borders.
        ri = jax.lax.broadcasted_iota(jnp.int32, (Hm, Wm, 1), 0) + (r0 - 1)
        ci = jax.lax.broadcasted_iota(jnp.int32, (Hm, Wm, 1), 1) - 1
        keep = (ri >= 0) & (ri < H_out) & (ci >= 0) & (ci < Wo)
        mid = jnp.where(keep, mid, 0.0)

        mid = jnp.where(mid >= 0, mid, a2 * mid)         # PReLU #2 (f32)
        mid = mid.astype(mxu_dtype)

        # conv2: 9 shifted MXU matmuls -> (TH*Wo, Cout), f32 accumulate.
        acc = None
        for ky in range(3):
            for kx in range(3):
                p = mid[ky:ky + TH, kx:kx + Wo, :].reshape(TH * Wo, Cmid)
                d = jnp.dot(p, w2_ref[ky * 3 + kx],
                            preferred_element_type=jnp.float32)
                acc = d if acc is None else acc + d
        acc = acc + b2_ref[...]
        if has_add:
            acc = acc + add_ref[0]                       # fused residual "+"
        # TODO(synk): a (W,C)->(W*C) lane-folding reshape before this store would make
        # the vreg->VMEM stores fully lane-dense; skipped because the sublane->lane
        # relayout for Cout<128 is the one op we could not guarantee to lower.
        o_ref[0] = acc.astype(o_ref.dtype)

    return kernel


def _pick_tile_rows(h_out, n_batch):
    th = h_out if h_out <= MAX_TILE_ROWS else MAX_TILE_ROWS
    # Keep a few grid steps so both v7x TensorCores get work (tiles stay >= 8 rows).
    if h_out >= 16 and n_batch * pl.cdiv(h_out, th) < 4:
        th = 8
    return th


def fused_prelu_double_conv(x, a1, w1, b1, a2, w2, b2, *, mode="res", add=None,
                            mxu_dtype=None):
    """PReLU(a1)->Conv3x3(w1,b1)->PReLU(a2)->Conv3x3(w2,b2) [+ add] as one pallas_call.

    mode='res'  : both convs stride 1           (ResidualBlock)
    mode='down' : first conv stride 2           (DownsampleBlock)
    mode='up'   : 2x bilinear upsample first    (UpsampleBlock)
    x: (N,H,W,Cin) f32 NHWC; w*: (3,3,Cin,Cout) f32; returns (N,H_out,W_out,Cout) f32.
    """
    if mxu_dtype is None:
        mxu_dtype = MXU_DTYPE
    if mode == "up":
        x = bilinear_upsample2x(x)

    N = x.shape[0]
    Cmid = w1.shape[-1]
    Cout = w2.shape[-1]

    if mode == "down":
        z = _space_to_depth_phases(x)            # stride folded into channels
        w1e = _s2d_conv_weights(w1)
        k1 = 2
    else:
        z = x
        w1e = w1
        k1 = 3
    _, H_out, W_out, C1 = z.shape

    TH = _pick_tile_rows(H_out, N)
    T = pl.cdiv(H_out, TH)
    Hp_out = T * TH
    Hm = TH + 2                                  # intermediate rows (incl. conv2 halo)
    Wm = _round_up(W_out + 2, 8)                 # sublane-friendly intermediate width
    HW1 = TH + k1 + 1                            # input rows per tile (incl. halo)
    Hzp = Hp_out + k1 + 1
    Wzp = Wm + k1 - 1

    # Pre-padded input (2 zero rows/cols in front of the data, enough behind it that
    # every tile's fixed-size halo window is in bounds).  Single fused XLA pad.
    zp = jnp.pad(z, ((0, 0), (2, Hzp - 2 - H_out), (2, Wzp - 2 - W_out), (0, 0)))

    w1f = w1e.reshape(k1 * k1, C1, Cmid).astype(mxu_dtype)
    w2f = w2.reshape(9, Cmid, Cout).astype(mxu_dtype)
    b1f = b1.reshape(1, Cmid).astype(jnp.float32)
    b2f = b2.reshape(1, Cout).astype(jnp.float32)
    alphas = jnp.stack([jnp.asarray(a1, jnp.float32),
                        jnp.asarray(a2, jnp.float32)])

    has_add = add is not None
    args = [alphas, zp, w1f, b1f, w2f, b2f]
    in_specs = [
        pl.BlockSpec(memory_space=pltpu.MemorySpace.SMEM),              # PReLU alphas
        pl.BlockSpec((1, Hzp, Wzp, C1), lambda b, t: (b, 0, 0, 0)),     # resident image
        pl.BlockSpec((k1 * k1, C1, Cmid), lambda b, t: (0, 0, 0)),      # conv1 weights
        pl.BlockSpec((1, Cmid), lambda b, t: (0, 0)),                   # conv1 bias
        pl.BlockSpec((9, Cmid, Cout), lambda b, t: (0, 0, 0)),          # conv2 weights
        pl.BlockSpec((1, Cout), lambda b, t: (0, 0)),                   # conv2 bias
    ]
    if has_add:
        addf = add.reshape(N, H_out * W_out, Cout)
        if Hp_out != H_out:
            addf = jnp.pad(addf, ((0, 0), (0, (Hp_out - H_out) * W_out), (0, 0)))
        args.append(addf)
        in_specs.append(pl.BlockSpec((1, TH * W_out, Cout), lambda b, t: (b, t, 0)))

    kernel = _make_block_kernel(k1=k1, TH=TH, HW1=HW1, Hm=Hm, Wm=Wm, Wo=W_out,
                                H_out=H_out, C1=C1, Cmid=Cmid, Cout=Cout,
                                has_add=has_add, mxu_dtype=mxu_dtype)

    # Explicit VMEM budget (resident image + weights + double-buffered out/add tiles
    # + live kernel values), capped below v7x's 64 MiB physical VMEM.
    est = (4 * Hzp * Wzp * C1 * 2
           + 2 * (k1 * k1 * C1 * Cmid + 9 * Cmid * Cout) * 2
           + 4 * TH * W_out * Cout * 4 * (2 if has_add else 1)
           + (HW1 * Wzp * C1 + Hm * Wm * (C1 + 2 * Cmid) + TH * W_out * Cout) * 8)
    vmem_limit = int(min(64 * 2 ** 20, max(32 * 2 ** 20, 2 * est)))

    out = pl.pallas_call(
        kernel,
        out_shape=jax.ShapeDtypeStruct((N, Hp_out * W_out, Cout), jnp.float32),
        grid=(N, T),
        in_specs=in_specs,
        out_specs=pl.BlockSpec((1, TH * W_out, Cout), lambda b, t: (b, t, 0)),
        compiler_params=pltpu.CompilerParams(
            dimension_semantics=("parallel", "parallel"),
            vmem_limit_bytes=vmem_limit),
    )(*args)

    out = out[:, : H_out * W_out, :].reshape(N, H_out, W_out, Cout)
    return out


# ----------------------------------------------------------------------------
# Blocks / GridNet (mirrors the PyTorch module structure)
# ----------------------------------------------------------------------------
def res_block(p, x, add=None, mxu_dtype=None):
    return fused_prelu_double_conv(x, p["a1"], p["c1"]["w"], p["c1"]["b"],
                                   p["a2"], p["c2"]["w"], p["c2"]["b"],
                                   mode="res", add=add, mxu_dtype=mxu_dtype)


def down_block(p, x, add=None, mxu_dtype=None):
    return fused_prelu_double_conv(x, p["a1"], p["c1"]["w"], p["c1"]["b"],
                                   p["a2"], p["c2"]["w"], p["c2"]["b"],
                                   mode="down", add=add, mxu_dtype=mxu_dtype)


def up_block(p, x, add=None, mxu_dtype=None):
    return fused_prelu_double_conv(x, p["a1"], p["c1"]["w"], p["c1"]["b"],
                                   p["a2"], p["c2"]["w"], p["c2"]["b"],
                                   mode="up", add=add, mxu_dtype=mxu_dtype)


class KeyGen:
    def __init__(self, key):
        self.key = key

    def __call__(self):
        self.key, k = jax.random.split(self.key)
        return k


def conv_params(kg, cin, cout):
    fan_in = cin * 9
    w = jax.random.normal(kg(), (3, 3, cin, cout), jnp.float32) / math.sqrt(fan_in)
    b = jax.random.normal(kg(), (cout,), jnp.float32) * 0.1
    return {"w": w, "b": b}


def two_conv_params(kg, cin, cout):
    # nn.PReLU() default: single scalar alpha = 0.25
    return {"a1": jnp.float32(0.25), "c1": conv_params(kg, cin, cout),
            "a2": jnp.float32(0.25), "c2": conv_params(kg, cout, cout)}


def column_block_params(kg, channels, down):
    ch = list(channels) if down else list(channels)[::-1]
    res = [two_conv_params(kg, c, c) for c in ch]
    bridge = [two_conv_params(kg, cin, cout) for cin, cout in zip(ch[:-1], ch[1:])]
    return {"res": res, "bridge": bridge}


def column_block_forward(p, inputs, down):
    if not down:
        inputs = inputs[::-1]
    outputs = []
    for i, x in enumerate(inputs):
        if i == 0:
            out = res_block(p["res"][i], x)
        else:
            r = res_block(p["res"][i], x)
            bridge = down_block if down else up_block
            out = bridge(p["bridge"][i - 1], outputs[-1], add=r)   # fused "+"
        outputs.append(out)
    if not down:
        outputs = outputs[::-1]
    return outputs


def gridnet_params(kg, in_channels, hidden_channels, columns, out_channels):
    head_outs = [hidden_channels[0]] + list(hidden_channels)
    heads = [two_conv_params(kg, i, c) for i, c in zip(in_channels, head_outs)]
    downs = [None] + [two_conv_params(kg, cin, cout)
                      for cin, cout in zip(hidden_channels[:-1], hidden_channels[1:])]
    ncols = columns - 1
    col_down = tuple(n < ncols // 2 for n in range(ncols))
    cols = [column_block_params(kg, hidden_channels, d) for d in col_down]
    tail = two_conv_params(kg, hidden_channels[0], out_channels)
    return {"heads": heads, "downs": downs, "columns": cols, "tail": tail}, col_down


def gridnet_forward(params, inputs_nhwc, col_down):
    feats = []
    for i, x in enumerate(inputs_nhwc):
        if i == 0:
            feat = res_block(params["heads"][i], x)
        else:
            d = params["downs"][i - 1]
            if d is None:                         # nn.Identity() bridge
                feat = res_block(params["heads"][i], x, add=feats[-1])
            else:
                head = res_block(params["heads"][i], x)
                feat = down_block(d, feats[-1], add=head)
        feats.append(feat)
    feats.pop(0)
    for colp, down in zip(params["columns"], col_down):
        feats = column_block_forward(colp, feats, down)
    output = res_block(params["tail"], feats[0])
    return output, feats


# ----------------------------------------------------------------------------
if __name__ == "__main__":
    in_channels = [4, 4, 8, 16]
    hidden_channels = [8, 16, 32]
    columns = 3
    out_channels = 4
    N, S = 2, 16

    kg = KeyGen(jax.random.PRNGKey(0))
    params, col_down = gridnet_params(kg, in_channels, hidden_channels, columns,
                                      out_channels)

    spatial = [S, S, S // 2, S // 4]
    inputs_nchw = [jax.random.normal(kg(), (N, c, s, s), jnp.float32)
                   for c, s in zip(in_channels, spatial)]
    inputs_nhwc = [jnp.transpose(x, (0, 2, 3, 1)) for x in inputs_nchw]

    # --- structural spot-check of the fused kernel vs a lax.conv reference ---
    def ref_block(x, a1, w1, b1, a2, w2, b2, mode):
        if mode == "up":
            x = bilinear_upsample2x(x)
        s = 2 if mode == "down" else 1
        dn = ("NHWC", "HWIO", "NHWC")
        y = jnp.where(x >= 0, x, a1 * x).astype(MXU_DTYPE)
        y = jax.lax.conv_general_dilated(y, w1.astype(MXU_DTYPE), (s, s),
                                         ((1, 1), (1, 1)), dimension_numbers=dn,
                                         preferred_element_type=jnp.float32) + b1
        y = jnp.where(y >= 0, y, a2 * y).astype(MXU_DTYPE)
        y = jax.lax.conv_general_dilated(y, w2.astype(MXU_DTYPE), (1, 1),
                                         ((1, 1), (1, 1)), dimension_numbers=dn,
                                         preferred_element_type=jnp.float32) + b2
        return y

    ckg = KeyGen(jax.random.PRNGKey(1))
    for mode, (h, w, cin, cmid, cout) in [("res", (40, 20, 3, 5, 7)),
                                          ("down", (9, 11, 4, 6, 5)),
                                          ("up", (5, 7, 6, 4, 3))]:
        xt = jax.random.normal(ckg(), (1, h, w, cin), jnp.float32)
        w1 = jax.random.normal(ckg(), (3, 3, cin, cmid), jnp.float32) * 0.2
        b1 = jax.random.normal(ckg(), (cmid,), jnp.float32) * 0.1
        w2 = jax.random.normal(ckg(), (3, 3, cmid, cout), jnp.float32) * 0.2
        b2 = jax.random.normal(ckg(), (cout,), jnp.float32) * 0.1
        got = fused_prelu_double_conv(xt, 0.25, w1, b1, 0.1, w2, b2, mode=mode)
        want = ref_block(xt, 0.25, w1, b1, 0.1, w2, b2, mode)
        err = float(jnp.max(jnp.abs(got - want)))
        assert err < 5e-2, (mode, err)

    # --- full GridNet forward (column down/up flags stay static via closure) ---
    fwd = jax.jit(functools.partial(gridnet_forward, col_down=col_down))
    output, feats = fwd(params, inputs_nhwc)

    output_nchw = jnp.transpose(output, (0, 3, 1, 2))
    feats_nchw = [jnp.transpose(f, (0, 3, 1, 2)) for f in feats]

    assert output_nchw.shape == (N, out_channels, S, S)
    assert [f.shape for f in feats_nchw] == [
        (N, hidden_channels[0], S, S),
        (N, hidden_channels[1], S // 2, S // 2),
        (N, hidden_channels[2], S // 4, S // 4),
    ]

    jax.block_until_ready((output_nchw, feats_nchw))
    print("KERNEL_OK")
</pallas_src>

<mosaic_0001>
module attributes {stable_mosaic.version = 11 : i64} {
  func.func @kernel(%arg0: i32, %arg1: i32, %arg2: memref<2xf32, #tpu.memory_space<smem>>, %arg3: memref<1x44x26x3xf32, #tpu.memory_space<vmem>>, %arg4: memref<9x3x5xbf16, #tpu.memory_space<vmem>>, %arg5: memref<1x5xf32, #tpu.memory_space<vmem>>, %arg6: memref<9x5x7xbf16, #tpu.memory_space<vmem>>, %arg7: memref<1x7xf32, #tpu.memory_space<vmem>>, %arg8: memref<1x160x7xf32, #tpu.memory_space<vmem>>) attributes {dimension_semantics = [#tpu.dimension_semantics<parallel>, #tpu.dimension_semantics<parallel>], iteration_bounds = array<i64: 1, 5>, scalar_prefetch = 0 : i64, scratch_operands = 0 : i64, tpu.core_type = #tpu.core_type<tc>, window_params = [{transform_indices = @transform_0, window_bounds = array<i64: 2>}, {transform_indices = @transform_1, window_bounds = array<i64: 1, 44, 26, 3>}, {pipeline_mode = #tpu.pipeline_mode<synchronous>, transform_indices = @transform_2, window_bounds = array<i64: 9, 3, 5>}, {pipeline_mode = #tpu.pipeline_mode<synchronous>, transform_indices = @transform_3, window_bounds = array<i64: 1, 5>}, {pipeline_mode = #tpu.pipeline_mode<synchronous>, transform_indices = @transform_4, window_bounds = array<i64: 9, 5, 7>}, {pipeline_mode = #tpu.pipeline_mode<synchronous>, transform_indices = @transform_5, window_bounds = array<i64: 1, 7>}, {transform_indices = @transform_6, window_bounds = array<i64: 1, 160, 7>}]} {
    %c8_i32 = arith.constant 8 : i32
    %0 = arith.muli %arg1, %c8_i32 : i32
    %c0 = arith.constant 0 : index
    %1 = memref.load %arg2[%c0] : memref<2xf32, #tpu.memory_space<smem>>
    %c1 = arith.constant 1 : index
    %2 = memref.load %arg2[%c1] : memref<2xf32, #tpu.memory_space<smem>>
    %3 = tpu.assume_multiple %0, 8 : i32
    %c0_0 = arith.constant 0 : index
    %4 = arith.index_cast %3 : i32 to index
    %c0_1 = arith.constant 0 : index
    %c0_2 = arith.constant 0 : index
    %5 = vector.load %arg3[%c0_0, %4, %c0_1, %c0_2] : memref<1x44x26x3xf32, #tpu.memory_space<vmem>>, vector<1x12x26x3xf32>
    %6 = vector.shape_cast %5 : vector<1x12x26x3xf32> to vector<12x26x3xf32>
    %cst = arith.constant 0.000000e+00 : f32
    %7 = vector.broadcast %cst : f32 to vector<12x26x3xf32>
    %8 = arith.cmpf oge, %6, %7 : vector<12x26x3xf32>
    %9 = vector.broadcast %1 : f32 to vector<12x26x3xf32>
    %10 = arith.mulf %9, %6 : vector<12x26x3xf32>
    %11 = arith.select %8, %6, %10 : vector<12x26x3xi1>, vector<12x26x3xf32>
    %12 = arith.truncf %11 : vector<12x26x3xf32> to vector<12x26x3xbf16>
    %13 = vector.extract_strided_slice %12 {offsets = [0, 0, 0], sizes = [10, 24, 3], strides = [1, 1, 1]} : vector<12x26x3xbf16> to vector<10x24x3xbf16>
    %14 = vector.shape_cast %13 : vector<10x24x3xbf16> to vector<240x3xbf16>
    %c0_3 = arith.constant 0 : index
    %c0_4 = arith.constant 0 : index
    %c0_5 = arith.constant 0 : index
    %15 = vector.load %arg4[%c0_3, %c0_4, %c0_5] : memref<9x3x5xbf16, #tpu.memory_space<vmem>>, vector<1x3x5xbf16>
    %16 = vector.shape_cast %15 : vector<1x3x5xbf16> to vector<3x5xbf16>
    %cst_6 = arith.constant dense<0.000000e+00> : vector<240x5xf32>
    %17 = tpu.matmul %14, %16, %cst_6 {dimension_numbers = #tpu.dot_dimension_numbers<[1], [0], [0], [1], [0, 0, 1, 1], [], []>} : vector<240x3xbf16>, vector<3x5xbf16>, vector<240x5xf32> -> vector<240x5xf32>
    %18 = vector.extract_strided_slice %12 {offsets = [0, 1, 0], sizes = [10, 24, 3], strides = [1, 1, 1]} : vector<12x26x3xbf16> to vector<10x24x3xbf16>
    %19 = vector.shape_cast %18 : vector<10x24x3xbf16> to vector<240x3xbf16>
    %c1_7 = arith.constant 1 : index
    %c0_8 = arith.constant 0 : index
    %c0_9 = arith.constant 0 : index
    %20 = vector.load %arg4[%c1_7, %c0_8, %c0_9] : memref<9x3x5xbf16, #tpu.memory_space<vmem>>, vector<1x3x5xbf16>
    %21 = vector.shape_cast %20 : vector<1x3x5xbf16> to vector<3x5xbf16>
    %cst_10 = arith.constant dense<0.000000e+00> : vector<240x5xf32>
    %22 = tpu.matmul %19, %21, %cst_10 {dimension_numbers = #tpu.dot_dimension_numbers<[1], [0], [0], [1], [0, 0, 1, 1], [], []>} : vector<240x3xbf16>, vector<3x5xbf16>, vector<240x5xf32> -> vector<240x5xf32>
    %23 = arith.addf %17, %22 : vector<240x5xf32>
    %24 = vector.extract_strided_slice %12 {offsets = [0, 2, 0], sizes = [10, 24, 3], strides = [1, 1, 1]} : vector<12x26x3xbf16> to vector<10x24x3xbf16>
    %25 = vector.shape_cast %24 : vector<10x24x3xbf16> to vector<240x3xbf16>
    %c2 = arith.constant 2 : index
    %c0_11 = arith.constant 0 : index
    %c0_12 = arith.constant 0 : index
    %26 = vector.load %arg4[%c2, %c0_11, %c0_12] : memref<9x3x5xbf16, #tpu.memory_space<vmem>>, vector<1x3x5xbf16>
    %27 = vector.shape_cast %26 : vector<1x3x5xbf16> to vector<3x5xbf16>
    %cst_13 = arith.constant dense<0.000000e+00> : vector<240x5xf32>
    %28 = tpu.matmul %25, %27, %cst_13 {dimension_numbers = #tpu.dot_dimension_numbers<[1], [0], [0], [1], [0, 0, 1, 1], [], []>} : vector<240x3xbf16>, vector<3x5xbf16>, vector<240x5xf32> -> vector<240x5xf32>
    %29 = arith.addf %23, %28 : vector<240x5xf32>
    %30 = vector.extract_strided_slice %12 {offsets = [1, 0, 0], sizes = [10, 24, 3], strides = [1, 1, 1]} : vector<12x26x3xbf16> to vector<10x24x3xbf16>
    %31 = vector.shape_cast %30 : vector<10x24x3xbf16> to vector<240x3xbf16>
    %c3 = arith.constant 3 : index
    %c0_14 = arith.constant 0 : index
    %c0_15 = arith.constant 0 : index
    %32 = vector.load %arg4[%c3, %c0_14, %c0_15] : memref<9x3x5xbf16, #tpu.memory_space<vmem>>, vector<1x3x5xbf16>
    %33 = vector.shape_cast %32 : vector<1x3x5xbf16> to vector<3x5xbf16>
    %cst_16 = arith.constant dense<0.000000e+00> : vector<240x5xf32>
    %34 = tpu.matmul %31, %33, %cst_16 {dimension_numbers = #tpu.dot_dimension_numbers<[1], [0], [0], [1], [0, 0, 1, 1], [], []>} : vector<240x3xbf16>, vector<3x5xbf16>, vector<240x5xf32> -> vector<240x5xf32>
    %35 = arith.addf %29, %34 : vector<240x5xf32>
    %36 = vector.extract_strided_slice %12 {offsets = [1, 1, 0], sizes = [10, 24, 3], strides = [1, 1, 1]} : vector<12x26x3xbf16> to vector<10x24x3xbf16>
    %37 = vector.shape_cast %36 : vector<10x24x3xbf16> to vector<240x3xbf16>
    %c4 = arith.constant 4 : index
    %c0_17 = arith.constant 0 : index
    %c0_18 = arith.constant 0 : index
    %38 = vector.load %arg4[%c4, %c0_17, %c0_18] : memref<9x3x5xbf16, #tpu.memory_space<vmem>>, vector<1x3x5xbf16>
    %39 = vector.shape_cast %38 : vector<1x3x5xbf16> to vector<3x5xbf16>
    %cst_19 = arith.constant dense<0.000000e+00> : vector<240x5xf32>
    %40 = tpu.matmul %37, %39, %cst_19 {dimension_numbers = #tpu.dot_dimension_numbers<[1], [0], [0], [1], [0, 0, 1, 1], [], []>} : vector<240x3xbf16>, vector<3x5xbf16>, vector<240x5xf32> -> vector<240x5xf32>
    %41 = arith.addf %35, %40 : vector<240x5xf32>
    %42 = vector.extract_strided_slice %12 {offsets = [1, 2, 0], sizes = [10, 24, 3], strides = [1, 1, 1]} : vector<12x26x3xbf16> to vector<10x24x3xbf16>
    %43 = vector.shape_cast %42 : vector<10x24x3xbf16> to vector<240x3xbf16>
    %c5 = arith.constant 5 : index
    %c0_20 = arith.constant 0 : index
    %c0_21 = arith.constant 0 : index
    %44 = vector.load %arg4[%c5, %c0_20, %c0_21] : memref<9x3x5xbf16, #tpu.memory_space<vmem>>, vector<1x3x5xbf16>
    %45 = vector.shape_cast %44 : vector<1x3x5xbf16> to vector<3x5xbf16>
    %cst_22 = arith.constant dense<0.000000e+00> : vector<240x5xf32>
    %46 = tpu.matmul %43, %45, %cst_22 {dimension_numbers = #tpu.dot_dimension_numbers<[1], [0], [0], [1], [0, 0, 1, 1], [], []>} : vector<240x3xbf16>, vector<3x5xbf16>, vector<240x5xf32> -> vector<240x5xf32>
    %47 = arith.addf %41, %46 : vector<240x5xf32>
    %48 = vector.extract_strided_slice %12 {offsets = [2, 0, 0], sizes = [10, 24, 3], strides = [1, 1, 1]} : vector<12x26x3xbf16> to vector<10x24x3xbf16>
    %49 = vector.shape_cast %48 : vector<10x24x3xbf16> to vector<240x3xbf16>
    %c6 = arith.constant 6 : index
    %c0_23 = arith.constant 0 : index
    %c0_24 = arith.constant 0 : index
    %50 = vector.load %arg4[%c6, %c0_23, %c0_24] : memref<9x3x5xbf16, #tpu.memory_space<vmem>>, vector<1x3x5xbf16>
    %51 = vector.shape_cast %50 : vector<1x3x5xbf16> to vector<3x5xbf16>
    %cst_25 = arith.constant dense<0.000000e+00> : vector<240x5xf32>
    %52 = tpu.matmul %49, %51, %cst_25 {dimension_numbers = #tpu.dot_dimension_numbers<[1], [0], [0], [1], [0, 0, 1, 1], [], []>} : vector<240x3xbf16>, vector<3x5xbf16>, vector<240x5xf32> -> vector<240x5xf32>
    %53 = arith.addf %47, %52 : vector<240x5xf32>
    %54 = vector.extract_strided_slice %12 {offsets = [2, 1, 0], sizes = [10, 24, 3], strides = [1, 1, 1]} : vector<12x26x3xbf16> to vector<10x24x3xbf16>
    %55 = vector.shape_cast %54 : vector<10x24x3xbf16> to vector<240x3xbf16>
    %c7 = arith.constant 7 : index
    %c0_26 = arith.constant 0 : index
    %c0_27 = arith.constant 0 : index
    %56 = vector.load %arg4[%c7, %c0_26, %c0_27] : memref<9x3x5xbf16, #tpu.memory_space<vmem>>, vector<1x3x5xbf16>
    %57 = vector.shape_cast %56 : vector<1x3x5xbf16> to vector<3x5xbf16>
    %cst_28 = arith.constant dense<0.000000e+00> : vector<240x5xf32>
    %58 = tpu.matmul %55, %57, %cst_28 {dimension_numbers = #tpu.dot_dimension_numbers<[1], [0], [0], [1], [0, 0, 1, 1], [], []>} : vector<240x3xbf16>, vector<3x5xbf16>, vector<240x5xf32> -> vector<240x5xf32>
    %59 = arith.addf %53, %58 : vector<240x5xf32>
    %60 = vector.extract_strided_slice %12 {offsets = [2, 2, 0], sizes = [10, 24, 3], strides = [1, 1, 1]} : vector<12x26x3xbf16> to vector<10x24x3xbf16>
    %61 = vector.shape_cast %60 : vector<10x24x3xbf16> to vector<240x3xbf16>
    %c8 = arith.constant 8 : index
    %c0_29 = arith.constant 0 : index
    %c0_30 = arith.constant 0 : index
    %62 = vector.load %arg4[%c8, %c0_29, %c0_30] : memref<9x3x5xbf16, #tpu.memory_space<vmem>>, vector<1x3x5xbf16>
    %63 = vector.shape_cast %62 : vector<1x3x5xbf16> to vector<3x5xbf16>
    %cst_31 = arith.constant dense<0.000000e+00> : vector<240x5xf32>
    %64 = tpu.matmul %61, %63, %cst_31 {dimension_numbers = #tpu.dot_dimension_numbers<[1], [0], [0], [1], [0, 0, 1, 1], [], []>} : vector<240x3xbf16>, vector<3x5xbf16>, vector<240x5xf32> -> vector<240x5xf32>
    %65 = arith.addf %59, %64 : vector<240x5xf32>
    %c0_32 = arith.constant 0 : index
    %c0_33 = arith.constant 0 : index
    %66 = vector.load %arg5[%c0_32, %c0_33] : memref<1x5xf32, #tpu.memory_space<vmem>>, vector<1x5xf32>
    %67 = vector.broadcast %66 : vector<1x5xf32> to vector<240x5xf32>
    %68 = arith.addf %65, %67 : vector<240x5xf32>
    %69 = vector.shape_cast %68 : vector<240x5xf32> to vector<10x24x5xf32>
    %70 = tpu.iota {dimensions = array<i32: 0>} : vector<10x24x1xi32>
    %c1_i32 = arith.constant 1 : i32
    %71 = arith.subi %0, %c1_i32 : i32
    %72 = vector.broadcast %71 : i32 to vector<10x24x1xi32>
    %73 = arith.addi %70, %72 : vector<10x24x1xi32>
    %74 = tpu.iota {dimensions = array<i32: 1>} : vector<10x24x1xi32>
    %c1_i32_34 = arith.constant 1 : i32
    %75 = vector.broadcast %c1_i32_34 : i32 to vector<10x24x1xi32>
    %76 = arith.subi %74, %75 : vector<10x24x1xi32>
    %c0_i32 = arith.constant 0 : i32
    %77 = vector.broadcast %c0_i32 : i32 to vector<10x24x1xi32>
    %78 = arith.cmpi sge, %73, %77 : vector<10x24x1xi32>
    %c40_i32 = arith.constant 40 : i32
    %79 = vector.broadcast %c40_i32 : i32 to vector<10x24x1xi32>
    %80 = arith.cmpi slt, %73, %79 : vector<10x24x1xi32>
    %81 = arith.andi %78, %80 : vector<10x24x1xi1>
    %c0_i32_35 = arith.constant 0 : i32
    %82 = vector.broadcast %c0_i32_35 : i32 to vector<10x24x1xi32>
    %83 = arith.cmpi sge, %76, %82 : vector<10x24x1xi32>
    %84 = arith.andi %81, %83 : vector<10x24x1xi1>
    %c20_i32 = arith.constant 20 : i32
    %85 = vector.broadcast %c20_i32 : i32 to vector<10x24x1xi32>
    %86 = arith.cmpi slt, %76, %85 : vector<10x24x1xi32>
    %87 = arith.andi %84, %86 : vector<10x24x1xi1>
    %cst_36 = arith.constant 0.000000e+00 : f32
    %88 = vector.shape_cast %87 : vector<10x24x1xi1> to vector<10x24x1xi1>
    %89 = vector.broadcast %88 : vector<10x24x1xi1> to vector<10x24x5xi1>
    %90 = vector.broadcast %cst_36 : f32 to vector<10x24x5xf32>
    %91 = arith.select %89, %69, %90 : vector<10x24x5xi1>, vector<10x24x5xf32>
    %cst_37 = arith.constant 0.000000e+00 : f32
    %92 = vector.broadcast %cst_37 : f32 to vector<10x24x5xf32>
    %93 = arith.cmpf oge, %91, %92 : vector<10x24x5xf32>
    %94 = vector.broadcast %2 : f32 to vector<10x24x5xf32>
    %95 = arith.mulf %94, %91 : vector<10x24x5xf32>
    %96 = arith.select %93, %91, %95 : vector<10x24x5xi1>, vector<10x24x5xf32>
    %97 = arith.truncf %96 : vector<10x24x5xf32> to vector<10x24x5xbf16>
    %98 = vector.extract_strided_slice %97 {offsets = [0, 0, 0], sizes = [8, 20, 5], strides = [1, 1, 1]} : vector<10x24x5xbf16> to vector<8x20x5xbf16>
    %99 = vector.shape_cast %98 : vector<8x20x5xbf16> to vector<160x5xbf16>
    %c0_38 = arith.constant 0 : index
    %c0_39 = arith.constant 0 : index
    %c0_40 = arith.constant 0 : index
    %100 = vector.load %arg6[%c0_38, %c0_39, %c0_40] : memref<9x5x7xbf16, #tpu.memory_space<vmem>>, vector<1x5x7xbf16>
    %101 = vector.shape_cast %100 : vector<1x5x7xbf16> to vector<5x7xbf16>
    %cst_41 = arith.constant dense<0.000000e+00> : vector<160x7xf32>
    %102 = tpu.matmul %99, %101, %cst_41 {dimension_numbers = #tpu.dot_dimension_numbers<[1], [0], [0], [1], [0, 0, 1, 1], [], []>} : vector<160x5xbf16>, vector<5x7xbf16>, vector<160x7xf32> -> vector<160x7xf32>
    %103 = vector.extract_strided_slice %97 {offsets = [0, 1, 0], sizes = [8, 20, 5], strides = [1, 1, 1]} : vector<10x24x5xbf16> to vector<8x20x5xbf16>
    %104 = vector.shape_cast %103 : vector<8x20x5xbf16> to vector<160x5xbf16>
    %c1_42 = arith.constant 1 : index
    %c0_43 = arith.constant 0 : index
    %c0_44 = arith.constant 0 : index
    %105 = vector.load %arg6[%c1_42, %c0_43, %c0_44] : memref<9x5x7xbf16, #tpu.memory_space<vmem>>, vector<1x5x7xbf16>
    %106 = vector.shape_cast %105 : vector<1x5x7xbf16> to vector<5x7xbf16>
    %cst_45 = arith.constant dense<0.000000e+00> : vector<160x7xf32>
    %107 = tpu.matmul %104, %106, %cst_45 {dimension_numbers = #tpu.dot_dimension_numbers<[1], [0], [0], [1], [0, 0, 1, 1], [], []>} : vector<160x5xbf16>, vector<5x7xbf16>, vector<160x7xf32> -> vector<160x7xf32>
    %108 = arith.addf %102, %107 : vector<160x7xf32>
    %109 = vector.extract_strided_slice %97 {offsets = [0, 2, 0], sizes = [8, 20, 5], strides = [1, 1, 1]} : vector<10x24x5xbf16> to vector<8x20x5xbf16>
    %110 = vector.shape_cast %109 : vector<8x20x5xbf16> to vector<160x5xbf16>
    %c2_46 = arith.constant 2 : index
    %c0_47 = arith.constant 0 : index
    %c0_48 = arith.constant 0 : index
    %111 = vector.load %arg6[%c2_46, %c0_47, %c0_48] : memref<9x5x7xbf16, #tpu.memory_space<vmem>>, vector<1x5x7xbf16>
    %112 = vector.shape_cast %111 : vector<1x5x7xbf16> to vector<5x7xbf16>
    %cst_49 = arith.constant dense<0.000000e+00> : vector<160x7xf32>
    %113 = tpu.matmul %110, %112, %cst_49 {dimension_numbers = #tpu.dot_dimension_numbers<[1], [0], [0], [1], [0, 0, 1, 1], [], []>} : vector<160x5xbf16>, vector<5x7xbf16>, vector<160x7xf32> -> vector<160x7xf32>
    %114 = arith.addf %108, %113 : vector<160x7xf32>
    %115 = vector.extract_strided_slice %97 {offsets = [1, 0, 0], sizes = [8, 20, 5], strides = [1, 1, 1]} : vector<10x24x5xbf16> to vector<8x20x5xbf16>
    %116 = vector.shape_cast %115 : vector<8x20x5xbf16> to vector<160x5xbf16>
    %c3_50 = arith.constant 3 : index
    %c0_51 = arith.constant 0 : index
    %c0_52 = arith.constant 0 : index
    %117 = vector.load %arg6[%c3_50, %c0_51, %c0_52] : memref<9x5x7xbf16, #tpu.memory_space<vmem>>, vector<1x5x7xbf16>
    %118 = vector.shape_cast %117 : vector<1x5x7xbf16> to vector<5x7xbf16>
    %cst_53 = arith.constant dense<0.000000e+00> : vector<160x7xf32>
    %119 = tpu.matmul %116, %118, %cst_53 {dimension_numbers = #tpu.dot_dimension_numbers<[1], [0], [0], [1], [0, 0, 1, 1], [], []>} : vector<160x5xbf16>, vector<5x7xbf16>, vector<160x7xf32> -> vector<160x7xf32>
    %120 = arith.addf %114, %119 : vector<160x7xf32>
    %121 = vector.extract_strided_slice %97 {offsets = [1, 1, 0], sizes = [8, 20, 5], strides = [1, 1, 1]} : vector<10x24x5xbf16> to vector<8x20x5xbf16>
    %122 = vector.shape_cast %121 : vector<8x20x5xbf16> to vector<160x5xbf16>
    %c4_54 = arith.constant 4 : index
    %c0_55 = arith.constant 0 : index
    %c0_56 = arith.constant 0 : index
    %123 = vector.load %arg6[%c4_54, %c0_55, %c0_56] : memref<9x5x7xbf16, #tpu.memory_space<vmem>>, vector<1x5x7xbf16>
    %124 = vector.shape_cast %123 : vector<1x5x7xbf16> to vector<5x7xbf16>
    %cst_57 = arith.constant dense<0.000000e+00> : vector<160x7xf32>
    %125 = tpu.matmul %122, %124, %cst_57 {dimension_numbers = #tpu.dot_dimension_numbers<[1], [0], [0], [1], [0, 0, 1, 1], [], []>} : vector<160x5xbf16>, vector<5x7xbf16>, vector<160x7xf32> -> vector<160x7xf32>
    %126 = arith.addf %120, %125 : vector<160x7xf32>
    %127 = vector.extract_strided_slice %97 {offsets = [1, 2, 0], sizes = [8, 20, 5], strides = [1, 1, 1]} : vector<10x24x5xbf16> to vector<8x20x5xbf16>
    %128 = vector.shape_cast %127 : vector<8x20x5xbf16> to vector<160x5xbf16>
    %c5_58 = arith.constant 5 : index
    %c0_59 = arith.constant 0 : index
    %c0_60 = arith.constant 0 : index
    %129 = vector.load %arg6[%c5_58, %c0_59, %c0_60] : memref<9x5x7xbf16, #tpu.memory_space<vmem>>, vector<1x5x7xbf16>
    %130 = vector.shape_cast %129 : vector<1x5x7xbf16> to vector<5x7xbf16>
    %cst_61 = arith.constant dense<0.000000e+00> : vector<160x7xf32>
    %131 = tpu.matmul %128, %130, %cst_61 {dimension_numbers = #tpu.dot_dimension_numbers<[1], [0], [0], [1], [0, 0, 1, 1], [], []>} : vector<160x5xbf16>, vector<5x7xbf16>, vector<160x7xf32> -> vector<160x7xf32>
    %132 = arith.addf %126, %131 : vector<160x7xf32>
    %133 = vector.extract_strided_slice %97 {offsets = [2, 0, 0], sizes = [8, 20, 5], strides = [1, 1, 1]} : vector<10x24x5xbf16> to vector<8x20x5xbf16>
    %134 = vector.shape_cast %133 : vector<8x20x5xbf16> to vector<160x5xbf16>
    %c6_62 = arith.constant 6 : index
    %c0_63 = arith.constant 0 : index
    %c0_64 = arith.constant 0 : index
    %135 = vector.load %arg6[%c6_62, %c0_63, %c0_64] : memref<9x5x7xbf16, #tpu.memory_space<vmem>>, vector<1x5x7xbf16>
    %136 = vector.shape_cast %135 : vector<1x5x7xbf16> to vector<5x7xbf16>
    %cst_65 = arith.constant dense<0.000000e+00> : vector<160x7xf32>
    %137 = tpu.matmul %134, %136, %cst_65 {dimension_numbers = #tpu.dot_dimension_numbers<[1], [0], [0], [1], [0, 0, 1, 1], [], []>} : vector<160x5xbf16>, vector<5x7xbf16>, vector<160x7xf32> -> vector<160x7xf32>
    %138 = arith.addf %132, %137 : vector<160x7xf32>
    %139 = vector.extract_strided_slice %97 {offsets = [2, 1, 0], sizes = [8, 20, 5], strides = [1, 1, 1]} : vector<10x24x5xbf16> to vector<8x20x5xbf16>
    %140 = vector.shape_cast %139 : vector<8x20x5xbf16> to vector<160x5xbf16>
    %c7_66 = arith.constant 7 : index
    %c0_67 = arith.constant 0 : index
    %c0_68 = arith.constant 0 : index
    %141 = vector.load %arg6[%c7_66, %c0_67, %c0_68] : memref<9x5x7xbf16, #tpu.memory_space<vmem>>, vector<1x5x7xbf16>
    %142 = vector.shape_cast %141 : vector<1x5x7xbf16> to vector<5x7xbf16>
    %cst_69 = arith.constant dense<0.000000e+00> : vector<160x7xf32>
    %143 = tpu.matmul %140, %142, %cst_69 {dimension_numbers = #tpu.dot_dimension_numbers<[1], [0], [0], [1], [0, 0, 1, 1], [], []>} : vector<160x5xbf16>, vector<5x7xbf16>, vector<160x7xf32> -> vector<160x7xf32>
    %144 = arith.addf %138, %143 : vector<160x7xf32>
    %145 = vector.extract_strided_slice %97 {offsets = [2, 2, 0], sizes = [8, 20, 5], strides = [1, 1, 1]} : vector<10x24x5xbf16> to vector<8x20x5xbf16>
    %146 = vector.shape_cast %145 : vector<8x20x5xbf16> to vector<160x5xbf16>
    %c8_70 = arith.constant 8 : index
    %c0_71 = arith.constant 0 : index
    %c0_72 = arith.constant 0 : index
    %147 = vector.load %arg6[%c8_70, %c0_71, %c0_72] : memref<9x5x7xbf16, #tpu.memory_space<vmem>>, vector<1x5x7xbf16>
    %148 = vector.shape_cast %147 : vector<1x5x7xbf16> to vector<5x7xbf16>
    %cst_73 = arith.constant dense<0.000000e+00> : vector<160x7xf32>
    %149 = tpu.matmul %146, %148, %cst_73 {dimension_numbers = #tpu.dot_dimension_numbers<[1], [0], [0], [1], [0, 0, 1, 1], [], []>} : vector<160x5xbf16>, vector<5x7xbf16>, vector<160x7xf32> -> vector<160x7xf32>
    %150 = arith.addf %144, %149 : vector<160x7xf32>
    %c0_74 = arith.constant 0 : index
    %c0_75 = arith.constant 0 : index
    %151 = vector.load %arg7[%c0_74, %c0_75] : memref<1x7xf32, #tpu.memory_space<vmem>>, vector<1x7xf32>
    %152 = vector.broadcast %151 : vector<1x7xf32> to vector<160x7xf32>
    %153 = arith.addf %150, %152 : vector<160x7xf32>
    %c0_76 = arith.constant 0 : index
    %c0_77 = arith.constant 0 : index
    %c0_78 = arith.constant 0 : index
    %154 = vector.load %arg8[%c0_76, %c0_77, %c0_78] : memref<1x160x7xf32, #tpu.memory_space<vmem>>, vector<1x160x7xf32>
    %155 = vector.shape_cast %154 : vector<1x160x7xf32> to vector<160x7xf32>
    %156 = vector.shape_cast %153 : vector<160x7xf32> to vector<1x160x7xf32>
    tpu.vector_store %arg8[%c0_76, %c0_77, %c0_78], %156 {strides = array<i32>} : memref<1x160x7xf32, #tpu.memory_space<vmem>>, vector<1x160x7xf32>,
    return
  }
  func.func @transform_0(%arg0: i32, %arg1: i32) -> i32 {
    %c0_i32 = arith.constant 0 : i32
    %c0_i32_0 = arith.constant 0 : i32
    return %c0_i32 : i32
  }
  func.func @transform_1(%arg0: i32, %arg1: i32) -> (i32, i32, i32, i32) {
    %c0_i32 = arith.constant 0 : i32
    %c0_i32_0 = arith.constant 0 : i32
    %c0_i32_1 = arith.constant 0 : i32
    %c0_i32_2 = arith.constant 0 : i32
    return %arg0, %c0_i32, %c0_i32_0, %c0_i32_1 : i32, i32, i32, i32
  }
  func.func @transform_2(%arg0: i32, %arg1: i32) -> (i32, i32, i32) {
    %c0_i32 = arith.constant 0 : i32
    %c0_i32_0 = arith.constant 0 : i32
    %c0_i32_1 = arith.constant 0 : i32
    %c0_i32_2 = arith.constant 0 : i32
    return %c0_i32, %c0_i32_0, %c0_i32_1 : i32, i32, i32
  }
  func.func @transform_3(%arg0: i32, %arg1: i32) -> (i32, i32) {
    %c0_i32 = arith.constant 0 : i32
    %c0_i32_0 = arith.constant 0 : i32
    %c0_i32_1 = arith.constant 0 : i32
    return %c0_i32, %c0_i32_0 : i32, i32
  }
  func.func @transform_4(%arg0: i32, %arg1: i32) -> (i32, i32, i32) {
    %c0_i32 = arith.constant 0 : i32
    %c0_i32_0 = arith.constant 0 : i32
    %c0_i32_1 = arith.constant 0 : i32
    %c0_i32_2 = arith.constant 0 : i32
    return %c0_i32, %c0_i32_0, %c0_i32_1 : i32, i32, i32
  }
  func.func @transform_5(%arg0: i32, %arg1: i32) -> (i32, i32) {
    %c0_i32 = arith.constant 0 : i32
    %c0_i32_0 = arith.constant 0 : i32
    %c0_i32_1 = arith.constant 0 : i32
    return %c0_i32, %c0_i32_0 : i32, i32
  }
  func.func @transform_6(%arg0: i32, %arg1: i32) -> (i32, i32, i32) {
    %c0_i32 = arith.constant 0 : i32
    %c0_i32_0 = arith.constant 0 : i32
    return %arg0, %arg1, %c0_i32 : i32, i32, i32
  }
}

</mosaic_0001>

<bundles_post_ra>
// kernel: tpu_custom_call.1
= control target key start
LH: loop header
LB: loop body
LE: loop exit
PB: predicated region body
PF: predicated region fallthrough
CT: control target
= control target key end

     0   :  { %11 = vsyncpa [#allocation3], 0  ;;  %s9156_s21 = smov 0   ;;  %s9158_s22 = smov 0   ;;  %s13710_s0 = inlined_call_operand.vmem [shape: f32[2], index: 0, kind: input, shape index: {}]   ;;  %s13711_s1 = inlined_call_operand.vmem [shape: f32[1,44,26,3], index: 1, kind: input, shape index: {}]   ;;  %s13712_s2 = inlined_call_operand.vmem [shape: bf16[9,3,5], index: 2, kind: input, shape index: {}]   ;;  %s13713_s3 = inlined_call_operand.vmem [shape: f32[1,5], index: 3, kind: input, shape index: {}]   ;;  %s13714_s4 = inlined_call_operand.vmem [shape: bf16[9,5,7], index: 4, kind: input, shape index: {}]   ;;  %s13715_s5 = inlined_call_operand.vmem [shape: f32[1,7], index: 5, kind: input, shape index: {}]   ;;  %s13716_s6 = inlined_call_operand.vmem [shape: f32[1,800,7], index: 6, kind: output, shape index: {}]  }
   0x1   :  { %s9160_s23 = smov 0  }
   0x2 LB: > { %s7397_s24 = sadd.s32 4294967295, %s9114_s23   ;;  %s26_s25 = sadd.s32 1, %s9110_s22  ;;  %s9114_s23 = sphi %s9160_s23, %s17_s23   ;;  %s9110_s22 = sphi %s9158_s22, %s14779_s22   ;;  %s9106_s21 = sphi %s9156_s21, %s14778_s21  }
   0x3   : > { %p27_p0 = scmp.ge.s32.totalorder %s26_s25, 5  ;;  %p7399_p1 = scmp.ge.s32.totalorder %s9114_s23, 1 }
   0x4   : > { %p193_p2 = scmp.lt.s32.totalorder %s9114_s23, 6  ;;  %p9181_p4 = scmp.eq.s32.totalorder %s7397_s24, 0 }
   0x5   : > { %s14781_s25 = smov (%p27_p0, %s26_s25), 0  ;;  %s206_s30 = sshll.u32 %s13710_s0, 4  ;;  %s207_s30 = int_to_ptr.vmem [resolvable:$true] %s206_s30 }
   0x6   : > { %p9177_p3 = pnand %p7399_p1, %p193_p2  ;;  %s9073_s7 = scalar_lea.vmem %s207_s30, 16 }
   0x7   : > { %p9074_p7 = scmp.ne.s32.totalorder %s207_s30, %s9073_s7  ;;  %p9081_p11 = scmp.lt.s32.totalorder %s207_s30, %s207_s30 }
   0x8   : > { %p9037_p5 = pneg %p9177_p3  ;;  %p9082_p12 = scmp.lt.s32.totalorder %s9073_s7, %s9073_s7 }
   0xa   : > { %p9038_p6 = pnand %p9181_p4, %p9037_p5  ;;  %p9083_p13 = por %p9082_p12, %p9081_p11 }
   0xc   : > { %p9075_p8 = pneg %p9038_p6 }
   0xe   : > { %p9076_p9 = pnand %p9075_p8, %p9074_p7 }
  0x10   : > { %p9077_p10 = pneg %p9076_p9 }
  0x12   : > { %p9084_p0 = pnand %p9083_p13, %p9077_p10 }
  0x14   : > { %9087 = shalt.err (!%p9084_p0)
}
  0x15   : > { %s9116_s8 = smov [#allocation2]   ;;  %239 = sbr.rel (%p9177_p3) target bundleno = 1574 (0x626), region = 44 }
  0x16   : > { %9040 = dma.vmem_to_smem (!%p9038_p6), %s207_s30, 16, %s9116_s8, [#allocation3]  }
  0x1c   : > { %9101 = dma.done.wait (%p9181_p4), [#allocation3], 16  }
  0x1d   : > { %9103 = vsyncadd (%p9181_p4), [#allocation3], 4294967280 }
  0x1e   : > { %245 = sfence }
  0x1f   : > { %v7448_v0 = vld [vmem:[%s13712_s2 + $0x2] sm:$0x3]  ;;  %vm1049_vm0 = vcmask 1040384   ;;  %vm1050_vm1 = vcmask 1041408   ;;  %v13717_v1 = vmov 0.0   ;;  %v9118_v2 = vmov 65535  }
  0x20   : > { %8117 = vmatprep.subr.bf16.mxu0 %v13717_v1  ;;  %v1051_v3 = vsel %vm1049_vm0, 4294967295, %v9118_v2  ;;  %v9203_v4 = vsel %vm1050_vm1, 4294967295, %v9118_v2  ;;  %s291_s11 = sld [smem:[#allocation2]]  ;;  %8303 = vmatprep.subr.bf16.mxu1 %v13717_v1  ;;  %s7814_s12 = sshll.u32 %s9106_s21, 8  ;;  %vm9119_vm2 = vmmov 0   ;;  %vm1003_vm13 = vcmask 23552  }
  0x21   : > { %14020 = vst [vmem:[#allocation5_spill] sm:$0xff] %v9203_v4  ;;  %v9206_v5 = vsel %vm1050_vm1, %v1051_v3, 0  ;;  %8119 = vmatprep.mubr.msk.bf16.mxu0 %vm9119_vm2, %v13717_v1  ;;  %s9215_s15 = scalar_lea.vmem %s13711_s1, %s7814_s12  ;;  %v9220_v7 = vld [vmem:[%s13712_s2] sm:$0x3]  ;;  %8305 = vmatprep.mubr.msk.bf16.mxu1 %vm9119_vm2, %v13717_v1  ;;  %vm613_vm6 = vsmask.f32 3328 }
  0x22   : > { %v1054_v6 = vand.u32 %v7448_v0, %v9206_v5  ;;  %v295_v8 = vld [vmem:[%s9215_s15] sm:$0xff]  ;;  %v296_v9 = vld [vmem:[%s9215_s15 + $0x8] sm:$0xff]  ;;  %v297_v10 = vld [vmem:[%s9215_s15 + $0x10] sm:$0xff]  ;;  %v1270_v12 = vand.u32 %v9206_v5, %v9220_v7  ;;  %vm614_vm7 = vsmask.f32 7440  ;;  %s7405_s14 = sshll.u32 %s9106_s21, 3 }
  0x23   : > { %v298_v11 = vld [vmem:[%s9215_s15 + $0x18] sm:$0x3]  ;;  %vm343_vm3 = vcmp.ge.f32.partialorder %v295_v8, 0.0  ;;  %vm344_vm4 = vcmp.ge.f32.partialorder %v296_v9, 0.0  ;;  %v299_v13 = vld [vmem:[%s9215_s15 + $0x20] sm:$0xff]  ;;  %v300_v14 = vld [vmem:[%s9215_s15 + $0x28] sm:$0xff] }
  0x24   : > { %8118 = vmatpush3.bf16.msra.mxu0 %v1054_v6  ;;  %v301_v15 = vld [vmem:[%s9215_s15 + $0x30] sm:$0xff]  ;;  %vm345_vm5 = vcmp.ge.f32.partialorder %v297_v10, 0.0  ;;  %vm346_vm8 = vcmp.ge.f32.partialorder %v298_v11, 0.0  ;;  %vm347_vm9 = vcmp.ge.f32.partialorder %v299_v13, 0.0  ;;  %vm348_vm10 = vcmp.ge.f32.partialorder %v300_v14, 0.0  ;;  %vm9293_vm14 = vmor %vm613_vm6, %vm614_vm7  ;;  %s7406_s18 = sld [smem:[#allocation2 + $0x1]] }
  0x25   : > { %8179 = vmatprep.subr.bf16.mxu0 %v13717_v1  ;;  %v302_v23 = vld [vmem:[%s9215_s15 + $0x38] sm:$0x3]  ;;  %vm349_vm11 = vcmp.ge.f32.partialorder %v301_v15, 0.0  ;;  %s279_s17 = smul.u32 20, %s9106_s21 }
  0x26   : > { %v9234_v16 = vstv %s291_s11  ;;  %vm350_vm12 = vcmp.ge.f32.partialorder %v302_v23, 0.0 }
  0x27   : > { %14021 = vst [vmem:[#allocation6_spill] sm:$0xff] %v9234_v16  ;;  %v392_v17 = vmul.f32 %v9234_v16, %v295_v8  ;;  %v393_v18 = vmul.f32 %v9234_v16, %v296_v9  ;;  %v394_v19 = vmul.f32 %v9234_v16, %v297_v10  ;;  %v395_v20 = vmul.f32 %v9234_v16, %v298_v11  ;;  %p282_p1 = scmp.lt.s32.totalorder %s279_s17, 99 }
  0x28   : > { %v396_v21 = vmul.f32 %v9234_v16, %v299_v13  ;;  %v397_v22 = vmul.f32 %v9234_v16, %v300_v14  ;;  %v398_v41 = vmul.f32 %v9234_v16, %v301_v15  ;;  %v399_v42 = vmul.f32 %v9234_v16, %v302_v23 }
  0x29   : > { %v9244_v24 = vsel %vm343_vm3, %v295_v8, %v392_v17  ;;  %v9247_v25 = vsel %vm344_vm4, %v296_v9, %v393_v18  ;;  %v9250_v26 = vsel %vm345_vm5, %v297_v10, %v394_v19  ;;  %v443_v27 = vsel %vm346_vm8, %v298_v11, %v395_v20  ;;  %v303_v8 = vld [vmem:[%s9215_s15 + $0x40] sm:$0xff]  ;;  %v305_v20 = vld [vmem:[%s9215_s15 + $0x50] sm:$0xff]  ;;  %s14783_s17 = smov (!%p282_p1, %s279_s17), 99 }
  0x2a   : > { %v9254_v28 = vpack.c.bf16 %v9244_v24, %v9244_v24  ;;  %v9258_v29 = vpack.c.bf16 %v9247_v25, %v9247_v25  ;;  %v9262_v30 = vpack.c.bf16 %v9250_v26, %v9250_v26  ;;  %v9265_v31 = vsel %vm347_vm9, %v299_v13, %v396_v21 }
  0x2b   : > { %v9267_v32 = vsel %vm348_vm10, %v300_v14, %v397_v22  ;;  %v9269_v33 = vpack.c.bf16 %v443_v27, %v443_v27  ;;  %v9273_v34 = vpack.c.bf16 %v9265_v31, %v9265_v31  ;;  %v9298_v59 = vsel %vm349_vm11, %v301_v15, %v398_v41  ;;  %v304_v14 = vld [vmem:[%s9215_s15 + $0x48] sm:$0xff] }
  0x2c   : > { %v617_v35 = vshrl.u32 %v9254_v28, 16  ;;  %v620_v36 = vshll.u32 %v9254_v28, 16  ;;  %v626_v37 = vshll.u32 %v9258_v29, 16  ;;  %v630_v38 = vshrl.u32 %v9258_v29, 16 }
  0x2d   : > { %14022 = vst [vmem:[#allocation7_spill] sm:$0xff] %v9269_v33  ;;  %14023 = vst [vmem:[#allocation8_spill] sm:$0xff] %v9273_v34  ;;  %v636_v39 = vshll.u32 %v9262_v30, 16  ;;  %v9282_v40 = vpack.c.bf16 %v9267_v32, %v9267_v32  ;;  %v640_v48 = vshrl.u32 %v9262_v30, 16  ;;  %v646_v49 = vshll.u32 %v9269_v33, 16 }
  0x2e   : > { %v619_v43 = vrot.slane %v617_v35, 4  ;;  %v622_v44 = vrot.slane %v620_v36, 5  ;;  %v628_v45 = vrot.slane %v626_v37, 5  ;;  %v632_v46 = vrot.slane %v630_v38, 4  ;;  %v306_v37 = vld [vmem:[%s9215_s15 + $0x58] sm:$0x3] }
  0x2f   : > { %14024 = vst [vmem:[#allocation9_spill] sm:$0xff] %v9282_v40  ;;  %v638_v47 = vrot.slane %v636_v39, 5  ;;  %v651_v50 = vshrl.u32 %v9273_v34, 16  ;;  %v654_v53 = vshll.u32 %v9273_v34, 16  ;;  %v660_v54 = vshll.u32 %v9282_v40, 16  ;;  %v307_v38 = vld [vmem:[%s9215_s15 + $0x60] sm:$0xff] }
  0x30   : > { %v623_v51 = vor.u32 %v622_v44, %v619_v43  ;;  %v633_v52 = vor.u32 %v632_v46, %v628_v45  ;;  %v642_v56 = vrot.slane %v640_v48, 4  ;;  %v648_v57 = vrot.slane %v646_v49, 5  ;;  %v308_v43 = vld [vmem:[%s9215_s15 + $0x68] sm:$0xff] }
  0x31   : > { %v653_v58 = vrot.slane %v651_v50, 4  ;;  %v656_v62 = vrot.slane %v654_v53, 5  ;;  %v662_v63 = vrot.slane %v660_v54, 5  ;;  %v9301_v2 = vsel %vm350_vm12, %v302_v23, %v399_v42 }
  0x32   : > { %v624_v60 = vrot.slane %v623_v51, 4  ;;  %v634_v61 = vrot.slane %v633_v52, 4  ;;  %v643_v0 = vor.u32 %v642_v56, %v638_v47  ;;  %v9305_v3 = vpack.c.bf16 %v9298_v59, %v9298_v59  ;;  %v316_v52 = vld [vmem:[%s9215_s15 + $0xa8] sm:$0xff] }
  0x33   : > { %v664_v6 = vshrl.u32 %v9282_v40, 16  ;;  %v657_v11 = vor.u32 %v656_v62, %v653_v58  ;;  %v9315_v13 = vpack.c.bf16 %v9301_v2, %v9301_v2  ;;  %vm351_vm15 = vcmp.ge.f32.partialorder %v303_v8, 0.0 }
  0x34   : > { %14027 = vst [vmem:[#allocation10_spill] sm:$0xff] %v9305_v3  ;;  %v629_v9 = vsel %vm9293_vm14, %v624_v60, %v628_v45  ;;  %v639_v10 = vsel %vm9293_vm14, %v634_v61, %v638_v47  ;;  %v644_v17 = vrot.slane %v643_v0, 4  ;;  %v670_v19 = vshll.u32 %v9305_v3, 16 }
  0x35   : > { %14028 = vst [vmem:[#allocation11_spill] sm:$0xff] %v9315_v13  ;;  %v7449_v15 = vcombine.low %v629_v9, %v639_v10  ;;  %v666_v18 = vrot.slane %v664_v6, 4  ;;  %v658_v21 = vrot.slane %v657_v11, 4  ;;  %v674_v22 = vshrl.u32 %v9305_v3, 16 }
  0x36   : > { %v680_v23 = vshll.u32 %v9315_v13, 16  ;;  %v649_v27 = vsel %vm9293_vm14, %v644_v17, %v648_v57  ;;  %v672_v36 = vrot.slane %v670_v19, 5  ;;  %vm352_vm1 = vcmp.ge.f32.partialorder %v304_v14, 0.0  ;;  %v309_v17 = vld [vmem:[%s9215_s15 + $0x70] sm:$0xff] }
  0x37   : > { %8120 = vmatmul.mubr.msk.bf16.vlgmr.msra.gmra.mrb[0].mxu0 %vm1003_vm13, %v7449_v15  ;;  %v667_v35 = vor.u32 %v666_v18, %v662_v63  ;;  %v9334_v39 = vsel %vm9293_vm14, %v658_v21, %v662_v63  ;;  %v676_v41 = vrot.slane %v674_v22, 4  ;;  %vm353_vm3 = vcmp.ge.f32.partialorder %v305_v20, 0.0 }
  0x38   : > { %8180 = vmatpush3.bf16.msra.mxu0 %v1270_v12  ;;  %8123 = vmatprep.mubr.msk.bf16.mxu0 %vm9119_vm2, %v13717_v1  ;;  %14029 = vst [vmem:[#allocation12_spill] sm:$0xff] %v9334_v39  ;;  %v682_v42 = vrot.slane %v680_v23, 5  ;;  %v7450_v44 = vcombine.low %v649_v27, %v9334_v39  ;;  %v400_v46 = vmul.f32 %v9234_v16, %v303_v8  ;;  %vm354_vm4 = vcmp.ge.f32.partialorder %v306_v37, 0.0 }
  0x39   : > { %v668_v45 = vrot.slane %v667_v35, 4  ;;  %v401_v47 = vmul.f32 %v9234_v16, %v304_v14  ;;  %8241 = vmatprep.subr.bf16.mxu0 %v13717_v1  ;;  %v677_v7 = vor.u32 %v676_v41, %v672_v36  ;;  %v402_v12 = vmul.f32 %v9234_v16, %v305_v20  ;;  %v310_v41 = vld [vmem:[%s9215_s15 + $0x78] sm:$0x3] }
  0x3a   : > { %vm355_vm5 = vcmp.ge.f32.partialorder %v307_v38, 0.0  ;;  %v9347_v49 = vsel %vm351_vm15, %v303_v8, %v400_v46  ;;  %vm356_vm6 = vcmp.ge.f32.partialorder %v308_v43, 0.0  ;;  %v403_v58 = vmul.f32 %v9234_v16, %v306_v37 }
  0x3b   : > { %v9344_v48 = vsel %vm9293_vm14, %v668_v45, %v672_v36  ;;  %v9350_v50 = vsel %vm352_vm1, %v304_v14, %v401_v47  ;;  %v678_v51 = vrot.slane %v677_v7, 4  ;;  %v9355_v53 = vsel %vm353_vm3, %v305_v20, %v402_v12 }
  0x3c   : > { %14030 = vst [vmem:[#allocation13_spill] sm:$0xff] %v9344_v48  ;;  %v9359_v54 = vpack.c.bf16 %v9347_v49, %v9347_v49  ;;  %v9363_v56 = vpack.c.bf16 %v9350_v50, %v9350_v50  ;;  %v9367_v57 = vpack.c.bf16 %v9355_v53, %v9355_v53  ;;  %v404_v60 = vmul.f32 %v9234_v16, %v307_v38 }
  0x3d   : > { %v9373_v61 = vsel %vm9293_vm14, %v678_v51, %v682_v42  ;;  %v405_v0 = vmul.f32 %v9234_v16, %v308_v43  ;;  %v9385_v14 = vsel %vm354_vm4, %v306_v37, %v403_v58  ;;  %vm357_vm7 = vcmp.ge.f32.partialorder %v309_v17, 0.0 }
  0x3e   : > { %14031 = vst [vmem:[#allocation14_spill] sm:$0xff] %v9359_v54  ;;  %14032 = vst [vmem:[#allocation15_spill] sm:$0xff] %v9363_v56  ;;  %v685_v62 = vshrl.u32 %v9359_v54, 16  ;;  %v688_v63 = vshll.u32 %v9359_v54, 16  ;;  %v694_v6 = vshll.u32 %v9363_v56, 16  ;;  %v698_v8 = vshrl.u32 %v9363_v56, 16 }
  0x3f   : > { %14033 = vst [vmem:[#allocation16_spill] sm:$0xff] %v9367_v57  ;;  %14034 = vst [vmem:[#allocation17_spill] sm:$0xff] %v9373_v61  ;;  %8124 = vmatmul.mubr.msk.bf16.gmra.mrb[4].mxu0 %vm1003_vm13, %v7450_v44  ;;  %v704_v9 = vshll.u32 %v9367_v57, 16  ;;  %v9388_v15 = vsel %vm355_vm5, %v307_v38, %v404_v60  ;;  %v7451_v18 = vcombine.low %v9344_v48, %v9373_v61  ;;  %v708_v38 = vshrl.u32 %v9367_v57, 16  ;;  %v325_v56 = vld [vmem:[%s9215_s15 + $0xf0] sm:$0xff] }
  0x40   : > { %8127 = vmatprep.mubr.msk.bf16.mxu0 %vm9119_vm2, %v13717_v1  ;;  %v687_v10 = vrot.slane %v685_v62, 4  ;;  %v690_v11 = vrot.slane %v688_v63, 5  ;;  %v696_v19 = vrot.slane %v694_v6, 5  ;;  %v700_v20 = vrot.slane %v698_v8, 4  ;;  %v311_v8 = vld [vmem:[%s9215_s15 + $0x80] sm:$0xff] }
  0x41   : > { %v9394_v21 = vsel %vm356_vm6, %v308_v43, %v405_v0  ;;  %v9398_v23 = vpack.c.bf16 %v9385_v14, %v9385_v14  ;;  %v9402_v27 = vpack.c.bf16 %v9388_v15, %v9388_v15  ;;  %v706_v37 = vrot.slane %v704_v9, 5 }
  0x42   : > { %v691_v22 = vor.u32 %v690_v11, %v687_v10  ;;  %v9406_v35 = vpack.c.bf16 %v9394_v21, %v9394_v21  ;;  %v701_v36 = vor.u32 %v700_v20, %v696_v19  ;;  %v710_v47 = vrot.slane %v708_v38, 4 }
  0x43   : > { %14035 = vst [vmem:[#allocation18_spill] sm:$0xff] %v9398_v23  ;;  %14036 = vst [vmem:[#allocation19_spill] sm:$0xff] %v9402_v27  ;;  %v714_v43 = vshll.u32 %v9398_v23, 16  ;;  %v719_v44 = vshrl.u32 %v9402_v27, 16  ;;  %v722_v45 = vshll.u32 %v9402_v27, 16  ;;  %v406_v12 = vmul.f32 %v9234_v16, %v309_v17 }
  0x44   : > { %14037 = vst [vmem:[#allocation20_spill] sm:$0xff] %v9406_v35  ;;  %v692_v42 = vrot.slane %v691_v22, 4  ;;  %v702_v46 = vrot.slane %v701_v36, 4  ;;  %v728_v7 = vshll.u32 %v9406_v35, 16  ;;  %vm358_vm8 = vcmp.ge.f32.partialorder %v310_v41, 0.0 }
  0x45   : > { %v721_v58 = vrot.slane %v719_v44, 4  ;;  %v724_v60 = vrot.slane %v722_v45, 5  ;;  %v711_v63 = vor.u32 %v710_v47, %v706_v37  ;;  %v716_v0 = vrot.slane %v714_v43, 5  ;;  %v313_v43 = vld [vmem:[%s9215_s15 + $0x90] sm:$0xff] }
  0x46   : > { %v9417_v51 = vsel %vm9293_vm14, %v692_v42, %v696_v19  ;;  %v9422_v62 = vsel %vm9293_vm14, %v702_v46, %v706_v37  ;;  %v407_v6 = vmul.f32 %v9234_v16, %v310_v41  ;;  %v730_v10 = vrot.slane %v728_v7, 5  ;;  %v312_v19 = vld [vmem:[%s9215_s15 + $0x88] sm:$0xff] }
  0x47   : > { %14038 = vst [vmem:[#allocation21_spill] sm:$0xff] %v9417_v51  ;;  %8128 = vmatmul.mubr.msk.bf16.gmra.mrb[8].mxu0 %vm1003_vm13, %v7451_v18  ;;  %14039 = vst [vmem:[#allocation22_spill] sm:$0xff] %v9422_v62  ;;  %v725_v9 = vor.u32 %v724_v60, %v721_v58  ;;  %v9429_v11 = vsel %vm357_vm7, %v309_v17, %v406_v12  ;;  %v732_v18 = vshrl.u32 %v9406_v35, 16  ;;  %v712_v22 = vrot.slane %v711_v63, 4 }
  0x48   : > { %8131 = vmatprep.mubr.msk.bf16.mxu0 %vm9119_vm2, %v13717_v1  ;;  %v9435_v20 = vcombine.low %v9417_v51, %v9422_v62  ;;  %v9437_v36 = vsel %vm358_vm8, %v310_v41, %v407_v6  ;;  %v9441_v37 = vpack.c.bf16 %v9429_v11, %v9429_v11  ;;  %vm359_vm9 = vcmp.ge.f32.partialorder %v311_v8, 0.0 }
  0x49   : > { %v726_v38 = vrot.slane %v725_v9, 4  ;;  %v9445_v42 = vpack.c.bf16 %v9437_v36, %v9437_v36  ;;  %v734_v17 = vrot.slane %v732_v18, 4  ;;  %v9450_v44 = vsel %vm9293_vm14, %v712_v22, %v716_v0  ;;  %v314_v9 = vld [vmem:[%s9215_s15 + $0x98] sm:$0x3] }
  0x4a   : > { %14040 = vst [vmem:[#allocation23_spill] sm:$0xff] %v9435_v20  ;;  %14041 = vst [vmem:[#allocation24_spill] sm:$0xff] %v9441_v37  ;;  %v738_v41 = vshll.u32 %v9441_v37, 16  ;;  %v742_v45 = vshrl.u32 %v9441_v37, 16  ;;  %vm360_vm10 = vcmp.ge.f32.partialorder %v312_v19, 0.0  ;;  %v408_v12 = vmul.f32 %v9234_v16, %v311_v8  ;;  %v321_v37 = vld [vmem:[%s9215_s15 + $0xd0] sm:$0xff] }
  0x4b   : > { %14042 = vst [vmem:[#allocation25_spill] sm:$0xff] %v9445_v42  ;;  %14043 = vst [vmem:[#allocation26_spill] sm:$0xff] %v9450_v44  ;;  %v9456_v46 = vsel %vm9293_vm14, %v726_v38, %v730_v10  ;;  %v735_v47 = vor.u32 %v734_v17, %v730_v10  ;;  %v748_v7 = vshll.u32 %v9445_v42, 16  ;;  %vm361_vm11 = vcmp.ge.f32.partialorder %v313_v43, 0.0  ;;  %v315_v17 = vld [vmem:[%s9215_s15 + $0xa0] sm:$0xff] }
  0x4c   : > { %14044 = vst [vmem:[#allocation27_spill] sm:$0xff] %v9456_v46  ;;  %v740_v58 = vrot.slane %v738_v41, 5  ;;  %v744_v60 = vrot.slane %v742_v45, 4  ;;  %v409_v63 = vmul.f32 %v9234_v16, %v312_v19  ;;  %v410_v0 = vmul.f32 %v9234_v16, %v313_v43 }
  0x4d   : > { %v9462_v6 = vsel %vm359_vm9, %v311_v8, %v408_v12  ;;  %v9469_v10 = vcombine.low %v9450_v44, %v9456_v46  ;;  %v736_v8 = vrot.slane %v735_v47, 4  ;;  %v750_v41 = vrot.slane %v748_v7, 5 }
  0x4e   : > { %v745_v18 = vor.u32 %v744_v60, %v740_v58  ;;  %v9471_v22 = vsel %vm360_vm10, %v312_v19, %v409_v63  ;;  %v9475_v38 = vpack.c.bf16 %v9462_v6, %v9462_v6  ;;  %v9480_v45 = vsel %vm361_vm11, %v313_v43, %v410_v0 }
  0x4f   : > { %8132 = vmatmul.mubr.msk.bf16.gmra.mrb[12].mxu0 %vm1003_vm13, %v9435_v20  ;;  %14045 = vst [vmem:[#allocation28_spill] sm:$0xff] %v9469_v10  ;;  %v9484_v12 = vpack.c.bf16 %v9471_v22, %v9471_v22  ;;  %v9489_v19 = vpack.c.bf16 %v9480_v45, %v9480_v45  ;;  %vm362_vm12 = vcmp.ge.f32.partialorder %v314_v9, 0.0  ;;  %vm363_vm15 = vcmp.ge.f32.partialorder %v315_v17, 0.0 }
  0x50   : > { %14046 = vst [vmem:[#allocation29_spill] sm:$0xff] %v9475_v38  ;;  %8135 = vmatprep.mubr.msk.bf16.mxu0 %vm9119_vm2, %v13717_v1  ;;  %v753_v60 = vshrl.u32 %v9475_v38, 16  ;;  %v756_v63 = vshll.u32 %v9475_v38, 16  ;;  %v411_v43 = vmul.f32 %v9234_v16, %v314_v9  ;;  %v746_v7 = vrot.slane %v745_v18, 4 }
  0x51   : > { %14047 = vst [vmem:[#allocation30_spill] sm:$0xff] %v9484_v12  ;;  %14048 = vst [vmem:[#allocation31_spill] sm:$0xff] %v9489_v19  ;;  %v762_v1 = vshll.u32 %v9484_v12, 16  ;;  %v766_v47 = vshrl.u32 %v9484_v12, 16  ;;  %vm364_vm1 = vcmp.ge.f32.partialorder %v316_v52, 0.0  ;;  %v772_v44 = vshll.u32 %v9489_v19, 16 }
  0x52   : > { %v755_v0 = vrot.slane %v753_v60, 4  ;;  %v758_v4 = vrot.slane %v756_v63, 5  ;;  %v412_v61 = vmul.f32 %v9234_v16, %v315_v17  ;;  %v413_v48 = vmul.f32 %v9234_v16, %v316_v52 }
  0x53   : > { %v764_v46 = vrot.slane %v762_v1, 5  ;;  %v768_v62 = vrot.slane %v766_v47, 4  ;;  %v9499_v39 = vsel %vm362_vm12, %v314_v9, %v411_v43  ;;  %v776_v18 = vshrl.u32 %v9489_v19, 16  ;;  %v320_v19 = vld [vmem:[%s9215_s15 + $0xc8] sm:$0xff] }
  0x54   : > { %v759_v51 = vor.u32 %v758_v4, %v755_v0  ;;  %v9501_v12 = vsel %vm363_vm15, %v315_v17, %v412_v61  ;;  %v9508_v1 = vsel %vm9293_vm14, %v736_v8, %v740_v58  ;;  %v9512_v60 = vsel %vm9293_vm14, %v746_v7, %v750_v41  ;;  %v317_v61 = vld [vmem:[%s9215_s15 + $0xb0] sm:$0xff]  ;;  %v318_v8 = vld [vmem:[%s9215_s15 + $0xb8] sm:$0x3] }
  0x55   : > { %v769_v20 = vor.u32 %v768_v62, %v764_v46  ;;  %14049 = vst [vmem:[#allocation32_spill] sm:$0xff] %v9508_v1  ;;  %14050 = vst [vmem:[#allocation33_spill] sm:$0xff] %v9512_v60  ;;  %v9514_v4 = vsel %vm364_vm1, %v316_v52, %v413_v48  ;;  %v9518_v62 = vpack.c.bf16 %v9501_v12, %v9501_v12  ;;  %v14052_v9 = vmov 0.0  }
  0x56   : > { %v774_v17 = vrot.slane %v772_v44, 5  ;;  %v9525_v58 = vpack.c.bf16 %v9499_v39, %v9499_v39  ;;  %v760_v41 = vrot.slane %v759_v51, 4  ;;  %v9532_v47 = vcombine.low %v9508_v1, %v9512_v60 }
  0x57   : > { %8136 = vmatmul.mubr.msk.bf16.gmra.mrb[16].mxu0 %vm1003_vm13, %v9469_v10  ;;  %14051 = vst [vmem:[#allocation34_spill] sm:$0xff] %v9518_v62  ;;  %v770_v63 = vrot.slane %v769_v20, 4  ;;  %v787_v48 = vshrl.u32 %v9518_v62, 16  ;;  %v790_v52 = vshll.u32 %v9518_v62, 16  ;;  %v9536_v43 = vpack.c.bf16 %v9514_v4, %v9514_v4  ;;  %v319_v20 = vld [vmem:[%s9215_s15 + $0xc0] sm:$0xff] }
  0x58   : > { %8139 = vmatprep.mubr.msk.bf16.mxu0 %vm9119_vm2, %v14052_v9  ;;  %14053 = vst [vmem:[#allocation35_spill] sm:$0xff] %v9525_v58  ;;  %14054 = vst [vmem:[#allocation36_spill] sm:$0xff] %v9532_v47  ;;  %v778_v44 = vrot.slane %v776_v18, 4  ;;  %vm365_vm3 = vcmp.ge.f32.partialorder %v317_v61, 0.0  ;;  %vm366_vm4 = vcmp.ge.f32.partialorder %v318_v8, 0.0  ;;  %v414_v51 = vmul.f32 %v9234_v16, %v317_v61 }
  0x59   : > { %14055 = vst [vmem:[#allocation37_spill] sm:$0xff] %v9536_v43  ;;  %v789_v7 = vrot.slane %v787_v48, 4  ;;  %v792_v0 = vrot.slane %v790_v52, 5  ;;  %v415_v10 = vmul.f32 %v9234_v16, %v318_v8  ;;  %v800_v62 = vshrl.u32 %v9536_v43, 16 }
  0x5a   : > { %v9545_v60 = vsel %vm9293_vm14, %v760_v41, %v764_v46  ;;  %v9549_v18 = vsel %vm9293_vm14, %v770_v63, %v774_v17  ;;  %v782_v48 = vshll.u32 %v9525_v58, 16  ;;  %v9552_v52 = vsel %vm365_vm3, %v317_v61, %v414_v51 }
  0x5b   : > { %14056 = vst [vmem:[#allocation38_spill] sm:$0xff] %v9545_v60  ;;  %14057 = vst [vmem:[#allocation39_spill] sm:$0xff] %v9549_v18  ;;  %v796_v1 = vshll.u32 %v9536_v43, 16  ;;  %v9555_v38 = vsel %vm366_vm4, %v318_v8, %v415_v10  ;;  %v9559_v42 = vpack.c.bf16 %v9552_v52, %v9552_v52  ;;  %vm367_vm5 = vcmp.ge.f32.partialorder %v319_v20, 0.0 }
  0x5c   : > { %v779_v46 = vor.u32 %v778_v44, %v774_v17  ;;  %v793_v41 = vor.u32 %v792_v0, %v789_v7  ;;  %vm368_vm6 = vcmp.ge.f32.partialorder %v320_v19, 0.0  ;;  %v416_v63 = vmul.f32 %v9234_v16, %v319_v20 }
  0x5d   : > { %14058 = vst [vmem:[#allocation40_spill] sm:$0xff] %v9559_v42  ;;  %v802_v61 = vrot.slane %v800_v62, 4  ;;  %v806_v10 = vshll.u32 %v9559_v42, 16  ;;  %v810_v8 = vshrl.u32 %v9559_v42, 16  ;;  %v417_v51 = vmul.f32 %v9234_v16, %v320_v19 }
  0x5e   : > { %v9572_v43 = vpack.c.bf16 %v9555_v38, %v9555_v38  ;;  %v418_v17 = vmul.f32 %v9234_v16, %v321_v37  ;;  %v9575_v44 = vsel %vm367_vm5, %v319_v20, %v416_v63  ;;  %v798_v7 = vrot.slane %v796_v1, 5 }
  0x5f   : > { %8140 = vmatmul.mubr.msk.bf16.gmra.mrb[20].mxu0 %vm1003_vm13, %v9532_v47  ;;  %v808_v0 = vrot.slane %v806_v10, 5  ;;  %v812_v47 = vrot.slane %v810_v8, 4  ;;  %vm369_vm7 = vcmp.ge.f32.partialorder %v321_v37, 0.0  ;;  %v9579_v62 = vcombine.low %v9545_v60, %v9549_v18 }
  0x60   : > { %8143 = vmatprep.mubr.msk.bf16.mxu0 %vm9119_vm2, %v14052_v9  ;;  %14059 = vst [vmem:[#allocation41_spill] sm:$0xff] %v9572_v43  ;;  %v784_v42 = vrot.slane %v782_v48, 5  ;;  %v9582_v58 = vsel %vm368_vm6, %v320_v19, %v417_v51  ;;  %v9586_v27 = vpack.c.bf16 %v9575_v44, %v9575_v44  ;;  %v780_v35 = vrot.slane %v779_v46, 4  ;;  %v323_v19 = vld [vmem:[%s9215_s15 + $0xe0] sm:$0xff] }
  0x61   : > { %14060 = vst [vmem:[#allocation42_spill] sm:$0xff] %v9579_v62  ;;  %v794_v20 = vrot.slane %v793_v41, 4  ;;  %v803_v63 = vor.u32 %v802_v61, %v798_v7  ;;  %v9590_v1 = vpack.c.bf16 %v9582_v58, %v9582_v58  ;;  %v813_v10 = vor.u32 %v812_v47, %v808_v0 }
  0x62   : > { %14061 = vst [vmem:[#allocation43_spill] sm:$0xff] %v9586_v27  ;;  %v816_v8 = vshll.u32 %v9572_v43, 16  ;;  %v9593_v18 = vsel %vm369_vm7, %v321_v37, %v418_v17  ;;  %v821_v48 = vshrl.u32 %v9586_v27, 16  ;;  %v824_v51 = vshll.u32 %v9586_v27, 16  ;;  %v322_v17 = vld [vmem:[%s9215_s15 + $0xd8] sm:$0x3] }
  0x63   : > { %14062 = vst [vmem:[#allocation44_spill] sm:$0xff] %v9590_v1  ;;  %v830_v46 = vshll.u32 %v9590_v1, 16  ;;  %v834_v41 = vshrl.u32 %v9590_v1, 16  ;;  %v9606_v37 = vsel %vm9293_vm14, %v780_v35, %v784_v42  ;;  %v9610_v47 = vsel %vm9293_vm14, %v794_v20, %v798_v7  ;;  %v324_v27 = vld [vmem:[%s9215_s15 + $0xe8] sm:$0xff] }
  0x64   : > { %14063 = vst [vmem:[#allocation45_spill] sm:$0xff] %v9606_v37  ;;  %14064 = vst [vmem:[#allocation46_spill] sm:$0xff] %v9610_v47  ;;  %v804_v61 = vrot.slane %v803_v63, 4  ;;  %vm371_vm8 = vcmp.ge.f32.partialorder %v323_v19, 0.0  ;;  %v814_v60 = vrot.slane %v813_v10, 4  ;;  %v818_v1 = vrot.slane %v816_v8, 5 }
  0x65   : > { %v420_v43 = vmul.f32 %v9234_v16, %v323_v19  ;;  %v823_v23 = vrot.slane %v821_v48, 4  ;;  %v826_v57 = vrot.slane %v824_v51, 5  ;;  %v832_v35 = vrot.slane %v830_v46, 5 }
  0x66   : > { %v836_v42 = vrot.slane %v834_v41, 4  ;;  %v9622_v7 = vcombine.low %v9606_v37, %v9610_v47  ;;  %v419_v20 = vmul.f32 %v9234_v16, %v322_v17  ;;  %v9629_v10 = vsel %vm9293_vm14, %v804_v61, %v808_v0  ;;  %v326_v37 = vld [vmem:[%s9215_s15 + $0xf8] sm:$0x3] }
  0x67   : > { %8144 = vmatmul.mubr.msk.bf16.gmra.mrb[24].mxu0 %vm1003_vm13, %v9579_v62  ;;  %v9615_v62 = vpack.c.bf16 %v9593_v18, %v9593_v18  ;;  %v9625_v63 = vsel %vm371_vm8, %v323_v19, %v420_v43  ;;  %14067 = vst [vmem:[#allocation49_spill] sm:$0xff] %v9629_v10  ;;  %vm370_vm9 = vcmp.ge.f32.partialorder %v322_v17, 0.0  ;;  %v421_v8 = vmul.f32 %v9234_v16, %v324_v27 }
  0x68   : > { %8147 = vmatprep.mubr.msk.bf16.mxu0 %vm9119_vm2, %v14052_v9  ;;  %14066 = vst [vmem:[#allocation48_spill] sm:$0xff] %v9622_v7  ;;  %v9634_v48 = vpack.c.bf16 %v9625_v63, %v9625_v63  ;;  %v9638_v51 = vsel %vm9293_vm14, %v814_v60, %v818_v1  ;;  %vm372_vm10 = vcmp.ge.f32.partialorder %v324_v27, 0.0  ;;  %v422_v19 = vmul.f32 %v9234_v16, %v325_v56 }
  0x69   : > { %14065 = vst [vmem:[#allocation47_spill] sm:$0xff] %v9615_v62  ;;  %14069 = vst [vmem:[#allocation51_spill] sm:$0xff] %v9638_v51  ;;  %v840_v43 = vshll.u32 %v9615_v62, 16  ;;  %v827_v0 = vor.u32 %v826_v57, %v823_v23  ;;  %v837_v46 = vor.u32 %v836_v42, %v832_v35  ;;  %v844_v41 = vshrl.u32 %v9615_v62, 16  ;;  %v327_v57 = vld [vmem:[%s9215_s15 + $0x100] sm:$0xff] }
  0x6a   : > { %14068 = vst [vmem:[#allocation50_spill] sm:$0xff] %v9634_v48  ;;  %vm373_vm11 = vcmp.ge.f32.partialorder %v325_v56, 0.0  ;;  %v9645_v61 = vsel %vm370_vm9, %v322_v17, %v419_v20  ;;  %v855_v47 = vshrl.u32 %v9634_v48, 16  ;;  %v9650_v60 = vsel %vm372_vm10, %v324_v27, %v421_v8  ;;  %v328_v17 = vld [vmem:[%s9215_s15 + $0x108] sm:$0xff] }
  0x6b   : > { %14070 = vst [vmem:[#allocation52_spill] sm:$0xff] %v9645_v61  ;;  %v858_v1 = vshll.u32 %v9634_v48, 16  ;;  %v9657_v23 = vcombine.low %v9629_v10, %v9638_v51  ;;  %v842_v42 = vrot.slane %v840_v43, 5  ;;  %v9659_v62 = vsel %vm373_vm11, %v325_v56, %v422_v19 }
  0x6c   : > { %v828_v20 = vrot.slane %v827_v0, 4  ;;  %v9664_v33 = vpack.c.bf16 %v9645_v61, %v9645_v61  ;;  %v846_v27 = vrot.slane %v844_v41, 4  ;;  %v9668_v8 = vpack.c.bf16 %v9650_v60, %v9650_v60  ;;  %v333_v61 = vld [vmem:[%s9215_s15 + $0x130] sm:$0xff] }
  0x6d   : > { %14071 = vst [vmem:[#allocation53_spill] sm:$0xff] %v9657_v23  ;;  %v857_v48 = vrot.slane %v855_v47, 4  ;;  %v423_v54 = vmul.f32 %v9234_v16, %v326_v37  ;;  %vm375_vm12 = vcmp.ge.f32.partialorder %v327_v57, 0.0  ;;  %v860_v51 = vrot.slane %v858_v1, 5 }
  0x6e   : > { %14072 = vst [vmem:[#allocation54_spill] sm:$0xff] %v9664_v33  ;;  %14073 = vst [vmem:[#allocation55_spill] sm:$0xff] %v9668_v8  ;;  %v9673_v56 = vpack.c.bf16 %v9659_v62, %v9659_v62  ;;  %vm376_vm15 = vcmp.ge.f32.partialorder %v328_v17, 0.0  ;;  %v424_v43 = vmul.f32 %v9234_v16, %v327_v57  ;;  %vm374_vm1 = vcmp.ge.f32.partialorder %v326_v37, 0.0 }
  0x6f   : > { %8148 = vmatmul.mubr.msk.bf16.gmra.mrb[28].mxu0 %vm1003_vm13, %v9622_v7  ;;  %v838_v7 = vrot.slane %v837_v46, 4  ;;  %v425_v19 = vmul.f32 %v9234_v16, %v328_v17  ;;  %v9679_v0 = vsel %vm9293_vm14, %v828_v20, %v832_v35  ;;  %v847_v47 = vor.u32 %v846_v27, %v842_v42 }
  0x70   : > { %8151 = vmatprep.mubr.msk.bf16.mxu0 %vm9119_vm2, %v14052_v9  ;;  %14074 = vst [vmem:[#allocation56_spill] sm:$0xff] %v9673_v56  ;;  %14075 = vst [vmem:[#allocation57_spill] sm:$0xff] %v9679_v0  ;;  %v850_v46 = vshll.u32 %v9664_v33, 16  ;;  %v9682_v41 = vsel %vm375_vm12, %v327_v57, %v424_v43  ;;  %v864_v10 = vshll.u32 %v9668_v8, 16  ;;  %v868_v13 = vshrl.u32 %v9668_v8, 16  ;;  %v329_v43 = vld [vmem:[%s9215_s15 + $0x110] sm:$0xff] }
  0x71   : > { %14076 = vst [vmem:[#allocation58_spill] sm:$0xff] %v9682_v41  ;;  %v9688_v1 = vsel %vm9293_vm14, %v838_v7, %v842_v42  ;;  %v9692_v3 = vsel %vm376_vm15, %v328_v17, %v425_v19  ;;  %v861_v35 = vor.u32 %v860_v51, %v857_v48  ;;  %v9696_v57 = vsel %vm374_vm1, %v326_v37, %v423_v54  ;;  %v331_v54 = vld [vmem:[%s9215_s15 + $0x120] sm:$0xff] }
  0x72   : > { %14077 = vst [vmem:[#allocation59_spill] sm:$0xff] %v9688_v1  ;;  %14078 = vst [vmem:[#allocation60_spill] sm:$0xff] %v9692_v3  ;;  %v874_v20 = vshll.u32 %v9673_v56, 16  ;;  %v878_v27 = vshrl.u32 %v9673_v56, 16  ;;  %v9703_v7 = vpack.c.bf16 %v9682_v41, %v9682_v41  ;;  %v9707_v42 = vcombine.low %v9679_v0, %v9688_v1 }
  0x73   : > { %v848_v17 = vrot.slane %v847_v47, 4  ;;  %v852_v19 = vrot.slane %v850_v46, 5  ;;  %v9711_v48 = vpack.c.bf16 %v9692_v3, %v9692_v3  ;;  %v866_v37 = vrot.slane %v864_v10, 5 }
  0x74   : > { %14079 = vst [vmem:[#allocation61_spill] sm:$0xff] %v9703_v7  ;;  %14080 = vst [vmem:[#allocation62_spill] sm:$0xff] %v9707_v42  ;;  %v9716_v51 = vpack.c.bf16 %v9696_v57, %v9696_v57  ;;  %v426_v56 = vmul.f32 %v9234_v16, %v329_v43  ;;  %v862_v8 = vrot.slane %v861_v35, 4  ;;  %v876_v33 = vrot.slane %v874_v20, 5 }
  0x75   : > { %14081 = vst [vmem:[#allocation63_spill] sm:$0xff] %v9711_v48  ;;  %v880_v1 = vrot.slane %v878_v27, 4  ;;  %vm377_vm3 = vcmp.ge.f32.partialorder %v329_v43, 0.0  ;;  %v889_v47 = vshrl.u32 %v9703_v7, 16  ;;  %v892_v46 = vshll.u32 %v9703_v7, 16 }
  0x76   : > { %14082 = vst [vmem:[#allocation64_spill] sm:$0xff] %v9716_v51  ;;  %vm379_vm4 = vcmp.ge.f32.partialorder %v331_v54, 0.0  ;;  %v428_v10 = vmul.f32 %v9234_v16, %v331_v54  ;;  %v898_v0 = vshll.u32 %v9711_v48, 16  ;;  %v902_v34 = vshrl.u32 %v9711_v48, 16  ;;  %v330_v27 = vld [vmem:[%s9215_s15 + $0x118] sm:$0x3] }
  0x77   : > { %8152 = vmatmul.mubr.msk.bf16.gmra.mrb[32].mxu0 %vm1003_vm13, %v9657_v23  ;;  %v870_v23 = vrot.slane %v868_v13, 4  ;;  %v9728_v13 = vsel %vm9293_vm14, %v848_v17, %v852_v19  ;;  %v884_v35 = vshll.u32 %v9716_v51, 16  ;;  %v9731_v20 = vsel %vm377_vm3, %v329_v43, %v426_v56 }
  0x78   : > { %8155 = vmatprep.mubr.msk.bf16.mxu0 %vm9119_vm2, %v14052_v9  ;;  %14083 = vst [vmem:[#allocation65_spill] sm:$0xff] %v9728_v13  ;;  %14084 = vst [vmem:[#allocation66_spill] sm:$0xff] %v9731_v20  ;;  %v9738_v7 = vsel %vm9293_vm14, %v862_v8, %v866_v37  ;;  %v881_v40 = vor.u32 %v880_v1, %v876_v33  ;;  %v9741_v3 = vsel %vm379_vm4, %v331_v54, %v428_v10  ;;  %vm1425_vm9 = vcmask 1042432  }
  0x79   : > { %14085 = vst [vmem:[#allocation67_spill] sm:$0xff] %v9738_v7  ;;  %v871_v48 = vor.u32 %v870_v23, %v866_v37  ;;  %v891_v17 = vrot.slane %v889_v47, 4  ;;  %v894_v19 = vrot.slane %v892_v46, 5  ;;  %v9745_v51 = vpack.c.bf16 %v9731_v20, %v9731_v20 }
  0x7a   : > { %v900_v56 = vrot.slane %v898_v0, 5  ;;  %v904_v43 = vrot.slane %v902_v34, 4  ;;  %v427_v41 = vmul.f32 %v9234_v16, %v330_v27  ;;  %v9751_v8 = vcombine.low %v9728_v13, %v9738_v7 }
  0x7b   : > { %14086 = vst [vmem:[#allocation68_spill] sm:$0xff] %v9745_v51  ;;  %vm378_vm5 = vcmp.ge.f32.partialorder %v330_v27, 0.0  ;;  %v9756_v1 = vpack.c.bf16 %v9741_v3, %v9741_v3  ;;  %v872_v54 = vrot.slane %v871_v48, 4  ;;  %v882_v37 = vrot.slane %v881_v40, 4 }
  0x7c   : > { %14087 = vst [vmem:[#allocation69_spill] sm:$0xff] %v9751_v8  ;;  %v886_v47 = vrot.slane %v884_v35, 5  ;;  %v895_v34 = vor.u32 %v894_v19, %v891_v17  ;;  %v912_v0 = vshrl.u32 %v9745_v51, 16  ;;  %v430_v46 = vmul.f32 %v9234_v16, %v333_v61  ;;  %v334_v35 = vld [vmem:[%s9215_s15 + $0x138] sm:$0x3] }
  0x7d   : > { %14088 = vst [vmem:[#allocation70_spill] sm:$0xff] %v9756_v1  ;;  %v905_v10 = vor.u32 %v904_v43, %v900_v56  ;;  %v908_v7 = vshll.u32 %v9745_v51, 16  ;;  %v9761_v13 = vsel %vm378_vm5, %v330_v27, %v427_v41  ;;  %vm381_vm7 = vcmp.ge.f32.partialorder %v333_v61, 0.0 }
  0x7e   : > { %14089 = vst [vmem:[#allocation71_spill] sm:$0xff] %v9761_v13  ;;  %v923_v48 = vshrl.u32 %v9756_v1, 16  ;;  %v926_v40 = vshll.u32 %v9756_v1, 16  ;;  %v9772_v17 = vsel %vm9293_vm14, %v872_v54, %v876_v33  ;;  %v9776_v41 = vsel %vm9293_vm14, %v882_v37, %v886_v47 }
  0x7f   : > { %8156 = vmatmul.mubr.msk.bf16.gmra.mrb[36].mxu0 %vm1003_vm13, %v9707_v42  ;;  %v332_v42 = vld [vmem:[%s9215_s15 + $0x128] sm:$0xff]  ;;  %14090 = vst [vmem:[#allocation72_spill] sm:$0xff] %v9772_v17  ;;  %14091 = vst [vmem:[#allocation73_spill] sm:$0xff] %v9776_v41  ;;  %v896_v27 = vrot.slane %v895_v34, 4  ;;  %v914_v19 = vrot.slane %v912_v0, 4  ;;  %v9782_v43 = vsel %vm381_vm7, %v333_v61, %v430_v46  ;;  %v431_v51 = vmul.f32 %v9234_v16, %v334_v35 }
  0x80   : > { %8159 = vmatprep.mubr.msk.bf16.mxu0 %vm9119_vm2, %v14052_v9  ;;  %v429_v23 = vmul.f32 %v9234_v16, %v332_v42  ;;  %vm380_vm6 = vcmp.ge.f32.partialorder %v332_v42, 0.0  ;;  %v9789_v33 = vcombine.low %v9772_v17, %v9776_v41  ;;  %v925_v54 = vrot.slane %v923_v48, 4 }
  0x81   : > { %v928_v37 = vrot.slane %v926_v40, 5  ;;  %vm382_vm8 = vcmp.ge.f32.partialorder %v334_v35, 0.0  ;;  %v9793_v47 = vpack.c.bf16 %v9782_v43, %v9782_v43  ;;  %v9797_v61 = vsel %vm9293_vm14, %v896_v27, %v900_v56 }
  0x82   : > { %v477_v20 = vsel %vm380_vm6, %v332_v42, %v429_v23  ;;  %v9780_v42 = vpack.c.bf16 %v9761_v13, %v9761_v13  ;;  %v906_v23 = vrot.slane %v905_v10, 4  ;;  %14094 = vst [vmem:[#allocation76_spill] sm:$0xff] %v9789_v33  ;;  %v479_v10 = vsel %vm382_vm8, %v334_v35, %v431_v51 }
  0x83   : > { %v9784_v1 = vpack.c.bf16 %v477_v20, %v477_v20  ;;  %14095 = vst [vmem:[#allocation77_spill] sm:$0xff] %v9793_v47  ;;  %v9807_v48 = vpack.c.bf16 %v9514_v4, %v9501_v12  ;;  %v929_v40 = vor.u32 %v928_v37, %v925_v54  ;;  %v499_v27 = vpack.c.bf16 %v9555_v38, %v9552_v52 }
  0x84   : > { %14092 = vst [vmem:[#allocation74_spill] sm:$0xff] %v9780_v42  ;;  %v918_v34 = vshll.u32 %v9780_v42, 16  ;;  %v942_v51 = vshll.u32 %v9793_v47, 16  ;;  %v946_v4 = vshrl.u32 %v9793_v47, 16  ;;  %vm1426_vm10 = vcmask 1046532  }
  0x85   : > { %14093 = vst [vmem:[#allocation75_spill] sm:$0xff] %v9784_v1  ;;  %v932_v46 = vshll.u32 %v9784_v1, 16  ;;  %v936_v56 = vshrl.u32 %v9784_v1, 16  ;;  %v548_v35 = vunpack.c.h.b16 %v9807_v48  ;;  %v930_v42 = vrot.slane %v929_v40, 4  ;;  %vm9883_vm11 = vmor %vm1425_vm9, %vm1426_vm10 }
  0x86   : > { %v920_v37 = vrot.slane %v918_v34, 5  ;;  %v944_v16 = vrot.slane %v942_v51, 5  ;;  %v948_v13 = vrot.slane %v946_v4, 4 }
  0x87   : > { %8160 = vmatmul.mubr.msk.bf16.gmra.mrb[40].mxu0 %vm1003_vm13, %v9751_v8  ;;  %v910_v8 = vrot.slane %v908_v7, 5  ;;  %v934_v17 = vrot.slane %v932_v46, 5  ;;  %v938_v1 = vrot.slane %v936_v56, 4  ;;  %v507_v56 = vpack.c.bf16 %v479_v10, %v9782_v43 }
  0x88   : > { %8163 = vmatprep.mubr.msk.bf16.mxu0 %vm9119_vm2, %v14052_v9  ;;  %v949_v46 = vor.u32 %v948_v13, %v944_v16  ;;  %v1430_v13 = vrot.slane %v9258_v29, 5  ;;  %v7499_v29 = vrot.slane %v9254_v28, 9 }
  0x89   : > { %v915_v7 = vor.u32 %v914_v19, %v910_v8  ;;  %v9802_v0 = vsel %vm9293_vm14, %v906_v23, %v910_v8  ;;  %v9816_v8 = vpack.c.bf16 %v9650_v60, %v9625_v63  ;;  %v503_v19 = vpack.c.bf16 %v9696_v57, %v9659_v62 }
  0x8a   : > { %14096 = vst [vmem:[#allocation78_spill] sm:$0xff] %v9802_v0  ;;  %v549_v23 = vunpack.c.l.b16 %v499_v27  ;;  %v9828_v38 = vcombine.low %v9797_v61, %v9802_v0  ;;  %v939_v34 = vor.u32 %v938_v1, %v934_v17 }
  0x8b   : > { %v554_v54 = vunpack.c.h.b16 %v9816_v8  ;;  %v916_v60 = vrot.slane %v915_v7, 4  ;;  %v555_v41 = vunpack.c.l.b16 %v503_v19  ;;  %v9846_v7 = vsel %vm9293_vm14, %v930_v42, %v934_v17 }
  0x8c   : > { %v9832_v47 = vpack.c.b16 %v549_v23, %v548_v35  ;;  %14100 = vst [vmem:[#allocation82_spill] sm:$0xff] %v9846_v7  ;;  %v561_v35 = vunpack.c.l.b16 %v507_v56  ;;  %v940_v19 = vrot.slane %v939_v34, 4  ;;  %v950_v23 = vrot.slane %v949_v46, 4 }
  0x8d   : > { %v9834_v57 = vpack.c.b16 %v555_v41, %v554_v54  ;;  %v9840_v27 = vsel %vm9293_vm14, %v916_v60, %v920_v37  ;;  %v9850_v41 = vpack.c.bf16 %v477_v20, %v9741_v3  ;;  %v1433_v20 = vrot.slane %v9262_v30, 5  ;;  %v7540_v37 = vld [vmem:[%s13712_s2 + $0x6] sm:$0x3] }
  0x8e   : > { %14097 = vst [vmem:[#allocation79_spill] sm:$0xff] %v9832_v47  ;;  %14099 = vst [vmem:[#allocation81_spill] sm:$0xff] %v9840_v27  ;;  %v9855_v51 = vcombine.low %v9840_v27, %v9846_v7  ;;  %v9868_v1 = vsel %vm9293_vm14, %v940_v19, %v944_v16  ;;  %v14105_v16 = vmov 0  ;;  %v1874_v34 = vand.u32 %v7540_v37, %v9206_v5 }
  0x8f   : > { %8164 = vmatmul.mubr.msk.bf16.gmra.mrb[44].mxu0 %vm1003_vm13, %v9789_v33  ;;  %v9830_v33 = vpack.c.bf16 %v479_v10, %v479_v10  ;;  %14098 = vst [vmem:[#allocation80_spill] sm:$0xff] %v9834_v57  ;;  %v560_v4 = vunpack.c.h.b16 %v9850_v41  ;;  %14102 = vst [vmem:[#allocation84_spill] sm:$0xff] %v9868_v1  ;;  %v1432_v10 = vrot.slane %v1430_v13, 4  ;;  %v14106_v16 = vsel %vm9883_vm11, 4294967295, %v14105_v16 }
  0x90   : > { %8167 = vmatprep.mubr.msk.bf16.mxu0 %vm9119_vm2, %v14052_v9  ;;  %14107 = vst [vmem:[#allocation87_spill] sm:$0xff] %v14106_v16  ;;  %v9890_v46 = vsel %vm9883_vm11, %v7499_v29, %v1430_v13  ;;  %8304 = vmatpush3.bf16.msra.mxu1 %v1874_v34  ;;  %v490_v56 = vpack.c.bf16 %v9267_v32, %v9265_v31 }
  0x91   : > { %v952_v40 = vshll.u32 %v9830_v33, 16  ;;  %v9858_v54 = vpack.c.b16 %v561_v35, %v560_v4  ;;  %v9896_v28 = vsel %vm9883_vm11, %v1432_v10, %v1433_v20  ;;  %8427 = vmatprep.subr.bf16.mxu1 %v14052_v9  ;;  %v7509_v4 = vld [vmem:[%s13712_s2 + $0x4] sm:$0x3]  ;;  %v488_v35 = vpack.c.bf16 %v9247_v25, %v9244_v24 }
  0x92   : > { %v1621_v19 = vand.u32 %v7509_v4, %v9206_v5  ;;  %v7860_v32 = vpack.c.bf16 %v9347_v49, %v9298_v59  ;;  %v7855_v24 = vpack.c.bf16 %v9265_v31, %v9250_v26  ;;  %v491_v25 = vpack.c.bf16 %v9301_v2, %v9298_v59 }
  0x93   : > { %v954_v42 = vrot.slane %v952_v40, 5  ;;  %14101 = vst [vmem:[#allocation83_spill] sm:$0xff] %v9858_v54  ;;  %v7510_v40 = vcombine.low %v9890_v46, %v9896_v28  ;;  %8306 = vmatmul.mubr.msk.bf16.vlgmr.msra.gmra.mrb[0].mxu1 %vm1003_vm13, %v490_v56  ;;  %v536_v10 = vunpack.c.h.b16 %v490_v56  ;;  %v494_v31 = vpack.c.bf16 %v9394_v21, %v9388_v15 }
  0x94   : > { %8309 = vmatprep.mubr.msk.bf16.mxu1 %vm9119_vm2, %v14052_v9  ;;  %v537_v37 = vunpack.c.l.b16 %v491_v25  ;;  %v7861_v59 = vpack.c.bf16 %v9462_v6, %v9429_v11  ;;  %v9961_v2 = vpack.c.bf16 %v9388_v15, %v9355_v53 }
  0x95   : > { %v9872_v17 = vsel %vm9293_vm14, %v950_v23, %v954_v42  ;;  %v9931_v23 = vpack.c.bf16 %v9350_v50, %v9347_v49  ;;  %v493_v42 = vpack.c.bf16 %v9385_v14, %v9355_v53  ;;  %v495_v49 = vpack.c.bf16 %v9437_v36, %v9429_v11 }
  0x96   : > { %14103 = vst [vmem:[#allocation85_spill] sm:$0xff] %v9872_v17  ;;  %v9877_v60 = vcombine.low %v9868_v1, %v9872_v17  ;;  %v1211_v26 = vpack.c.b16 %v537_v37, %v536_v10  ;;  %14109 = vst [vmem:[#allocation89_spill] sm:$0xff] %v9961_v2  ;;  %v9967_v50 = vpack.c.bf16 %v9471_v22, %v9462_v6  ;;  %v542_v4 = vunpack.c.h.b16 %v494_v31  ;;  %v14114_v6 = vld [vmem:[#allocation52_spill] sm:$0xff]  ;;  %v14121_v37 = vld [vmem:[#allocation6_spill] sm:$0xff] }
  0x97   : > { %8168 = vmatmul.mubr.msk.bf16.gmra.mrb[48].mxu0 %vm1003_vm13, %v9828_v38  ;;  %14108 = vst [vmem:[#allocation88_spill] sm:$0xff] %v9931_v23  ;;  %v539_v13 = vunpack.c.h.b16 %v9931_v23  ;;  %v540_v29 = vunpack.c.l.b16 %v493_v42  ;;  %v497_v14 = vpack.c.bf16 %v9499_v39, %v9480_v45  ;;  %v7862_v39 = vpack.c.bf16 %v9575_v44, %v9552_v52 }
  0x98   : > { %8171 = vmatprep.mubr.msk.bf16.mxu0 %vm9119_vm2, %v14052_v9  ;;  %14104 = vst [vmem:[#allocation86_spill] sm:$0xff] %v9877_v60  ;;  %14110 = vst [vmem:[#allocation90_spill] sm:$0xff] %v9967_v50  ;;  %v545_v21 = vunpack.c.h.b16 %v9967_v50  ;;  %v10000_v11 = vpack.c.bf16 %v9501_v12, %v9480_v45  ;;  %v10004_v36 = vpack.c.bf16 %v9582_v58, %v9575_v44  ;;  %v14115_v45 = vld [vmem:[#allocation58_spill] sm:$0xff]  ;;  %v14117_v44 = vld [vmem:[#allocation60_spill] sm:$0xff] }
  0x99   : > { %v1815_v34 = vpack.c.b16 %v540_v29, %v539_v13  ;;  %v546_v56 = vunpack.c.l.b16 %v497_v14  ;;  %v501_v22 = vpack.c.bf16 %v14114_v6, %v9593_v18  ;;  %v7863_v12 = vpack.c.bf16 %v14115_v45, %v9659_v62  ;;  %v335_v29 = vld [vmem:[%s9215_s15 + $0x140] sm:$0xff]  ;;  %v338_v14 = vld [vmem:[%s9215_s15 + $0x158] sm:$0x3] }
  0x9a   : > { %14112 = vst [vmem:[#allocation92_spill] sm:$0xff] %v10000_v11  ;;  %14113 = vst [vmem:[#allocation93_spill] sm:$0xff] %v10004_v36  ;;  %v551_v52 = vunpack.c.h.b16 %v10004_v36  ;;  %v10035_v58 = vpack.c.bf16 %v9625_v63, %v9593_v18  ;;  %vm383_vm12 = vcmp.ge.f32.partialorder %v335_v29, 0.0  ;;  %vm386_vm3 = vcmp.ge.f32.partialorder %v338_v14, 0.0 }
  0x9b   : > { %8310 = vmatmul.mubr.msk.bf16.gmra.mrb[4].mxu1 %vm1003_vm13, %v7860_v32  ;;  %v1818_v53 = vpack.c.b16 %v546_v56, %v545_v21  ;;  %v14119_v32 = vld [vmem:[#allocation66_spill] sm:$0xff] }
  0x9c   : > { %8313 = vmatprep.mubr.msk.bf16.mxu1 %vm9119_vm2, %v14052_v9  ;;  %14116 = vst [vmem:[#allocation52_spill] sm:$0xff] %v10035_v58 }
  0x9f   : > { %8172 = vmatmul.mubr.msk.bf16.gmra.mrb[52].mxu0 %vm1003_vm13, %v9855_v51 }
  0xa0   : > { %8175 = vmatprep.mubr.msk.bf16.mxu0 %vm9119_vm2, %v14052_v9 }
  0xa3   : > { %8314 = vmatmul.mubr.msk.bf16.gmra.mrb[8].mxu1 %vm1003_vm13, %v1815_v34  ;;  %v432_v34 = vmul.f32 %v14121_v37, %v335_v29 }
  0xa4   : > { %8317 = vmatprep.mubr.msk.bf16.mxu1 %vm9119_vm2, %v14052_v9 }
  0xa7   : > { %8176 = vmatmul.mubr.msk.bf16.gmra.mrb[56].mxu0 %vm1003_vm13, %v9877_v60  ;;  %v14172_v60 = vld [vmem:[#allocation77_spill] sm:$0xff] }
  0xa8   : > { %8181 = vmatprep.mubr.msk.bf16.mxu0 %vm9119_vm2, %v14052_v9 }
  0xab   : > { %8318 = vmatmul.mubr.msk.bf16.gmra.mrb[12].mxu1 %vm1003_vm13, %v494_v31  ;;  %v10065_v31 = vsel %vm383_vm12, %v335_v29, %v432_v34  ;;  %v14127_v29 = vld [vmem:[#allocation8_spill] sm:$0xff] }
  0xac   : > { %8321 = vmatprep.mubr.msk.bf16.mxu1 %vm9119_vm2, %v14052_v9  ;;  %v7500_v34 = vrot.slane %v14127_v29, 9 }
  0xaf   : > { %8182 = vmatmul.mubr.msk.bf16.vlgmr.msra.gmra.mrb[60].mxu0 %vm1003_vm13, %v488_v35  ;;  %v543_v35 = vunpack.c.l.b16 %v495_v49  ;;  %v337_v49 = vld [vmem:[%s9215_s15 + $0x150] sm:$0xff] }
  0xb0   : > { %8242 = vmatpush3.bf16.msra.mxu0 %v1621_v19  ;;  %8185 = vmatprep.mubr.msk.bf16.mxu0 %vm9119_vm2, %v14052_v9  ;;  %v434_v56 = vmul.f32 %v14121_v37, %v337_v49  ;;  %vm385_vm1 = vcmp.ge.f32.partialorder %v337_v49, 0.0 }
  0xb1   : > { %8365 = vmatprep.subr.bf16.mxu0 %v14052_v9  ;;  %v9979_v15 = vpack.c.b16 %v543_v35, %v542_v4  ;;  %v435_v4 = vmul.f32 %v14121_v37, %v338_v14 }
  0xb2   : > { %v10090_v6 = vsel %vm385_vm1, %v337_v49, %v434_v56  ;;  %v14128_v56 = vld [vmem:[#allocation10_spill] sm:$0xff] }
  0xb3   : > { %8322 = vmatmul.mubr.msk.bf16.gmra.mrb[16].mxu1 %vm1003_vm13, %v7861_v59  ;;  %14111 = vst [vmem:[#allocation91_spill] sm:$0xff] %v9979_v15  ;;  %v336_v59 = vld [vmem:[%s9215_s15 + $0x148] sm:$0xff]  ;;  %14123 = vst [vmem:[#allocation66_spill] sm:$0xff] %v10090_v6 }
  0xb4   : > { %8325 = vmatprep.mubr.msk.bf16.mxu1 %vm9119_vm2, %v14052_v9  ;;  %v433_v21 = vmul.f32 %v14121_v37, %v336_v59  ;;  %vm384_vm15 = vcmp.ge.f32.partialorder %v336_v59, 0.0 }
  0xb7   : > { %8186 = vmatmul.mubr.msk.bf16.gmra.mrb[64].mxu0 %vm1003_vm13, %v7855_v24  ;;  %v14120_v24 = vld [vmem:[#allocation71_spill] sm:$0xff] }
  0xb8   : > { %8189 = vmatprep.mubr.msk.bf16.mxu0 %vm9119_vm2, %v14052_v9  ;;  %v505_v62 = vpack.c.bf16 %v14120_v24, %v14119_v32  ;;  %v14125_v24 = vld [vmem:[#allocation9_spill] sm:$0xff] }
  0xba   : > { %v558_v42 = vunpack.c.l.b16 %v505_v62  ;;  %v1440_v62 = vrot.slane %v14125_v24, 5  ;;  %v14129_v24 = vld [vmem:[#allocation11_spill] sm:$0xff] }
  0xbb   : > { %8326 = vmatmul.mubr.msk.bf16.gmra.mrb[20].mxu1 %vm1003_vm13, %v1818_v53 }
  0xbc   : > { %8329 = vmatprep.mubr.msk.bf16.mxu1 %vm9119_vm2, %v14052_v9 }
  0xbf   : > { %8190 = vmatmul.mubr.msk.bf16.gmra.mrb[68].mxu0 %vm1003_vm13, %v1211_v26 }
  0xc0   : > { %8193 = vmatprep.mubr.msk.bf16.mxu0 %vm9119_vm2, %v14052_v9 }
  0xc3   : > { %8330 = vmatmul.mubr.msk.bf16.gmra.mrb[24].mxu1 %vm1003_vm13, %v9807_v48  ;;  %v552_v48 = vunpack.c.l.b16 %v501_v22  ;;  %v10092_v22 = vsel %vm386_vm3, %v338_v14, %v435_v4  ;;  %v1443_v4 = vrot.slane %v14128_v56, 5  ;;  %v14132_v56 = vld [vmem:[#allocation15_spill] sm:$0xff] }
  0xc4   : > { %8333 = vmatprep.mubr.msk.bf16.mxu1 %vm9119_vm2, %v14052_v9  ;;  %v7868_v0 = vpack.c.bf16 %v10092_v22, %v10092_v22 }
  0xc5   : > { %v1821_v19 = vpack.c.b16 %v552_v48, %v551_v52 }
  0xc7   : > { %8194 = vmatmul.mubr.msk.bf16.gmra.mrb[72].mxu0 %vm1003_vm13, %v9931_v23 }
  0xc8   : > { %8197 = vmatprep.mubr.msk.bf16.mxu0 %vm9119_vm2, %v14052_v9 }
  0xcb   : > { %8334 = vmatmul.mubr.msk.bf16.gmra.mrb[28].mxu1 %vm1003_vm13, %v7862_v39  ;;  %v10088_v39 = vpack.c.bf16 %v9741_v3, %v14119_v32  ;;  %v339_v3 = vld [vmem:[%s9215_s15 + $0x160] sm:$0xff] }
  0xcc   : > { %8337 = vmatprep.mubr.msk.bf16.mxu1 %vm9119_vm2, %v14052_v9  ;;  %vm387_vm4 = vcmp.ge.f32.partialorder %v339_v3, 0.0  ;;  %v436_v32 = vmul.f32 %v14121_v37, %v339_v3 }
  0xcd   : > { %14122 = vst [vmem:[#allocation60_spill] sm:$0xff] %v10088_v39 }
  0xcf   : > { %8198 = vmatmul.mubr.msk.bf16.gmra.mrb[76].mxu0 %vm1003_vm13, %v9961_v2 }
  0xd0   : > { %8201 = vmatprep.mubr.msk.bf16.mxu0 %vm9119_vm2, %v14052_v9 }
  0xd3   : > { %8338 = vmatmul.mubr.msk.bf16.gmra.mrb[32].mxu1 %vm1003_vm13, %v1821_v19  ;;  %v509_v19 = vpack.c.bf16 %v10092_v22, %v10090_v6 }
  0xd4   : > { %8341 = vmatprep.mubr.msk.bf16.mxu1 %vm9119_vm2, %v14052_v9 }
  0xd7   : > { %8202 = vmatmul.mubr.msk.bf16.gmra.mrb[80].mxu0 %vm1003_vm13, %v9979_v15  ;;  %v14162_v15 = vld [vmem:[#allocation61_spill] sm:$0xff] }
  0xd8   : > { %8205 = vmatprep.mubr.msk.bf16.mxu0 %vm9119_vm2, %v14052_v9 }
  0xdb   : > { %8342 = vmatmul.mubr.msk.bf16.gmra.mrb[36].mxu1 %vm1003_vm13, %v9816_v8  ;;  %v10039_v8 = vpack.c.bf16 %v14117_v44, %v14115_v45  ;;  %v1810_v44 = vunpack.c.l.b16 %v509_v19 }
  0xdc   : > { %8345 = vmatprep.mubr.msk.bf16.mxu1 %vm9119_vm2, %v14052_v9 }
  0xdd   : > { %14118 = vst [vmem:[#allocation58_spill] sm:$0xff] %v10039_v8  ;;  %v557_v25 = vunpack.c.h.b16 %v10039_v8 }
  0xdf   : > { %8206 = vmatmul.mubr.msk.bf16.gmra.mrb[84].mxu0 %vm1003_vm13, %v9967_v50  ;;  %v1824_v13 = vpack.c.b16 %v558_v42, %v557_v25  ;;  %v10112_v42 = vsel %vm387_vm4, %v339_v3, %v436_v32  ;;  %v1445_v32 = vrot.slane %v1443_v4, 4 }
  0xe0   : > { %8209 = vmatprep.mubr.msk.bf16.mxu0 %vm9119_vm2, %v14052_v9  ;;  %14126 = vst [vmem:[#allocation6_spill] sm:$0xff] %v10112_v42 }
  0xe3   : > { %8346 = vmatmul.mubr.msk.bf16.gmra.mrb[40].mxu1 %vm1003_vm13, %v7863_v12 }
  0xe4   : > { %8349 = vmatprep.mubr.msk.bf16.mxu1 %vm9119_vm2, %v14052_v9 }
  0xe7   : > { %8210 = vmatmul.mubr.msk.bf16.gmra.mrb[88].mxu0 %vm1003_vm13, %v10000_v11 }
  0xe8   : > { %8213 = vmatprep.mubr.msk.bf16.mxu0 %vm9119_vm2, %v14052_v9 }
  0xeb   : > { %8350 = vmatmul.mubr.msk.bf16.gmra.mrb[44].mxu1 %vm1003_vm13, %v1824_v13 }
  0xec   : > { %8353 = vmatprep.mubr.msk.bf16.mxu1 %vm9119_vm2, %v14052_v9 }
  0xef   : > { %8214 = vmatmul.mubr.msk.bf16.gmra.mrb[92].mxu0 %vm1003_vm13, %v9832_v47 }
  0xf0   : > { %8217 = vmatprep.mubr.msk.bf16.mxu0 %vm9119_vm2, %v14052_v9 }
  0xf3   : > { %8354 = vmatmul.mubr.msk.bf16.gmra.mrb[48].mxu1 %vm1003_vm13, %v9850_v41  ;;  %v7864_v41 = vpack.c.bf16 %v10065_v31, %v9782_v43  ;;  %v10084_v43 = vsel %vm384_vm15, %v336_v59, %v433_v21  ;;  %v7597_v59 = vld [vmem:[%s13712_s2 + $0xa] sm:$0x3] }
  0xf4   : > { %8357 = vmatprep.mubr.msk.bf16.mxu1 %vm9119_vm2, %v14052_v9  ;;  %v10096_v52 = vpack.c.bf16 %v10084_v43, %v10065_v31  ;;  %v2425_v14 = vand.u32 %v7597_v59, %v9206_v5  ;;  %v14131_v59 = vld [vmem:[#allocation7_spill] sm:$0xff] }
  0xf6   : > { %14124 = vst [vmem:[#allocation71_spill] sm:$0xff] %v10096_v52  ;;  %v1809_v12 = vunpack.c.h.b16 %v10096_v52  ;;  %8428 = vmatpush3.bf16.msra.mxu1 %v2425_v14  ;;  %v1436_v14 = vrot.slane %v14131_v59, 5  ;;  %v14135_v59 = vld [vmem:[#allocation20_spill] sm:$0xff] }
  0xf7   : > { %8218 = vmatmul.mubr.msk.bf16.gmra.mrb[96].mxu0 %vm1003_vm13, %v10004_v36  ;;  %8551 = vmatprep.subr.bf16.mxu1 %v14052_v9 }
  0xf8   : > { %8221 = vmatprep.mubr.msk.bf16.mxu0 %vm9119_vm2, %v14052_v9  ;;  %v1827_v13 = vpack.c.b16 %v1810_v44, %v1809_v12  ;;  %v7565_v12 = vld [vmem:[%s13712_s2 + $0x8] sm:$0x3] }
  0xfb   : > { %8358 = vmatmul.mubr.msk.bf16.gmra.mrb[52].mxu1 %vm1003_vm13, %v7864_v41  ;;  %v1450_v41 = vrot.slane %v14132_v56, 5 }
  0xfc   : > { %8361 = vmatprep.mubr.msk.bf16.mxu1 %vm9119_vm2, %v14052_v9 }
  0xff   : > { %8222 = vmatmul.mubr.msk.bf16.gmra.mrb[100].mxu0 %vm1003_vm13, %v10035_v58 }
 0x100   : > { %8225 = vmatprep.mubr.msk.bf16.mxu0 %vm9119_vm2, %v14052_v9 }
 0x103   : > { %8362 = vmatmul.mubr.msk.bf16.gmra.mrb[56].mxu1 %vm1003_vm13, %v1827_v13  ;;  %v1446_v13 = vrot.slane %v14129_v24, 5 }
 0x104   : > { %8429 = vmatprep.mubr.msk.bf16.mxu1 %vm9119_vm2, %v14052_v9 }
 0x107   : > { %8226 = vmatmul.mubr.msk.bf16.gmra.mrb[104].mxu0 %vm1003_vm13, %v9834_v57  ;;  %v14151_v57 = vld [vmem:[#allocation43_spill] sm:$0xff] }
 0x108   : > { %8229 = vmatprep.mubr.msk.bf16.mxu0 %vm9119_vm2, %v14052_v9 }
 0x10a   : > { %v10057_v18 = vpop.f32.mrb[0].mxu0 }
 0x10b   : > { %v8121_v63 = vpop.f32.mrb[1].mxu0 }
 0x10c   : > { %v10062_v10 = vpop.f32.mrb[2].mxu0 }
 0x10d   : > { %v8122_v26 = vpop.f32.mrb[3].mxu0 }
 0x10e   : > { %v1442_v26 = vrot.slane %v1440_v62, 4 }
 0x10f   : > { %8230 = vmatmul.mubr.msk.bf16.gmra.mrb[108].mxu0 %vm1003_vm13, %v10039_v8 }
 0x110   : > { %8233 = vmatprep.mubr.msk.bf16.mxu0 %vm9119_vm2, %v14052_v9  ;;  %v1444_v19 = vsel %vm9883_vm11, %v1442_v26, %v1443_v4  ;;  %v1435_v26 = vrot.slane %v1433_v20, 4  ;;  %v1447_v4 = vsel %vm9883_vm11, %v1445_v32, %v1446_v13  ;;  %v1452_v32 = vrot.slane %v1450_v41, 4  ;;  %v14134_v13 = vld [vmem:[#allocation18_spill] sm:$0xff] }
 0x112   : > { %v10080_v35 = vpop.f32.mrb[4].mxu0  ;;  %v1437_v20 = vsel %vm9883_vm11, %v1435_v26, %v1436_v14  ;;  %v1460_v14 = vrot.slane %v14135_v59, 5 }
 0x113   : > { %v8125_v53 = vpop.f32.mrb[5].mxu0 }
 0x114   : > { %v10098_v48 = vpop.f32.mrb[6].mxu0  ;;  %v1441_v53 = vsel %vm9883_vm11, %v7500_v34, %v1440_v62  ;;  %v14130_v62 = vld [vmem:[#allocation14_spill] sm:$0xff]  ;;  %v2164_v34 = vand.u32 %v7565_v12, %v9206_v5  ;;  %v14133_v12 = vld [vmem:[#allocation16_spill] sm:$0xff] }
 0x115   : > { %v8126_v45 = vpop.f32.mrb[7].mxu0 }
 0x116   : > { %v7598_v45 = vcombine.low %v1441_v53, %v1444_v19 }
 0x117   : > { %8234 = vmatmul.mubr.msk.bf16.gmra.mrb[112].mxu0 %vm1003_vm13, %v10088_v39 }
 0x118   : > { %8237 = vmatprep.mubr.msk.bf16.mxu0 %vm9119_vm2, %v14052_v9  ;;  %8430 = vmatmul.mubr.msk.bf16.vlgmr.msra.gmra.mrb[60].mxu1 %vm1003_vm13, %v7598_v45 }
 0x119   : > { %8433 = vmatprep.mubr.msk.bf16.mxu1 %vm9119_vm2, %v14052_v9 }
 0x11a   : > { %v10110_v25 = vpop.f32.mrb[8].mxu0 }
 0x11b   : > { %v8129_v63 = vpop.f32.mrb[9].mxu0 }
 0x11c   : > { %v10120_v49 = vpop.f32.mrb[10].mxu0  ;;  %v7501_v63 = vrot.slane %v14130_v62, 9  ;;  %v1456_v62 = vrot.slane %v14134_v13, 5 }
 0x11d   : > { %v8130_v21 = vpop.f32.mrb[11].mxu0 }
 0x11e   : > { %v1451_v30 = vsel %vm9883_vm11, %v7501_v63, %v1450_v41 }
 0x11f   : > { %8238 = vmatmul.mubr.msk.bf16.gmra.mrb[116].mxu0 %vm1003_vm13, %v9858_v54  ;;  %v7599_v45 = vcombine.low %v1447_v4, %v1451_v30 }
 0x120   : > { %8243 = vmatprep.mubr.msk.bf16.mxu0 %vm9119_vm2, %v14052_v9 }
 0x121   : > { %8434 = vmatmul.mubr.msk.bf16.gmra.mrb[64].mxu1 %vm1003_vm13, %v7599_v45  ;;  %v14136_v45 = vld [vmem:[#allocation19_spill] sm:$0xff] }
 0x122   : > { %v10139_v44 = vpop.f32.mrb[12].mxu0  ;;  %8437 = vmatprep.mubr.msk.bf16.mxu1 %vm9119_vm2, %v14052_v9 }
 0x123   : > { %v8133_v3 = vpop.f32.mrb[13].mxu0 }
 0x124   : > { %v10143_v29 = vpop.f32.mrb[14].mxu0  ;;  %v1453_v3 = vrot.slane %v14133_v12, 5  ;;  %v7502_v12 = vrot.slane %v14136_v45, 9 }
 0x125   : > { %v8134_v21 = vpop.f32.mrb[15].mxu0 }
 0x126   : > { %v1455_v24 = vrot.slane %v1453_v3, 4  ;;  %v1454_v26 = vsel %vm9883_vm11, %v1452_v32, %v1453_v3  ;;  %v14137_v32 = vld [vmem:[#allocation24_spill] sm:$0xff]  ;;  %v1461_v13 = vsel %vm9883_vm11, %v7502_v12, %v1460_v14  ;;  %v14141_v12 = vld [vmem:[#allocation30_spill] sm:$0xff] }
 0x127   : > { %8244 = vmatmul.mubr.msk.bf16.vlgmr.msra.gmra.mrb[120].mxu0 %vm1003_vm13, %v7510_v40  ;;  %v7511_v40 = vcombine.low %v1437_v20, %v1441_v53  ;;  %v7512_v20 = vcombine.low %v1444_v19, %v1447_v4 }
 0x128   : > { %8366 = vmatpush3.bf16.msra.mxu0 %v2164_v34  ;;  %8247 = vmatprep.mubr.msk.bf16.mxu0 %vm9119_vm2, %v14052_v9  ;;  %v1457_v53 = vsel %vm9883_vm11, %v1455_v24, %v1456_v62  ;;  %v1463_v24 = vrot.slane %v14137_v32, 5 }
 0x129   : > { %8489 = vmatprep.subr.bf16.mxu0 %v14052_v9  ;;  %v7600_v41 = vcombine.low %v1454_v26, %v1457_v53 }
 0x12a   : > { %v10167_v46 = vpop.f32.mrb[16].mxu0  ;;  %v1465_v59 = vrot.slane %v1463_v24, 4 }
 0x12b   : > { %v8137_v28 = vpop.f32.mrb[17].mxu0  ;;  %8438 = vmatmul.mubr.msk.bf16.gmra.mrb[68].mxu1 %vm1003_vm13, %v7600_v41  ;;  %v10201_v41 = vcombine.low %v1451_v30, %v1454_v26 }
 0x12c   : > { %v10170_v63 = vpop.f32.mrb[18].mxu0  ;;  %v1462_v28 = vrot.slane %v1460_v14, 4  ;;  %8441 = vmatprep.mubr.msk.bf16.mxu1 %vm9119_vm2, %v14052_v9 }
 0x12d   : > { %v8138_v34 = vpop.f32.mrb[19].mxu0  ;;  %14138 = vst [vmem:[#allocation9_spill] sm:$0xff] %v10201_v41 }
 0x12e   : > { %v1464_v19 = vsel %vm9883_vm11, %v1462_v28, %v1463_v24  ;;  %v1470_v28 = vrot.slane %v14141_v12, 5 }
 0x12f   : > { %8248 = vmatmul.mubr.msk.bf16.gmra.mrb[124].mxu0 %vm1003_vm13, %v7511_v40  ;;  %v7601_v4 = vcombine.low %v1461_v13, %v1464_v19 }
 0x130   : > { %8251 = vmatprep.mubr.msk.bf16.mxu0 %vm9119_vm2, %v14052_v9  ;;  %v1472_v12 = vrot.slane %v1470_v28, 4 }
 0x132   : > { %v10183_v21 = vpop.f32.mrb[20].mxu0 }
 0x133   : > { %v8141_v56 = vpop.f32.mrb[21].mxu0  ;;  %8442 = vmatmul.mubr.msk.bf16.gmra.mrb[72].mxu1 %vm1003_vm13, %v7601_v4  ;;  %v14142_v4 = vld [vmem:[#allocation31_spill] sm:$0xff] }
 0x134   : > { %v10186_v40 = vpop.f32.mrb[22].mxu0  ;;  %v14139_v56 = vld [vmem:[#allocation25_spill] sm:$0xff]  ;;  %8445 = vmatprep.mubr.msk.bf16.mxu1 %vm9119_vm2, %v14052_v9 }
 0x135   : > { %v8142_v3 = vpop.f32.mrb[23].mxu0  ;;  %v1466_v45 = vrot.slane %v14139_v56, 5 }
 0x136   : > { %v14140_v3 = vld [vmem:[#allocation29_spill] sm:$0xff] }
 0x137   : > { %8252 = vmatmul.mubr.msk.bf16.gmra.mrb[128].mxu0 %vm1003_vm13, %v7512_v20  ;;  %v7503_v20 = vrot.slane %v14140_v3, 9  ;;  %v1467_v30 = vsel %vm9883_vm11, %v1465_v59, %v1466_v45 }
 0x138   : > { %8255 = vmatprep.mubr.msk.bf16.mxu0 %vm9119_vm2, %v14052_v9 }
 0x139   : > { %v1471_v26 = vsel %vm9883_vm11, %v7503_v20, %v1470_v28 }
 0x13a   : > { %v10199_v62 = vpop.f32.mrb[24].mxu0  ;;  %v7602_v24 = vcombine.low %v1467_v30, %v1471_v26 }
 0x13b   : > { %v8145_v34 = vpop.f32.mrb[25].mxu0 }
 0x13c   : > { %v10205_v32 = vpop.f32.mrb[26].mxu0  ;;  %v1473_v34 = vrot.slane %v14142_v4, 5  ;;  %8446 = vmatmul.mubr.msk.bf16.gmra.mrb[76].mxu1 %vm1003_vm13, %v7602_v24  ;;  %v10241_v4 = vcombine.low %v1464_v19, %v1467_v30 }
 0x13d   : > { %v8146_v14 = vpop.f32.mrb[27].mxu0  ;;  %8449 = vmatprep.mubr.msk.bf16.mxu1 %vm9119_vm2, %v14052_v9 }
 0x13e   : > { %v10222_v14 = vcombine.low %v1457_v53, %v1461_v13  ;;  %v1475_v52 = vrot.slane %v1473_v34, 4  ;;  %v1474_v45 = vsel %vm9883_vm11, %v1472_v12, %v1473_v34  ;;  %14146 = vst [vmem:[#allocation10_spill] sm:$0xff] %v10241_v4 }
 0x13f   : > { %8256 = vmatmul.mubr.msk.bf16.gmra.mrb[132].mxu0 %vm1003_vm13, %v10201_v41  ;;  %v14144_v41 = vld [vmem:[#allocation35_spill] sm:$0xff] }
 0x140   : > { %8259 = vmatprep.mubr.msk.bf16.mxu0 %vm9119_vm2, %v14052_v9  ;;  %14143 = vst [vmem:[#allocation8_spill] sm:$0xff] %v10222_v14  ;;  %v1476_v54 = vrot.slane %v14144_v41, 5  ;;  %v14145_v41 = vld [vmem:[#allocation37_spill] sm:$0xff] }
 0x141   : > { %v1480_v20 = vrot.slane %v14145_v41, 5 }
 0x142   : > { %v10220_v56 = vpop.f32.mrb[28].mxu0  ;;  %v1477_v53 = vsel %vm9883_vm11, %v1475_v52, %v1476_v54  ;;  %v14148_v54 = vld [vmem:[#allocation40_spill] sm:$0xff] }
 0x143   : > { %v8149_v3 = vpop.f32.mrb[29].mxu0  ;;  %v7603_v13 = vcombine.low %v1474_v45, %v1477_v53  ;;  %v1483_v52 = vrot.slane %v14148_v54, 5 }
 0x144   : > { %v10225_v39 = vpop.f32.mrb[30].mxu0  ;;  %v14147_v3 = vld [vmem:[#allocation34_spill] sm:$0xff] }
 0x145   : > { %v8150_v59 = vpop.f32.mrb[31].mxu0  ;;  %8450 = vmatmul.mubr.msk.bf16.gmra.mrb[80].mxu1 %vm1003_vm13, %v7603_v13 }
 0x146   : > { %v7504_v59 = vrot.slane %v14147_v3, 9  ;;  %8453 = vmatprep.mubr.msk.bf16.mxu1 %vm9119_vm2, %v14052_v9  ;;  %v1485_v3 = vrot.slane %v1483_v52, 4 }
 0x147   : > { %8260 = vmatmul.mubr.msk.bf16.gmra.mrb[136].mxu0 %vm1003_vm13, %v10222_v14  ;;  %v1482_v14 = vrot.slane %v1480_v20, 4 }
 0x148   : > { %8263 = vmatprep.mubr.msk.bf16.mxu0 %vm9119_vm2, %v14052_v9  ;;  %v1481_v19 = vsel %vm9883_vm11, %v7504_v59, %v1480_v20 }
 0x149   : > { %v1484_v30 = vsel %vm9883_vm11, %v1482_v14, %v1483_v52  ;;  %v14152_v14 = vld [vmem:[#allocation44_spill] sm:$0xff]  ;;  %v14153_v52 = vld [vmem:[#allocation47_spill] sm:$0xff] }
 0x14a   : > { %v10239_v28 = vpop.f32.mrb[32].mxu0  ;;  %v7604_v12 = vcombine.low %v1481_v19, %v1484_v30  ;;  %v1490_v59 = vrot.slane %v14152_v14, 5 }
 0x14b   : > { %v8153_v24 = vpop.f32.mrb[33].mxu0 }
 0x14c   : > { %v10244_v8 = vpop.f32.mrb[34].mxu0  ;;  %v10260_v24 = vcombine.low %v1471_v26, %v1474_v45  ;;  %v1492_v14 = vrot.slane %v1490_v59, 4 }
 0x14d   : > { %v8154_v34 = vpop.f32.mrb[35].mxu0  ;;  %8454 = vmatmul.mubr.msk.bf16.gmra.mrb[84].mxu1 %vm1003_vm13, %v7604_v12  ;;  %v1493_v12 = vrot.slane %v14153_v52, 5 }
 0x14e   : > { %14149 = vst [vmem:[#allocation11_spill] sm:$0xff] %v10260_v24  ;;  %v14150_v34 = vld [vmem:[#allocation41_spill] sm:$0xff]  ;;  %8457 = vmatprep.mubr.msk.bf16.mxu1 %vm9119_vm2, %v14052_v9 }
 0x14f   : > { %8264 = vmatmul.mubr.msk.bf16.gmra.mrb[140].mxu0 %vm1003_vm13, %v10241_v4  ;;  %v1486_v54 = vrot.slane %v14150_v34, 5  ;;  %v7505_v4 = vrot.slane %v14151_v57, 9  ;;  %v1495_v36 = vrot.slane %v1493_v12, 4 }
 0x150   : > { %8267 = vmatprep.mubr.msk.bf16.mxu0 %vm9119_vm2, %v14052_v9 }
 0x151   : > { %v1487_v26 = vsel %vm9883_vm11, %v1485_v3, %v1486_v54  ;;  %v1491_v45 = vsel %vm9883_vm11, %v7505_v4, %v1490_v59  ;;  %v1494_v3 = vsel %vm9883_vm11, %v1492_v14, %v1493_v12 }
 0x152   : > { %v10258_v13 = vpop.f32.mrb[36].mxu0  ;;  %v7605_v57 = vcombine.low %v1487_v26, %v1491_v45  ;;  %v10300_v52 = vcombine.low %v1484_v30, %v1487_v26 }
 0x153   : > { %v8157_v41 = vpop.f32.mrb[37].mxu0 }
 0x154   : > { %v10264_v58 = vpop.f32.mrb[38].mxu0  ;;  %14157 = vst [vmem:[#allocation7_spill] sm:$0xff] %v10300_v52 }
 0x155   : > { %v8158_v20 = vpop.f32.mrb[39].mxu0  ;;  %8458 = vmatmul.mubr.msk.bf16.gmra.mrb[88].mxu1 %vm1003_vm13, %v7605_v57 }
 0x156   : > { %v10281_v20 = vcombine.low %v1477_v53, %v1481_v19  ;;  %8461 = vmatprep.mubr.msk.bf16.mxu1 %vm9119_vm2, %v14052_v9 }
 0x157   : > { %8268 = vmatmul.mubr.msk.bf16.gmra.mrb[144].mxu0 %vm1003_vm13, %v10260_v24  ;;  %v14155_v24 = vld [vmem:[#allocation54_spill] sm:$0xff] }
 0x158   : > { %8271 = vmatprep.mubr.msk.bf16.mxu0 %vm9119_vm2, %v14052_v9  ;;  %14154 = vst [vmem:[#allocation14_spill] sm:$0xff] %v10281_v20  ;;  %v1496_v47 = vrot.slane %v14155_v24, 5  ;;  %v14156_v24 = vld [vmem:[#allocation55_spill] sm:$0xff] }
 0x159   : > { %v1500_v54 = vrot.slane %v14156_v24, 5 }
 0x15a   : > { %v10279_v41 = vpop.f32.mrb[40].mxu0  ;;  %v1497_v53 = vsel %vm9883_vm11, %v1495_v36, %v1496_v47  ;;  %v14159_v47 = vld [vmem:[#allocation56_spill] sm:$0xff] }
 0x15b   : > { %v8161_v34 = vpop.f32.mrb[41].mxu0  ;;  %v7606_v19 = vcombine.low %v1494_v3, %v1497_v53  ;;  %v1503_v36 = vrot.slane %v14159_v47, 5 }
 0x15c   : > { %v10284_v11 = vpop.f32.mrb[42].mxu0  ;;  %v14158_v34 = vld [vmem:[#allocation50_spill] sm:$0xff] }
 0x15d   : > { %v8162_v4 = vpop.f32.mrb[43].mxu0  ;;  %8462 = vmatmul.mubr.msk.bf16.gmra.mrb[92].mxu1 %vm1003_vm13, %v7606_v19 }
 0x15e   : > { %v7506_v4 = vrot.slane %v14158_v34, 9  ;;  %8465 = vmatprep.mubr.msk.bf16.mxu1 %vm9119_vm2, %v14052_v9  ;;  %v1505_v34 = vrot.slane %v1503_v36, 4 }
 0x15f   : > { %8272 = vmatmul.mubr.msk.bf16.gmra.mrb[148].mxu0 %vm1003_vm13, %v10281_v20  ;;  %v1502_v20 = vrot.slane %v1500_v54, 4 }
 0x160   : > { %8275 = vmatprep.mubr.msk.bf16.mxu0 %vm9119_vm2, %v14052_v9  ;;  %v1501_v30 = vsel %vm9883_vm11, %v7506_v4, %v1500_v54 }
 0x161   : > { %v1504_v26 = vsel %vm9883_vm11, %v1502_v20, %v1503_v36  ;;  %v14163_v20 = vld [vmem:[#allocation63_spill] sm:$0xff]  ;;  %v14164_v36 = vld [vmem:[#allocation68_spill] sm:$0xff] }
 0x162   : > { %v10298_v59 = vpop.f32.mrb[44].mxu0  ;;  %v7607_v14 = vcombine.low %v1501_v30, %v1504_v26  ;;  %v1510_v4 = vrot.slane %v14163_v20, 5 }
 0x163   : > { %v8165_v57 = vpop.f32.mrb[45].mxu0 }
 0x164   : > { %v10303_v50 = vpop.f32.mrb[46].mxu0  ;;  %v10319_v57 = vcombine.low %v1491_v45, %v1494_v3  ;;  %v1512_v20 = vrot.slane %v1510_v4, 4 }
 0x165   : > { %v8166_v12 = vpop.f32.mrb[47].mxu0  ;;  %8466 = vmatmul.mubr.msk.bf16.gmra.mrb[96].mxu1 %vm1003_vm13, %v7607_v14  ;;  %v1513_v14 = vrot.slane %v14164_v36, 5 }
 0x166   : > { %14160 = vst [vmem:[#allocation15_spill] sm:$0xff] %v10319_v57  ;;  %v14161_v12 = vld [vmem:[#allocation64_spill] sm:$0xff]  ;;  %8469 = vmatprep.mubr.msk.bf16.mxu1 %vm9119_vm2, %v14052_v9 }
 0x167   : > { %8276 = vmatmul.mubr.msk.bf16.gmra.mrb[152].mxu0 %vm1003_vm13, %v10300_v52  ;;  %v1506_v47 = vrot.slane %v14161_v12, 5  ;;  %v7507_v52 = vrot.slane %v14162_v15, 9  ;;  %v1515_v23 = vrot.slane %v1513_v14, 4 }
 0x168   : > { %8279 = vmatprep.mubr.msk.bf16.mxu0 %vm9119_vm2, %v14052_v9 }
 0x169   : > { %v1507_v45 = vsel %vm9883_vm11, %v1505_v34, %v1506_v47  ;;  %v1511_v3 = vsel %vm9883_vm11, %v7507_v52, %v1510_v4  ;;  %v1514_v34 = vsel %vm9883_vm11, %v1512_v20, %v1513_v14  ;;  %v14167_v47 = vld [vmem:[#allocation75_spill] sm:$0xff]  ;;  %v14169_v14 = vld [vmem:[#allocation70_spill] sm:$0xff] }
 0x16a   : > { %v10317_v19 = vpop.f32.mrb[48].mxu0  ;;  %v7608_v15 = vcombine.low %v1507_v45, %v1511_v3  ;;  %v1520_v4 = vrot.slane %v14167_v47, 5  ;;  %v7508_v20 = vrot.slane %v14169_v14, 9 }
 0x16b   : > { %v8169_v24 = vpop.f32.mrb[49].mxu0 }
 0x16c   : > { %v10323_v2 = vpop.f32.mrb[50].mxu0 }
 0x16d   : > { %v8170_v54 = vpop.f32.mrb[51].mxu0  ;;  %8470 = vmatmul.mubr.msk.bf16.gmra.mrb[100].mxu1 %vm1003_vm13, %v7608_v15 }
 0x16e   : > { %v10340_v54 = vcombine.low %v1497_v53, %v1501_v30  ;;  %8473 = vmatprep.mubr.msk.bf16.mxu1 %vm9119_vm2, %v14052_v9  ;;  %v7865_v30 = vpack.c.bf16 %v10065_v31, %v10065_v31  ;;  %v10374_v31 = vpop.f32.mrb[0].mxu1 }
 0x16f   : > { %8280 = vmatmul.mubr.msk.bf16.gmra.mrb[156].mxu0 %vm1003_vm13, %v10319_v57  ;;  %v14166_v57 = vld [vmem:[#allocation74_spill] sm:$0xff]  ;;  %14171 = vst [vmem:[#allocation19_spill] sm:$0xff] %v10374_v31 }
 0x170   : > { %8283 = vmatprep.mubr.msk.bf16.mxu0 %vm9119_vm2, %v14052_v9  ;;  %14165 = vst [vmem:[#allocation16_spill] sm:$0xff] %v10340_v54  ;;  %v1516_v17 = vrot.slane %v14166_v57, 5  ;;  %v2068_v47 = vshll.u32 %v7865_v30, 16 }
 0x172   : > { %v10338_v24 = vpop.f32.mrb[52].mxu0  ;;  %v10354_v53 = vsel %vm9883_vm11, %v1515_v23, %v1516_v17  ;;  %v10371_v23 = vpack.c.bf16 %v10084_v43, %v10084_v43  ;;  %v1521_v43 = vsel %vm9883_vm11, %v7508_v20, %v1520_v4 }
 0x173   : > { %v8173_v12 = vpop.f32.mrb[53].mxu0  ;;  %v7609_v57 = vcombine.low %v1514_v34, %v10354_v53 }
 0x174   : > { %v10343_v7 = vpop.f32.mrb[54].mxu0  ;;  %v10364_v12 = vcombine.low %v1504_v26, %v1507_v45  ;;  %v8307_v26 = vpop.f32.mrb[1].mxu1 }
 0x175   : > { %v8174_v52 = vpop.f32.mrb[55].mxu0  ;;  %8474 = vmatmul.mubr.msk.bf16.gmra.mrb[104].mxu1 %vm1003_vm13, %v7609_v57  ;;  %v10379_v45 = vpop.f32.mrb[2].mxu1 }
 0x176   : > { %14168 = vst [vmem:[#allocation18_spill] sm:$0xff] %v10364_v12  ;;  %v1522_v52 = vrot.slane %v1520_v4, 4  ;;  %8477 = vmatprep.mubr.msk.bf16.mxu1 %vm9119_vm2, %v14052_v9  ;;  %14173 = vst [vmem:[#allocation24_spill] sm:$0xff] %v10379_v45  ;;  %v10395_v45 = vcombine.low %v1511_v3, %v1514_v34  ;;  %v7596_v34 = vrot.slane %v7865_v30, 9 }
 0x177   : > { %8284 = vmatmul.mubr.msk.bf16.gmra.mrb[160].mxu0 %vm1003_vm13, %v10340_v54  ;;  %v2065_v54 = vshrl.u32 %v7865_v30, 16 }
 0x178   : > { %8287 = vmatprep.mubr.msk.bf16.mxu0 %vm9119_vm2, %v14052_v9  ;;  %14174 = vst [vmem:[#allocation25_spill] sm:$0xff] %v10395_v45 }
 0x179   : > { %v2067_v14 = vrot.slane %v2065_v54, 4  ;;  %v2074_v54 = vshll.u32 %v10371_v23, 16 }
 0x17a   : > { %v10362_v15 = vpop.f32.mrb[56].mxu0 }
 0x17b   : > { %v8177_v36 = vpop.f32.mrb[57].mxu0  ;;  %v2076_v20 = vrot.slane %v2074_v54, 5 }
 0x17c   : > { %v10367_v17 = vpop.f32.mrb[58].mxu0  ;;  %v1523_v36 = vrot.slane %v14172_v60, 5 }
 0x17d   : > { %14170 = vst [vmem:[#allocation20_spill] sm:$0xff] %v10367_v17  ;;  %v8178_v1 = vpop.f32.mrb[59].mxu0  ;;  %v2070_v17 = vrot.slane %v2068_v47, 5  ;;  %v7867_v47 = vpack.c.bf16 %v10090_v6, %v10090_v6  ;;  %v2094_v6 = vshll.u32 %v7868_v0, 16 }
 0x17e   : > { %v10387_v57 = vsel %vm9883_vm11, %v1522_v52, %v1523_v36  ;;  %v8308_v1 = vpop.f32.mrb[3].mxu1  ;;  %v1525_v52 = vrot.slane %v1523_v36, 4 }
 0x17f   : > { %8288 = vmatmul.mubr.msk.bf16.gmra.mrb[164].mxu0 %vm1003_vm13, %v10364_v12  ;;  %v7610_v60 = vcombine.low %v1521_v43, %v10387_v57  ;;  %v2071_v26 = vor.u32 %v2070_v17, %v2067_v14  ;;  %v1526_v1 = vrot.slane %v9830_v33, 5  ;;  %v10404_v14 = vpop.f32.mrb[4].mxu1  ;;  %v2078_v33 = vshrl.u32 %v10371_v23, 16 }
 0x180   : > { %8291 = vmatprep.mubr.msk.bf16.mxu0 %vm9119_vm2, %v14052_v9  ;;  %14176 = vst [vmem:[#allocation30_spill] sm:$0xff] %v10404_v14 }
 0x181   : > { %v2072_v4 = vrot.slane %v2071_v26, 4  ;;  %8478 = vmatmul.mubr.msk.bf16.gmra.mrb[108].mxu1 %vm1003_vm13, %v7610_v60  ;;  %v2088_v60 = vshrl.u32 %v7867_v47, 16  ;;  %v2080_v30 = vrot.slane %v2078_v33, 4  ;;  %v2096_v33 = vrot.slane %v2094_v6, 5 }
 0x182   : > { %v1306_v12 = vpop.f32.mrb[60].mxu0  ;;  %8481 = vmatprep.mubr.msk.bf16.mxu1 %vm9119_vm2, %v14052_v9 }
 0x183   : > { %v8183_v31 = vpop.f32.mrb[61].mxu0  ;;  %v10401_v27 = vadd.f32 %v1306_v12, %v10057_v18  ;;  %v10408_v3 = vsel %vm9293_vm14, %v2072_v4, %v2076_v20  ;;  %v8311_v18 = vpop.f32.mrb[5].mxu1  ;;  %v2084_v12 = vshll.u32 %v7867_v47, 16 }
 0x184   : > { %v1309_v17 = vpop.f32.mrb[62].mxu0  ;;  %v2351_v31 = vrot.slane %v10371_v23, 5  ;;  %v10417_v26 = vpop.f32.mrb[6].mxu1  ;;  %v2081_v18 = vor.u32 %v2080_v30, %v2076_v20 }
 0x185   : > { %14175 = vst [vmem:[#allocation29_spill] sm:$0xff] %v10401_v27  ;;  %v8184_v36 = vpop.f32.mrb[63].mxu0  ;;  %v10413_v22 = vadd.f32 %v1309_v17, %v10062_v10  ;;  %14178 = vst [vmem:[#allocation35_spill] sm:$0xff] %v10417_v26  ;;  %v1527_v10 = vsel %vm9883_vm11, %v1525_v52, %v1526_v1  ;;  %v8312_v23 = vpop.f32.mrb[7].mxu1  ;;  %v2086_v4 = vrot.slane %v2084_v12, 5  ;;  %v2090_v17 = vrot.slane %v2088_v60, 4 }
 0x186   : > { %v10421_v54 = vsel %vm9883_vm11, %v7596_v34, %v2351_v31  ;;  %v2082_v14 = vrot.slane %v2081_v18, 4  ;;  %v10437_v60 = vpop.f32.mrb[8].mxu1  ;;  %v2353_v30 = vrot.slane %v2351_v31, 4  ;;  %v14190_v23 = vld [vmem:[#allocation28_spill] sm:$0xff] }
 0x187   : > { %14177 = vst [vmem:[#allocation31_spill] sm:$0xff] %v10413_v22  ;;  %14179 = vst [vmem:[#allocation37_spill] sm:$0xff] %v10421_v54  ;;  %8292 = vmatmul.mubr.msk.bf16.gmra.mrb[168].mxu0 %vm1003_vm13, %v10395_v45  ;;  %v7611_v36 = vcombine.low %v1527_v10, %v10421_v54  ;;  %v2091_v26 = vor.u32 %v2090_v17, %v2086_v4  ;;  %v2354_v22 = vrot.slane %v7867_v47, 5  ;;  %v2357_v47 = vrot.slane %v7868_v0, 5 }
 0x188   : > { %8295 = vmatprep.mubr.msk.bf16.mxu0 %vm9119_vm2, %v14052_v9  ;;  %v10431_v45 = vcombine.low %v10354_v53, %v1521_v43  ;;  %v10441_v20 = vsel %vm9293_vm14, %v2082_v14, %v2086_v4  ;;  %v8315_v43 = vpop.f32.mrb[9].mxu1 }
 0x189   : > { %v2092_v1 = vrot.slane %v2091_v26, 4  ;;  %8482 = vmatmul.mubr.msk.bf16.gmra.mrb[112].mxu1 %vm1003_vm13, %v7611_v36  ;;  %v2356_v6 = vrot.slane %v2354_v22, 4  ;;  %v10452_v26 = vpop.f32.mrb[10].mxu1  ;;  %v10458_v0 = vsel %vm9883_vm11, %v2353_v30, %v2354_v22  ;;  %v10473_v36 = vcombine.low %v10387_v57, %v1527_v10 }
 0x18a   : > { %v1314_v34 = vpop.f32.mrb[64].mxu0  ;;  %14180 = vst [vmem:[#allocation34_spill] sm:$0xff] %v10431_v45  ;;  %8485 = vmatprep.mubr.msk.bf16.mxu1 %vm9119_vm2, %v14052_v9  ;;  %14181 = vst [vmem:[#allocation40_spill] sm:$0xff] %v10458_v0  ;;  %v8316_v4 = vpop.f32.mrb[11].mxu1 }
 0x18b   : > { %v8187_v27 = vpop.f32.mrb[65].mxu0  ;;  %v10434_v52 = vadd.f32 %v1314_v34, %v10080_v35  ;;  %v10448_v35 = vsel %vm9293_vm14, %v2092_v1, %v2096_v33  ;;  %14183 = vst [vmem:[#allocation43_spill] sm:$0xff] %v10473_v36  ;;  %v7649_v34 = vld [vmem:[%s13712_s2 + $0xe] sm:$0x3]  ;;  %v10482_v1 = vpop.f32.mrb[12].mxu1 }
 0x18c   : > { %v1317_v12 = vpop.f32.mrb[66].mxu0  ;;  %v8319_v57 = vpop.f32.mrb[13].mxu1 }
 0x18d   : > { %v8188_v27 = vpop.f32.mrb[67].mxu0  ;;  %v10444_v53 = vadd.f32 %v1317_v12, %v10098_v48  ;;  %v10462_v48 = vsel %vm9883_vm11, %v2356_v6, %v2357_v47  ;;  %v2872_v12 = vand.u32 %v7649_v34, %v9206_v5  ;;  %v7628_v47 = vld [vmem:[%s13712_s2 + $0xc] sm:$0x3]  ;;  %v14186_v57 = vld [vmem:[#allocation13_spill] sm:$0xff] }
 0x18e   : > { %14182 = vst [vmem:[#allocation41_spill] sm:$0xff] %v10462_v48  ;;  %v7612_v31 = vcombine.low %v10458_v0, %v10462_v48  ;;  %v2630_v4 = vand.u32 %v7628_v47, %v9206_v5 }
 0x18f   : > { %8296 = vmatmul.mubr.msk.bf16.gmra.mrb[172].mxu0 %vm1003_vm13, %v10431_v45  ;;  %8552 = vmatpush3.bf16.msra.mxu1 %v2872_v12 }
 0x190   : > { %8299 = vmatprep.mubr.msk.bf16.mxu0 %vm9119_vm2, %v14052_v9 }
 0x191   : > { %8486 = vmatmul.mubr.msk.bf16.gmra.mrb[116].mxu1 %vm1003_vm13, %v7612_v31 }
 0x192   : > { %v1322_v17 = vpop.f32.mrb[68].mxu0  ;;  %8553 = vmatprep.mubr.msk.bf16.mxu1 %vm9119_vm2, %v14052_v9 }
 0x193   : > { %v8191_v22 = vpop.f32.mrb[69].mxu0  ;;  %v10476_v18 = vadd.f32 %v1322_v17, %v10110_v25  ;;  %v10490_v25 = vpop.f32.mrb[14].mxu1  ;;  %v14184_v17 = vld [vmem:[#allocation23_spill] sm:$0xff] }
 0x194   : > { %v1325_v33 = vpop.f32.mrb[70].mxu0  ;;  %v8320_v10 = vpop.f32.mrb[15].mxu1 }
 0x195   : > { %v8192_v30 = vpop.f32.mrb[71].mxu0  ;;  %v10486_v6 = vadd.f32 %v1325_v33, %v10120_v49  ;;  %v10505_v22 = vpop.f32.mrb[16].mxu1 }
 0x196   : > { %v8323_v12 = vpop.f32.mrb[17].mxu1 }
 0x197   : > { %8300 = vmatmul.mubr.msk.bf16.gmra.mrb[176].mxu0 %vm1003_vm13, %v10473_v36  ;;  %v10512_v30 = vpop.f32.mrb[18].mxu1 }
 0x198   : > { %8367 = vmatprep.mubr.msk.bf16.mxu0 %vm9119_vm2, %v14052_v9  ;;  %v8324_v47 = vpop.f32.mrb[19].mxu1 }
 0x199   : > { %8554 = vmatmul.mubr.msk.bf16.vlgmr.msra.gmra.mrb[120].mxu1 %vm1003_vm13, %v14184_v17 }
 0x19a   : > { %v1330_v49 = vpop.f32.mrb[72].mxu0  ;;  %8557 = vmatprep.mubr.msk.bf16.mxu1 %vm9119_vm2, %v14052_v9 }
 0x19b   : > { %v8195_v27 = vpop.f32.mrb[73].mxu0  ;;  %v10500_v43 = vadd.f32 %v1330_v49, %v10139_v44  ;;  %v14185_v44 = vld [vmem:[#allocation12_spill] sm:$0xff] }
 0x19c   : > { %v1333_v31 = vpop.f32.mrb[74].mxu0  ;;  %v14187_v10 = vcombine.low %v14185_v44, %v14186_v57  ;;  %v14188_v27 = vld [vmem:[#allocation21_spill] sm:$0xff]  ;;  %v10528_v44 = vpop.f32.mrb[20].mxu1 }
 0x19d   : > { %v8196_v34 = vpop.f32.mrb[75].mxu0  ;;  %v10508_v33 = vadd.f32 %v1333_v31, %v10143_v29  ;;  %v14189_v31 = vld [vmem:[#allocation17_spill] sm:$0xff] }
 0x19e   : > { %v7567_v17 = vcombine.low %v14189_v31, %v14188_v27  ;;  %v14192_v27 = vld [vmem:[#allocation22_spill] sm:$0xff] }
 0x19f   : > { %8368 = vmatmul.mubr.msk.bf16.vlgmr.msra.gmra.mrb[180].mxu0 %vm1003_vm13, %v14187_v10  ;;  %v8327_v10 = vpop.f32.mrb[21].mxu1 }
 0x1a0   : > { %8490 = vmatpush3.bf16.msra.mxu0 %v2630_v4  ;;  %8371 = vmatprep.mubr.msk.bf16.mxu0 %vm9119_vm2, %v14052_v9  ;;  %v10535_v47 = vpop.f32.mrb[22].mxu1 }
 0x1a1   : > { %8613 = vmatprep.subr.bf16.mxu0 %v14052_v9  ;;  %8558 = vmatmul.mubr.msk.bf16.gmra.mrb[124].mxu1 %vm1003_vm13, %v14190_v23 }
 0x1a2   : > { %v1338_v29 = vpop.f32.mrb[76].mxu0  ;;  %8561 = vmatprep.mubr.msk.bf16.mxu1 %vm9119_vm2, %v14052_v9 }
 0x1a3   : > { %v8199_v49 = vpop.f32.mrb[77].mxu0  ;;  %v10524_v34 = vadd.f32 %v1338_v29, %v10167_v46  ;;  %v8328_v46 = vpop.f32.mrb[23].mxu1 }
 0x1a4   : > { %v1341_v12 = vpop.f32.mrb[78].mxu0  ;;  %v14191_v49 = vld [vmem:[#allocation26_spill] sm:$0xff]  ;;  %v10547_v10 = vpop.f32.mrb[24].mxu1 }
 0x1a5   : > { %v8200_v4 = vpop.f32.mrb[79].mxu0  ;;  %v10531_v57 = vadd.f32 %v1341_v12, %v10170_v63  ;;  %v7568_v31 = vcombine.low %v14192_v27, %v14191_v49  ;;  %v8331_v46 = vpop.f32.mrb[25].mxu1  ;;  %v14194_v27 = vld [vmem:[#allocation32_spill] sm:$0xff] }
 0x1a6   : > { %v14193_v4 = vld [vmem:[#allocation36_spill] sm:$0xff]  ;;  %v14196_v46 = vld [vmem:[#allocation42_spill] sm:$0xff] }
 0x1a7   : > { %8372 = vmatmul.mubr.msk.bf16.gmra.mrb[184].mxu0 %vm1003_vm13, %v7567_v17 }
 0x1a8   : > { %8375 = vmatprep.mubr.msk.bf16.mxu0 %vm9119_vm2, %v14052_v9 }
 0x1a9   : > { %8562 = vmatmul.mubr.msk.bf16.gmra.mrb[128].mxu1 %vm1003_vm13, %v14193_v4  ;;  %v14195_v4 = vld [vmem:[#allocation27_spill] sm:$0xff] }
 0x1aa   : > { %v1346_v29 = vpop.f32.mrb[80].mxu0  ;;  %8565 = vmatprep.mubr.msk.bf16.mxu1 %vm9119_vm2, %v14052_v9 }
 0x1ab   : > { %v8203_v23 = vpop.f32.mrb[81].mxu0  ;;  %v10543_v63 = vadd.f32 %v1346_v29, %v10183_v21 }
 0x1ac   : > { %v1349_v12 = vpop.f32.mrb[82].mxu0  ;;  %v10554_v23 = vpop.f32.mrb[26].mxu1 }
 0x1ad   : > { %v8204_v14 = vpop.f32.mrb[83].mxu0  ;;  %v10550_v17 = vadd.f32 %v1349_v12, %v10186_v40  ;;  %v8332_v21 = vpop.f32.mrb[27].mxu1 }
 0x1ae   : > { %v7569_v14 = vcombine.low %v14195_v4, %v14194_v27  ;;  %v10566_v48 = vpop.f32.mrb[28].mxu1  ;;  %v14197_v4 = vld [vmem:[#allocation38_spill] sm:$0xff] }
 0x1af   : > { %8376 = vmatmul.mubr.msk.bf16.gmra.mrb[188].mxu0 %vm1003_vm13, %v7568_v31  ;;  %v8335_v21 = vpop.f32.mrb[29].mxu1 }
 0x1b0   : > { %8379 = vmatprep.mubr.msk.bf16.mxu0 %vm9119_vm2, %v14052_v9  ;;  %v14199_v21 = vld [vmem:[#allocation48_spill] sm:$0xff] }
 0x1b1   : > { %8566 = vmatmul.mubr.msk.bf16.gmra.mrb[132].mxu1 %vm1003_vm13, %v14196_v46  ;;  %v14198_v46 = vld [vmem:[#allocation33_spill] sm:$0xff] }
 0x1b2   : > { %v1354_v29 = vpop.f32.mrb[84].mxu0  ;;  %8569 = vmatprep.mubr.msk.bf16.mxu1 %vm9119_vm2, %v14052_v9 }
 0x1b3   : > { %v8207_v49 = vpop.f32.mrb[85].mxu0  ;;  %v10562_v40 = vadd.f32 %v1354_v29, %v10199_v62 }
 0x1b4   : > { %v1357_v12 = vpop.f32.mrb[86].mxu0  ;;  %v10573_v49 = vpop.f32.mrb[30].mxu1 }
 0x1b5   : > { %v8208_v0 = vpop.f32.mrb[87].mxu0  ;;  %v10569_v31 = vadd.f32 %v1357_v12, %v10205_v32  ;;  %v8336_v62 = vpop.f32.mrb[31].mxu1 }
 0x1b6   : > { %v7570_v0 = vcombine.low %v14198_v46, %v14197_v4  ;;  %v10585_v54 = vpop.f32.mrb[32].mxu1  ;;  %v14201_v46 = vld [vmem:[#allocation45_spill] sm:$0xff] }
 0x1b7   : > { %8380 = vmatmul.mubr.msk.bf16.gmra.mrb[192].mxu0 %vm1003_vm13, %v7569_v14  ;;  %v8339_v62 = vpop.f32.mrb[33].mxu1 }
 0x1b8   : > { %8383 = vmatprep.mubr.msk.bf16.mxu0 %vm9119_vm2, %v14052_v9  ;;  %v14203_v62 = vld [vmem:[#allocation53_spill] sm:$0xff] }
 0x1b9   : > { %8570 = vmatmul.mubr.msk.bf16.gmra.mrb[136].mxu1 %vm1003_vm13, %v14199_v21  ;;  %v14202_v21 = vld [vmem:[#allocation39_spill] sm:$0xff] }
 0x1ba   : > { %v1362_v29 = vpop.f32.mrb[88].mxu0  ;;  %8573 = vmatprep.mubr.msk.bf16.mxu1 %vm9119_vm2, %v14052_v9 }
 0x1bb   : > { %v8211_v27 = vpop.f32.mrb[89].mxu0  ;;  %v10581_v32 = vadd.f32 %v1362_v29, %v10220_v56 }
 0x1bc   : > { %v1365_v12 = vpop.f32.mrb[90].mxu0  ;;  %v10592_v27 = vpop.f32.mrb[34].mxu1 }
 0x1bd   : > { %v8212_v36 = vpop.f32.mrb[91].mxu0  ;;  %v10588_v14 = vadd.f32 %v1365_v12, %v10225_v39  ;;  %14200 = vst [vmem:[#allocation44_spill] sm:$0xff] %v10592_v27  ;;  %v8340_v56 = vpop.f32.mrb[35].mxu1 }
 0x1be   : > { %v7571_v36 = vcombine.low %v14202_v21, %v14201_v46  ;;  %v10604_v45 = vpop.f32.mrb[36].mxu1  ;;  %v14206_v21 = vld [vmem:[#allocation49_spill] sm:$0xff] }
 0x1bf   : > { %8384 = vmatmul.mubr.msk.bf16.gmra.mrb[196].mxu0 %vm1003_vm13, %v7570_v0  ;;  %14204 = vst [vmem:[#allocation47_spill] sm:$0xff] %v10604_v45  ;;  %v8343_v56 = vpop.f32.mrb[37].mxu1 }
 0x1c0   : > { %8387 = vmatprep.mubr.msk.bf16.mxu0 %vm9119_vm2, %v14052_v9  ;;  %v14208_v56 = vld [vmem:[#allocation62_spill] sm:$0xff] }
 0x1c1   : > { %8574 = vmatmul.mubr.msk.bf16.gmra.mrb[140].mxu1 %vm1003_vm13, %v14203_v62  ;;  %v14207_v62 = vld [vmem:[#allocation46_spill] sm:$0xff] }
 0x1c2   : > { %v1370_v29 = vpop.f32.mrb[92].mxu0  ;;  %8577 = vmatprep.mubr.msk.bf16.mxu1 %vm9119_vm2, %v14052_v9 }
 0x1c3   : > { %v8215_v4 = vpop.f32.mrb[93].mxu0  ;;  %v10600_v39 = vadd.f32 %v1370_v29, %v10239_v28 }
 0x1c4   : > { %v1373_v12 = vpop.f32.mrb[94].mxu0  ;;  %v10611_v4 = vpop.f32.mrb[38].mxu1 }
 0x1c5   : > { %v8216_v27 = vpop.f32.mrb[95].mxu0  ;;  %v10607_v0 = vadd.f32 %v1373_v12, %v10244_v8  ;;  %14205 = vst [vmem:[#allocation54_spill] sm:$0xff] %v10611_v4  ;;  %v8344_v28 = vpop.f32.mrb[39].mxu1 }
 0x1c6   : > { %v7572_v27 = vcombine.low %v14207_v62, %v14206_v21  ;;  %v10623_v45 = vpop.f32.mrb[40].mxu1  ;;  %v14211_v62 = vld [vmem:[#allocation57_spill] sm:$0xff] }
 0x1c7   : > { %8388 = vmatmul.mubr.msk.bf16.gmra.mrb[200].mxu0 %vm1003_vm13, %v7571_v36  ;;  %14209 = vst [vmem:[#allocation55_spill] sm:$0xff] %v10623_v45  ;;  %v8347_v28 = vpop.f32.mrb[41].mxu1 }
 0x1c8   : > { %8391 = vmatprep.mubr.msk.bf16.mxu0 %vm9119_vm2, %v14052_v9  ;;  %v14213_v28 = vld [vmem:[#allocation69_spill] sm:$0xff] }
 0x1c9   : > { %8578 = vmatmul.mubr.msk.bf16.gmra.mrb[144].mxu1 %vm1003_vm13, %v14208_v56  ;;  %v14212_v56 = vld [vmem:[#allocation51_spill] sm:$0xff] }
 0x1ca   : > { %v1378_v29 = vpop.f32.mrb[96].mxu0  ;;  %8581 = vmatprep.mubr.msk.bf16.mxu1 %vm9119_vm2, %v14052_v9 }
 0x1cb   : > { %v8219_v46 = vpop.f32.mrb[97].mxu0  ;;  %v10619_v8 = vadd.f32 %v1378_v29, %v10258_v13 }
 0x1cc   : > { %v1381_v12 = vpop.f32.mrb[98].mxu0  ;;  %v10630_v46 = vpop.f32.mrb[42].mxu1 }
 0x1cd   : > { %v8220_v4 = vpop.f32.mrb[99].mxu0  ;;  %v10626_v36 = vadd.f32 %v1381_v12, %v10264_v58  ;;  %14210 = vst [vmem:[#allocation50_spill] sm:$0xff] %v10630_v46  ;;  %v8348_v13 = vpop.f32.mrb[43].mxu1 }
 0x1ce   : > { %v7573_v4 = vcombine.low %v14212_v56, %v14211_v62  ;;  %v10642_v45 = vpop.f32.mrb[44].mxu1  ;;  %v14217_v56 = vld [vmem:[#allocation65_spill] sm:$0xff] }
 0x1cf   : > { %8392 = vmatmul.mubr.msk.bf16.gmra.mrb[204].mxu0 %vm1003_vm13, %v7572_v27  ;;  %14214 = vst [vmem:[#allocation56_spill] sm:$0xff] %v10642_v45  ;;  %v8351_v13 = vpop.f32.mrb[45].mxu1 }
 0x1d0   : > { %8395 = vmatprep.mubr.msk.bf16.mxu0 %vm9119_vm2, %v14052_v9  ;;  %v14219_v13 = vld [vmem:[#allocation76_spill] sm:$0xff] }
 0x1d1   : > { %8582 = vmatmul.mubr.msk.bf16.gmra.mrb[148].mxu1 %vm1003_vm13, %v14213_v28 }
 0x1d2   : > { %v1386_v29 = vpop.f32.mrb[100].mxu0  ;;  %8585 = vmatprep.mubr.msk.bf16.mxu1 %vm9119_vm2, %v14052_v9 }
 0x1d3   : > { %v8223_v21 = vpop.f32.mrb[101].mxu0  ;;  %v10638_v58 = vadd.f32 %v1386_v29, %v10279_v41 }
 0x1d4   : > { %v1389_v12 = vpop.f32.mrb[102].mxu0  ;;  %v10649_v21 = vpop.f32.mrb[46].mxu1 }
 0x1d5   : > { %v8224_v46 = vpop.f32.mrb[103].mxu0  ;;  %v10645_v27 = vadd.f32 %v1389_v12, %v10284_v11  ;;  %14215 = vst [vmem:[#allocation64_spill] sm:$0xff] %v10649_v21  ;;  %v8352_v41 = vpop.f32.mrb[47].mxu1  ;;  %v14218_v11 = vld [vmem:[#allocation59_spill] sm:$0xff] }
 0x1d6   : > { %v7574_v12 = vcombine.low %v14218_v11, %v14217_v56  ;;  %v10661_v45 = vpop.f32.mrb[48].mxu1 }
 0x1d7   : > { %8396 = vmatmul.mubr.msk.bf16.gmra.mrb[208].mxu0 %vm1003_vm13, %v7573_v4  ;;  %14220 = vst [vmem:[#allocation63_spill] sm:$0xff] %v10661_v45  ;;  %v8355_v21 = vpop.f32.mrb[49].mxu1 }
 0x1d8   : > { %8399 = vmatprep.mubr.msk.bf16.mxu0 %vm9119_vm2, %v14052_v9 }
 0x1d9   : > { %8586 = vmatmul.mubr.msk.bf16.gmra.mrb[152].mxu1 %vm1003_vm13, %v14219_v13 }
 0x1da   : > { %v1394_v29 = vpop.f32.mrb[104].mxu0  ;;  %8589 = vmatprep.mubr.msk.bf16.mxu1 %vm9119_vm2, %v14052_v9 }
 0x1db   : > { %v10655_v62 = vadd.f32 %v1394_v29, %v10298_v59  ;;  %v8227_v46 = vpop.f32.mrb[105].mxu0  ;;  %v10668_v59 = vpop.f32.mrb[50].mxu1 }
 0x1dc   : > { %v1397_v28 = vpop.f32.mrb[106].mxu0  ;;  %14222 = vst [vmem:[#allocation74_spill] sm:$0xff] %v10668_v59  ;;  %v8356_v29 = vpop.f32.mrb[51].mxu1 }
 0x1dd   : > { %14216 = vst [vmem:[#allocation61_spill] sm:$0xff] %v10655_v62  ;;  %v10664_v4 = vadd.f32 %v1397_v28, %v10303_v50  ;;  %v8228_v41 = vpop.f32.mrb[107].mxu0  ;;  %v14224_v50 = vld [vmem:[#allocation72_spill] sm:$0xff]  ;;  %v14225_v28 = vld [vmem:[#allocation67_spill] sm:$0xff] }
 0x1de   : > { %v7575_v13 = vcombine.low %v14225_v28, %v14224_v50  ;;  %v10680_v41 = vpop.f32.mrb[52].mxu1  ;;  %v14230_v50 = vld [vmem:[#allocation73_spill] sm:$0xff]  ;;  %v340_v28 = vld [vmem:[%s9215_s15 + $0x168] sm:$0xff] }
 0x1df   : > { %14221 = vst [vmem:[#allocation68_spill] sm:$0xff] %v10664_v4  ;;  %8400 = vmatmul.mubr.msk.bf16.gmra.mrb[212].mxu0 %vm1003_vm13, %v7574_v12  ;;  %14226 = vst [vmem:[#allocation70_spill] sm:$0xff] %v10680_v41  ;;  %v8359_v59 = vpop.f32.mrb[53].mxu1  ;;  %vm388_vm5 = vcmp.ge.f32.partialorder %v340_v28, 0.0  ;;  %v14248_v4 = vld [vmem:[#allocation82_spill] sm:$0xff] }
 0x1e0   : > { %8403 = vmatprep.mubr.msk.bf16.mxu0 %vm9119_vm2, %v14052_v9  ;;  %v7576_v59 = vcombine.low %v14230_v50, %v9797_v61 }
 0x1e1   : > { %8590 = vmatmul.mubr.msk.bf16.gmra.mrb[156].mxu1 %vm1003_vm13, %v9828_v38 }
 0x1e2   : > { %v1402_v46 = vpop.f32.mrb[108].mxu0  ;;  %8593 = vmatprep.mubr.msk.bf16.mxu1 %vm9119_vm2, %v14052_v9 }
 0x1e3   : > { %v10674_v56 = vadd.f32 %v1402_v46, %v10317_v19  ;;  %v8231_v11 = vpop.f32.mrb[109].mxu0  ;;  %v10687_v19 = vpop.f32.mrb[54].mxu1 }
 0x1e4   : > { %v1405_v21 = vpop.f32.mrb[110].mxu0  ;;  %14228 = vst [vmem:[#allocation23_spill] sm:$0xff] %v10687_v19  ;;  %v8360_v46 = vpop.f32.mrb[55].mxu1  ;;  %v14238_v19 = vld [vmem:[#allocation78_spill] sm:$0xff] }
 0x1e5   : > { %14223 = vst [vmem:[#allocation75_spill] sm:$0xff] %v10674_v56  ;;  %v10683_v12 = vadd.f32 %v1405_v21, %v10323_v2  ;;  %v8232_v29 = vpop.f32.mrb[111].mxu0  ;;  %v10707_v46 = vpop.f32.mrb[56].mxu1  ;;  %v14247_v56 = vld [vmem:[#allocation84_spill] sm:$0xff] }
 0x1e6   : > { %14232 = vst [vmem:[#allocation21_spill] sm:$0xff] %v10707_v46  ;;  %v8363_v61 = vpop.f32.mrb[57].mxu1  ;;  %v14237_v46 = vld [vmem:[#allocation81_spill] sm:$0xff] }
 0x1e7   : > { %14227 = vst [vmem:[#allocation77_spill] sm:$0xff] %v10683_v12  ;;  %8404 = vmatmul.mubr.msk.bf16.gmra.mrb[216].mxu0 %vm1003_vm13, %v7575_v13  ;;  %v7577_v41 = vcombine.low %v14238_v19, %v14237_v46 }
 0x1e8   : > { %8407 = vmatprep.mubr.msk.bf16.mxu0 %vm9119_vm2, %v14052_v9 }
 0x1e9   : > { %8594 = vmatmul.mubr.msk.bf16.gmra.mrb[160].mxu1 %vm1003_vm13, %v9855_v51  ;;  %v10711_v51 = vpop.f32.mrb[58].mxu1 }
 0x1ea   : > { %v1410_v11 = vpop.f32.mrb[112].mxu0  ;;  %8597 = vmatprep.mubr.msk.bf16.mxu1 %vm9119_vm2, %v14052_v9  ;;  %14233 = vst [vmem:[#allocation17_spill] sm:$0xff] %v10711_v51  ;;  %v8364_v50 = vpop.f32.mrb[59].mxu1 }
 0x1eb   : > { %v10693_v38 = vadd.f32 %v1410_v11, %v10338_v24  ;;  %v8235_v2 = vpop.f32.mrb[113].mxu0  ;;  %v437_v24 = vmul.f32 %v14121_v37, %v340_v28  ;;  %v10716_v11 = vpack.c.bf16 %v10112_v42, %v10112_v42  ;;  %v14293_v16 = vld [vmem:[#allocation23_spill] sm:$0xff] }
 0x1ec   : > { %v1413_v21 = vpop.f32.mrb[114].mxu0 }
 0x1ed   : > { %14229 = vst [vmem:[#allocation12_spill] sm:$0xff] %v10693_v38  ;;  %v10701_v13 = vadd.f32 %v1413_v21, %v10343_v7  ;;  %v8236_v29 = vpop.f32.mrb[115].mxu0  ;;  %v341_v7 = vld [vmem:[%s9215_s15 + $0x170] sm:$0xff]  ;;  %14234 = vst [vmem:[#allocation28_spill] sm:$0xff] %v10716_v11  ;;  %v10718_v21 = vsel %vm388_vm5, %v340_v28, %v437_v24  ;;  %v14240_v38 = vld [vmem:[#allocation20_spill] sm:$0xff]  ;;  %v2821_v19 = vshrl.u32 %v10716_v11, 16 }
 0x1ee   : > { %14235 = vst [vmem:[#allocation26_spill] sm:$0xff] %v10718_v21  ;;  %v438_v51 = vmul.f32 %v14121_v37, %v341_v7  ;;  %v342_v28 = vld [vmem:[%s9215_s15 + $0x178] sm:$0x3]  ;;  %vm389_vm6 = vcmp.ge.f32.partialorder %v341_v7, 0.0  ;;  %v2824_v24 = vshll.u32 %v10716_v11, 16  ;;  %s7689_s15 = sadd.s32 4294967295, %s7405_s14 }
 0x1ef   : > { %14231 = vst [vmem:[#allocation13_spill] sm:$0xff] %v10701_v13  ;;  %8408 = vmatmul.mubr.msk.bf16.gmra.mrb[220].mxu0 %vm1003_vm13, %v7576_v59  ;;  %v14239_v13 = vld [vmem:[#allocation86_spill] sm:$0xff]  ;;  %v2823_v46 = vrot.slane %v2821_v19, 4  ;;  %v439_v50 = vmul.f32 %v14121_v37, %v342_v28  ;;  %vm390_vm7 = vcmp.ge.f32.partialorder %v342_v28, 0.0 }
 0x1f0   : > { %8411 = vmatprep.mubr.msk.bf16.mxu0 %vm9119_vm2, %v14052_v9 }
 0x1f1   : > { %8598 = vmatmul.mubr.msk.bf16.gmra.mrb[164].mxu1 %vm1003_vm13, %v14239_v13  ;;  %v10741_v13 = vpop.f32.mrb[60].mxu1 }
 0x1f2   : > { %v1418_v2 = vpop.f32.mrb[116].mxu0  ;;  %8601 = vmatprep.mubr.msk.bf16.mxu1 %vm9119_vm2, %v14052_v9  ;;  %14243 = vst [vmem:[#allocation27_spill] sm:$0xff] %v10741_v13 }
 0x1f3   : > { %v10721_v59 = vadd.f32 %v1418_v2, %v10362_v15  ;;  %v8239_v29 = vpop.f32.mrb[117].mxu0  ;;  %v10736_v15 = vpack.c.bf16 %v10718_v21, %v10718_v21  ;;  %v2826_v2 = vrot.slane %v2824_v24, 5  ;;  %v10759_v24 = vsel %vm390_vm7, %v342_v28, %v439_v50 }
 0x1f4   : > { %v1421_v61 = vpop.f32.mrb[118].mxu0  ;;  %v10748_v29 = vsel %vm389_vm6, %v341_v7, %v438_v51  ;;  %v7873_v50 = vpack.c.bf16 %v10759_v24, %v10759_v24  ;;  %vm3839_vm7 = vsmask.f32 1280 }
 0x1f5   : > { %14236 = vst [vmem:[#allocation22_spill] sm:$0xff] %v10721_v59  ;;  %v10729_v42 = vadd.f32 %v1421_v61, %v14240_v38  ;;  %v8240_v45 = vpop.f32.mrb[119].mxu0  ;;  %14242 = vst [vmem:[#allocation32_spill] sm:$0xff] %v10736_v15  ;;  %v8431_v38 = vpop.f32.mrb[61].mxu1  ;;  %v2827_v21 = vor.u32 %v2826_v2, %v2823_v46  ;;  %v2830_v13 = vshll.u32 %v10736_v15, 16  ;;  %v7872_v7 = vpack.c.bf16 %v10748_v29, %v10748_v29  ;;  %v14250_v2 = vld [vmem:[#allocation19_spill] sm:$0xff] }
 0x1f6   : > { %v7650_v45 = vcombine.low %v10408_v3, %v10441_v20  ;;  %14244 = vst [vmem:[#allocation42_spill] sm:$0xff] %v10748_v29  ;;  %v10750_v61 = vpop.f32.mrb[62].mxu1  ;;  %v7578_v38 = vcombine.low %v14248_v4, %v14247_v56  ;;  %v2834_v56 = vshrl.u32 %v10736_v15, 16  ;;  %v2850_v29 = vshll.u32 %v7873_v50, 16 }
 0x1f7   : > { %14241 = vst [vmem:[#allocation36_spill] sm:$0xff] %v10729_v42  ;;  %8412 = vmatmul.mubr.msk.bf16.gmra.mrb[224].mxu0 %vm1003_vm13, %v7577_v41  ;;  %14245 = vst [vmem:[#allocation38_spill] sm:$0xff] %v10750_v61  ;;  %v8432_v41 = vpop.f32.mrb[63].mxu1  ;;  %v14246_v42 = vld [vmem:[#allocation29_spill] sm:$0xff]  ;;  %v2828_v37 = vrot.slane %v2827_v21, 4  ;;  %v2832_v51 = vrot.slane %v2830_v13, 5 }
 0x1f8   : > { %8415 = vmatprep.mubr.msk.bf16.mxu0 %vm9119_vm2, %v14052_v9  ;;  %v14249_v41 = vld [vmem:[#allocation31_spill] sm:$0xff]  ;;  %v14252_v21 = vld [vmem:[#allocation24_spill] sm:$0xff]  ;;  %v10774_v28 = vpop.f32.mrb[64].mxu1 }
 0x1f9   : > { %8602 = vmatmul.mubr.msk.bf16.gmra.mrb[168].mxu1 %vm1003_vm13, %v7650_v45  ;;  %v2833_v4 = vsel %vm9293_vm14, %v2828_v37, %v2832_v51  ;;  %14254 = vst [vmem:[#allocation45_spill] sm:$0xff] %v10774_v28  ;;  %v8435_v45 = vpop.f32.mrb[65].mxu1 }
 0x1fa   : > { %v1657_v11 = vpop.f32.mrb[120].mxu0  ;;  %8605 = vmatprep.mubr.msk.bf16.mxu1 %vm9119_vm2, %v14052_v9  ;;  %v13834_v45 = vrot.slane %v10736_v15, 5 }
 0x1fb   : > { %v1776_v59 = vadd.f32 %v1657_v11, %v14246_v42  ;;  %v8245_v12 = vpop.f32.mrb[121].mxu0  ;;  %v2844_v11 = vshrl.u32 %v7872_v7, 16 }
 0x1fc   : > { %v1660_v19 = vpop.f32.mrb[122].mxu0  ;;  %v2840_v12 = vshll.u32 %v7872_v7, 16 }
 0x1fd   : > { %v1777_v46 = vadd.f32 %v1660_v19, %v14249_v41  ;;  %v10763_v61 = vadd.f32 %v14250_v2, %v1776_v59  ;;  %v8246_v42 = vpop.f32.mrb[123].mxu0  ;;  %v7651_v59 = vcombine.low %v10448_v35, %v2833_v4  ;;  %v2836_v19 = vrot.slane %v2834_v56, 4  ;;  %v10781_v2 = vpop.f32.mrb[66].mxu1 }
 0x1fe   : > { %v2842_v37 = vrot.slane %v2840_v12, 5  ;;  %v2846_v41 = vrot.slane %v2844_v11, 4  ;;  %14255 = vst [vmem:[#allocation39_spill] sm:$0xff] %v10781_v2  ;;  %v8436_v42 = vpop.f32.mrb[67].mxu1  ;;  %v2852_v11 = vrot.slane %v2850_v29, 5 }
 0x1ff   : > { %14251 = vst [vmem:[#allocation33_spill] sm:$0xff] %v10763_v61  ;;  %v10771_v13 = vadd.f32 %v14252_v21, %v1777_v46  ;;  %8416 = vmatmul.mubr.msk.bf16.gmra.mrb[228].mxu0 %vm1003_vm13, %v7578_v38  ;;  %v2837_v21 = vor.u32 %v2836_v19, %v2832_v51  ;;  %v14257_v42 = vld [vmem:[#allocation30_spill] sm:$0xff] }
 0x200   : > { %8419 = vmatprep.mubr.msk.bf16.mxu0 %vm9119_vm2, %v14052_v9  ;;  %v2847_v38 = vor.u32 %v2846_v41, %v2842_v37 }
 0x201   : > { %14253 = vst [vmem:[#allocation48_spill] sm:$0xff] %v10771_v13  ;;  %v14256_v13 = vld [vmem:[#allocation85_spill] sm:$0xff]  ;;  %8606 = vmatmul.mubr.msk.bf16.gmra.mrb[172].mxu1 %vm1003_vm13, %v7651_v59  ;;  %v2838_v56 = vrot.slane %v2837_v21, 4  ;;  %v14258_v59 = vld [vmem:[#allocation35_spill] sm:$0xff] }
 0x202   : > { %v1665_v46 = vpop.f32.mrb[124].mxu0  ;;  %v7579_v61 = vcombine.low %v14256_v13, %v10408_v3  ;;  %v2848_v12 = vrot.slane %v2847_v38, 4  ;;  %8609 = vmatprep.mubr.msk.bf16.mxu1 %vm9119_vm2, %v14052_v9 }
 0x203   : > { %v1778_v28 = vadd.f32 %v1665_v46, %v10434_v52  ;;  %v8249_v4 = vpop.f32.mrb[125].mxu0  ;;  %v3061_v52 = vrot.slane %v13834_v45, 4  ;;  %v2843_v3 = vsel %vm9293_vm14, %v2838_v56, %v2842_v37  ;;  %v14285_v56 = vld [vmem:[#allocation74_spill] sm:$0xff] }
 0x204   : > { %v1668_v62 = vpop.f32.mrb[126].mxu0  ;;  %v2853_v13 = vsel %vm9293_vm14, %v2848_v12, %v2852_v11 }
 0x205   : > { %v1779_v2 = vadd.f32 %v1668_v62, %v10444_v53  ;;  %v10790_v51 = vadd.f32 %v14257_v42, %v1778_v28  ;;  %v8250_v19 = vpop.f32.mrb[127].mxu0  ;;  %v10804_v53 = vpop.f32.mrb[68].mxu1  ;;  %v3062_v62 = vrot.slane %v7872_v7, 5  ;;  %v3065_v28 = vrot.slane %v7873_v50, 5 }
 0x206   : > { %v8439_v41 = vpop.f32.mrb[69].mxu1  ;;  %v7652_v46 = vcombine.low %v2843_v3, %v2853_v13 }
 0x207   : > { %v10801_v29 = vadd.f32 %v14258_v59, %v1779_v2  ;;  %8420 = vmatmul.mubr.msk.bf16.gmra.mrb[232].mxu0 %vm1003_vm13, %v7579_v61  ;;  %v10808_v21 = vpop.f32.mrb[70].mxu1  ;;  %v10812_v55 = vsel %vm9883_vm11, %v3061_v52, %v3062_v62  ;;  %v3064_v37 = vrot.slane %v3062_v62, 4 }
 0x208   : > { %8423 = vmatprep.mubr.msk.bf16.mxu0 %vm9119_vm2, %v14052_v9  ;;  %14259 = vst [vmem:[#allocation53_spill] sm:$0xff] %v10812_v55  ;;  %v8440_v38 = vpop.f32.mrb[71].mxu1 }
 0x209   : > { %v10817_v7 = vsel %vm9883_vm11, %v3064_v37, %v3065_v28  ;;  %8610 = vmatmul.mubr.msk.bf16.gmra.mrb[176].mxu1 %vm1003_vm13, %v7652_v46  ;;  %v10833_v52 = vpop.f32.mrb[72].mxu1 }
 0x20a   : > { %v1673_v2 = vpop.f32.mrb[128].mxu0  ;;  %14260 = vst [vmem:[#allocation49_spill] sm:$0xff] %v10817_v7  ;;  %v8443_v3 = vpop.f32.mrb[73].mxu1  ;;  %v14286_v7 = vld [vmem:[#allocation58_spill] sm:$0xff] }
 0x20b   : > { %v1780_v61 = vadd.f32 %v1673_v2, %v10476_v18  ;;  %v8253_v4 = vpop.f32.mrb[129].mxu0  ;;  %v14261_v18 = vcombine.low %v10441_v20, %v10448_v35  ;;  %v14262_v2 = vld [vmem:[#allocation88_spill] sm:$0xff]  ;;  %v14263_v3 = vld [vmem:[#allocation89_spill] sm:$0xff] }
 0x20c   : > { %v1676_v50 = vpop.f32.mrb[130].mxu0 }
 0x20d   : > { %v1781_v12 = vadd.f32 %v1676_v50, %v10486_v6  ;;  %v10824_v11 = vadd.f32 %v10437_v60, %v1780_v61  ;;  %v8254_v42 = vpop.f32.mrb[131].mxu0  ;;  %v7669_v60 = vld [vmem:[%s13712_s2 + $0x10] sm:$0x3]  ;;  %v10840_v6 = vpop.f32.mrb[74].mxu1 }
 0x20e   : > { %v3085_v35 = vand.u32 %v7669_v60, %v9206_v5 }
 0x20f   : > { %v10827_v19 = vadd.f32 %v10452_v26, %v1781_v12  ;;  %8424 = vmatmul.mubr.msk.bf16.gmra.mrb[236].mxu0 %vm1003_vm13, %v14261_v18  ;;  %v8444_v26 = vpop.f32.mrb[75].mxu1 }
 0x210   : > { %8491 = vmatprep.mubr.msk.bf16.mxu0 %vm9119_vm2, %v14052_v9  ;;  %v10853_v38 = vpop.f32.mrb[76].mxu1 }
 0x212   : > { %v1681_v13 = vpop.f32.mrb[132].mxu0 }
 0x213   : > { %v1782_v59 = vadd.f32 %v1681_v13, %v10500_v43  ;;  %v8257_v62 = vpop.f32.mrb[133].mxu0  ;;  %v8447_v43 = vpop.f32.mrb[77].mxu1 }
 0x214   : > { %v1684_v20 = vpop.f32.mrb[134].mxu0  ;;  %v10857_v5 = vpop.f32.mrb[78].mxu1 }
 0x215   : > { %v1783_v28 = vadd.f32 %v1684_v20, %v10508_v33  ;;  %v10846_v41 = vadd.f32 %v10482_v1, %v1782_v59  ;;  %v8258_v46 = vpop.f32.mrb[135].mxu0  ;;  %v8448_v61 = vpop.f32.mrb[79].mxu1 }
 0x216   : > { %v14264_v46 = vld [vmem:[#allocation91_spill] sm:$0xff] }
 0x217   : > { %v10849_v37 = vadd.f32 %v10490_v25, %v1783_v28  ;;  %8492 = vmatmul.mubr.msk.bf16.vlgmr.msra.gmra.mrb[240].mxu0 %vm1003_vm13, %v14262_v2 }
 0x218   : > { %8614 = vmatpush3.bf16.msra.mxu0 %v3085_v35  ;;  %8495 = vmatprep.mubr.msk.bf16.mxu0 %vm9119_vm2, %v14052_v9  ;;  %v10869_v60 = vpop.f32.mrb[80].mxu1 }
 0x21a   : > { %v1689_v33 = vpop.f32.mrb[136].mxu0 }
 0x21b   : > { %v1784_v1 = vadd.f32 %v1689_v33, %v10524_v34  ;;  %v8261_v4 = vpop.f32.mrb[137].mxu0  ;;  %v8451_v34 = vpop.f32.mrb[81].mxu1 }
 0x21c   : > { %v1692_v50 = vpop.f32.mrb[138].mxu0  ;;  %v10873_v13 = vpop.f32.mrb[82].mxu1 }
 0x21d   : > { %v1785_v25 = vadd.f32 %v1692_v50, %v10531_v57  ;;  %v10862_v12 = vadd.f32 %v10505_v22, %v1784_v1  ;;  %v8262_v42 = vpop.f32.mrb[139].mxu0  ;;  %v8452_v57 = vpop.f32.mrb[83].mxu1 }
 0x21e   : > { %v14265_v42 = vld [vmem:[#allocation90_spill] sm:$0xff] }
 0x21f   : > { %v10865_v18 = vadd.f32 %v10512_v30, %v1785_v25  ;;  %8496 = vmatmul.mubr.msk.bf16.gmra.mrb[244].mxu0 %vm1003_vm13, %v14263_v3 }
 0x220   : > { %8499 = vmatprep.mubr.msk.bf16.mxu0 %vm9119_vm2, %v14052_v9  ;;  %v10885_v2 = vpop.f32.mrb[84].mxu1 }
 0x222   : > { %v1697_v26 = vpop.f32.mrb[140].mxu0 }
 0x223   : > { %v1786_v22 = vadd.f32 %v1697_v26, %v10543_v63  ;;  %v8265_v59 = vpop.f32.mrb[141].mxu0  ;;  %v8455_v63 = vpop.f32.mrb[85].mxu1 }
 0x224   : > { %v1700_v62 = vpop.f32.mrb[142].mxu0  ;;  %v10889_v43 = vpop.f32.mrb[86].mxu1 }
 0x225   : > { %v1787_v30 = vadd.f32 %v1700_v62, %v10550_v17  ;;  %v10878_v20 = vadd.f32 %v10528_v44, %v1786_v22  ;;  %v8266_v35 = vpop.f32.mrb[143].mxu0  ;;  %v8456_v17 = vpop.f32.mrb[87].mxu1 }
 0x226   : > { %v14266_v35 = vld [vmem:[#allocation92_spill] sm:$0xff] }
 0x227   : > { %v10881_v28 = vadd.f32 %v10535_v47, %v1787_v30  ;;  %8500 = vmatmul.mubr.msk.bf16.gmra.mrb[248].mxu0 %vm1003_vm13, %v14264_v46 }
 0x228   : > { %8503 = vmatprep.mubr.msk.bf16.mxu0 %vm9119_vm2, %v14052_v9  ;;  %v10901_v3 = vpop.f32.mrb[88].mxu1 }
 0x22a   : > { %v1705_v33 = vpop.f32.mrb[144].mxu0 }
 0x22b   : > { %v1788_v44 = vadd.f32 %v1705_v33, %v10562_v40  ;;  %v8269_v61 = vpop.f32.mrb[145].mxu0  ;;  %v8459_v40 = vpop.f32.mrb[89].mxu1 }
 0x22c   : > { %v1708_v1 = vpop.f32.mrb[146].mxu0  ;;  %v10905_v34 = vpop.f32.mrb[90].mxu1 }
 0x22d   : > { %v1789_v47 = vadd.f32 %v1708_v1, %v10569_v31  ;;  %v10894_v4 = vadd.f32 %v10547_v10, %v1788_v44  ;;  %v8270_v50 = vpop.f32.mrb[147].mxu0  ;;  %v8460_v31 = vpop.f32.mrb[91].mxu1 }
 0x22f   : > { %v10897_v25 = vadd.f32 %v10554_v23, %v1789_v47  ;;  %8504 = vmatmul.mubr.msk.bf16.gmra.mrb[252].mxu0 %vm1003_vm13, %v14265_v42  ;;  %v14267_v47 = vld [vmem:[#allocation44_spill] sm:$0xff]  ;;  %v14268_v42 = vld [vmem:[#allocation79_spill] sm:$0xff] }
 0x230   : > { %8507 = vmatprep.mubr.msk.bf16.mxu0 %vm9119_vm2, %v14052_v9  ;;  %v10917_v46 = vpop.f32.mrb[92].mxu1 }
 0x232   : > { %v1713_v26 = vpop.f32.mrb[148].mxu0 }
 0x233   : > { %v1790_v10 = vadd.f32 %v1713_v26, %v10581_v32  ;;  %v8273_v57 = vpop.f32.mrb[149].mxu0  ;;  %v8463_v32 = vpop.f32.mrb[93].mxu1 }
 0x234   : > { %v1716_v22 = vpop.f32.mrb[150].mxu0  ;;  %v10921_v63 = vpop.f32.mrb[94].mxu1  ;;  %v14270_v32 = vld [vmem:[#allocation54_spill] sm:$0xff] }
 0x235   : > { %v1791_v23 = vadd.f32 %v1716_v22, %v10588_v14  ;;  %v10910_v59 = vadd.f32 %v10566_v48, %v1790_v10  ;;  %v8274_v62 = vpop.f32.mrb[151].mxu0  ;;  %v8464_v14 = vpop.f32.mrb[95].mxu1 }
 0x236   : > { %v14271_v14 = vld [vmem:[#allocation93_spill] sm:$0xff] }
 0x237   : > { %v10913_v30 = vadd.f32 %v10573_v49, %v1791_v23  ;;  %8508 = vmatmul.mubr.msk.bf16.gmra.mrb[0].mxu0 %vm1003_vm13, %v14266_v35  ;;  %v14269_v23 = vld [vmem:[#allocation47_spill] sm:$0xff] }
 0x238   : > { %8511 = vmatprep.mubr.msk.bf16.mxu0 %vm9119_vm2, %v14052_v9  ;;  %v10933_v40 = vpop.f32.mrb[96].mxu1 }
 0x23a   : > { %v1721_v33 = vpop.f32.mrb[152].mxu0 }
 0x23b   : > { %v1792_v48 = vadd.f32 %v1721_v33, %v10600_v39  ;;  %v8277_v17 = vpop.f32.mrb[153].mxu0  ;;  %v8467_v39 = vpop.f32.mrb[97].mxu1 }
 0x23c   : > { %v1724_v44 = vpop.f32.mrb[154].mxu0  ;;  %v10937_v26 = vpop.f32.mrb[98].mxu1  ;;  %v14272_v39 = vld [vmem:[#allocation55_spill] sm:$0xff] }
 0x23d   : > { %v1793_v49 = vadd.f32 %v1724_v44, %v10607_v0  ;;  %v10926_v61 = vadd.f32 %v10585_v54, %v1792_v48  ;;  %v8278_v1 = vpop.f32.mrb[155].mxu0  ;;  %v8468_v0 = vpop.f32.mrb[99].mxu1 }
 0x23f   : > { %v10929_v50 = vadd.f32 %v14267_v47, %v1793_v49  ;;  %8512 = vmatmul.mubr.msk.bf16.gmra.mrb[4].mxu0 %vm1003_vm13, %v14268_v42 }
 0x240   : > { %8515 = vmatprep.mubr.msk.bf16.mxu0 %vm9119_vm2, %v14052_v9  ;;  %v10949_v48 = vpop.f32.mrb[100].mxu1 }
 0x242   : > { %v1729_v31 = vpop.f32.mrb[156].mxu0 }
 0x243   : > { %v1794_v54 = vadd.f32 %v1729_v31, %v10619_v8  ;;  %v8281_v10 = vpop.f32.mrb[157].mxu0  ;;  %v8471_v8 = vpop.f32.mrb[101].mxu1 }
 0x244   : > { %v1732_v57 = vpop.f32.mrb[158].mxu0  ;;  %v10953_v17 = vpop.f32.mrb[102].mxu1 }
 0x245   : > { %v1795_v22 = vadd.f32 %v1732_v57, %v10626_v36  ;;  %v10942_v62 = vadd.f32 %v14269_v23, %v1794_v54  ;;  %v8282_v35 = vpop.f32.mrb[159].mxu0  ;;  %v8472_v36 = vpop.f32.mrb[103].mxu1  ;;  %v14273_v54 = vld [vmem:[#allocation50_spill] sm:$0xff]  ;;  %v14274_v57 = vld [vmem:[#allocation52_spill] sm:$0xff] }
 0x246   : > { %v14276_v36 = vld [vmem:[#allocation68_spill] sm:$0xff] }
 0x247   : > { %v10945_v33 = vadd.f32 %v14270_v32, %v1795_v22  ;;  %8516 = vmatmul.mubr.msk.bf16.gmra.mrb[8].mxu0 %vm1003_vm13, %v14271_v14  ;;  %v14275_v32 = vld [vmem:[#allocation61_spill] sm:$0xff] }
 0x248   : > { %8519 = vmatprep.mubr.msk.bf16.mxu0 %vm9119_vm2, %v14052_v9  ;;  %v10965_v22 = vpop.f32.mrb[104].mxu1 }
 0x24a   : > { %v1737_v44 = vpop.f32.mrb[160].mxu0 }
 0x24b   : > { %v1796_v49 = vadd.f32 %v1737_v44, %v10638_v58  ;;  %v8285_v1 = vpop.f32.mrb[161].mxu0  ;;  %v8475_v58 = vpop.f32.mrb[105].mxu1 }
 0x24c   : > { %v1740_v47 = vpop.f32.mrb[162].mxu0  ;;  %v10969_v23 = vpop.f32.mrb[106].mxu1  ;;  %v14277_v1 = vld [vmem:[#allocation56_spill] sm:$0xff] }
 0x24d   : > { %v1797_v42 = vadd.f32 %v1740_v47, %v10645_v27  ;;  %v10958_v31 = vadd.f32 %v14272_v39, %v1796_v49  ;;  %v8286_v0 = vpop.f32.mrb[163].mxu0  ;;  %v8476_v27 = vpop.f32.mrb[107].mxu1  ;;  %v14278_v39 = vld [vmem:[#allocation64_spill] sm:$0xff] }
 0x24f   : > { %v10961_v10 = vadd.f32 %v14273_v54, %v1797_v42  ;;  %8520 = vmatmul.mubr.msk.bf16.gmra.mrb[12].mxu0 %vm1003_vm13, %v14274_v57  ;;  %v14279_v54 = vld [vmem:[#allocation80_spill] sm:$0xff] }
 0x250   : > { %8523 = vmatprep.mubr.msk.bf16.mxu0 %vm9119_vm2, %v14052_v9 }
 0x252   : > { %v1745_v35 = vpop.f32.mrb[164].mxu0 }
 0x253   : > { %v1798_v14 = vadd.f32 %v1745_v35, %v14275_v32  ;;  %v8289_v8 = vpop.f32.mrb[165].mxu0 }
 0x254   : > { %v1748_v44 = vpop.f32.mrb[166].mxu0  ;;  %v10981_v57 = vpop.f32.mrb[108].mxu1  ;;  %v14282_v8 = vld [vmem:[#allocation75_spill] sm:$0xff] }
 0x255   : > { %v1799_v49 = vadd.f32 %v1748_v44, %v14276_v36  ;;  %v10974_v47 = vadd.f32 %v14277_v1, %v1798_v14  ;;  %v8290_v42 = vpop.f32.mrb[167].mxu0  ;;  %14280 = vst [vmem:[#allocation46_spill] sm:$0xff] %v10981_v57  ;;  %v8479_v58 = vpop.f32.mrb[109].mxu1  ;;  %v14283_v1 = vld [vmem:[#allocation77_spill] sm:$0xff] }
 0x256   : > { %v10985_v35 = vpop.f32.mrb[110].mxu1  ;;  %v14284_v42 = vld [vmem:[#allocation63_spill] sm:$0xff] }
 0x257   : > { %v10977_v0 = vadd.f32 %v14278_v39, %v1799_v49  ;;  %8524 = vmatmul.mubr.msk.bf16.gmra.mrb[16].mxu0 %vm1003_vm13, %v14279_v54  ;;  %14281 = vst [vmem:[#allocation62_spill] sm:$0xff] %v10985_v35  ;;  %v8480_v32 = vpop.f32.mrb[111].mxu1  ;;  %v14320_v35 = vld [vmem:[#allocation39_spill] sm:$0xff] }
 0x258   : > { %8527 = vmatprep.mubr.msk.bf16.mxu0 %vm9119_vm2, %v14052_v9 }
 0x25a   : > { %v1753_v27 = vpop.f32.mrb[168].mxu0 }
 0x25b   : > { %v1800_v14 = vadd.f32 %v1753_v27, %v14282_v8  ;;  %v8293_v44 = vpop.f32.mrb[169].mxu0 }
 0x25c   : > { %v1756_v36 = vpop.f32.mrb[170].mxu0  ;;  %v10997_v58 = vpop.f32.mrb[112].mxu1 }
 0x25d   : > { %v1801_v49 = vadd.f32 %v1756_v36, %v14283_v1  ;;  %v10990_v39 = vadd.f32 %v14284_v42, %v1800_v14  ;;  %v8294_v54 = vpop.f32.mrb[171].mxu0  ;;  %14287 = vst [vmem:[#allocation57_spill] sm:$0xff] %v10997_v58  ;;  %v8483_v27 = vpop.f32.mrb[113].mxu1  ;;  %v14289_v36 = vld [vmem:[#allocation12_spill] sm:$0xff] }
 0x25e   : > { %v11001_v32 = vpop.f32.mrb[114].mxu1  ;;  %v14290_v54 = vld [vmem:[#allocation13_spill] sm:$0xff]  ;;  %v14295_v58 = vld [vmem:[#allocation60_spill] sm:$0xff] }
 0x25f   : > { %v10993_v45 = vadd.f32 %v14285_v56, %v1801_v49  ;;  %8528 = vmatmul.mubr.msk.bf16.gmra.mrb[20].mxu0 %vm1003_vm13, %v14286_v7  ;;  %14288 = vst [vmem:[#allocation51_spill] sm:$0xff] %v11001_v32  ;;  %v8484_v44 = vpop.f32.mrb[115].mxu1  ;;  %v14291_v49 = vld [vmem:[#allocation70_spill] sm:$0xff] }
 0x260   : > { %8531 = vmatprep.mubr.msk.bf16.mxu0 %vm9119_vm2, %v14052_v9 }
 0x262   : > { %v1761_v8 = vpop.f32.mrb[172].mxu0 }
 0x263   : > { %v1802_v14 = vadd.f32 %v1761_v8, %v14289_v36  ;;  %v8297_v1 = vpop.f32.mrb[173].mxu0 }
 0x264   : > { %v1764_v42 = vpop.f32.mrb[174].mxu0  ;;  %v11013_v27 = vpop.f32.mrb[116].mxu1 }
 0x265   : > { %v1803_v56 = vadd.f32 %v1764_v42, %v14290_v54  ;;  %v11006_v55 = vadd.f32 %v14291_v49, %v1802_v14  ;;  %v8298_v7 = vpop.f32.mrb[175].mxu0  ;;  %14296 = vst [vmem:[#allocation59_spill] sm:$0xff] %v11013_v27  ;;  %v8487_v8 = vpop.f32.mrb[117].mxu1  ;;  %v14298_v42 = vld [vmem:[#allocation22_spill] sm:$0xff] }
 0x266   : > { %v11017_v44 = vpop.f32.mrb[118].mxu1  ;;  %v14299_v7 = vld [vmem:[#allocation36_spill] sm:$0xff] }
 0x267   : > { %14292 = vst [vmem:[#allocation69_spill] sm:$0xff] %v11006_v55  ;;  %v11009_v15 = vadd.f32 %v14293_v16, %v1803_v56  ;;  %8532 = vmatmul.mubr.msk.bf16.gmra.mrb[24].mxu0 %vm1003_vm13, %v14295_v58  ;;  %14297 = vst [vmem:[#allocation76_spill] sm:$0xff] %v11017_v44  ;;  %v8488_v1 = vpop.f32.mrb[119].mxu1  ;;  %v14300_v56 = vld [vmem:[#allocation21_spill] sm:$0xff]  ;;  %v14304_v55 = vld [vmem:[#allocation83_spill] sm:$0xff] }
 0x268   : > { %8535 = vmatprep.mubr.msk.bf16.mxu0 %vm9119_vm2, %v14052_v9 }
 0x269   : > { %14294 = vst [vmem:[#allocation65_spill] sm:$0xff] %v11009_v15  ;;  %v14302_v15 = vld [vmem:[#allocation17_spill] sm:$0xff] }
 0x26a   : > { %v1769_v36 = vpop.f32.mrb[176].mxu0 }
 0x26b   : > { %v1804_v14 = vadd.f32 %v1769_v36, %v14298_v42  ;;  %v8301_v54 = vpop.f32.mrb[177].mxu0 }
 0x26c   : > { %v1772_v49 = vpop.f32.mrb[178].mxu0  ;;  %v11029_v8 = vpop.f32.mrb[120].mxu1 }
 0x26d   : > { %v1805_v16 = vadd.f32 %v1772_v49, %v14299_v7  ;;  %v11022_v32 = vadd.f32 %v14300_v56, %v1804_v14  ;;  %v8302_v58 = vpop.f32.mrb[179].mxu0  ;;  %14305 = vst [vmem:[#allocation73_spill] sm:$0xff] %v11029_v8  ;;  %v8555_v36 = vpop.f32.mrb[121].mxu1  ;;  %v14307_v49 = vld [vmem:[#allocation33_spill] sm:$0xff] }
 0x26e   : > { %v11033_v1 = vpop.f32.mrb[122].mxu1  ;;  %v14308_v58 = vld [vmem:[#allocation48_spill] sm:$0xff] }
 0x26f   : > { %14301 = vst [vmem:[#allocation72_spill] sm:$0xff] %v11022_v32  ;;  %v11025_v27 = vadd.f32 %v14302_v15, %v1805_v16  ;;  %8536 = vmatmul.mubr.msk.bf16.gmra.mrb[28].mxu0 %vm1003_vm13, %v14304_v55  ;;  %14306 = vst [vmem:[#allocation81_spill] sm:$0xff] %v11033_v1  ;;  %v8556_v54 = vpop.f32.mrb[123].mxu1  ;;  %v14309_v16 = vld [vmem:[#allocation27_spill] sm:$0xff]  ;;  %v14319_v1 = vld [vmem:[#allocation45_spill] sm:$0xff] }
 0x270   : > { %8539 = vmatprep.mubr.msk.bf16.mxu0 %vm9119_vm2, %v14052_v9  ;;  %v14313_v32 = vld [vmem:[#allocation71_spill] sm:$0xff] }
 0x271   : > { %14303 = vst [vmem:[#allocation67_spill] sm:$0xff] %v11025_v27  ;;  %v14311_v27 = vld [vmem:[#allocation38_spill] sm:$0xff] }
 0x272   : > { %v2200_v42 = vpop.f32.mrb[180].mxu0 }
 0x273   : > { %v2319_v14 = vadd.f32 %v2200_v42, %v14307_v49  ;;  %v8369_v7 = vpop.f32.mrb[181].mxu0 }
 0x274   : > { %v2203_v56 = vpop.f32.mrb[182].mxu0  ;;  %v11045_v36 = vpop.f32.mrb[124].mxu1 }
 0x275   : > { %v2320_v15 = vadd.f32 %v2203_v56, %v14308_v58  ;;  %v11038_v44 = vadd.f32 %v14309_v16, %v2319_v14  ;;  %v8370_v55 = vpop.f32.mrb[183].mxu0  ;;  %14314 = vst [vmem:[#allocation20_spill] sm:$0xff] %v11045_v36  ;;  %v8559_v42 = vpop.f32.mrb[125].mxu1  ;;  %v14316_v56 = vld [vmem:[#allocation6_spill] sm:$0xff] }
 0x276   : > { %v11049_v54 = vpop.f32.mrb[126].mxu1  ;;  %v14317_v14 = vld [vmem:[#allocation26_spill] sm:$0xff] }
 0x277   : > { %14310 = vst [vmem:[#allocation78_spill] sm:$0xff] %v11038_v44  ;;  %v11041_v8 = vadd.f32 %v14311_v27, %v2320_v15  ;;  %8540 = vmatmul.mubr.msk.bf16.gmra.mrb[32].mxu0 %vm1003_vm13, %v14313_v32  ;;  %14315 = vst [vmem:[#allocation29_spill] sm:$0xff] %v11049_v54  ;;  %v8560_v7 = vpop.f32.mrb[127].mxu1  ;;  %v510_v58 = vpack.c.bf16 %v14317_v14, %v14316_v56  ;;  %v14318_v16 = vld [vmem:[#allocation42_spill] sm:$0xff] }
 0x278   : > { %8543 = vmatprep.mubr.msk.bf16.mxu0 %vm9119_vm2, %v14052_v9  ;;  %v511_v27 = vpack.c.bf16 %v10759_v24, %v14318_v16  ;;  %v14321_v14 = vld [vmem:[#allocation66_spill] sm:$0xff] }
 0x279   : > { %14312 = vst [vmem:[#allocation86_spill] sm:$0xff] %v11041_v8  ;;  %v2613_v44 = vunpack.c.h.b16 %v510_v58  ;;  %v14322_v57 = vpack.c.bf16 %v14316_v56, %v14321_v14 }
 0x27a   : > { %v2208_v49 = vpop.f32.mrb[184].mxu0  ;;  %v2614_v54 = vunpack.c.l.b16 %v511_v27 }
 0x27b   : > { %v2321_v15 = vadd.f32 %v2208_v49, %v10790_v51  ;;  %v8373_v55 = vpop.f32.mrb[185].mxu0 }
 0x27c   : > { %v2211_v32 = vpop.f32.mrb[186].mxu0  ;;  %v11067_v24 = vpop.f32.mrb[128].mxu1  ;;  %v2619_v58 = vpack.c.b16 %v2614_v54, %v2613_v44 }
 0x27d   : > { %v2322_v36 = vadd.f32 %v2211_v32, %v10801_v29  ;;  %v11058_v8 = vadd.f32 %v14319_v1, %v2321_v15  ;;  %v8374_v42 = vpop.f32.mrb[187].mxu0  ;;  %v8563_v51 = vpop.f32.mrb[129].mxu1 }
 0x27e   : > { %v11071_v29 = vpop.f32.mrb[130].mxu1 }
 0x27f   : > { %v11061_v7 = vadd.f32 %v14320_v35, %v2322_v36  ;;  %8544 = vmatmul.mubr.msk.bf16.gmra.mrb[36].mxu0 %vm1003_vm13, %v14322_v57  ;;  %v8564_v49 = vpop.f32.mrb[131].mxu1 }
 0x280   : > { %8547 = vmatprep.mubr.msk.bf16.mxu0 %vm9119_vm2, %v14052_v9  ;;  %v14323_v49 = vld [vmem:[#allocation9_spill] sm:$0xff] }
 0x282   : > { %v2216_v1 = vpop.f32.mrb[188].mxu0 }
 0x283   : > { %v2323_v16 = vadd.f32 %v2216_v1, %v10824_v11  ;;  %v8377_v35 = vpop.f32.mrb[189].mxu0 }
 0x284   : > { %v2219_v36 = vpop.f32.mrb[190].mxu0  ;;  %v11082_v55 = vpop.f32.mrb[132].mxu1 }
 0x285   : > { %v2324_v27 = vadd.f32 %v2219_v36, %v10827_v19  ;;  %v11076_v56 = vadd.f32 %v10804_v53, %v2323_v16  ;;  %v8378_v57 = vpop.f32.mrb[191].mxu0  ;;  %v8567_v44 = vpop.f32.mrb[133].mxu1 }
 0x286   : > { %v11086_v11 = vpop.f32.mrb[134].mxu1 }
 0x287   : > { %v11079_v15 = vadd.f32 %v10808_v21, %v2324_v27  ;;  %8548 = vmatmul.mubr.msk.bf16.gmra.mrb[40].mxu0 %vm1003_vm13, %v2619_v58  ;;  %v8568_v32 = vpop.f32.mrb[135].mxu1 }
 0x288   : > { %8615 = vmatprep.mubr.msk.bf16.mxu0 %vm9119_vm2, %v14052_v9  ;;  %v14324_v32 = vld [vmem:[#allocation8_spill] sm:$0xff] }
 0x28a   : > { %v2224_v54 = vpop.f32.mrb[192].mxu0 }
 0x28b   : > { %v2325_v19 = vadd.f32 %v2224_v54, %v10846_v41  ;;  %v8381_v53 = vpop.f32.mrb[193].mxu0 }
 0x28c   : > { %v2227_v42 = vpop.f32.mrb[194].mxu0  ;;  %v11098_v58 = vpop.f32.mrb[136].mxu1 }
 0x28d   : > { %v2326_v14 = vadd.f32 %v2227_v42, %v10849_v37  ;;  %v11091_v21 = vadd.f32 %v10833_v52, %v2325_v19  ;;  %v8382_v51 = vpop.f32.mrb[195].mxu0  ;;  %v8571_v41 = vpop.f32.mrb[137].mxu1 }
 0x28e   : > { %v11102_v16 = vpop.f32.mrb[138].mxu1 }
 0x28f   : > { %v11094_v1 = vadd.f32 %v10840_v6, %v2326_v14  ;;  %8616 = vmatmul.mubr.msk.bf16.vlgmr.msra.gmra.mrb[44].mxu0 %vm1003_vm13, %v14323_v49  ;;  %v8572_v37 = vpop.f32.mrb[139].mxu1 }
 0x290   : > { %8619 = vmatprep.mubr.msk.bf16.mxu0 %vm9119_vm2, %v14052_v9  ;;  %v14325_v37 = vld [vmem:[#allocation10_spill] sm:$0xff] }
 0x292   : > { %v2232_v35 = vpop.f32.mrb[196].mxu0 }
 0x293   : > { %v2327_v52 = vadd.f32 %v2232_v35, %v10862_v12  ;;  %v8385_v36 = vpop.f32.mrb[197].mxu0 }
 0x294   : > { %v2235_v27 = vpop.f32.mrb[198].mxu0  ;;  %v11114_v19 = vpop.f32.mrb[140].mxu1 }
 0x295   : > { %v2328_v6 = vadd.f32 %v2235_v27, %v10865_v18  ;;  %v11107_v57 = vadd.f32 %v10853_v38, %v2327_v52  ;;  %v8386_v44 = vpop.f32.mrb[199].mxu0  ;;  %v8575_v12 = vpop.f32.mrb[141].mxu1 }
 0x296   : > { %v11118_v53 = vpop.f32.mrb[142].mxu1 }
 0x297   : > { %v11110_v54 = vadd.f32 %v10857_v5, %v2328_v6  ;;  %8620 = vmatmul.mubr.msk.bf16.gmra.mrb[48].mxu0 %vm1003_vm13, %v14324_v32  ;;  %v8576_v18 = vpop.f32.mrb[143].mxu1 }
 0x298   : > { %8623 = vmatprep.mubr.msk.bf16.mxu0 %vm9119_vm2, %v14052_v9  ;;  %v14326_v18 = vld [vmem:[#allocation11_spill] sm:$0xff] }
 0x29a   : > { %v2240_v42 = vpop.f32.mrb[200].mxu0 }
 0x29b   : > { %v2329_v38 = vadd.f32 %v2240_v42, %v10878_v20  ;;  %v8389_v14 = vpop.f32.mrb[201].mxu0 }
 0x29c   : > { %v2243_v51 = vpop.f32.mrb[202].mxu0  ;;  %v11130_v52 = vpop.f32.mrb[144].mxu1 }
 0x29d   : > { %v2330_v5 = vadd.f32 %v2243_v51, %v10881_v28  ;;  %v11123_v49 = vadd.f32 %v10869_v60, %v2329_v38  ;;  %v8390_v41 = vpop.f32.mrb[203].mxu0  ;;  %v8579_v20 = vpop.f32.mrb[145].mxu1 }
 0x29e   : > { %v11134_v36 = vpop.f32.mrb[146].mxu1 }
 0x29f   : > { %v11126_v35 = vadd.f32 %v10873_v13, %v2330_v5  ;;  %8624 = vmatmul.mubr.msk.bf16.gmra.mrb[52].mxu0 %vm1003_vm13, %v14325_v37  ;;  %v8580_v28 = vpop.f32.mrb[147].mxu1 }
 0x2a0   : > { %8627 = vmatprep.mubr.msk.bf16.mxu0 %vm9119_vm2, %v14052_v9  ;;  %v14327_v28 = vld [vmem:[#allocation14_spill] sm:$0xff] }
 0x2a2   : > { %v2248_v27 = vpop.f32.mrb[204].mxu0 }
 0x2a3   : > { %v2331_v60 = vadd.f32 %v2248_v27, %v10894_v4  ;;  %v8393_v6 = vpop.f32.mrb[205].mxu0 }
 0x2a4   : > { %v2251_v44 = vpop.f32.mrb[206].mxu0  ;;  %v11146_v38 = vpop.f32.mrb[148].mxu1 }
 0x2a5   : > { %v2332_v13 = vadd.f32 %v2251_v44, %v10897_v25  ;;  %v11139_v32 = vadd.f32 %v10885_v2, %v2331_v60  ;;  %v8394_v12 = vpop.f32.mrb[207].mxu0  ;;  %v8583_v4 = vpop.f32.mrb[149].mxu1 }
 0x2a6   : > { %v11150_v14 = vpop.f32.mrb[150].mxu1 }
 0x2a7   : > { %v11142_v42 = vadd.f32 %v10889_v43, %v2332_v13  ;;  %8628 = vmatmul.mubr.msk.bf16.gmra.mrb[56].mxu0 %vm1003_vm13, %v14326_v18  ;;  %v8584_v25 = vpop.f32.mrb[151].mxu1 }
 0x2a8   : > { %8631 = vmatprep.mubr.msk.bf16.mxu0 %vm9119_vm2, %v14052_v9  ;;  %v14328_v25 = vld [vmem:[#allocation7_spill] sm:$0xff] }
 0x2aa   : > { %v2256_v51 = vpop.f32.mrb[208].mxu0 }
 0x2ab   : > { %v2333_v2 = vadd.f32 %v2256_v51, %v10910_v59  ;;  %v8397_v5 = vpop.f32.mrb[209].mxu0 }
 0x2ac   : > { %v2259_v41 = vpop.f32.mrb[210].mxu0  ;;  %v11162_v60 = vpop.f32.mrb[152].mxu1 }
 0x2ad   : > { %v2334_v43 = vadd.f32 %v2259_v41, %v10913_v30  ;;  %v11155_v37 = vadd.f32 %v10901_v3, %v2333_v2  ;;  %v8398_v20 = vpop.f32.mrb[211].mxu0  ;;  %v8587_v59 = vpop.f32.mrb[153].mxu1 }
 0x2ae   : > { %v11166_v6 = vpop.f32.mrb[154].mxu1 }
 0x2af   : > { %v11158_v27 = vadd.f32 %v10905_v34, %v2334_v43  ;;  %8632 = vmatmul.mubr.msk.bf16.gmra.mrb[60].mxu0 %vm1003_vm13, %v14327_v28  ;;  %v8588_v30 = vpop.f32.mrb[155].mxu1 }
 0x2b0   : > { %8635 = vmatprep.mubr.msk.bf16.mxu0 %vm9119_vm2, %v14052_v9  ;;  %v14329_v30 = vld [vmem:[#allocation15_spill] sm:$0xff] }
 0x2b2   : > { %v2264_v44 = vpop.f32.mrb[212].mxu0 }
 0x2b3   : > { %v2335_v3 = vadd.f32 %v2264_v44, %v10926_v61  ;;  %v8401_v13 = vpop.f32.mrb[213].mxu0 }
 0x2b4   : > { %v2267_v12 = vpop.f32.mrb[214].mxu0  ;;  %v11178_v2 = vpop.f32.mrb[156].mxu1  ;;  %v14330_v13 = vld [vmem:[#allocation5_spill] sm:$0xff] }
 0x2b5   : > { %v2336_v34 = vadd.f32 %v2267_v12, %v10929_v50  ;;  %v11171_v18 = vadd.f32 %v10917_v46, %v2335_v3  ;;  %v8402_v4 = vpop.f32.mrb[215].mxu0  ;;  %v8591_v61 = vpop.f32.mrb[157].mxu1  ;;  %v11201_v12 = vsel %vm1425_vm9, %v14330_v13, 0 }
 0x2b6   : > { %v11182_v5 = vpop.f32.mrb[158].mxu1  ;;  %14331 = vst [vmem:[#allocation84_spill] sm:$0xff] %v11201_v12 }
 0x2b7   : > { %v11174_v51 = vadd.f32 %v10921_v63, %v2336_v34  ;;  %8636 = vmatmul.mubr.msk.bf16.gmra.mrb[64].mxu0 %vm1003_vm13, %v14328_v25  ;;  %v8592_v50 = vpop.f32.mrb[159].mxu1 }
 0x2b8   : > { %8639 = vmatprep.mubr.msk.bf16.mxu0 %vm9119_vm2, %v14052_v9 }
 0x2ba   : > { %v2272_v41 = vpop.f32.mrb[216].mxu0 }
 0x2bb   : > { %v2337_v46 = vadd.f32 %v2272_v41, %v10942_v62  ;;  %v8405_v43 = vpop.f32.mrb[217].mxu0  ;;  %v7701_v62 = vld [vmem:[%s13714_s4 + $0x4] sm:$0x7] }
 0x2bc   : > { %v2275_v20 = vpop.f32.mrb[218].mxu0  ;;  %v11194_v3 = vpop.f32.mrb[160].mxu1 }
 0x2bd   : > { %v2338_v63 = vadd.f32 %v2275_v20, %v10945_v33  ;;  %v11187_v28 = vadd.f32 %v10933_v40, %v2337_v46  ;;  %v8406_v59 = vpop.f32.mrb[219].mxu0  ;;  %v8595_v40 = vpop.f32.mrb[161].mxu1 }
 0x2be   : > { %v11206_v33 = vpop.f32.mrb[162].mxu1 }
 0x2bf   : > { %v11190_v44 = vadd.f32 %v10937_v26, %v2338_v63  ;;  %8640 = vmatmul.mubr.msk.bf16.gmra.mrb[68].mxu0 %vm1003_vm13, %v14329_v30  ;;  %v4485_v26 = vand.u32 %v7701_v62, %v11201_v12  ;;  %v8596_v4 = vpop.f32.mrb[163].mxu1  ;;  %v14332_v63 = vld [vmem:[#allocation16_spill] sm:$0xff]  ;;  %v14346_v12 = vld [vmem:[#allocation34_spill] sm:$0xff] }
 0x2c0   : > { %8643 = vmatprep.mubr.msk.bf16.mxu0 %vm9119_vm2, %v14052_v9 }
 0x2c1   : > { %8675 = vmatprep.subr.bf16.mxu1 %v4485_v26 }
 0x2c2   : > { %v2280_v34 = vpop.f32.mrb[220].mxu0  ;;  %8676 = vmatpush3.bf16.msra.mxu1 %v4485_v26 }
 0x2c3   : > { %v2339_v25 = vadd.f32 %v2280_v34, %v10958_v31  ;;  %v8409_v61 = vpop.f32.mrb[221].mxu0 }
 0x2c4   : > { %v2283_v41 = vpop.f32.mrb[222].mxu0  ;;  %v11218_v59 = vpop.f32.mrb[164].mxu1 }
 0x2c5   : > { %v2340_v50 = vadd.f32 %v2283_v41, %v10961_v10  ;;  %v11211_v46 = vadd.f32 %v10949_v48, %v2339_v25  ;;  %v8410_v43 = vpop.f32.mrb[223].mxu0  ;;  %v8599_v31 = vpop.f32.mrb[165].mxu1  ;;  %v14333_v25 = vld [vmem:[#allocation18_spill] sm:$0xff] }
 0x2c6   : > { %v11222_v30 = vpop.f32.mrb[166].mxu1  ;;  %v14335_v31 = vld [vmem:[#allocation46_spill] sm:$0xff] }
 0x2c7   : > { %v11214_v20 = vadd.f32 %v10953_v17, %v2340_v50  ;;  %8644 = vmatmul.mubr.msk.bf16.gmra.mrb[72].mxu0 %vm1003_vm13, %v14332_v63  ;;  %v8600_v10 = vpop.f32.mrb[167].mxu1 }
 0x2c8   : > { %8647 = vmatprep.mubr.msk.bf16.mxu0 %vm9119_vm2, %v14052_v9 }
 0x2ca   : > { %v2288_v62 = vpop.f32.mrb[224].mxu0 }
 0x2cb   : > { %v2341_v48 = vadd.f32 %v2288_v62, %v10974_v47  ;;  %v8413_v13 = vpop.f32.mrb[225].mxu0 }
 0x2cc   : > { %v2291_v40 = vpop.f32.mrb[226].mxu0  ;;  %v11234_v61 = vpop.f32.mrb[168].mxu1 }
 0x2cd   : > { %v2342_v17 = vadd.f32 %v2291_v40, %v10977_v0  ;;  %v11227_v26 = vadd.f32 %v10965_v22, %v2341_v48  ;;  %v8414_v34 = vpop.f32.mrb[227].mxu0  ;;  %v8603_v47 = vpop.f32.mrb[169].mxu1  ;;  %v14336_v48 = vld [vmem:[#allocation62_spill] sm:$0xff]  ;;  %v14337_v40 = vld [vmem:[#allocation25_spill] sm:$0xff] }
 0x2ce   : > { %v11238_v41 = vpop.f32.mrb[170].mxu1  ;;  %v14340_v47 = vld [vmem:[#allocation69_spill] sm:$0xff] }
 0x2cf   : > { %v11230_v4 = vadd.f32 %v10969_v23, %v2342_v17  ;;  %8648 = vmatmul.mubr.msk.bf16.gmra.mrb[76].mxu0 %vm1003_vm13, %v14333_v25  ;;  %14334 = vst [vmem:[#allocation82_spill] sm:$0xff] %v11238_v41  ;;  %v8604_v0 = vpop.f32.mrb[171].mxu1  ;;  %v14364_v41 = vld [vmem:[#allocation32_spill] sm:$0xff] }
 0x2d0   : > { %8651 = vmatprep.mubr.msk.bf16.mxu0 %vm9119_vm2, %v14052_v9 }
 0x2d2   : > { %v2296_v50 = vpop.f32.mrb[228].mxu0 }
 0x2d3   : > { %v2343_v22 = vadd.f32 %v2296_v50, %v10990_v39  ;;  %v8417_v43 = vpop.f32.mrb[229].mxu0 }
 0x2d4   : > { %v2299_v63 = vpop.f32.mrb[230].mxu0  ;;  %v11250_v17 = vpop.f32.mrb[172].mxu1  ;;  %v14341_v43 = vld [vmem:[#allocation65_spill] sm:$0xff] }
 0x2d5   : > { %v2344_v23 = vadd.f32 %v2299_v63, %v10993_v45  ;;  %v11243_v62 = vadd.f32 %v14335_v31, %v2343_v22  ;;  %v8418_v10 = vpop.f32.mrb[231].mxu0  ;;  %14338 = vst [vmem:[#allocation31_spill] sm:$0xff] %v11250_v17  ;;  %v8607_v39 = vpop.f32.mrb[173].mxu1  ;;  %v14353_v17 = vld [vmem:[#allocation76_spill] sm:$0xff] }
 0x2d6   : > { %v11254_v34 = vpop.f32.mrb[174].mxu1 }
 0x2d7   : > { %v11246_v13 = vadd.f32 %v14336_v48, %v2344_v23  ;;  %8652 = vmatmul.mubr.msk.bf16.gmra.mrb[80].mxu0 %vm1003_vm13, %v14337_v40  ;;  %14339 = vst [vmem:[#allocation19_spill] sm:$0xff] %v11254_v34  ;;  %v8608_v45 = vpop.f32.mrb[175].mxu1  ;;  %v14342_v23 = vld [vmem:[#allocation57_spill] sm:$0xff]  ;;  %v14344_v48 = vld [vmem:[#allocation51_spill] sm:$0xff] }
 0x2d8   : > { %8655 = vmatprep.mubr.msk.bf16.mxu0 %vm9119_vm2, %v14052_v9 }
 0x2da   : > { %v2304_v25 = vpop.f32.mrb[232].mxu0 }
 0x2db   : > { %v2345_v50 = vadd.f32 %v2304_v25, %v14340_v47  ;;  %v8421_v0 = vpop.f32.mrb[233].mxu0 }
 0x2dc   : > { %v2307_v22 = vpop.f32.mrb[234].mxu0  ;;  %v11266_v39 = vpop.f32.mrb[176].mxu1 }
 0x2dd   : > { %v2346_v63 = vadd.f32 %v2307_v22, %v14341_v43  ;;  %v11259_v31 = vadd.f32 %v14342_v23, %v2345_v50  ;;  %v8422_v10 = vpop.f32.mrb[235].mxu0  ;;  %14347 = vst [vmem:[#allocation30_spill] sm:$0xff] %v11266_v39  ;;  %v8611_v25 = vpop.f32.mrb[177].mxu1  ;;  %v14349_v22 = vld [vmem:[#allocation72_spill] sm:$0xff] }
 0x2de   : > { %v11270_v45 = vpop.f32.mrb[178].mxu1  ;;  %v14350_v10 = vld [vmem:[#allocation67_spill] sm:$0xff] }
 0x2df   : > { %14343 = vst [vmem:[#allocation24_spill] sm:$0xff] %v11259_v31  ;;  %v11262_v40 = vadd.f32 %v14344_v48, %v2346_v63  ;;  %8656 = vmatmul.mubr.msk.bf16.gmra.mrb[84].mxu0 %vm1003_vm13, %v14346_v12  ;;  %14348 = vst [vmem:[#allocation35_spill] sm:$0xff] %v11270_v45  ;;  %v8612_v0 = vpop.f32.mrb[179].mxu1  ;;  %v14351_v48 = vld [vmem:[#allocation59_spill] sm:$0xff] }
 0x2e0   : > { %8659 = vmatprep.mubr.msk.bf16.mxu0 %vm9119_vm2, %v14052_v9  ;;  %v14356_v0 = vld [vmem:[#allocation78_spill] sm:$0xff] }
 0x2e1   : > { %14345 = vst [vmem:[#allocation85_spill] sm:$0xff] %v11262_v40  ;;  %v14355_v40 = vld [vmem:[#allocation43_spill] sm:$0xff] }
 0x2e2   : > { %v2312_v47 = vpop.f32.mrb[236].mxu0 }
 0x2e3   : > { %v2347_v50 = vadd.f32 %v2312_v47, %v14349_v22  ;;  %v8425_v43 = vpop.f32.mrb[237].mxu0 }
 0x2e4   : > { %v2315_v23 = vpop.f32.mrb[238].mxu0  ;;  %v14357_v43 = vld [vmem:[#allocation28_spill] sm:$0xff] }
 0x2e5   : > { %v2348_v63 = vadd.f32 %v2315_v23, %v14350_v10  ;;  %v11275_v34 = vadd.f32 %v14351_v48, %v2347_v50  ;;  %v8426_v12 = vpop.f32.mrb[239].mxu0  ;;  %v7668_v45 = vrot.slane %v14357_v43, 9  ;;  %v14358_v10 = vld [vmem:[#allocation86_spill] sm:$0xff]  ;;  %v14359_v48 = vld [vmem:[#allocation73_spill] sm:$0xff] }
 0x2e7   : > { %14352 = vst [vmem:[#allocation88_spill] sm:$0xff] %v11275_v34  ;;  %v11278_v39 = vadd.f32 %v14353_v17, %v2348_v63  ;;  %8660 = vmatmul.mubr.msk.bf16.gmra.mrb[88].mxu0 %vm1003_vm13, %v14355_v40  ;;  %v14360_v63 = vld [vmem:[#allocation81_spill] sm:$0xff]  ;;  %v14362_v34 = vld [vmem:[#allocation40_spill] sm:$0xff] }
 0x2e8   : > { %8663 = vmatprep.mubr.msk.bf16.mxu0 %vm9119_vm2, %v14052_v9  ;;  %v14361_v40 = vld [vmem:[#allocation37_spill] sm:$0xff] }
 0x2e9   : > { %14354 = vst [vmem:[#allocation89_spill] sm:$0xff] %v11278_v39  ;;  %v14363_v31 = vcombine.low %v14361_v40, %v14362_v34  ;;  %v14368_v34 = vld [vmem:[#allocation20_spill] sm:$0xff] }
 0x2ea   : > { %v2666_v25 = vpop.f32.mrb[240].mxu0 }
 0x2eb   : > { %v2785_v47 = vadd.f32 %v2666_v25, %v14356_v0  ;;  %v8493_v22 = vpop.f32.mrb[241].mxu0  ;;  %v14365_v25 = vrot.slane %v14364_v41, 5  ;;  %v14369_v41 = vld [vmem:[#allocation29_spill] sm:$0xff] }
 0x2ec   : > { %v2669_v23 = vpop.f32.mrb[242].mxu0 }
 0x2ed   : > { %v2786_v50 = vadd.f32 %v2669_v23, %v14358_v10  ;;  %v11288_v12 = vadd.f32 %v14359_v48, %v2785_v47  ;;  %v8494_v17 = vpop.f32.mrb[243].mxu0  ;;  %v3060_v22 = vsel %vm9883_vm11, %v7668_v45, %v14365_v25  ;;  %v14367_v47 = vld [vmem:[#allocation41_spill] sm:$0xff] }
 0x2ee   : > { %v7671_v23 = vcombine.low %v14367_v47, %v3060_v22 }
 0x2ef   : > { %v11291_v39 = vadd.f32 %v14360_v63, %v2786_v50  ;;  %8664 = vmatmul.mubr.msk.bf16.gmra.mrb[92].mxu0 %vm1003_vm13, %v14363_v31 }
 0x2f0   : > { %8667 = vmatprep.mubr.msk.bf16.mxu0 %vm9119_vm2, %v14052_v9 }
 0x2f2   : > { %v2674_v43 = vpop.f32.mrb[244].mxu0 }
 0x2f3   : > { %v2787_v10 = vadd.f32 %v2674_v43, %v11058_v8  ;;  %v8497_v50 = vpop.f32.mrb[245].mxu0 }
 0x2f4   : > { %v2677_v48 = vpop.f32.mrb[246].mxu0  ;;  %v14371_v50 = vld [vmem:[#allocation49_spill] sm:$0xff] }
 0x2f5   : > { %v2788_v17 = vadd.f32 %v2677_v48, %v11061_v7  ;;  %v11307_v63 = vadd.f32 %v14368_v34, %v2787_v10  ;;  %v8498_v31 = vpop.f32.mrb[247].mxu0  ;;  %v14370_v10 = vld [vmem:[#allocation53_spill] sm:$0xff] }
 0x2f7   : > { %v11310_v40 = vadd.f32 %v14369_v41, %v2788_v17  ;;  %8668 = vmatmul.mubr.msk.bf16.gmra.mrb[96].mxu0 %vm1003_vm13, %v7671_v23  ;;  %v14372_v23 = vcombine.low %v14370_v10, %v14371_v50 }
 0x2f8   : > { %8671 = vmatprep.mubr.msk.bf16.mxu0 %vm9119_vm2, %v14052_v9 }
 0x2fa   : > { %v2682_v45 = vpop.f32.mrb[248].mxu0 }
 0x2fb   : > { %v2789_v25 = vadd.f32 %v2682_v45, %v11076_v56  ;;  %v8501_v8 = vpop.f32.mrb[249].mxu0 }
 0x2fc   : > { %v2685_v0 = vpop.f32.mrb[250].mxu0 }
 0x2fd   : > { %v2790_v22 = vadd.f32 %v2685_v0, %v11079_v15  ;;  %v11318_v7 = vadd.f32 %v11067_v24, %v2789_v25  ;;  %v8502_v43 = vpop.f32.mrb[251].mxu0 }
 0x2ff   : > { %v11321_v47 = vadd.f32 %v11071_v29, %v2790_v22  ;;  %8672 = vmatmul.mubr.msk.bf16.gmra.mrb[100].mxu0 %vm1003_vm13, %v14372_v23 }
 0x302   : > { %v2690_v9 = vpop.f32.mrb[252].mxu0 }
 0x303   : > { %v2791_v48 = vadd.f32 %v2690_v9, %v11091_v21  ;;  %v8505_v56 = vpop.f32.mrb[253].mxu0 }
 0x304   : > { %v2693_v17 = vpop.f32.mrb[254].mxu0 }
 0x305   : > { %v2792_v34 = vadd.f32 %v2693_v17, %v11094_v1  ;;  %v11330_v15 = vadd.f32 %v11082_v55, %v2791_v48  ;;  %v8506_v24 = vpop.f32.mrb[255].mxu0 }
 0x307   : > { %v11333_v31 = vadd.f32 %v11086_v11, %v2792_v34 }
 0x30a   : > { %v2698_v29 = vpop.f32.mrb[0].mxu0 }
 0x30b   : > { %v2793_v41 = vadd.f32 %v2698_v29, %v11107_v57  ;;  %v8509_v45 = vpop.f32.mrb[1].mxu0 }
 0x30c   : > { %v2701_v25 = vpop.f32.mrb[2].mxu0 }
 0x30d   : > { %v2794_v8 = vadd.f32 %v2701_v25, %v11110_v54  ;;  %v11338_v21 = vadd.f32 %v11098_v58, %v2793_v41  ;;  %v8510_v0 = vpop.f32.mrb[3].mxu0 }
 0x30f   : > { %v11341_v1 = vadd.f32 %v11102_v16, %v2794_v8 }
 0x312   : > { %v2706_v55 = vpop.f32.mrb[4].mxu0 }
 0x313   : > { %v2795_v22 = vadd.f32 %v2706_v55, %v11123_v49  ;;  %v8513_v43 = vpop.f32.mrb[5].mxu0 }
 0x314   : > { %v2709_v11 = vpop.f32.mrb[6].mxu0 }
 0x315   : > { %v2796_v10 = vadd.f32 %v2709_v11, %v11126_v35  ;;  %v11346_v57 = vadd.f32 %v11114_v19, %v2795_v22  ;;  %v8514_v50 = vpop.f32.mrb[7].mxu0 }
 0x317   : > { %v11349_v54 = vadd.f32 %v11118_v53, %v2796_v10 }
 0x31a   : > { %v2714_v58 = vpop.f32.mrb[8].mxu0 }
 0x31b   : > { %v2797_v23 = vadd.f32 %v2714_v58, %v11139_v32  ;;  %v8517_v9 = vpop.f32.mrb[9].mxu0 }
 0x31c   : > { %v2717_v16 = vpop.f32.mrb[10].mxu0 }
 0x31d   : > { %v2798_v48 = vadd.f32 %v2717_v16, %v11142_v42  ;;  %v11354_v49 = vadd.f32 %v11130_v52, %v2797_v23  ;;  %v8518_v56 = vpop.f32.mrb[11].mxu0 }
 0x31f   : > { %v11357_v35 = vadd.f32 %v11134_v36, %v2798_v48 }
 0x322   : > { %v2722_v19 = vpop.f32.mrb[12].mxu0 }
 0x323   : > { %v2799_v17 = vadd.f32 %v2722_v19, %v11155_v37  ;;  %v8521_v34 = vpop.f32.mrb[13].mxu0 }
 0x324   : > { %v2725_v53 = vpop.f32.mrb[14].mxu0 }
 0x325   : > { %v2800_v24 = vadd.f32 %v2725_v53, %v11158_v27  ;;  %v11362_v32 = vadd.f32 %v11146_v38, %v2799_v17  ;;  %v8522_v29 = vpop.f32.mrb[15].mxu0 }
 0x327   : > { %v11365_v42 = vadd.f32 %v11150_v14, %v2800_v24  ;;  %v14374_v24 = vld [vmem:[#allocation24_spill] sm:$0xff] }
 0x32a   : > { %v2730_v52 = vpop.f32.mrb[16].mxu0 }
 0x32b   : > { %v2801_v41 = vadd.f32 %v2730_v52, %v11171_v18  ;;  %v8525_v45 = vpop.f32.mrb[17].mxu0 }
 0x32c   : > { %v2733_v36 = vpop.f32.mrb[18].mxu0 }
 0x32d   : > { %v2802_v25 = vadd.f32 %v2733_v36, %v11174_v51  ;;  %v11370_v37 = vadd.f32 %v11162_v60, %v2801_v41  ;;  %v8526_v8 = vpop.f32.mrb[19].mxu0  ;;  %v14375_v41 = vld [vmem:[#allocation85_spill] sm:$0xff]  ;;  %v14376_v36 = vld [vmem:[#allocation31_spill] sm:$0xff] }
 0x32e   : > { %v14377_v8 = vld [vmem:[#allocation19_spill] sm:$0xff] }
 0x32f   : > { %v11373_v27 = vadd.f32 %v11166_v6, %v2802_v25 }
 0x332   : > { %v2738_v38 = vpop.f32.mrb[20].mxu0 }
 0x333   : > { %v2803_v0 = vadd.f32 %v2738_v38, %v11187_v28  ;;  %v8529_v55 = vpop.f32.mrb[21].mxu0 }
 0x334   : > { %v2741_v14 = vpop.f32.mrb[22].mxu0 }
 0x335   : > { %v2804_v22 = vadd.f32 %v2741_v14, %v11190_v44  ;;  %v11378_v18 = vadd.f32 %v11178_v2, %v2803_v0  ;;  %v8530_v43 = vpop.f32.mrb[23].mxu0  ;;  %v3830_v0 = vld [vmem:[%s13714_s4] sm:$0x7]  ;;  %v14378_v14 = vld [vmem:[#allocation84_spill] sm:$0xff] }
 0x336   : > { %v14379_v43 = vld [vmem:[#allocation88_spill] sm:$0xff] }
 0x337   : > { %v11381_v51 = vadd.f32 %v11182_v5, %v2804_v22  ;;  %v11420_v22 = vand.u32 %v14378_v14, %v3830_v0 }
 0x339   : > { %8697 = vmatprep.subr.bf16.mxu1 %v11420_v22 }
 0x33a   : > { %v2746_v60 = vpop.f32.mrb[24].mxu0 }
 0x33b   : > { %v2805_v11 = vadd.f32 %v2746_v60, %v11211_v46  ;;  %v8533_v10 = vpop.f32.mrb[25].mxu0 }
 0x33c   : > { %v2749_v6 = vpop.f32.mrb[26].mxu0  ;;  %v11423_v10 = vstv %s7689_s15 }
 0x33d   : > { %v2806_v50 = vadd.f32 %v2749_v6, %v11214_v20  ;;  %v11386_v28 = vadd.f32 %v11194_v3, %v2805_v11  ;;  %v8534_v58 = vpop.f32.mrb[27].mxu0  ;;  %vm3325_vm2 = vcmp.ge.s32.totalorder %v11423_v10, 0  ;;  %vm3335_vm13 = vcmp.lt.s32.totalorder %v11423_v10, 40 }
 0x33e   : > { %vm11437_vm14 = vmand %vm3325_vm2, %vm3335_vm13  ;;  %vm3840_vm2 = vsmask.f32 3336  ;;  %vm3842_vm13 = vsmask.f32 5392 }
 0x33f   : > { %v11389_v44 = vadd.f32 %v11206_v33, %v2806_v50  ;;  %v14380_v50 = vld [vmem:[#allocation89_spill] sm:$0xff] }
 0x342   : > { %v2754_v2 = vpop.f32.mrb[28].mxu0 }
 0x343   : > { %v2807_v23 = vadd.f32 %v2754_v2, %v11227_v26  ;;  %v8537_v9 = vpop.f32.mrb[29].mxu0  ;;  %v14381_v2 = vld [vmem:[#allocation30_spill] sm:$0xff] }
 0x344   : > { %v2757_v5 = vpop.f32.mrb[30].mxu0 }
 0x345   : > { %v2808_v16 = vadd.f32 %v2757_v5, %v11230_v4  ;;  %v11394_v46 = vadd.f32 %v11218_v59, %v2807_v23  ;;  %v8538_v48 = vpop.f32.mrb[31].mxu0  ;;  %v14373_v4 = vld [vmem:[#allocation82_spill] sm:$0xff] }
 0x347   : > { %v11397_v20 = vadd.f32 %v11222_v30, %v2808_v16  ;;  %v14382_v16 = vld [vmem:[#allocation35_spill] sm:$0xff] }
 0x34a   : > { %v2762_v3 = vpop.f32.mrb[32].mxu0 }
 0x34b   : > { %v2809_v56 = vadd.f32 %v2762_v3, %v11243_v62  ;;  %v8541_v33 = vpop.f32.mrb[33].mxu0 }
 0x34c   : > { %v2765_v19 = vpop.f32.mrb[34].mxu0 }
 0x34d   : > { %v2810_v17 = vadd.f32 %v2765_v19, %v11246_v13  ;;  %v11402_v26 = vadd.f32 %v11234_v61, %v2809_v56  ;;  %v8542_v34 = vpop.f32.mrb[35].mxu0  ;;  %v3318_v13 = vlaneseq  ;;  %v11445_v19 = vld [vmem:[%s13713_s3] ss:$0 sm:$0xff] }
 0x34e   : > { %v9120_v34 = vmov 1983009808  }
 0x34f   : > { %v11405_v53 = vadd.f32 %v14373_v4, %v2810_v17  ;;  %v3319_v38 = vshrl.u32 %v3318_v13, 7  ;;  %v3640_v4 = vunpack.c.l.s4 %v9120_v34 }
 0x351   : > { %v11430_v5 = vadd.s32 4294967295, %v3319_v38  ;;  %v3321_v3 = vadd.s32 16, %v3319_v38 }
 0x352   : > { %v2770_v59 = vpop.f32.mrb[36].mxu0 }
 0x353   : > { %v2811_v29 = vadd.f32 %v2770_v59, %v14374_v24  ;;  %v8545_v30 = vpop.f32.mrb[37].mxu0  ;;  %vm3355_vm8 = vcmp.ge.s32.totalorder %v11430_v5, 0 }
 0x354   : > { %v2773_v52 = vpop.f32.mrb[38].mxu0  ;;  %vm3358_vm9 = vmand %vm11437_vm14, %vm3355_vm8 }
 0x355   : > { %v2812_v45 = vadd.f32 %v2773_v52, %v14375_v41  ;;  %v11410_v62 = vadd.f32 %v14376_v36, %v2811_v29  ;;  %v8546_v25 = vpop.f32.mrb[39].mxu0  ;;  %v11452_v29 = vadd.s32 4294967295, %v3321_v3  ;;  %v11455_v52 = vstv %s7406_s18  ;;  %s7404_s18 = sshll.u32 %s14783_s17, 3 }
 0x356   : > { %v3641_v25 = vunpack.c.0.s8 %v3640_v4  ;;  %v3310_v4 = vadd.s32 2, %v11423_v10  ;;  %s13659_s27 = scalar_lea.vmem %s13716_s6, %s7404_s18 }
 0x357   : > { %v11414_v61 = vadd.f32 %v14377_v8, %v2812_v45  ;;  %vm3390_vm10 = vcmp.lt.s32.totalorder %v11452_v29, 20 }
 0x358   : > { %vm3393_vm3 = vmand %vm11437_vm14, %vm3390_vm10 }
 0x35a   : > { %v2778_v55 = vpop.f32.mrb[40].mxu0 }
 0x35b   : > { %v2813_v60 = vadd.f32 %v2778_v55, %v14379_v43  ;;  %v8549_v11 = vpop.f32.mrb[41].mxu0  ;;  %v11465_v43 = vsub.s32 %v3641_v25, %v3319_v38 }
 0x35c   : > { %v2781_v6 = vpop.f32.mrb[42].mxu0 }
 0x35d   : > { %v2814_v58 = vadd.f32 %v2781_v6, %v14380_v50  ;;  %v11428_v23 = vadd.f32 %v14381_v2, %v2813_v60  ;;  %v8550_v9 = vpop.f32.mrb[43].mxu0 }
 0x35f   : > { %v11435_v48 = vadd.f32 %v14382_v16, %v2814_v58 }
 0x362   : > { %v3121_v33 = vpop.f32.mrb[44].mxu0 }
 0x363   : > { %v3240_v17 = vadd.f32 %v3121_v33, %v11288_v12  ;;  %v8617_v59 = vpop.f32.mrb[45].mxu0  ;;  %v3309_v12 = vadd.s32 1, %v11423_v10 }
 0x364   : > { %v3124_v24 = vpop.f32.mrb[46].mxu0 }
 0x365   : > { %v3277_v30 = vadd.f32 %v11445_v19, %v3240_v17  ;;  %v3241_v41 = vadd.f32 %v3124_v24, %v11291_v39  ;;  %v8618_v45 = vpop.f32.mrb[47].mxu0  ;;  %vm3326_vm12 = vcmp.ge.s32.totalorder %v3309_v12, 0  ;;  %vm3336_vm15 = vcmp.lt.s32.totalorder %v3309_v12, 40 }
 0x366   : > { %vm11472_vm4 = vmand %vm3326_vm12, %vm3336_vm15 }
 0x367   : > { %v3481_v36 = vsel %vm3358_vm9, %v3277_v30, 0.0  ;;  %v3278_v13 = vadd.f32 %v11445_v19, %v3241_v41  ;;  %vm3361_vm5 = vmand %vm11472_vm4, %vm3355_vm8  ;;  %vm3337_vm9 = vcmp.lt.s32.totalorder %v3310_v4, 40 }
 0x368   : > { %v3542_v8 = vmul.f32 %v11455_v52, %v3481_v36  ;;  %vm3511_vm11 = vcmp.ge.f32.partialorder %v3481_v36, 0.0  ;;  %vm3841_vm12 = vmor %vm3839_vm7, %vm3840_vm2 }
 0x369   : > { %v3482_v0 = vsel %vm11437_vm14, %v3278_v13, 0.0  ;;  %vm3327_vm14 = vcmp.ge.s32.totalorder %v3310_v4, 0  ;;  %vm3396_vm15 = vmand %vm11472_vm4, %vm3390_vm10 }
 0x36a   : > { %vm3512_vm1 = vcmp.ge.f32.partialorder %v3482_v0, 0.0  ;;  %v3543_v39 = vmul.f32 %v11455_v52, %v3482_v0  ;;  %v3129_v55 = vpop.f32.mrb[48].mxu0  ;;  %v3572_v6 = vsel %vm3511_vm11, %v3481_v36, %v3542_v8 }
 0x36b   : > { %v3242_v60 = vadd.f32 %v3129_v55, %v11307_v63  ;;  %v8621_v11 = vpop.f32.mrb[49].mxu0 }
 0x36c   : > { %v3573_v50 = vsel %vm3512_vm1, %v3482_v0, %v3543_v39  ;;  %v3132_v58 = vpop.f32.mrb[50].mxu0 }
 0x36d   : > { %v3602_v9 = vpack.c.bf16 %v3573_v50, %v3572_v6  ;;  %v7693_v16 = vpack.c.bf16 %v3573_v50, %v3573_v50  ;;  %v3279_v38 = vadd.f32 %v11445_v19, %v3242_v60  ;;  %v3243_v3 = vadd.f32 %v3132_v58, %v11310_v40  ;;  %v8622_v63 = vpop.f32.mrb[51].mxu0 }
 0x36f   : > { %v11479_v33 = vrot.slane %v3602_v9, %v11465_v43  ;;  %v3483_v56 = vsel %vm3393_vm3, %v3279_v38, 0.0  ;;  %v3280_v17 = vadd.f32 %v11445_v19, %v3243_v3  ;;  %v11489_v40 = vrot.slane %v7693_v16, %v11465_v43  ;;  %vm11526_vm3 = vmor %vm3841_vm12, %vm3842_vm13 }
 0x370   : > { %vm3513_vm6 = vcmp.ge.f32.partialorder %v3483_v56, 0.0  ;;  %v3544_v34 = vmul.f32 %v11455_v52, %v3483_v56 }
 0x371   : > { %14387 = vst [vmem:[#allocation91_spill] sm:$0xff] %v11479_v33  ;;  %14388 = vst [vmem:[#allocation90_spill] sm:$0xff] %v11489_v40  ;;  %v11493_v59 = vcombine.high %v11479_v33, %v11479_v33  ;;  %v3847_v24 = vshrl.u32 %v11479_v33, 16  ;;  %v3484_v41 = vsel %vm3361_vm5, %v3280_v17, 0.0  ;;  %v3850_v12 = vshll.u32 %v11479_v33, 16 }
 0x372   : > { %v3574_v30 = vsel %vm3513_vm6, %v3483_v56, %v3544_v34  ;;  %v3137_v45 = vpop.f32.mrb[52].mxu0  ;;  %v3545_v11 = vmul.f32 %v11455_v52, %v3484_v41  ;;  %v3866_v9 = vshll.u32 %v11489_v40, 16  ;;  %vm3514_vm11 = vcmp.ge.f32.partialorder %v3484_v41, 0.0 }
 0x373   : > { %v3603_v36 = vpack.c.bf16 %v3574_v30, %v3574_v30  ;;  %v3244_v25 = vadd.f32 %v3137_v45, %v11318_v7  ;;  %v8625_v13 = vpop.f32.mrb[53].mxu0  ;;  %v3849_v8 = vrot.slane %v3847_v24, 6  ;;  %v3856_v0 = vshll.u32 %v11493_v59, 16 }
 0x374   : > { %v3140_v39 = vpop.f32.mrb[54].mxu0  ;;  %v3852_v55 = vrot.slane %v3850_v12, 7  ;;  %v3860_v60 = vshrl.u32 %v11493_v59, 16  ;;  %v3870_v56 = vshrl.u32 %v11489_v40, 16  ;;  %v11521_v17 = vcombine.high %v11489_v40, %v11489_v40 }
 0x375   : > { %v3281_v6 = vadd.f32 %v11445_v19, %v3244_v25  ;;  %v3245_v50 = vadd.f32 %v3140_v39, %v11321_v47  ;;  %v8626_v58 = vpop.f32.mrb[55].mxu0  ;;  %v11505_v7 = vrot.slane %v3603_v36, %v11465_v43  ;;  %v11509_v16 = vrot.slane %v3856_v0, 7 }
 0x376   : > { %v3862_v38 = vrot.slane %v3860_v60, 6  ;;  %v3853_v47 = vor.u32 %v3852_v55, %v3849_v8  ;;  %14390 = vst [vmem:[#allocation44_spill] sm:$0xff] %v11521_v17  ;;  %v3311_v24 = vadd.s32 3, %v11423_v10  ;;  %v3575_v30 = vsel %vm3514_vm11, %v3484_v41, %v3545_v11 }
 0x377   : > { %14389 = vst [vmem:[#allocation92_spill] sm:$0xff] %v11505_v7  ;;  %v3485_v3 = vsel %vm11472_vm4, %v3281_v6, 0.0  ;;  %v3282_v63 = vadd.f32 %v11445_v19, %v3245_v50  ;;  %vm3844_vm5 = vsmask.f32 7448  ;;  %v11530_v2 = vrot.slane %v3866_v9, 7  ;;  %vm11538_vm4 = vmand %vm3327_vm14, %vm3337_vm9 }
 0x378   : > { %vm3515_vm1 = vcmp.ge.f32.partialorder %v3485_v3, 0.0  ;;  %v3546_v34 = vmul.f32 %v11455_v52, %v3485_v3  ;;  %v11534_v12 = vcombine.high %v11505_v7, %v11505_v7  ;;  %v3863_v41 = vor.u32 %v3862_v38, %v11509_v16  ;;  %vm11546_vm6 = vmor %vm11526_vm3, %vm3844_vm5 }
 0x379   : > { %v3486_v25 = vsel %vm3396_vm15, %v3282_v63, 0.0  ;;  %v3854_v60 = vrot.slane %v3853_v47, 2  ;;  %v3872_v11 = vrot.slane %v3870_v56, 6  ;;  %v14396_v50 = vmov 0  ;;  %vm3364_vm13 = vmand %vm11538_vm4, %vm3355_vm8 }
 0x37a   : > { %14393 = vst [vmem:[#allocation79_spill] sm:$0xff] %v11534_v12  ;;  %v3576_v36 = vsel %vm3515_vm1, %v3485_v3, %v3546_v34  ;;  %v3145_v13 = vpop.f32.mrb[56].mxu0  ;;  %v14397_v50 = vsel %vm11546_vm6, 4294967295, %v14396_v50  ;;  %v3876_v4 = vshll.u32 %v11521_v17, 16  ;;  %vm3328_vm7 = vcmp.ge.s32.totalorder %v3311_v24, 0 }
 0x37b   : > { %v3604_v0 = vpack.c.bf16 %v3576_v36, %v3575_v30  ;;  %v3246_v39 = vadd.f32 %v3145_v13, %v11330_v15  ;;  %v8629_v55 = vpop.f32.mrb[57].mxu0  ;;  %14398 = vst [vmem:[#allocation47_spill] sm:$0xff] %v14397_v50  ;;  %vm3338_vm2 = vcmp.lt.s32.totalorder %v3311_v24, 40  ;;  %v7694_v58 = vpack.c.bf16 %v3576_v36, %v3576_v36 }
 0x37c   : > { %v3148_v6 = vpop.f32.mrb[58].mxu0  ;;  %v3547_v15 = vmul.f32 %v11455_v52, %v3486_v25  ;;  %vm3516_vm14 = vcmp.ge.f32.partialorder %v3486_v25, 0.0  ;;  %v3864_v47 = vrot.slane %v3863_v41, 2  ;;  %v3880_v56 = vshrl.u32 %v11521_v17, 16  ;;  %vm11588_vm12 = vmand %vm3328_vm7, %vm3338_vm2 }
 0x37d   : > { %v11552_v9 = vrot.slane %v3604_v0, %v11465_v43  ;;  %v3283_v38 = vadd.f32 %v11445_v19, %v3246_v39  ;;  %v8630_v3 = vpop.f32.mrb[59].mxu0  ;;  %v3247_v63 = vadd.f32 %v3148_v6, %v11333_v31  ;;  %v3896_v34 = vshll.u32 %v11534_v12, 16  ;;  %vm3367_vm3 = vmand %vm11588_vm12, %vm3355_vm8 }
 0x37e   : > { %v3859_v30 = vsel %vm11546_vm6, %v3854_v60, %v11509_v16  ;;  %v3873_v45 = vor.u32 %v3872_v11, %v11530_v2  ;;  %v11568_v36 = vadd.s32 4, %v11423_v10  ;;  %v3878_v31 = vrot.slane %v3876_v4, 7  ;;  %vm3399_vm7 = vmand %vm11538_vm4, %vm3390_vm10 }
 0x37f   : > { %14399 = vst [vmem:[#allocation54_spill] sm:$0xff] %v11552_v9  ;;  %v3901_v13 = vshrl.u32 %v11552_v9, 16  ;;  %v3487_v0 = vsel %vm3364_vm13, %v3283_v38, 0.0  ;;  %v3284_v39 = vadd.f32 %v11445_v19, %v3247_v63  ;;  %v11573_v41 = vrot.slane %v7694_v58, %v11465_v43  ;;  %vm11652_vm2 = vmand %vm11588_vm12, %vm3390_vm10 }
 0x380   : > { %v3904_v55 = vshll.u32 %v11552_v9, 16  ;;  %v3577_v6 = vsel %vm3516_vm14, %v3486_v25, %v3547_v15  ;;  %v3548_v3 = vmul.f32 %v11455_v52, %v3487_v0  ;;  %vm3517_vm9 = vcmp.ge.f32.partialorder %v3487_v0, 0.0 }
 0x381   : > { %14400 = vst [vmem:[#allocation93_spill] sm:$0xff] %v11573_v41  ;;  %v3488_v16 = vsel %vm11538_vm4, %v3284_v39, 0.0  ;;  %v3869_v11 = vsel %vm11546_vm6, %v3864_v47, %v11530_v2  ;;  %v3882_v38 = vrot.slane %v3880_v56, 6  ;;  %v3874_v63 = vrot.slane %v3873_v45, 2 }
 0x382   : > { %v3153_v60 = vpop.f32.mrb[60].mxu0  ;;  %vm3518_vm11 = vcmp.ge.f32.partialorder %v3488_v16, 0.0  ;;  %v3549_v4 = vmul.f32 %v11455_v52, %v3488_v16  ;;  %v3903_v25 = vrot.slane %v3901_v13, 6  ;;  %v3886_v14 = vshll.u32 %v11505_v7, 16 }
 0x383   : > { %v3248_v58 = vadd.f32 %v3153_v60, %v11338_v21  ;;  %v8633_v12 = vpop.f32.mrb[61].mxu0  ;;  %v3883_v15 = vor.u32 %v3882_v38, %v3878_v31  ;;  %v3890_v40 = vshrl.u32 %v11505_v7, 16  ;;  %v3906_v2 = vrot.slane %v3904_v55, 7 }
 0x384   : > { %v3156_v39 = vpop.f32.mrb[62].mxu0  ;;  %v3578_v47 = vsel %vm3517_vm9, %v3487_v0, %v3548_v3  ;;  %v11593_v56 = vsel %vm3518_vm11, %v3488_v16, %v3549_v4  ;;  %vm4450_vm15 = vcmask 39936   ;;  %v3888_v60 = vrot.slane %v3886_v14, 7 }
 0x385   : > { %v3249_v21 = vadd.f32 %v3156_v39, %v11341_v1  ;;  %v8634_v12 = vpop.f32.mrb[63].mxu0  ;;  %v3606_v45 = vpack.c.bf16 %v11593_v56, %v3578_v47  ;;  %v3884_v13 = vrot.slane %v3883_v15, 2  ;;  %v4280_v38 = vcombine.low %v3859_v30, %v3869_v11 }
 0x386   : > { %vm3329_vm1 = vcmp.ge.s32.totalorder %v11568_v36, 0  ;;  %v3924_v24 = vshrl.u32 %v11573_v41, 16  ;;  %v3605_v7 = vpack.c.bf16 %v3577_v6, %v3577_v6  ;;  %v3892_v33 = vrot.slane %v3890_v40, 6 }
 0x387   : > { %v3286_v55 = vadd.f32 %v11445_v19, %v3249_v21  ;;  %v11604_v1 = vrot.slane %v3896_v34, 7  ;;  %v11608_v0 = vcombine.high %v11552_v9, %v11552_v9  ;;  %vm3339_vm5 = vcmp.lt.s32.totalorder %v11568_v36, 40 }
 0x388   : > { %v11612_v14 = vadd.s32 5, %v11423_v10  ;;  %v3285_v40 = vadd.f32 %v11445_v19, %v3248_v58  ;;  %v3879_v30 = vsel %vm11546_vm6, %v3874_v63, %v3878_v31  ;;  %v3889_v6 = vsel %vm11546_vm6, %v3884_v13, %v3888_v60  ;;  %vm11662_vm9 = vmand %vm3329_vm1, %vm3339_vm5 }
 0x389   : > { %14403 = vst [vmem:[#allocation55_spill] sm:$0xff] %v11608_v0  ;;  %v3907_v3 = vor.u32 %v3906_v2, %v3903_v25  ;;  %v11621_v34 = vcombine.high %v11573_v41, %v11573_v41  ;;  %v4281_v16 = vcombine.low %v3879_v30, %v3889_v6  ;;  %v4288_v11 = vrot.slane %v4280_v38, %v11465_v43  ;;  %vm3370_vm11 = vmand %vm11662_vm9, %vm3355_vm8 }
 0x38a   : > { %v3490_v4 = vsel %vm3367_vm3, %v3286_v55, 0.0  ;;  %v3161_v58 = vpop.f32.mrb[64].mxu0  ;;  %v3926_v15 = vrot.slane %v3924_v24, 6  ;;  %v11629_v31 = vrot.slane %v3605_v7, %v11465_v43  ;;  %v7695_v63 = vpack.c.bf16 %v11593_v56, %v11593_v56 }
 0x38b   : > { %14404 = vst [vmem:[#allocation50_spill] sm:$0xff] %v11621_v34  ;;  %v3893_v25 = vor.u32 %v3892_v33, %v3888_v60  ;;  %v8637_v39 = vpop.f32.mrb[65].mxu0  ;;  %v4295_v2 = vrot.slane %v4281_v16, %v11465_v43  ;;  %v3250_v47 = vadd.f32 %v3161_v58, %v11346_v57  ;;  %v3910_v21 = vshll.u32 %v11608_v0, 16 }
 0x38c   : > { %14405 = vst [vmem:[#allocation52_spill] sm:$0xff] %v11629_v31  ;;  %v3164_v8 = vpop.f32.mrb[66].mxu0  ;;  %v3914_v12 = vshrl.u32 %v11608_v0, 16  ;;  %v3489_v13 = vsel %vm3399_vm7, %v3285_v40, 0.0  ;;  %v3551_v38 = vmul.f32 %v11455_v52, %v3490_v4  ;;  %v3908_v55 = vrot.slane %v3907_v3, 2 }
 0x38d   : > { %v3251_v7 = vadd.f32 %v3164_v8, %v11349_v54  ;;  %v8638_v24 = vpop.f32.mrb[67].mxu0  ;;  %v4296_v30 = vcombine.low %v4288_v11, %v4295_v2  ;;  %v3287_v33 = vadd.f32 %v11445_v19, %v3250_v47  ;;  %v3912_v56 = vrot.slane %v3910_v21, 7 }
 0x38e   : > { %v3916_v60 = vrot.slane %v3914_v12, 6  ;;  %v11641_v6 = vrot.slane %v3606_v45, %v11465_v43  ;;  %v3894_v57 = vrot.slane %v3893_v25, 2  ;;  %vm3520_vm4 = vcmp.ge.f32.partialorder %v3490_v4, 0.0 }
 0x38f   : > { %v3920_v16 = vshll.u32 %v11573_v41, 16  ;;  %8677 = vmatprep.mubr.msk.bf16.mxu1 %vm4450_vm15, %v4296_v30  ;;  %v3491_v40 = vsel %vm11588_vm12, %v3287_v33, 0.0  ;;  %v3288_v54 = vadd.f32 %v11445_v19, %v3251_v7  ;;  %v3930_v11 = vshll.u32 %v11621_v34, 16 }
 0x390   : > { %14406 = vst [vmem:[#allocation61_spill] sm:$0xff] %v11641_v6  ;;  %v3917_v45 = vor.u32 %v3916_v60, %v3912_v56  ;;  %vm3519_vm13 = vcmp.ge.f32.partialorder %v3489_v13, 0.0  ;;  %vm3521_vm14 = vcmp.ge.f32.partialorder %v3491_v40, 0.0  ;;  %v3552_v58 = vmul.f32 %v11455_v52, %v3491_v40 }
 0x391   : > { %v3922_v25 = vrot.slane %v3920_v16, 7  ;;  %v3550_v17 = vmul.f32 %v11455_v52, %v3489_v13  ;;  %v11667_v2 = vsel %vm3520_vm4, %v3490_v4, %v3551_v38  ;;  %v11671_v47 = vsel %vm11546_vm6, %v3908_v55, %v3912_v56 }
 0x392   : > { %14411 = vst [vmem:[#allocation68_spill] sm:$0xff] %v11671_v47  ;;  %v3918_v8 = vrot.slane %v3917_v45, 2  ;;  %v3169_v21 = vpop.f32.mrb[68].mxu0  ;;  %v11673_v12 = vsel %vm3521_vm14, %v3491_v40, %v3552_v58  ;;  %v3934_v30 = vshrl.u32 %v11621_v34, 16  ;;  %v3492_v4 = vsel %vm11652_vm2, %v3288_v54, 0.0  ;;  %vm3405_vm2 = vmand %vm11662_vm9, %vm3390_vm10 }
 0x393   : > { %v3927_v7 = vor.u32 %v3926_v15, %v3922_v25  ;;  %v3252_v24 = vadd.f32 %v3169_v21, %v11354_v49  ;;  %v8641_v36 = vpop.f32.mrb[69].mxu0  ;;  %v3899_v38 = vsel %vm11546_vm6, %v3894_v57, %v11604_v1  ;;  %v3932_v55 = vrot.slane %v3930_v11, 7 }
 0x394   : > { %v3172_v49 = vpop.f32.mrb[70].mxu0  ;;  %v11690_v15 = vsel %vm11546_vm6, %v3918_v8, %v3922_v25  ;;  %v4297_v60 = vcombine.low %v3899_v38, %v11671_v47  ;;  %v11695_v54 = vrot.slane %v7695_v63, %v11465_v43  ;;  %v11699_v1 = vcombine.high %v11641_v6, %v11641_v6 }
 0x395   : > { %14412 = vst [vmem:[#allocation56_spill] sm:$0xff] %v11690_v15  ;;  %v3928_v56 = vrot.slane %v3927_v7, 2  ;;  %v3289_v16 = vadd.f32 %v11445_v19, %v3252_v24  ;;  %v8642_v40 = vpop.f32.mrb[71].mxu0  ;;  %v3253_v57 = vadd.f32 %v3172_v49, %v11357_v35  ;;  %v11703_v3 = vadd.s32 6, %v11423_v10 }
 0x396   : > { %14413 = vst [vmem:[#allocation64_spill] sm:$0xff] %v11695_v54  ;;  %14414 = vst [vmem:[#allocation80_spill] sm:$0xff] %v11699_v1  ;;  %v3936_v58 = vrot.slane %v3934_v30, 6  ;;  %v3940_v25 = vshll.u32 %v11629_v31, 16  ;;  %vm3330_vm12 = vcmp.ge.s32.totalorder %v11612_v14, 0  ;;  %vm3340_vm1 = vcmp.lt.s32.totalorder %v11612_v14, 40 }
 0x397   : > { %v11707_v45 = vsel %vm11546_vm6, %v3928_v56, %v3932_v55  ;;  %v3493_v11 = vsel %vm3370_vm11, %v3289_v16, 0.0  ;;  %v3580_v63 = vsel %vm3519_vm13, %v3489_v13, %v3550_v17  ;;  %vm3522_vm3 = vcmp.ge.f32.partialorder %v3492_v4, 0.0  ;;  %vm11761_vm4 = vmand %vm3330_vm12, %vm3340_vm1 }
 0x398   : > { %14415 = vst [vmem:[#allocation75_spill] sm:$0xff] %v11707_v45  ;;  %v4298_v35 = vcombine.low %v11690_v15, %v11707_v45  ;;  %v11717_v8 = vcombine.high %v11629_v31, %v11629_v31  ;;  %v4305_v21 = vrot.slane %v4297_v60, %v11465_v43  ;;  %vm3523_vm5 = vcmp.ge.f32.partialorder %v3493_v11, 0.0  ;;  %vm3373_vm13 = vmand %vm11761_vm4, %vm3355_vm8 }
 0x399   : > { %v3554_v7 = vmul.f32 %v11455_v52, %v3493_v11  ;;  %v3290_v24 = vadd.f32 %v11445_v19, %v3253_v57  ;;  %v3942_v38 = vrot.slane %v3940_v25, 7  ;;  %v3944_v13 = vshrl.u32 %v11629_v31, 16  ;;  %vm11854_vm12 = vmand %vm11761_vm4, %vm3390_vm10 }
 0x39a   : > { %14416 = vst [vmem:[#allocation77_spill] sm:$0xff] %v11717_v8  ;;  %v4312_v36 = vrot.slane %v4298_v35, %v11465_v43  ;;  %v3177_v30 = vpop.f32.mrb[72].mxu0  ;;  %v3955_v17 = vshrl.u32 %v11641_v6, 16  ;;  %v3553_v49 = vmul.f32 %v11455_v52, %v3492_v4  ;;  %v3937_v16 = vor.u32 %v3936_v58, %v3932_v55 }
 0x39b   : > { %v3494_v56 = vsel %vm11662_vm9, %v3290_v24, 0.0  ;;  %v3254_v60 = vadd.f32 %v3177_v30, %v11362_v32  ;;  %v8645_v40 = vpop.f32.mrb[73].mxu0  ;;  %v3946_v35 = vrot.slane %v3944_v13, 6  ;;  %v3607_v25 = vpack.c.bf16 %v3580_v63, %v3580_v63 }
 0x39c   : > { %v4313_v33 = vcombine.low %v4305_v21, %v4312_v36  ;;  %vm3524_vm7 = vcmp.ge.f32.partialorder %v3494_v56, 0.0  ;;  %v3555_v57 = vmul.f32 %v11455_v52, %v3494_v56  ;;  %v3180_v45 = vpop.f32.mrb[74].mxu0  ;;  %v11731_v47 = vsel %vm3523_vm5, %v3493_v11, %v3554_v7 }
 0x39d   : > { %v3950_v15 = vshll.u32 %v11717_v8, 16  ;;  %v3957_v34 = vrot.slane %v3955_v17, 6  ;;  %v8646_v31 = vpop.f32.mrb[75].mxu0  ;;  %v3947_v32 = vor.u32 %v3946_v35, %v3942_v38  ;;  %v3958_v55 = vshll.u32 %v11641_v6, 16 }
 0x39e   : > { %8678 = vmatmul.mubr.msk.bf16.vlgmr.msra.gmra.mrb[180].mxu1 %vm4450_vm15, %v4313_v33  ;;  %v11735_v24 = vsel %vm3524_vm7, %v3494_v56, %v3555_v57  ;;  %v3964_v58 = vshll.u32 %v11699_v1, 16  ;;  %v3583_v21 = vsel %vm3522_vm3, %v3492_v4, %v3553_v49  ;;  %v3938_v11 = vrot.slane %v3937_v16, 2 }
 0x39f   : > { %v3968_v7 = vshrl.u32 %v11699_v1, 16  ;;  %8698 = vmatpush3.bf16.msra.mxu1 %v11420_v22  ;;  %v7696_v31 = vpack.c.bf16 %v11673_v12, %v11673_v12  ;;  %v3948_v33 = vrot.slane %v3947_v32, 2  ;;  %v3960_v36 = vrot.slane %v3958_v55, 7 }
 0x3a0   : > { %v11747_v30 = vadd.s32 7, %v11423_v10  ;;  %v11751_v13 = vcombine.high %v11695_v54, %v11695_v54  ;;  %v3952_v4 = vrot.slane %v3950_v15, 7  ;;  %v3966_v17 = vrot.slane %v3964_v58, 7 }
 0x3a1   : > { %v3970_v49 = vrot.slane %v3968_v7, 6  ;;  %v11754_v56 = vrot.slane %v3607_v25, %v11465_v43  ;;  %v3609_v16 = vpack.c.bf16 %v3583_v21, %v3583_v21  ;;  %v3961_v22 = vor.u32 %v3960_v36, %v3957_v34 }
 0x3a2   : > { %14417 = vst [vmem:[#allocation63_spill] sm:$0xff] %v11751_v13  ;;  %v3974_v40 = vshll.u32 %v11695_v54, 16  ;;  %v3185_v35 = vpop.f32.mrb[76].mxu0  ;;  %v3291_v15 = vadd.f32 %v11445_v19, %v3254_v60  ;;  %v11768_v32 = vsel %vm11546_vm6, %v3938_v11, %v3942_v38  ;;  %v11772_v34 = vsel %vm11546_vm6, %v3948_v33, %v3952_v4 }
 0x3a3   : > { %14420 = vst [vmem:[#allocation74_spill] sm:$0xff] %v11768_v32  ;;  %14421 = vst [vmem:[#allocation58_spill] sm:$0xff] %v11772_v34  ;;  %v3971_v25 = vor.u32 %v3970_v49, %v3966_v17  ;;  %v8649_v55 = vpop.f32.mrb[77].mxu0  ;;  %v14422_v14 = vpack.c.bf16 %v11673_v12, %v11667_v2  ;;  %v11781_v21 = vrot.slane %v7696_v31, %v11465_v43  ;;  %v3962_v38 = vrot.slane %v3961_v22, 2 }
 0x3a4   : > { %v3255_v60 = vadd.f32 %v3180_v45, %v11365_v42  ;;  %v3188_v11 = vpop.f32.mrb[78].mxu0  ;;  %v3976_v33 = vrot.slane %v3974_v40, 7  ;;  %v3256_v2 = vadd.f32 %v3185_v35, %v11370_v37  ;;  %v11795_v36 = vrot.slane %v3609_v16, %v11465_v43 }
 0x3a5   : > { %v11778_v58 = vrot.slane %v14422_v14, %v11465_v43  ;;  %14424 = vst [vmem:[#allocation13_spill] sm:$0xff] %v11781_v21  ;;  %v3972_v7 = vrot.slane %v3971_v25, 2  ;;  %v3257_v12 = vadd.f32 %v3188_v11, %v11373_v27  ;;  %v8650_v31 = vpop.f32.mrb[79].mxu0  ;;  %v11799_v39 = vsel %vm11546_vm6, %v3962_v38, %v3966_v17 }
 0x3a6   : > { %14425 = vst [vmem:[#allocation70_spill] sm:$0xff] %v11799_v39  ;;  %v4314_v42 = vcombine.low %v11768_v32, %v11772_v34  ;;  %v3292_v45 = vadd.f32 %v11445_v19, %v3255_v60  ;;  %v3495_v4 = vsel %vm3405_vm2, %v3291_v15, 0.0  ;;  %v3293_v27 = vadd.f32 %v11445_v19, %v3256_v2 }
 0x3a7   : > { %14423 = vst [vmem:[#allocation12_spill] sm:$0xff] %v11778_v58  ;;  %v11806_v49 = vsel %vm11546_vm6, %v3972_v7, %v3976_v33  ;;  %v3978_v22 = vshrl.u32 %v11695_v54, 16  ;;  %v3984_v40 = vshll.u32 %v11751_v13, 16  ;;  %v7697_v35 = vpack.c.bf16 %v11735_v24, %v11735_v24 }
 0x3a8   : > { %14426 = vst [vmem:[#allocation23_spill] sm:$0xff] %v11806_v49  ;;  %v4315_v16 = vcombine.low %v11799_v39, %v11806_v49  ;;  %v3496_v17 = vsel %vm3373_vm13, %v3292_v45, 0.0  ;;  %v3497_v25 = vsel %vm11761_vm4, %v3293_v27, 0.0  ;;  %v4322_v55 = vrot.slane %v4314_v42, %v11465_v43 }
 0x3a9   : > { %vm3526_vm14 = vcmp.ge.f32.partialorder %v3496_v17, 0.0  ;;  %v3557_v15 = vmul.f32 %v11455_v52, %v3496_v17  ;;  %vm3527_vm9 = vcmp.ge.f32.partialorder %v3497_v25, 0.0  ;;  %v3558_v38 = vmul.f32 %v11455_v52, %v3497_v25 }
 0x3aa   : > { %v11822_v14 = vrot.slane %v4315_v16, %v11465_v43  ;;  %v11825_v60 = vpop.f32.mrb[80].mxu0  ;;  %v3556_v11 = vmul.f32 %v11455_v52, %v3495_v4  ;;  %v11832_v2 = vcombine.high %v11754_v56, %v11754_v56  ;;  %v3980_v31 = vrot.slane %v3978_v22, 6 }
 0x3ab   : > { %v11828_v7 = vsel %vm3526_vm14, %v3496_v17, %v3557_v15  ;;  %v8653_v45 = vpop.f32.mrb[81].mxu0  ;;  %v11835_v27 = vsel %vm3527_vm9, %v3497_v25, %v3558_v38  ;;  %v3986_v16 = vrot.slane %v3984_v40, 7  ;;  %v3988_v37 = vshrl.u32 %v11751_v13, 16 }
 0x3ac   : > { %14427 = vst [vmem:[#allocation60_spill] sm:$0xff] %v11822_v14  ;;  %14428 = vst [vmem:[#allocation22_spill] sm:$0xff] %v11832_v2  ;;  %v4330_v42 = vcombine.low %v4322_v55, %v11822_v14  ;;  %v11838_v63 = vpop.f32.mrb[82].mxu0  ;;  %v14429_v17 = vpack.c.bf16 %v11735_v24, %v11731_v47  ;;  %v3294_v22 = vadd.f32 %v11445_v19, %v3257_v12  ;;  %vm3525_vm11 = vcmp.ge.f32.partialorder %v3495_v4, 0.0 }
 0x3ad   : > { %v3981_v45 = vor.u32 %v3980_v31, %v3976_v33  ;;  %v8654_v55 = vpop.f32.mrb[83].mxu0  ;;  %v3990_v47 = vrot.slane %v3988_v37, 6  ;;  %v3994_v24 = vshll.u32 %v11754_v56, 16  ;;  %v3998_v25 = vshrl.u32 %v11754_v56, 16 }
 0x3ae   : > { %v11844_v15 = vrot.slane %v14429_v17, %v11465_v43  ;;  %8681 = vmatprep.mubr.msk.bf16.mxu1 %vm4450_vm15, %v4330_v42  ;;  %v11862_v33 = vcombine.high %v11778_v58, %v11778_v58  ;;  %v11866_v12 = vcombine.high %v11781_v21, %v11781_v21  ;;  %v4004_v57 = vshll.u32 %v11832_v2, 16 }
 0x3af   : > { %v3982_v38 = vrot.slane %v3981_v45, 2  ;;  %vm3331_vm1 = vcmp.ge.s32.totalorder %v11703_v3, 0  ;;  %vm3341_vm3 = vcmp.lt.s32.totalorder %v11703_v3, 40  ;;  %v11872_v37 = vrot.slane %v7697_v35, %v11465_v43 }
 0x3b0   : > { %14432 = vst [vmem:[#allocation36_spill] sm:$0xff] %v11862_v33  ;;  %14433 = vst [vmem:[#allocation21_spill] sm:$0xff] %v11866_v12  ;;  %v3991_v31 = vor.u32 %v3990_v47, %v3986_v16  ;;  %v3996_v42 = vrot.slane %v3994_v24, 7  ;;  %v4000_v17 = vrot.slane %v3998_v25, 6  ;;  %v11876_v55 = vcombine.high %v11844_v15, %v11844_v15 }
 0x3b1   : > { %v11879_v32 = vsel %vm3525_vm11, %v3495_v4, %v3556_v11  ;;  %v11883_v45 = vsel %vm11854_vm12, %v3294_v22, 0.0  ;;  %v11887_v14 = vsel %vm11546_vm6, %v3982_v38, %v3986_v16  ;;  %v4009_v47 = vshrl.u32 %v11778_v58, 16  ;;  %vm11929_vm5 = vmand %vm3331_vm1, %vm3341_vm3 }
 0x3b2   : > { %14434 = vst [vmem:[#allocation17_spill] sm:$0xff] %v11887_v14  ;;  %v3992_v35 = vrot.slane %v3991_v31, 2  ;;  %v4001_v2 = vor.u32 %v4000_v17, %v3996_v42  ;;  %v4012_v24 = vshll.u32 %v11778_v58, 16  ;;  %v3201_v25 = vpop.f32.mrb[84].mxu0  ;;  %v4006_v8 = vrot.slane %v4004_v57, 7  ;;  %vm3376_vm7 = vmand %vm11929_vm5, %vm3355_vm8 }
 0x3b3   : > { %v4018_v39 = vshll.u32 %v11862_v33, 16  ;;  %v4022_v11 = vshrl.u32 %v11862_v33, 16  ;;  %v8657_v22 = vpop.f32.mrb[85].mxu0  ;;  %v4011_v38 = vrot.slane %v4009_v47, 6  ;;  %v11905_v54 = vcombine.high %v11795_v36, %v11795_v36  ;;  %vm12051_vm12 = vmand %vm11929_vm5, %vm3390_vm10 }
 0x3b4   : > { %v11897_v16 = vsel %vm11546_vm6, %v3992_v35, %v3996_v42  ;;  %v4002_v40 = vrot.slane %v4001_v2, 2  ;;  %v4014_v31 = vrot.slane %v4012_v24, 7  ;;  %v11899_v17 = vpop.f32.mrb[86].mxu0  ;;  %v4028_v2 = vshll.u32 %v11781_v21, 16 }
 0x3b5   : > { %14435 = vst [vmem:[#allocation83_spill] sm:$0xff] %v11897_v16  ;;  %v4020_v34 = vrot.slane %v4018_v39, 7  ;;  %v4331_v57 = vcombine.low %v11887_v14, %v11897_v16  ;;  %14436 = vst [vmem:[#allocation33_spill] sm:$0xff] %v11905_v54  ;;  %v4024_v4 = vrot.slane %v4022_v11, 6  ;;  %v8658_v49 = vpop.f32.mrb[87].mxu0  ;;  %v4032_v35 = vshrl.u32 %v11781_v21, 16 }
 0x3b6   : > { %v11909_v22 = vsel %vm11546_vm6, %v4002_v40, %v4006_v8  ;;  %v4015_v42 = vor.u32 %v4014_v31, %v4011_v38  ;;  %v4038_v24 = vshll.u32 %v11866_v12, 16  ;;  %v4042_v16 = vshrl.u32 %v11866_v12, 16 }
 0x3b7   : > { %14437 = vst [vmem:[#allocation48_spill] sm:$0xff] %v11909_v22  ;;  %v11914_v39 = vrot.slane %v4331_v57, %v11465_v43  ;;  %v4025_v47 = vor.u32 %v4024_v4, %v4020_v34  ;;  %v4030_v11 = vrot.slane %v4028_v2, 7  ;;  %v4034_v49 = vrot.slane %v4032_v35, 6 }
 0x3b8   : > { %v4016_v14 = vrot.slane %v4015_v42, 2  ;;  %v4048_v13 = vshll.u32 %v11795_v36, 16  ;;  %v4040_v40 = vrot.slane %v4038_v24, 7  ;;  %v4044_v38 = vrot.slane %v4042_v16, 6 }
 0x3b9   : > { %14438 = vst [vmem:[#allocation27_spill] sm:$0xff] %v11914_v39  ;;  %v4026_v8 = vrot.slane %v4025_v47, 2  ;;  %v4052_v31 = vshrl.u32 %v11795_v36, 16  ;;  %v4035_v57 = vor.u32 %v4034_v49, %v4030_v11  ;;  %v4058_v6 = vshll.u32 %v11905_v54, 16 }
 0x3ba   : > { %v11922_v9 = vsel %vm11546_vm6, %v4016_v14, %v4020_v34  ;;  %v4050_v4 = vrot.slane %v4048_v13, 7  ;;  %v11933_v2 = vpop.f32.mrb[88].mxu0  ;;  %v4045_v13 = vor.u32 %v4044_v38, %v4040_v40  ;;  %v3258_v3 = vadd.f32 %v11825_v60, %v11378_v18 }
 0x3bb   : > { %14439 = vst [vmem:[#allocation38_spill] sm:$0xff] %v11922_v9  ;;  %v4332_v16 = vcombine.low %v11909_v22, %v11922_v9  ;;  %v11939_v34 = vsel %vm11546_vm6, %v4026_v8, %v4030_v11  ;;  %v4054_v14 = vrot.slane %v4052_v31, 6  ;;  %v8661_v35 = vpop.f32.mrb[89].mxu0  ;;  %v4036_v47 = vrot.slane %v4035_v57, 2 }
 0x3bc   : > { %14442 = vst [vmem:[#allocation71_spill] sm:$0xff] %v11939_v34  ;;  %v4060_v24 = vrot.slane %v4058_v6, 7  ;;  %v3259_v49 = vadd.f32 %v11838_v63, %v11381_v51  ;;  %v11945_v54 = vpop.f32.mrb[90].mxu0  ;;  %v4046_v22 = vrot.slane %v4045_v13, 2  ;;  %v3260_v6 = vadd.f32 %v3201_v25, %v11386_v28 }
 0x3bd   : > { %v11948_v12 = vrot.slane %v4332_v16, %v11465_v43  ;;  %v4055_v9 = vor.u32 %v4054_v14, %v4050_v4  ;;  %v8662_v11 = vpop.f32.mrb[91].mxu0  ;;  %v11957_v18 = vsel %vm11546_vm6, %v4036_v47, %v4040_v40  ;;  %v3295_v51 = vadd.f32 %v11445_v19, %v3258_v3 }
 0x3be   : > { %14444 = vst [vmem:[#allocation26_spill] sm:$0xff] %v11957_v18  ;;  %v3296_v63 = vadd.f32 %v11445_v19, %v3259_v49  ;;  %v4063_v60 = vshrl.u32 %v11844_v15, 16  ;;  %vm3332_vm4 = vcmp.ge.s32.totalorder %v11747_v30, 0  ;;  %v11967_v38 = vsel %vm11546_vm6, %v4046_v22, %v4050_v4 }
 0x3bf   : > { %14443 = vst [vmem:[#allocation6_spill] sm:$0xff] %v11948_v12  ;;  %v4347_v8 = vcombine.low %v11914_v39, %v11948_v12  ;;  %14445 = vst [vmem:[#allocation42_spill] sm:$0xff] %v11967_v38  ;;  %v4056_v28 = vrot.slane %v4055_v9, 2  ;;  %v4348_v25 = vcombine.low %v11939_v34, %v11957_v18  ;;  %v11973_v40 = vcombine.high %v11872_v37, %v11872_v37 }
 0x3c0   : > { %v3559_v31 = vmul.f32 %v11455_v52, %v11883_v45  ;;  %v3499_v57 = vsel %vm3376_vm7, %v3295_v51, 0.0  ;;  %v3500_v16 = vsel %vm11929_vm5, %v3296_v63, 0.0  ;;  %vm3528_vm13 = vcmp.ge.f32.partialorder %v11883_v45, 0.0 }
 0x3c1   : > { %8682 = vmatmul.mubr.msk.bf16.gmra.mrb[184].mxu1 %vm4450_vm15, %v4347_v8  ;;  %v11982_v22 = vsel %vm11546_vm6, %v4056_v28, %v4060_v24  ;;  %v11985_v9 = vrot.slane %v4348_v25, %v11465_v43  ;;  %vm3529_vm2 = vcmp.ge.f32.partialorder %v3499_v57, 0.0  ;;  %v3560_v4 = vmul.f32 %v11455_v52, %v3499_v57 }
 0x3c2   : > { %14446 = vst [vmem:[#allocation45_spill] sm:$0xff] %v11982_v22  ;;  %v4349_v13 = vcombine.low %v11967_v38, %v11982_v22  ;;  %vm3530_vm14 = vcmp.ge.f32.partialorder %v3500_v16, 0.0  ;;  %v3561_v14 = vmul.f32 %v11455_v52, %v3500_v16  ;;  %v11992_v35 = vpop.f32.mrb[92].mxu0  ;;  %v3611_v47 = vpack.c.bf16 %v11879_v32, %v11879_v32 }
 0x3c3   : > { %14447 = vst [vmem:[#allocation39_spill] sm:$0xff] %v11985_v9  ;;  %v11998_v3 = vsel %vm3529_vm2, %v3499_v57, %v3560_v4  ;;  %v4065_v49 = vrot.slane %v4063_v60, 6  ;;  %v8665_v11 = vpop.f32.mrb[93].mxu0  ;;  %v4066_v8 = vshll.u32 %v11844_v15, 16  ;;  %v4072_v28 = vshll.u32 %v11876_v55, 16 }
 0x3c4   : > { %v12001_v51 = vrot.slane %v4349_v13, %v11465_v43  ;;  %v12003_v63 = vsel %vm3530_vm14, %v3500_v16, %v3561_v14  ;;  %v12007_v25 = vpop.f32.mrb[94].mxu0  ;;  %v12010_v32 = vsel %vm3528_vm13, %v11883_v45, %v3559_v31  ;;  %v4076_v60 = vshrl.u32 %v11876_v55, 16 }
 0x3c5   : > { %vm3342_vm9 = vcmp.lt.s32.totalorder %v11747_v30, 40  ;;  %v8666_v4 = vpop.f32.mrb[95].mxu0  ;;  %v4068_v13 = vrot.slane %v4066_v8, 7  ;;  %v4074_v14 = vrot.slane %v4072_v28, 7  ;;  %v12019_v11 = vadd.s32 8, %v11423_v10 }
 0x3c6   : > { %14448 = vst [vmem:[#allocation66_spill] sm:$0xff] %v12001_v51  ;;  %v4364_v16 = vcombine.low %v11985_v9, %v12001_v51  ;;  %v12022_v24 = vrot.slane %v3611_v47, %v11465_v43  ;;  %v7698_v45 = vpack.c.bf16 %v11835_v27, %v11835_v27  ;;  %v4078_v31 = vrot.slane %v4076_v60, 6  ;;  %vm12043_vm11 = vmand %vm3332_vm4, %vm3342_vm9 }
 0x3c7   : > { %v4082_v57 = vshll.u32 %v11872_v37, 16  ;;  %v4069_v9 = vor.u32 %v4068_v13, %v4065_v49  ;;  %v4086_v8 = vshrl.u32 %v11872_v37, 16  ;;  %v4092_v28 = vshll.u32 %v11973_v40, 16  ;;  %vm3379_vm1 = vmand %vm12043_vm11, %vm3355_vm8 }
 0x3c8   : > { %8685 = vmatprep.mubr.msk.bf16.mxu1 %vm4450_vm15, %v4364_v16  ;;  %v14449_v47 = vpack.c.bf16 %v11835_v27, %v11828_v7  ;;  %v3297_v60 = vadd.f32 %v11445_v19, %v3260_v6  ;;  %v4079_v51 = vor.u32 %v4078_v31, %v4074_v14  ;;  %v4102_v31 = vshll.u32 %v12022_v24, 16  ;;  %vm3414_vm9 = vmand %vm12043_vm11, %vm3390_vm10 }
 0x3c9   : > { %v4084_v39 = vrot.slane %v4082_v57, 7  ;;  %v4070_v27 = vrot.slane %v4069_v9, 2  ;;  %v4088_v6 = vrot.slane %v4086_v8, 6  ;;  %v4094_v16 = vrot.slane %v4092_v28, 7 }
 0x3ca   : > { %v12036_v12 = vrot.slane %v14449_v47, %v11465_v43  ;;  %v4096_v57 = vshrl.u32 %v11973_v40, 16  ;;  %v12056_v13 = vpop.f32.mrb[96].mxu0  ;;  %v4080_v30 = vrot.slane %v4079_v51, 2  ;;  %v3261_v47 = vadd.f32 %v11899_v17, %v11389_v44 }
 0x3cb   : > { %v3262_v42 = vadd.f32 %v11933_v2, %v11394_v46  ;;  %v8669_v4 = vpop.f32.mrb[97].mxu0  ;;  %v12064_v18 = vrot.slane %v7698_v45, %v11465_v43  ;;  %v4089_v9 = vor.u32 %v4088_v6, %v4084_v39  ;;  %v12072_v51 = vadd.f32 %v11945_v54, %v11397_v20 }
 0x3cc   : > { %v4098_v8 = vrot.slane %v4096_v57, 6  ;;  %v12074_v28 = vpop.f32.mrb[98].mxu0  ;;  %v3501_v44 = vsel %vm12051_vm12, %v3297_v60, 0.0  ;;  %v12080_v46 = vsel %vm11546_vm6, %v4080_v30, %v4084_v39  ;;  %v3298_v17 = vadd.f32 %v11445_v19, %v3261_v47 }
 0x3cd   : > { %14454 = vst [vmem:[#allocation9_spill] sm:$0xff] %v12080_v46  ;;  %v3299_v2 = vadd.f32 %v11445_v19, %v3262_v42  ;;  %v8670_v45 = vpop.f32.mrb[99].mxu0  ;;  %v12086_v4 = vsel %vm11546_vm6, %v4070_v27, %v4074_v14  ;;  %v4090_v20 = vrot.slane %v4089_v9, 2  ;;  %v4104_v6 = vrot.slane %v4102_v31, 7 }
 0x3ce   : > { %14455 = vst [vmem:[#allocation8_spill] sm:$0xff] %v12086_v4  ;;  %v4099_v54 = vor.u32 %v4098_v8, %v4094_v16  ;;  %v4365_v7 = vcombine.low %v12086_v4, %v12080_v46  ;;  %v3502_v60 = vsel %vm3379_vm1, %v3298_v17, 0.0  ;;  %v4106_v57 = vshrl.u32 %v12022_v24, 16 }
 0x3cf   : > { %v3503_v39 = vsel %vm12043_vm11, %v3299_v2, 0.0  ;;  %v12095_v19 = vcombine.high %v12036_v12, %v12036_v12  ;;  %vm3532_vm3 = vcmp.ge.f32.partialorder %v3502_v60, 0.0  ;;  %v12099_v14 = vcombine.high %v12022_v24, %v12022_v24 }
 0x3d0   : > { %v4100_v30 = vrot.slane %v4099_v54, 2  ;;  %v3562_v27 = vmul.f32 %v11455_v52, %v3501_v44  ;;  %v3563_v31 = vmul.f32 %v11455_v52, %v3502_v60  ;;  %vm3533_vm5 = vcmp.ge.f32.partialorder %v3503_v39, 0.0 }
 0x3d1   : > { %14456 = vst [vmem:[#allocation10_spill] sm:$0xff] %v12099_v14  ;;  %v3564_v47 = vmul.f32 %v11455_v52, %v3503_v39  ;;  %vm3531_vm7 = vcmp.ge.f32.partialorder %v3501_v44, 0.0  ;;  %v12106_v42 = vsel %vm11546_vm6, %v4090_v20, %v4094_v16  ;;  %v4108_v8 = vrot.slane %v4106_v57, 6 }
 0x3d2   : > { %14457 = vst [vmem:[#allocation11_spill] sm:$0xff] %v12106_v42  ;;  %v12110_v9 = vsel %vm11546_vm6, %v4100_v30, %v4104_v6  ;;  %v12112_v17 = vpop.f32.mrb[100].mxu0  ;;  %v12117_v45 = vrot.slane %v4365_v7, %v11465_v43  ;;  %v12119_v54 = vsel %vm3532_vm3, %v3502_v60, %v3563_v31  ;;  %v4112_v30 = vshll.u32 %v12099_v14, 16 }
 0x3d3   : > { %14458 = vst [vmem:[#allocation14_spill] sm:$0xff] %v12110_v9  ;;  %v4366_v2 = vcombine.low %v12106_v42, %v12110_v9  ;;  %v12121_v46 = vsel %vm3533_vm5, %v3503_v39, %v3564_v47  ;;  %v8673_v38 = vpop.f32.mrb[101].mxu0  ;;  %v4109_v20 = vor.u32 %v4108_v8, %v4104_v6  ;;  %vm3333_vm4 = vcmp.ge.s32.totalorder %v12019_v11, 0 }
 0x3d4   : > { %14459 = vst [vmem:[#allocation7_spill] sm:$0xff] %v12117_v45  ;;  %v12127_v57 = vpop.f32.mrb[102].mxu0  ;;  %v12129_v22 = vsel %vm3531_vm7, %v3501_v44, %v3562_v27  ;;  %v4117_v60 = vshrl.u32 %v12036_v12, 16  ;;  %vm3343_vm2 = vcmp.lt.s32.totalorder %v12019_v11, 40  ;;  %v12138_v39 = vcombine.high %v12064_v18, %v12064_v18 }
 0x3d5   : > { %v12132_v7 = vrot.slane %v4366_v2, %v11465_v43  ;;  %v8674_v38 = vpop.f32.mrb[103].mxu0  ;;  %v14462_v6 = vpack.c.bf16 %v12010_v32, %v12010_v32  ;;  %v4120_v44 = vshll.u32 %v12036_v12, 16  ;;  %v7699_v27 = vpack.c.bf16 %v12003_v63, %v12003_v63  ;;  %vm12156_vm13 = vmand %vm3333_vm4, %vm3343_vm2 }
 0x3d6   : > { %14461 = vst [vmem:[#allocation5_spill] sm:$0xff] %v12138_v39  ;;  %v4119_v8 = vrot.slane %v4117_v60, 6  ;;  %v4126_v2 = vshll.u32 %v12095_v19, 16  ;;  %v3615_v38 = vpack.c.bf16 %v12129_v22, %v12129_v22  ;;  %v4110_v16 = vrot.slane %v4109_v20, 2  ;;  %vm3382_vm14 = vmand %vm12156_vm13, %vm3355_vm8 }
 0x3d7   : > { %14460 = vst [vmem:[#allocation15_spill] sm:$0xff] %v12132_v7  ;;  %v12144_v31 = vrot.slane %v14462_v6, %v11465_v43  ;;  %v4381_v47 = vcombine.low %v12117_v45, %v12132_v7  ;;  %v4114_v42 = vrot.slane %v4112_v30, 7  ;;  %v4122_v9 = vrot.slane %v4120_v44, 7 }
 0x3d8   : > { %v4128_v6 = vrot.slane %v4126_v2, 7  ;;  %v4130_v7 = vshrl.u32 %v12095_v19, 16  ;;  %v4136_v60 = vshll.u32 %v12064_v18, 16  ;;  %v4140_v45 = vshrl.u32 %v12064_v18, 16 }
 0x3d9   : > { %8686 = vmatmul.mubr.msk.bf16.gmra.mrb[188].mxu1 %vm4450_vm15, %v4381_v47  ;;  %v4123_v4 = vor.u32 %v4122_v9, %v4119_v8  ;;  %v4146_v22 = vshll.u32 %v12138_v39, 16  ;;  %v3264_v20 = vadd.f32 %v11992_v35, %v11402_v26  ;;  %v3265_v11 = vadd.f32 %v12007_v25, %v11405_v53  ;;  %v12186_v53 = vld [vmem:[%s13713_s3] ss:$0 sm:$0xff] }
 0x3da   : > { %v4132_v30 = vrot.slane %v4130_v7, 6  ;;  %v4138_v44 = vrot.slane %v4136_v60, 7  ;;  %v4142_v34 = vrot.slane %v4140_v45, 6  ;;  %v12175_v47 = vadd.f32 %v12056_v13, %v11410_v62 }
 0x3db   : > { %v14465_v9 = vpack.c.bf16 %v12003_v63, %v11998_v3  ;;  %v4124_v35 = vrot.slane %v4123_v4, 2  ;;  %v3301_v25 = vadd.f32 %v12186_v53, %v3264_v20  ;;  %v3302_v45 = vadd.f32 %v12186_v53, %v3265_v11 }
 0x3dc   : > { %v3300_v62 = vadd.f32 %v12186_v53, %v12072_v51  ;;  %v12194_v13 = vsel %vm11546_vm6, %v4110_v16, %v4114_v42  ;;  %v4133_v3 = vor.u32 %v4132_v30, %v4128_v6  ;;  %v4143_v63 = vor.u32 %v4142_v34, %v4138_v44 }
 0x3dd   : > { %v12181_v26 = vrot.slane %v14465_v9, %v11465_v43  ;;  %14466 = vst [vmem:[#allocation16_spill] sm:$0xff] %v12194_v13  ;;  %v12202_v4 = vsel %vm11546_vm6, %v4124_v35, %v4128_v6  ;;  %v4148_v7 = vrot.slane %v4146_v22, 7  ;;  %v3505_v8 = vsel %vm3382_vm14, %v3301_v25, 0.0  ;;  %vm3417_vm14 = vmand %vm12156_vm13, %vm3390_vm10 }
 0x3de   : > { %14467 = vst [vmem:[#allocation18_spill] sm:$0xff] %v12202_v4  ;;  %v3506_v51 = vsel %vm12156_vm13, %v3302_v45, 0.0  ;;  %v4134_v2 = vrot.slane %v4133_v3, 2  ;;  %v4144_v60 = vrot.slane %v4143_v63, 2  ;;  %vm3535_vm12 = vcmp.ge.f32.partialorder %v3505_v8, 0.0 }
 0x3df   : > { %v4150_v42 = vshrl.u32 %v12138_v39, 16  ;;  %v4382_v34 = vcombine.low %v12194_v13, %v12202_v4  ;;  %v3566_v49 = vmul.f32 %v11455_v52, %v3505_v8  ;;  %vm3536_vm11 = vcmp.ge.f32.partialorder %v3506_v51, 0.0 }
 0x3e0   : > { %v3567_v16 = vmul.f32 %v11455_v52, %v3506_v51  ;;  %v3504_v6 = vsel %vm3414_vm9, %v3300_v62, 0.0  ;;  %v12213_v22 = vsel %vm11546_vm6, %v4134_v2, %v4138_v44  ;;  %v12217_v20 = vsel %vm11546_vm6, %v4144_v60, %v4148_v7 }
 0x3e1   : > { %14468 = vst [vmem:[#allocation46_spill] sm:$0xff] %v12213_v22  ;;  %14469 = vst [vmem:[#allocation62_spill] sm:$0xff] %v12217_v20  ;;  %v12221_v11 = vcombine.high %v12144_v31, %v12144_v31  ;;  %v12224_v30 = vrot.slane %v7699_v27, %v11465_v43  ;;  %v4383_v9 = vcombine.low %v12213_v22, %v12217_v20  ;;  %v4152_v62 = vrot.slane %v4150_v42, 6 }
 0x3e2   : > { %v12228_v35 = vsel %vm3535_vm12, %v3505_v8, %v3566_v49  ;;  %v12230_v25 = vsel %vm3536_vm11, %v3506_v51, %v3567_v16  ;;  %v12234_v44 = vcombine.high %v12181_v26, %v12181_v26  ;;  %v4156_v3 = vshll.u32 %v12144_v31, 16 }
 0x3e3   : > { %14470 = vst [vmem:[#allocation25_spill] sm:$0xff] %v12221_v11  ;;  %v3565_v27 = vmul.f32 %v11455_v52, %v3504_v6  ;;  %v12241_v63 = vrot.slane %v4382_v34, %v11465_v43  ;;  %v12244_v8 = vrot.slane %v4383_v9, %v11465_v43  ;;  %v4160_v51 = vshrl.u32 %v12144_v31, 16 }
 0x3e4   : > { %v12248_v2 = vrot.slane %v3615_v38, %v11465_v43  ;;  %vm3534_vm1 = vcmp.ge.f32.partialorder %v3504_v6, 0.0  ;;  %v4153_v60 = vor.u32 %v4152_v62, %v4148_v7  ;;  %v4166_v49 = vshll.u32 %v12221_v11, 16 }
 0x3e5   : > { %14471 = vst [vmem:[#allocation69_spill] sm:$0xff] %v12241_v63  ;;  %14472 = vst [vmem:[#allocation65_spill] sm:$0xff] %v12244_v8  ;;  %v12253_v42 = vcombine.high %v12224_v30, %v12224_v30  ;;  %v4398_v34 = vcombine.low %v12241_v63, %v12244_v8  ;;  %v4158_v16 = vrot.slane %v4156_v3, 7  ;;  %v4162_v45 = vrot.slane %v4160_v51, 6 }
 0x3e6   : > { %v7700_v9 = vpack.c.bf16 %v12121_v46, %v12121_v46  ;;  %v4154_v20 = vrot.slane %v4153_v60, 2  ;;  %v4171_v38 = vshrl.u32 %v12181_v26, 16  ;;  %v4174_v4 = vshll.u32 %v12181_v26, 16 }
 0x3e7   : > { %v3595_v7 = vsel %vm3534_vm1, %v3504_v6, %v3565_v27  ;;  %8689 = vmatprep.mubr.msk.bf16.mxu1 %vm4450_vm15, %v4398_v34  ;;  %v4163_v62 = vor.u32 %v4162_v45, %v4158_v16  ;;  %v4180_v22 = vshll.u32 %v12234_v44, 16  ;;  %v4184_v13 = vshrl.u32 %v12234_v44, 16 }
 0x3e8   : > { %v4168_v11 = vrot.slane %v4166_v49, 7  ;;  %v4173_v8 = vrot.slane %v4171_v38, 6  ;;  %v4176_v3 = vrot.slane %v4174_v4, 7  ;;  %v3267_v51 = vadd.f32 %v12074_v28, %v11414_v61 }
 0x3e9   : > { %v4164_v63 = vrot.slane %v4163_v62, 2  ;;  %v4182_v60 = vrot.slane %v4180_v22, 7  ;;  %v4186_v14 = vrot.slane %v4184_v13, 6  ;;  %v4190_v39 = vshll.u32 %v12224_v30, 16 }
 0x3ea   : > { %v12269_v6 = vsel %vm11546_vm6, %v4154_v20, %v4158_v16  ;;  %v4177_v45 = vor.u32 %v4176_v3, %v4173_v8  ;;  %v3317_v27 = vadd.s32 9, %v11423_v10  ;;  %v3268_v49 = vadd.f32 %v12112_v17, %v11428_v23 }
 0x3eb   : > { %14473 = vst [vmem:[#allocation57_spill] sm:$0xff] %v12269_v6  ;;  %v12276_v4 = vsel %vm11546_vm6, %v4164_v63, %v4168_v11  ;;  %v4187_v61 = vor.u32 %v4186_v14, %v4182_v60  ;;  %v3304_v28 = vadd.f32 %v12186_v53, %v3267_v51  ;;  %v12281_v13 = vadd.f32 %v12127_v57, %v11435_v48 }
 0x3ec   : > { %14474 = vst [vmem:[#allocation51_spill] sm:$0xff] %v12276_v4  ;;  %v14475_v22 = vpack.c.bf16 %v12121_v46, %v12119_v54  ;;  %v4178_v10 = vrot.slane %v4177_v45, 2  ;;  %vm3334_vm3 = vcmp.ge.s32.totalorder %v3317_v27, 0  ;;  %vm3344_vm5 = vcmp.lt.s32.totalorder %v3317_v27, 40 }
 0x3ed   : > { %v4188_v23 = vrot.slane %v4187_v61, 2  ;;  %v4192_v17 = vrot.slane %v4190_v39, 7  ;;  %vm12289_vm7 = vmand %vm3334_vm3, %vm3344_vm5  ;;  %v3305_v14 = vadd.f32 %v12186_v53, %v3268_v49  ;;  %v4194_v48 = vshrl.u32 %v12224_v30, 16 }
 0x3ee   : > { %v12287_v20 = vrot.slane %v14475_v22, %v11465_v43  ;;  %v12297_v57 = vsel %vm11546_vm6, %v4178_v10, %v4182_v60  ;;  %v4399_v46 = vcombine.low %v12269_v6, %v12276_v4  ;;  %vm3385_vm4 = vmand %vm12289_vm7, %vm3355_vm8  ;;  %v4200_v54 = vshll.u32 %v12253_v42, 16 }
 0x3ef   : > { %14479 = vst [vmem:[#allocation72_spill] sm:$0xff] %v12297_v57  ;;  %v4204_v39 = vshrl.u32 %v12253_v42, 16  ;;  %v12309_v63 = vsel %vm11546_vm6, %v4188_v23, %v4192_v17  ;;  %v3508_v8 = vsel %vm3385_vm4, %v3304_v28, 0.0  ;;  %v3509_v34 = vsel %vm12289_vm7, %v3305_v14, 0.0 }
 0x3f0   : > { %14476 = vst [vmem:[#allocation34_spill] sm:$0xff] %v12287_v20  ;;  %14480 = vst [vmem:[#allocation67_spill] sm:$0xff] %v12309_v63  ;;  %v4196_v16 = vrot.slane %v4194_v48, 6  ;;  %v4400_v38 = vcombine.low %v12297_v57, %v12309_v63  ;;  %vm3538_vm2 = vcmp.ge.f32.partialorder %v3508_v8, 0.0  ;;  %v3569_v5 = vmul.f32 %v11455_v52, %v3508_v8 }
 0x3f1   : > { %vm3539_vm8 = vcmp.ge.f32.partialorder %v3509_v34, 0.0  ;;  %v3617_v62 = vpack.c.bf16 %v3595_v7, %v3595_v7  ;;  %v3570_v3 = vmul.f32 %v11455_v52, %v3509_v34  ;;  %v4202_v60 = vrot.slane %v4200_v54, 7 }
 0x3f2   : > { %v4197_v51 = vor.u32 %v4196_v16, %v4192_v17  ;;  %v12318_v45 = vrot.slane %v7700_v9, %v11465_v43  ;;  %v12321_v27 = vrot.slane %v4399_v46, %v11465_v43  ;;  %v12324_v49 = vrot.slane %v4400_v38, %v11465_v43 }
 0x3f3   : > { %v12328_v61 = vcombine.high %v12248_v2, %v12248_v2  ;;  %v12330_v28 = vsel %vm3538_vm2, %v3508_v8, %v3569_v5  ;;  %v12332_v7 = vsel %vm3539_vm8, %v3509_v34, %v3570_v3  ;;  %v4206_v22 = vrot.slane %v4204_v39, 6 }
 0x3f4   : > { %14481 = vst [vmem:[#allocation59_spill] sm:$0xff] %v12318_v45  ;;  %14482 = vst [vmem:[#allocation76_spill] sm:$0xff] %v12321_v27  ;;  %v4210_v10 = vshll.u32 %v12248_v2, 16  ;;  %v12337_v9 = vcombine.high %v12287_v20, %v12287_v20  ;;  %v4415_v23 = vcombine.low %v12321_v27, %v12324_v49  ;;  %v4198_v14 = vrot.slane %v4197_v51, 2 }
 0x3f5   : > { %14483 = vst [vmem:[#allocation43_spill] sm:$0xff] %v12324_v49  ;;  %14484 = vst [vmem:[#allocation78_spill] sm:$0xff] %v12328_v61  ;;  %v4207_v48 = vor.u32 %v4206_v22, %v4202_v60  ;;  %v12344_v54 = vrot.slane %v3617_v62, %v11465_v43  ;;  %v4214_v39 = vshrl.u32 %v12248_v2, 16  ;;  %v4220_v8 = vshll.u32 %v12328_v61, 16 }
 0x3f6   : > { %14485 = vst [vmem:[#allocation28_spill] sm:$0xff] %v12330_v28  ;;  %14486 = vst [vmem:[#allocation86_spill] sm:$0xff] %v12332_v7  ;;  %v4212_v46 = vrot.slane %v4210_v10, 7  ;;  %8690 = vmatmul.mubr.msk.bf16.gmra.mrb[192].mxu1 %vm4450_vm15, %v4415_v23  ;;  %v12351_v34 = vcombine.high %v12318_v45, %v12318_v45  ;;  %v4225_v38 = vshrl.u32 %v12287_v20, 16  ;;  %v4228_v5 = vshll.u32 %v12287_v20, 16  ;;  %v14502_v28 = vld [vmem:[#allocation84_spill] sm:$0xff] }
 0x3f7   : > { %14487 = vst [vmem:[#allocation73_spill] sm:$0xff] %v12337_v9  ;;  %14488 = vst [vmem:[#allocation81_spill] sm:$0xff] %v12344_v54  ;;  %v4208_v16 = vrot.slane %v4207_v48, 2  ;;  %v12357_v3 = vsel %vm11546_vm6, %v4198_v14, %v4202_v60  ;;  %v4216_v62 = vrot.slane %v4214_v39, 6  ;;  %v4222_v51 = vrot.slane %v4220_v8, 7  ;;  %v14516_v7 = vld [vmem:[#allocation64_spill] sm:$0xff] }
 0x3f8   : > { %14489 = vst [vmem:[#allocation37_spill] sm:$0xff] %v12351_v34  ;;  %14490 = vst [vmem:[#allocation40_spill] sm:$0xff] %v12357_v3  ;;  %v4234_v22 = vshll.u32 %v12337_v9, 16  ;;  %v4227_v23 = vrot.slane %v4225_v38, 6  ;;  %v4230_v17 = vrot.slane %v4228_v5, 7  ;;  %v4238_v48 = vshrl.u32 %v12337_v9, 16 }
 0x3f9   : > { %v12362_v10 = vsel %vm11546_vm6, %v4208_v16, %v4212_v46  ;;  %v4217_v49 = vor.u32 %v4216_v62, %v4212_v46  ;;  %v12367_v4 = vcombine.high %v12344_v54, %v12344_v54  ;;  %v4244_v60 = vshll.u32 %v12318_v45, 16 }
 0x3fa   : > { %14491 = vst [vmem:[#allocation32_spill] sm:$0xff] %v12362_v10  ;;  %v4236_v27 = vrot.slane %v4234_v22, 7  ;;  %v4231_v14 = vor.u32 %v4230_v17, %v4227_v23  ;;  %v4240_v39 = vrot.slane %v4238_v48, 6  ;;  %v4248_v8 = vshrl.u32 %v12318_v45, 16 }
 0x3fb   : > { %14492 = vst [vmem:[#allocation87_spill] sm:$0xff] %v12367_v4  ;;  %v4254_v57 = vshll.u32 %v12351_v34, 16  ;;  %v4218_v16 = vrot.slane %v4217_v49, 2  ;;  %v4416_v38 = vcombine.low %v12357_v3, %v12362_v10  ;;  %v4246_v5 = vrot.slane %v4244_v60, 7  ;;  %v14501_v3 = vld [vmem:[#allocation90_spill] sm:$0xff] }
 0x3fc   : > { %v4258_v46 = vshrl.u32 %v12351_v34, 16  ;;  %v4232_v62 = vrot.slane %v4231_v14, 2  ;;  %v4241_v22 = vor.u32 %v4240_v39, %v4236_v27  ;;  %v4250_v63 = vrot.slane %v4248_v8, 6 }
 0x3fd   : > { %v4256_v6 = vrot.slane %v4254_v57, 7  ;;  %v12377_v61 = vsel %vm11546_vm6, %v4218_v16, %v4222_v51  ;;  %v4264_v23 = vshll.u32 %v12344_v54, 16  ;;  %v4268_v48 = vshrl.u32 %v12344_v54, 16  ;;  %v7730_v16 = vld [vmem:[%s13714_s4 + $0x8] sm:$0x7] }
 0x3fe   : > { %14493 = vst [vmem:[#allocation41_spill] sm:$0xff] %v12377_v61  ;;  %v4260_v17 = vrot.slane %v4258_v46, 6  ;;  %v12383_v49 = vsel %vm11546_vm6, %v4232_v62, %v4236_v27  ;;  %v4242_v60 = vrot.slane %v4241_v22, 2  ;;  %v4251_v10 = vor.u32 %v4250_v63, %v4246_v5 }
 0x3ff   : > { %14494 = vst [vmem:[#allocation20_spill] sm:$0xff] %v12383_v49  ;;  %v4274_v14 = vshll.u32 %v12367_v4, 16  ;;  %v4417_v57 = vcombine.low %v12377_v61, %v12383_v49  ;;  %v4266_v8 = vrot.slane %v4264_v23, 7  ;;  %v4270_v51 = vrot.slane %v4268_v48, 6  ;;  %v14499_v48 = vld [vmem:[#allocation91_spill] sm:$0xff] }
 0x400   : > { %v4261_v39 = vor.u32 %v4260_v17, %v4256_v6  ;;  %v12392_v46 = vrot.slane %v4416_v38, %v11465_v43  ;;  %v12396_v27 = vsel %vm11546_vm6, %v4242_v60, %v4246_v5  ;;  %v4252_v63 = vrot.slane %v4251_v10, 2  ;;  %v14500_v38 = vld [vmem:[#allocation44_spill] sm:$0xff] }
 0x401   : > { %14496 = vst [vmem:[#allocation53_spill] sm:$0xff] %v12396_v27  ;;  %v12399_v62 = vrot.slane %v4417_v57, %v11465_v43  ;;  %v4271_v61 = vor.u32 %v4270_v51, %v4266_v8  ;;  %v4276_v17 = vrot.slane %v4274_v14, 7  ;;  %v4600_v49 = vcombine.low %v14499_v48, %v11493_v59 }
 0x402   : > { %14495 = vst [vmem:[#allocation29_spill] sm:$0xff] %v12392_v46  ;;  %v4262_v22 = vrot.slane %v4261_v39, 2  ;;  %v12403_v23 = vsel %vm11546_vm6, %v4252_v63, %v4256_v6  ;;  %v4601_v4 = vcombine.low %v14501_v3, %v14500_v38  ;;  %v5254_v5 = vand.u32 %v7730_v16, %v14502_v28 }
 0x403   : > { %14497 = vst [vmem:[#allocation49_spill] sm:$0xff] %v12399_v62  ;;  %14498 = vst [vmem:[#allocation82_spill] sm:$0xff] %v12403_v23  ;;  %v4432_v10 = vcombine.low %v12392_v46, %v12399_v62  ;;  %v4272_v14 = vrot.slane %v4271_v61, 2  ;;  %v4433_v6 = vcombine.low %v12396_v27, %v12403_v23  ;;  %v3303_v39 = vadd.f32 %v12186_v53, %v12175_v47  ;;  %v14511_v46 = vld [vmem:[#allocation92_spill] sm:$0xff] }
 0x404   : > { %v12414_v60 = vsel %vm11546_vm6, %v4262_v22, %v4266_v8  ;;  %8719 = vmatprep.subr.bf16.mxu1 %v5254_v5  ;;  %v4608_v61 = vrot.slane %v4600_v49, %v11465_v43  ;;  %v4615_v16 = vrot.slane %v4601_v4, %v11465_v43  ;;  %v4652_v63 = vcombine.low %v11754_v56, %v11778_v58 }
 0x405   : > { %14503 = vst [vmem:[#allocation24_spill] sm:$0xff] %v12414_v60  ;;  %8693 = vmatprep.mubr.msk.bf16.mxu1 %vm4450_vm15, %v4432_v10  ;;  %v12421_v57 = vsel %vm11546_vm6, %v4272_v14, %v4276_v17  ;;  %v12428_v8 = vrot.slane %v4433_v6, %v11465_v43  ;;  %v4668_v47 = vcombine.low %v11862_v33, %v11781_v21  ;;  %v3507_v32 = vsel %vm3417_vm14, %v3303_v39, 0.0  ;;  %v14509_v6 = vld [vmem:[#allocation61_spill] sm:$0xff] }
 0x406   : > { %14504 = vst [vmem:[#allocation85_spill] sm:$0xff] %v12421_v57  ;;  %v4434_v51 = vcombine.low %v12414_v60, %v12421_v57  ;;  %v12444_v17 = vrot.slane %v4652_v63, %v11465_v43  ;;  %v4618_v4 = vcombine.low %v11608_v0, %v11573_v41  ;;  %v4616_v14 = vcombine.low %v4608_v61, %v4615_v16  ;;  %v14510_v63 = vld [vmem:[#allocation54_spill] sm:$0xff] }
 0x407   : > { %14505 = vst [vmem:[#allocation31_spill] sm:$0xff] %v12428_v8  ;;  %v12447_v10 = vrot.slane %v4668_v47, %v11465_v43  ;;  %v4635_v62 = vcombine.low %v14509_v6, %v11699_v1  ;;  %v4617_v47 = vcombine.low %v14511_v46, %v14510_v63  ;;  %v3568_v39 = vmul.f32 %v11455_v52, %v3507_v32  ;;  %v14517_v63 = vld [vmem:[#allocation21_spill] sm:$0xff] }
 0x408   : > { %v12441_v22 = vrot.slane %v4434_v51, %v11465_v43  ;;  %14507 = vst [vmem:[#allocation88_spill] sm:$0xff] %v12444_v17  ;;  %vm3537_vm13 = vcmp.ge.f32.partialorder %v3507_v32, 0.0  ;;  %v4632_v61 = vrot.slane %v4618_v4, %v11465_v43  ;;  %vm4917_vm9 = vcmask 1042434   ;;  %v14515_v4 = vld [vmem:[#allocation63_spill] sm:$0xff] }
 0x409   : > { %14508 = vst [vmem:[#allocation89_spill] sm:$0xff] %v12447_v10  ;;  %v12466_v16 = vrot.slane %v4635_v62, %v11465_v43  ;;  %v4625_v51 = vrot.slane %v4617_v47, %v11465_v43  ;;  %v3598_v60 = vsel %vm3537_vm13, %v3507_v32, %v3568_v39  ;;  %v4651_v62 = vcombine.low %v14516_v7, %v14515_v4  ;;  %vm12485_vm12 = vmor %vm1049_vm0, %vm4917_vm9 }
 0x40a   : > { %14506 = vst [vmem:[#allocation19_spill] sm:$0xff] %v12441_v22  ;;  %v4449_v49 = vcombine.low %v12428_v8, %v12441_v22  ;;  %v14512_v22 = vld [vmem:[#allocation52_spill] sm:$0xff]  ;;  %v14513_v8 = vld [vmem:[#allocation50_spill] sm:$0xff]  ;;  %v4669_v48 = vcombine.low %v14517_v63, %v11795_v36  ;;  %v7741_v34 = vpack.c.bf16 %v12230_v25, %v12230_v25  ;;  %v3619_v47 = vpack.c.bf16 %v3598_v60, %v3598_v60  ;;  %v14520_v60 = vld [vmem:[#allocation79_spill] sm:$0xff] }
 0x40b   : > { %v4634_v23 = vcombine.low %v14513_v8, %v14512_v22  ;;  %14514 = vst [vmem:[#allocation30_spill] sm:$0xff] %v12466_v16  ;;  %vm4919_vm11 = vcmask 1044484   ;;  %v4685_v32 = vcombine.low %v11844_v15, %v11876_v55  ;;  %vm4921_vm1 = vcmask 1046534   ;;  %vm3420_vm0 = vmand %vm12289_vm7, %vm3390_vm10 }
 0x40c   : > { %8694 = vmatmul.mubr.msk.bf16.gmra.mrb[196].mxu1 %vm4450_vm15, %v4449_v49  ;;  %v7742_v49 = vld [vmem:[%s13714_s4 + $0xc] sm:$0x7]  ;;  %v12522_v29 = vrot.slane %v4651_v62, %v11465_v43  ;;  %v12525_v11 = vrot.slane %v4669_v48, %v11465_v43  ;;  %vm4920_vm10 = vmor %vm12485_vm12, %vm4919_vm11 }
 0x40d   : > { %8699 = vmatprep.mubr.msk.bf16.mxu1 %vm4450_vm15, %v4616_v14  ;;  %v4642_v57 = vrot.slane %v4634_v23, %v11465_v43  ;;  %v4633_v14 = vcombine.low %v4625_v51, %v4632_v61  ;;  %v12474_v27 = vand.u32 %v7742_v49, %v14502_v28  ;;  %v13932_v51 = vrot.slane %v14512_v22, 7  ;;  %v14521_v61 = vld [vmem:[#allocation58_spill] sm:$0xff]  ;;  %vm12556_vm3 = vmor %vm4920_vm10, %vm4921_vm1 }
 0x40e   : > { %v14522_v49 = vld [vmem:[#allocation70_spill] sm:$0xff]  ;;  %14531 = vst [vmem:[#allocation84_spill] sm:$0xff] %v12522_v29  ;;  %14532 = vst [vmem:[#allocation92_spill] sm:$0xff] %v12525_v11  ;;  %v4667_v48 = vcombine.low %v12522_v29, %v12444_v17  ;;  %v14541_v17 = vld [vmem:[#allocation5_spill] sm:$0xff] }
 0x40f   : > { %v4650_v50 = vcombine.low %v4642_v57, %v12466_v16  ;;  %v3306_v57 = vadd.f32 %v12186_v53, %v12281_v13  ;;  %v14525_v53 = vld [vmem:[#allocation23_spill] sm:$0xff]  ;;  %v14526_v13 = vld [vmem:[#allocation17_spill] sm:$0xff] }
 0x411   : > { %v12539_v62 = vsel %vm3420_vm0, %v3306_v57, 0.0  ;;  %v4957_v57 = vrot.slane %v11699_v1, 7 }
 0x412   : > { %v12567_v29 = vmul.f32 %v11455_v52, %v12539_v62  ;;  %v4719_v52 = vcombine.low %v14541_v17, %v12144_v31  ;;  %vm3540_vm5 = vcmp.ge.f32.partialorder %v12539_v62, 0.0 }
 0x414   : > { %8700 = vmatmul.mubr.msk.bf16.vlgmr.msra.gmra.mrb[180].mxu1 %vm4450_vm15, %v4633_v14  ;;  %v14523_v14 = vcombine.low %v14521_v61, %v14522_v49  ;;  %v14529_v61 = vpack.c.bf16 %v12230_v25, %v12228_v35  ;;  %v4952_v35 = vrot.slane %v13932_v51, 2  ;;  %v14535_v25 = vld [vmem:[#allocation77_spill] sm:$0xff]  ;;  %v4960_v51 = vrot.slane %v14516_v7, 7 }
 0x415   : > { %8720 = vmatpush3.bf16.msra.mxu1 %v5254_v5  ;;  %8703 = vmatprep.mubr.msk.bf16.mxu1 %vm4450_vm15, %v4650_v50  ;;  %v4686_v50 = vcombine.low %v11872_v37, %v11973_v40  ;;  %v14527_v5 = vcombine.low %v14525_v53, %v14526_v13  ;;  %v12534_v53 = vrot.slane %v3619_v47, %v11465_v43  ;;  %v4953_v13 = vrot.slane %v14535_v25, 7 }
 0x416   : > { %v12500_v16 = vrot.slane %v14523_v14, %v11465_v43  ;;  %8741 = vmatprep.subr.bf16.mxu1 %v12474_v27  ;;  %v12519_v49 = vrot.slane %v14529_v61, %v11465_v43  ;;  %v12531_v14 = vrot.slane %v7741_v34, %v11465_v43  ;;  %v4702_v34 = vcombine.low %v12022_v24, %v12036_v12 }
 0x417   : > { %v12513_v39 = vrot.slane %v14527_v5, %v11465_v43  ;;  %14534 = vst [vmem:[#allocation63_spill] sm:$0xff] %v12534_v53  ;;  %v12544_v5 = vrot.slane %v4685_v32, %v11465_v43  ;;  %v12549_v23 = vrot.slane %v4686_v50, %v11465_v43  ;;  %v4703_v47 = vcombine.low %v12095_v19, %v12064_v18 }
 0x418   : > { %14524 = vst [vmem:[#allocation35_spill] sm:$0xff] %v12500_v16  ;;  %14530 = vst [vmem:[#allocation90_spill] sm:$0xff] %v12519_v49  ;;  %v7724_v61 = vrot.slane %v14509_v6, 9  ;;  %v4684_v32 = vcombine.low %v12447_v10, %v12525_v11  ;;  %v12572_v6 = vsel %vm12556_vm3, %v4952_v35, %v4953_v13  ;;  %v4959_v10 = vrot.slane %v4957_v57, 2 }
 0x419   : > { %14528 = vst [vmem:[#allocation44_spill] sm:$0xff] %v12513_v39  ;;  %14533 = vst [vmem:[#allocation52_spill] sm:$0xff] %v12531_v14  ;;  %v12580_v50 = vrot.slane %v4702_v34, %v11465_v43  ;;  %v4962_v11 = vrot.slane %v4960_v51, 2  ;;  %v4701_v35 = vcombine.low %v12544_v5, %v12549_v23  ;;  %v12589_v13 = vrot.slane %v4703_v47, %v11465_v43 }
 0x41a   : > { %14536 = vst [vmem:[#allocation79_spill] sm:$0xff] %v12544_v5  ;;  %14537 = vst [vmem:[#allocation58_spill] sm:$0xff] %v12549_v23  ;;  %v12576_v1 = vsel %vm12556_vm3, %v7724_v61, %v4957_v57  ;;  %v4720_v61 = vcombine.low %v12181_v26, %v12234_v44  ;;  %v12595_v34 = vsel %vm12556_vm3, %v4959_v10, %v4960_v51  ;;  %v14544_v23 = vrot.slane %v11754_v56, 7  ;;  %v14545_v5 = vld [vmem:[#allocation22_spill] sm:$0xff] }
 0x41b   : > { %14540 = vst [vmem:[#allocation70_spill] sm:$0xff] %v12580_v50  ;;  %14542 = vst [vmem:[#allocation23_spill] sm:$0xff] %v12589_v13  ;;  %v4736_v57 = vcombine.low %v12224_v30, %v12253_v42  ;;  %v4969_v7 = vrot.slane %v14545_v5, 7  ;;  %v4737_v16 = vcombine.low %v12248_v2, %v12287_v20  ;;  %v7725_v10 = vrot.slane %v11778_v58, 9 }
 0x41c   : > { %8704 = vmatmul.mubr.msk.bf16.gmra.mrb[184].mxu1 %vm4450_vm15, %v4667_v48  ;;  %v4968_v47 = vrot.slane %v14544_v23, 2  ;;  %v4973_v51 = vrot.slane %v11862_v33, 7  ;;  %v12615_v53 = vrot.slane %v4719_v52, %v11465_v43  ;;  %v4979_v23 = vrot.slane %v14517_v63, 7  ;;  %v14555_v63 = vld [vmem:[#allocation91_spill] sm:$0xff] }
 0x41d   : > { %8707 = vmatprep.mubr.msk.bf16.mxu1 %vm4450_vm15, %v4684_v32  ;;  %v14543_v32 = vrot.slane %v14515_v4, 7  ;;  %v4928_v5 = vrot.slane %v14501_v3, 7  ;;  %v4931_v14 = vrot.slane %v14500_v38, 7  ;;  %v4718_v39 = vcombine.low %v12580_v50, %v12589_v13 }
 0x41e   : > { %14546 = vst [vmem:[#allocation17_spill] sm:$0xff] %v12615_v53  ;;  %v12624_v58 = vsel %vm12556_vm3, %v7725_v10, %v4973_v51  ;;  %v4975_v33 = vrot.slane %v4973_v51, 2  ;;  %v12629_v52 = vrot.slane %v4720_v61, %v11465_v43  ;;  %v4934_v3 = vrot.slane %v14511_v46, 7 }
 0x41f   : > { %v12603_v48 = vsel %vm12556_vm3, %v4962_v11, %v14543_v32  ;;  %v4925_v11 = vrot.slane %v11493_v59, 7  ;;  %v4976_v32 = vrot.slane %v11781_v21, 7  ;;  %14547 = vst [vmem:[#allocation77_spill] sm:$0xff] %v12624_v58  ;;  %v12633_v59 = vsel %vm12556_vm3, %v4968_v47, %v4969_v7 }
 0x420   : > { %14548 = vst [vmem:[#allocation5_spill] sm:$0xff] %v12629_v52  ;;  %14549 = vst [vmem:[#allocation22_spill] sm:$0xff] %v12633_v59  ;;  %v4941_v38 = vrot.slane %v11608_v0, 7  ;;  %v5105_v10 = vcombine.low %v12633_v59, %v12624_v58  ;;  %v4753_v7 = vcombine.low %v12337_v9, %v12318_v45  ;;  %v4944_v47 = vrot.slane %v11573_v41, 7  ;;  %v14554_v58 = vld [vmem:[#allocation37_spill] sm:$0xff] }
 0x421   : > { %v4978_v21 = vrot.slane %v4976_v32, 2  ;;  %v12642_v51 = vsel %vm12556_vm3, %v4975_v33, %v4976_v32  ;;  %v4927_v61 = vrot.slane %v4925_v11, 2  ;;  %v4933_v13 = vrot.slane %v4931_v14, 2 }
 0x422   : > { %14550 = vst [vmem:[#allocation94_spill] sm:$0xff] %v12642_v51  ;;  %v4947_v50 = vrot.slane %v14513_v8, 7  ;;  %v12656_v32 = vrot.slane %v4736_v57, %v11465_v43  ;;  %v4754_v59 = vcombine.low %v14554_v58, %v12344_v54  ;;  %v7722_v41 = vrot.slane %v14555_v63, 9 }
 0x423   : > { %v12650_v46 = vsel %vm12556_vm3, %v4978_v21, %v4979_v23  ;;  %v4935_v21 = vsel %vm12556_vm3, %v4933_v13, %v4934_v3  ;;  %v4943_v0 = vrot.slane %v4941_v38, 2  ;;  %v12667_v8 = vrot.slane %v5105_v10, %v11465_v43 }
 0x424   : > { %8708 = vmatmul.mubr.msk.bf16.gmra.mrb[188].mxu1 %vm4450_vm15, %v4701_v35  ;;  %14551 = vst [vmem:[#allocation95_spill] sm:$0xff] %v12650_v46  ;;  %v4930_v35 = vrot.slane %v4928_v5, 2  ;;  %v5121_v33 = vcombine.low %v12642_v51, %v12650_v46  ;;  %14552 = vst [vmem:[#allocation96_spill] sm:$0xff] %v12656_v32  ;;  %v4735_v57 = vcombine.low %v12615_v53, %v12629_v52  ;;  %v4946_v63 = vrot.slane %v4944_v47, 2  ;;  %v14559_v53 = vld [vmem:[#allocation54_spill] sm:$0xff] }
 0x425   : > { %8711 = vmatprep.mubr.msk.bf16.mxu1 %vm4450_vm15, %v4718_v39  ;;  %v12659_v39 = vrot.slane %v4737_v16, %v11465_v43  ;;  %14556 = vst [vmem:[#allocation91_spill] sm:$0xff] %v12667_v8  ;;  %v12675_v16 = vrot.slane %v4753_v7, %v11465_v43  ;;  %v4929_v51 = vsel %vm12556_vm3, %v4927_v61, %v4928_v5  ;;  %v4949_v49 = vrot.slane %v4947_v50, 2 }
 0x426   : > { %v12670_v46 = vrot.slane %v5121_v33, %v11465_v43  ;;  %v4932_v13 = vsel %vm12556_vm3, %v4930_v35, %v4931_v14  ;;  %v4982_v10 = vrot.slane %v11795_v36, 7  ;;  %v4926_v7 = vsel %vm12556_vm3, %v7722_v41, %v4925_v11  ;;  %v14562_v33 = vld [vmem:[#allocation86_spill] sm:$0xff] }
 0x427   : > { %14553 = vst [vmem:[#allocation97_spill] sm:$0xff] %v12659_v39  ;;  %14558 = vst [vmem:[#allocation99_spill] sm:$0xff] %v12675_v16  ;;  %v4752_v20 = vcombine.low %v12656_v32, %v12659_v39  ;;  %v5054_v52 = vcombine.low %v4932_v13, %v4935_v21  ;;  %v7723_v45 = vrot.slane %v14559_v53, 9  ;;  %v12691_v5 = vrot.slane %v4754_v59, %v11465_v43 }
 0x428   : > { %14557 = vst [vmem:[#allocation98_spill] sm:$0xff] %v12670_v46  ;;  %v4936_v14 = vrot.slane %v4934_v3, 2  ;;  %v5053_v61 = vcombine.low %v4926_v7, %v4929_v51  ;;  %v12695_v35 = vsel %vm12556_vm3, %v4943_v0, %v4944_v47  ;;  %v7776_v39 = vpack.c.bf16 %v14562_v33, %v14562_v33  ;;  %v14567_v47 = vld [vmem:[#allocation33_spill] sm:$0xff] }
 0x429   : > { %14560 = vst [vmem:[#allocation54_spill] sm:$0xff] %v12691_v5  ;;  %14561 = vst [vmem:[#allocation100_spill] sm:$0xff] %v12695_v35  ;;  %v12703_v41 = vsel %vm12556_vm3, %v7723_v45, %v4941_v38  ;;  %v12707_v11 = vsel %vm12556_vm3, %v4946_v63, %v4947_v50  ;;  %v14565_v59 = vrot.slane %v14512_v22, 7  ;;  %v4981_v3 = vrot.slane %v4979_v23, 2 }
 0x42a   : > { %14563 = vst [vmem:[#allocation86_spill] sm:$0xff] %v12703_v41  ;;  %14564 = vst [vmem:[#allocation101_spill] sm:$0xff] %v12707_v11  ;;  %v4984_v51 = vrot.slane %v4982_v10, 2  ;;  %v4985_v21 = vrot.slane %v14567_v47, 7  ;;  %v5071_v45 = vcombine.low %v12695_v35, %v12707_v11  ;;  %v14568_v38 = vrot.slane %v14515_v4, 7 }
 0x42b   : > { %v12713_v0 = vsel %vm12556_vm3, %v4949_v49, %v14565_v59  ;;  %v4989_v50 = vrot.slane %v11876_v55, 7  ;;  %v12724_v63 = vsel %vm3540_vm5, %v12539_v62, %v12567_v29  ;;  %v4769_v49 = vcombine.low %v12675_v16, %v12691_v5 }
 0x42c   : > { %8712 = vmatmul.mubr.msk.bf16.gmra.mrb[192].mxu1 %vm4450_vm15, %v4735_v57  ;;  %14566 = vst [vmem:[#allocation102_spill] sm:$0xff] %v12713_v0  ;;  %v4965_v57 = vrot.slane %v14568_v38, 2  ;;  %v5061_v23 = vrot.slane %v5053_v61, %v11465_v43  ;;  %v14569_v13 = vrot.slane %v14520_v60, 7  ;;  %v5087_v59 = vcombine.low %v12713_v0, %v12572_v6 }
 0x42d   : > { %8715 = vmatprep.mubr.msk.bf16.mxu1 %vm4450_vm15, %v4752_v20  ;;  %v5068_v20 = vrot.slane %v5054_v52, %v11465_v43  ;;  %v5088_v47 = vcombine.low %v12576_v1, %v12595_v34  ;;  %v14570_v29 = vrot.slane %v11754_v56, 7  ;;  %v12746_v60 = vsel %vm12556_vm3, %v4981_v3, %v4982_v10 }
 0x42e   : > { %v4938_v52 = vsel %vm12556_vm3, %v4936_v14, %v14569_v13  ;;  %v12750_v14 = vsel %vm12556_vm3, %v4984_v51, %v4985_v21  ;;  %v4992_v61 = vrot.slane %v11872_v37, 7  ;;  %v4995_v38 = vrot.slane %v11973_v40, 7 }
 0x42f   : > { %v5070_v7 = vcombine.low %v4938_v52, %v12703_v41  ;;  %v12742_v62 = vsel %vm12556_vm3, %v4965_v57, %v14570_v29  ;;  %v5069_v13 = vcombine.low %v5061_v23, %v5068_v20  ;;  %v5085_v52 = vrot.slane %v5071_v45, %v11465_v43  ;;  %v14571_v57 = vld [vmem:[#allocation28_spill] sm:$0xff] }
 0x430   : > { %v4991_v5 = vrot.slane %v4989_v50, 2  ;;  %v5005_v16 = vrot.slane %v12095_v19, 7  ;;  %v14572_v29 = vpack.c.bf16 %v14562_v33, %v14571_v57  ;;  %v5104_v51 = vcombine.low %v12603_v48, %v12742_v62 }
 0x431   : > { %v4998_v21 = vrot.slane %v12022_v24, 7  ;;  %v5078_v20 = vrot.slane %v5070_v7, %v11465_v43  ;;  %v12771_v45 = vrot.slane %v5088_v47, %v11465_v43  ;;  %v5122_v33 = vcombine.low %v12746_v60, %v12750_v14 }
 0x432   : > { %v12760_v10 = vrot.slane %v14572_v29, %v11465_v43  ;;  %v5008_v23 = vrot.slane %v12064_v18, 7  ;;  %v12777_v57 = vrot.slane %v7776_v39, %v11465_v43  ;;  %v4994_v29 = vrot.slane %v4992_v61, 2 }
 0x433   : > { %14574 = vst [vmem:[#allocation28_spill] sm:$0xff] %v12771_v45  ;;  %v4997_v3 = vrot.slane %v4995_v38, 2  ;;  %v5086_v32 = vcombine.low %v5078_v20, %v5085_v52  ;;  %v12783_v7 = vsel %vm12556_vm3, %v4991_v5, %v4992_v61  ;;  %v5007_v47 = vrot.slane %v5005_v16, 2 }
 0x434   : > { %14573 = vst [vmem:[#allocation33_spill] sm:$0xff] %v12760_v10  ;;  %8716 = vmatmul.mubr.msk.bf16.gmra.mrb[196].mxu1 %vm4450_vm15, %v4769_v49  ;;  %14575 = vst [vmem:[#allocation103_spill] sm:$0xff] %v12777_v57  ;;  %v5095_v49 = vrot.slane %v5087_v59, %v11465_v43  ;;  %v12786_v11 = vrot.slane %v5104_v51, %v11465_v43  ;;  %v5011_v39 = vrot.slane %v14541_v17, 7  ;;  %v5014_v59 = vrot.slane %v12144_v31, 7  ;;  %v7753_v51 = vld [vmem:[%s13714_s4 + $0x10] sm:$0x7] }
 0x435   : > { %8721 = vmatprep.mubr.msk.bf16.mxu1 %vm4450_vm15, %v5069_v13  ;;  %v7726_v13 = vrot.slane %v11844_v15, 9  ;;  %14576 = vst [vmem:[#allocation104_spill] sm:$0xff] %v12783_v7  ;;  %v12790_v0 = vsel %vm12556_vm3, %v4997_v3, %v4998_v21  ;;  %v12796_v20 = vrot.slane %v5122_v33, %v11465_v43  ;;  %v5010_v61 = vrot.slane %v5008_v23, 2 }
 0x436   : > { %14577 = vst [vmem:[#allocation105_spill] sm:$0xff] %v12786_v11  ;;  %14578 = vst [vmem:[#allocation106_spill] sm:$0xff] %v12790_v0  ;;  %v5103_v52 = vcombine.low %v5095_v49, %v12771_v45  ;;  %v5120_v3 = vcombine.low %v12786_v11, %v12667_v8  ;;  %v12809_v41 = vsel %vm12556_vm3, %v4994_v29, %v4995_v38  ;;  %v14580_v49 = vld [vmem:[#allocation10_spill] sm:$0xff]  ;;  %v7727_v35 = vrot.slane %v12036_v12, 9  ;;  %v14582_v29 = vld [vmem:[#allocation25_spill] sm:$0xff] }
 0x437   : > { %14579 = vst [vmem:[#allocation107_spill] sm:$0xff] %v12796_v20  ;;  %v12800_v5 = vsel %vm12556_vm3, %v7726_v13, %v4989_v50  ;;  %v5001_v45 = vrot.slane %v14580_v49, 7  ;;  %v5139_v50 = vcombine.low %v12809_v41, %v12790_v0  ;;  %v5000_v13 = vrot.slane %v4998_v21, 2  ;;  %v14595_v0 = vld [vmem:[#allocation87_spill] sm:$0xff] }
 0x438   : > { %v5138_v33 = vcombine.low %v12800_v5, %v12783_v7  ;;  %v12819_v57 = vsel %vm12556_vm3, %v5007_v47, %v5008_v23  ;;  %v5013_v8 = vrot.slane %v5011_v39, 2  ;;  %v5016_v38 = vrot.slane %v5014_v59, 2 }
 0x439   : > { %14581 = vst [vmem:[#allocation10_spill] sm:$0xff] %v12819_v57  ;;  %v5017_v11 = vrot.slane %v14582_v29, 7  ;;  %v12824_v10 = vand.u32 %v7753_v51, %v14502_v28  ;;  %v5137_v21 = vcombine.low %v12670_v46, %v12796_v20  ;;  %v12832_v23 = vsel %vm12556_vm3, %v7727_v35, %v5005_v16 }
 0x43a   : > { %14584 = vst [vmem:[#allocation108_spill] sm:$0xff] %v12832_v23  ;;  %v5021_v47 = vrot.slane %v12234_v44, 7  ;;  %v12840_v51 = vrot.slane %v5138_v33, %v11465_v43  ;;  %v5037_v49 = vrot.slane %v12337_v9, 7  ;;  %v12848_v16 = vrot.slane %v5139_v50, %v11465_v43 }
 0x43b   : > { %14583 = vst [vmem:[#allocation25_spill] sm:$0xff] %v12824_v10  ;;  %v12852_v35 = vsel %vm12556_vm3, %v5000_v13, %v5001_v45  ;;  %v12860_v29 = vsel %vm12556_vm3, %v5013_v8, %v5014_v59  ;;  %v12864_v46 = vsel %vm12556_vm3, %v5016_v38, %v5017_v11  ;;  %v7728_v50 = vrot.slane %v12181_v26, 9 }
 0x43c   : > { %8722 = vmatmul.mubr.msk.bf16.vlgmr.msra.gmra.mrb[180].mxu1 %vm4450_vm15, %v5086_v32  ;;  %v12836_v32 = vsel %vm12556_vm3, %v5010_v61, %v5011_v39  ;;  %14586 = vst [vmem:[#allocation110_spill] sm:$0xff] %v12840_v51  ;;  %14587 = vst [vmem:[#allocation111_spill] sm:$0xff] %v12848_v16  ;;  %v5043_v39 = vrot.slane %v14554_v58, 7  ;;  %v5046_v61 = vrot.slane %v12344_v54, 7  ;;  %v5155_v33 = vcombine.low %v12852_v35, %v12832_v23  ;;  %v14591_v58 = vld [vmem:[#allocation59_spill] sm:$0xff]  ;;  %v14594_v23 = vld [vmem:[#allocation34_spill] sm:$0xff] }
 0x43d   : > { %8742 = vmatpush3.bf16.msra.mxu1 %v12474_v27  ;;  %8725 = vmatprep.mubr.msk.bf16.mxu1 %vm4450_vm15, %v5103_v52  ;;  %14585 = vst [vmem:[#allocation109_spill] sm:$0xff] %v12836_v32  ;;  %v5156_v27 = vcombine.low %v12819_v57, %v12836_v32  ;;  %v5030_v52 = vrot.slane %v12248_v2, 7  ;;  %14588 = vst [vmem:[#allocation112_spill] sm:$0xff] %v12852_v35  ;;  %v5023_v20 = vrot.slane %v5021_v47, 2  ;;  %v5024_v45 = vrot.slane %v12224_v30, 7  ;;  %v14593_v32 = vld [vmem:[#allocation78_spill] sm:$0xff] }
 0x43e   : > { %8763 = vmatprep.subr.bf16.mxu1 %v12824_v10  ;;  %14589 = vst [vmem:[#allocation113_spill] sm:$0xff] %v12860_v29  ;;  %14590 = vst [vmem:[#allocation114_spill] sm:$0xff] %v12864_v46  ;;  %v5027_v13 = vrot.slane %v12253_v42, 7  ;;  %v5040_v54 = vrot.slane %v14591_v58, 7  ;;  %v5033_v8 = vrot.slane %v14593_v32, 7  ;;  %v5039_v59 = vrot.slane %v5037_v49, 2 }
 0x43f   : > { %v12871_v9 = vrot.slane %v5156_v27, %v11465_v43  ;;  %v5032_v10 = vrot.slane %v5030_v52, 2  ;;  %v7729_v57 = vrot.slane %v14594_v23, 9  ;;  %v5045_v11 = vrot.slane %v5043_v39, 2 }
 0x440   : > { %v5048_v38 = vrot.slane %v5046_v61, 2  ;;  %v5049_v35 = vrot.slane %v14595_v0, 7  ;;  %v5154_v7 = vcombine.low %v12840_v51, %v12848_v16  ;;  %v12880_v58 = vrot.slane %v5155_v33, %v11465_v43 }
 0x441   : > { %14592 = vst [vmem:[#allocation115_spill] sm:$0xff] %v12871_v9  ;;  %v12884_v27 = vsel %vm12556_vm3, %v7728_v50, %v5021_v47  ;;  %v5172_v32 = vcombine.low %v12860_v29, %v12864_v46  ;;  %v12891_v0 = vsel %vm12556_vm3, %v5023_v20, %v5024_v45  ;;  %v12895_v16 = vsel %vm12556_vm3, %v7729_v57, %v5037_v49  ;;  %v14602_v49 = vld [vmem:[#allocation90_spill] sm:$0xff]  ;;  %v14608_v46 = vld [vmem:[#allocation63_spill] sm:$0xff] }
 0x442   : > { %14596 = vst [vmem:[#allocation78_spill] sm:$0xff] %v12880_v58  ;;  %14597 = vst [vmem:[#allocation87_spill] sm:$0xff] %v12884_v27  ;;  %v5042_v33 = vrot.slane %v5040_v54, 2  ;;  %v5171_v51 = vcombine.low %v12880_v58, %v12871_v9  ;;  %v5029_v47 = vrot.slane %v5027_v13, 2  ;;  %v12901_v50 = vsel %vm12556_vm3, %v5032_v10, %v5033_v8  ;;  %v14604_v9 = vld [vmem:[#allocation52_spill] sm:$0xff]  ;;  %v14607_v58 = vld [vmem:[#allocation93_spill] sm:$0xff] }
 0x443   : > { %14598 = vst [vmem:[#allocation116_spill] sm:$0xff] %v12891_v0  ;;  %14599 = vst [vmem:[#allocation117_spill] sm:$0xff] %v12895_v16  ;;  %v12909_v20 = vsel %vm12556_vm3, %v5045_v11, %v5046_v61  ;;  %v12913_v57 = vsel %vm12556_vm3, %v5048_v38, %v5049_v35  ;;  %v12921_v10 = vcombine.high %v14604_v9, %v14604_v9  ;;  %v14605_v35 = vld [vmem:[#allocation55_spill] sm:$0xff]  ;;  %v14606_v38 = vld [vmem:[#allocation50_spill] sm:$0xff] }
 0x444   : > { %8726 = vmatmul.mubr.msk.bf16.gmra.mrb[184].mxu1 %vm4450_vm15, %v5120_v3  ;;  %v5026_v3 = vrot.slane %v5024_v45, 2  ;;  %14600 = vst [vmem:[#allocation118_spill] sm:$0xff] %v12901_v50  ;;  %14601 = vst [vmem:[#allocation119_spill] sm:$0xff] %v12913_v57  ;;  %v12917_v45 = vcombine.high %v14602_v49, %v14602_v49  ;;  %v12927_v8 = vsel %vm12556_vm3, %v5029_v47, %v5030_v52 }
 0x445   : > { %8729 = vmatprep.mubr.msk.bf16.mxu1 %vm4450_vm15, %v5137_v21  ;;  %v12905_v21 = vsel %vm12556_vm3, %v5039_v59, %v5040_v54  ;;  %v5173_v54 = vcombine.low %v12884_v27, %v12891_v0  ;;  %v5190_v61 = vcombine.low %v12901_v50, %v12895_v16  ;;  %v5417_v59 = vcombine.low %v14559_v53, %v14605_v35  ;;  %v14610_v35 = vld [vmem:[#allocation35_spill] sm:$0xff]  ;;  %v14612_v50 = vld [vmem:[#allocation80_spill] sm:$0xff] }
 0x446   : > { %14603 = vst [vmem:[#allocation120_spill] sm:$0xff] %v12917_v45  ;;  %v12935_v11 = vsel %vm12556_vm3, %v5042_v33, %v5043_v39  ;;  %v5418_v23 = vcombine.low %v14607_v58, %v14606_v38  ;;  %v5570_v0 = vcombine.low %v12917_v45, %v14604_v9  ;;  %v5571_v52 = vcombine.low %v12921_v10, %v14608_v46  ;;  %v14611_v38 = vld [vmem:[#allocation64_spill] sm:$0xff] }
 0x447   : > { %v12945_v47 = vsel %vm12556_vm3, %v5026_v3, %v5027_v13  ;;  %v5206_v53 = vcombine.low %v12905_v21, %v12935_v11  ;;  %v5207_v39 = vcombine.low %v12909_v20, %v12913_v57  ;;  %v5435_v27 = vcombine.low %v14612_v50, %v14611_v38  ;;  %v14616_v50 = vld [vmem:[#allocation61_spill] sm:$0xff] }
 0x448   : > { %v5189_v58 = vcombine.low %v12945_v47, %v12927_v8  ;;  %v12958_v29 = vrot.slane %v5570_v0, %v11465_v43  ;;  %v12961_v13 = vrot.slane %v5571_v52, %v11465_v43  ;;  %v12965_v3 = vrot.slane %v5172_v32, %v11465_v43  ;;  %v14617_v52 = vld [vmem:[#allocation36_spill] sm:$0xff] }
 0x449   : > { %v12968_v57 = vrot.slane %v5173_v54, %v11465_v43  ;;  %v12971_v16 = vrot.slane %v5190_v61, %v11465_v43  ;;  %v12974_v33 = vrot.slane %v5417_v59, %v11465_v43  ;;  %v12978_v0 = vrot.slane %v5418_v23, %v11465_v43  ;;  %v14618_v32 = vld [vmem:[#allocation12_spill] sm:$0xff] }
 0x44a   : > { %14613 = vst [vmem:[#allocation52_spill] sm:$0xff] %v12965_v3  ;;  %v5452_v38 = vcombine.low %v14618_v32, %v14617_v52  ;;  %v12987_v61 = vrot.slane %v5206_v53, %v11465_v43  ;;  %v12990_v59 = vrot.slane %v5207_v39, %v11465_v43  ;;  %v5469_v23 = vcombine.low %v11795_v36, %v11844_v15  ;;  %v14623_v39 = vld [vmem:[#allocation21_spill] sm:$0xff] }
 0x44b   : > { %14614 = vst [vmem:[#allocation55_spill] sm:$0xff] %v12968_v57  ;;  %14615 = vst [vmem:[#allocation50_spill] sm:$0xff] %v12971_v16  ;;  %v13003_v52 = vrot.slane %v5189_v58, %v11465_v43  ;;  %v13006_v53 = vrot.slane %v5435_v27, %v11465_v43  ;;  %v14624_v32 = vld [vmem:[#allocation13_spill] sm:$0xff]  ;;  %v14627_v15 = vcombine.low %v12595_v34, %v12603_v48 }
 0x44c   : > { %8730 = vmatmul.mubr.msk.bf16.gmra.mrb[188].mxu1 %vm4450_vm15, %v5154_v7  ;;  %v5434_v7 = vcombine.low %v14512_v22, %v14616_v50  ;;  %14619 = vst [vmem:[#allocation93_spill] sm:$0xff] %v12987_v61  ;;  %14620 = vst [vmem:[#allocation63_spill] sm:$0xff] %v12990_v59  ;;  %v14621_v22 = vpack.c.bf16 %v12724_v63, %v12724_v63  ;;  %v5468_v54 = vcombine.low %v14624_v32, %v14623_v39 }
 0x44d   : > { %8733 = vmatprep.mubr.msk.bf16.mxu1 %vm4450_vm15, %v5171_v51  ;;  %v5451_v51 = vcombine.low %v14515_v4, %v11754_v56  ;;  %14622 = vst [vmem:[#allocation35_spill] sm:$0xff] %v13003_v52  ;;  %v14625_v56 = vcombine.low %v12572_v6, %v12576_v1  ;;  %v13020_v4 = vrot.slane %v14627_v15, %v11465_v43  ;;  %v5755_v6 = vshrl.u32 %v14602_v49, 16 }
 0x44e   : > { %v13000_v50 = vrot.slane %v14621_v22, %v11465_v43  ;;  %v5188_v63 = vcombine.low %v12965_v3, %v12968_v57  ;;  %v5485_v27 = vcombine.low %v11876_v55, %v11872_v37  ;;  %v5205_v58 = vcombine.low %v13003_v52, %v12971_v16 }
 0x44f   : > { %v13014_v36 = vrot.slane %v14625_v56, %v11465_v43  ;;  %14628 = vst [vmem:[#allocation80_spill] sm:$0xff] %v13020_v4  ;;  %v13029_v22 = vrot.slane %v5434_v7, %v11465_v43  ;;  %v13032_v1 = vrot.slane %v5452_v38, %v11465_v43  ;;  %v5222_v48 = vcombine.low %v12987_v61, %v12990_v59  ;;  %v14639_v4 = vld [vmem:[#allocation108_spill] sm:$0xff] }
 0x450   : > { %v5433_v34 = vcombine.low %v12974_v33, %v12978_v0  ;;  %v13040_v39 = vrot.slane %v5451_v51, %v11465_v43  ;;  %v13043_v37 = vrot.slane %v5469_v23, %v11465_v43  ;;  %v13048_v7 = vrot.slane %v5468_v54, %v11465_v43 }
 0x451   : > { %14626 = vst [vmem:[#allocation64_spill] sm:$0xff] %v13014_v36  ;;  %v5486_v38 = vcombine.low %v11973_v40, %v12022_v24  ;;  %v5764_v32 = vshll.u32 %v12917_v45, 16  ;;  %v13055_v33 = vrot.slane %v5485_v27, %v11465_v43  ;;  %v5502_v0 = vcombine.low %v12036_v12, %v12095_v19 }
 0x452   : > { %v5503_v51 = vcombine.low %v12064_v18, %v14541_v17  ;;  %v5768_v23 = vshrl.u32 %v12917_v45, 16  ;;  %v13069_v54 = vcombine.high %v14608_v46, %v14608_v46  ;;  %v5774_v56 = vshll.u32 %v14604_v9, 16 }
 0x453   : > { %v13065_v24 = vrot.slane %v5764_v32, 7  ;;  %v5778_v18 = vshrl.u32 %v14604_v9, 16  ;;  %v5784_v17 = vshll.u32 %v12921_v10, 16  ;;  %v5794_v27 = vshll.u32 %v14608_v46, 16 }
 0x454   : > { %8734 = vmatmul.mubr.msk.bf16.gmra.mrb[192].mxu1 %vm4450_vm15, %v5188_v63  ;;  %v5770_v19 = vrot.slane %v5768_v23, 6  ;;  %v5776_v15 = vrot.slane %v5774_v56, 7  ;;  %v5788_v63 = vshrl.u32 %v12921_v10, 16  ;;  %v13080_v32 = vrot.slane %v5486_v38, %v11465_v43 }
 0x455   : > { %8737 = vmatprep.mubr.msk.bf16.mxu1 %vm4450_vm15, %v5205_v58  ;;  %v5798_v58 = vshrl.u32 %v14608_v46, 16  ;;  %v5780_v55 = vrot.slane %v5778_v18, 6  ;;  %v5786_v59 = vrot.slane %v5784_v17, 7  ;;  %v5796_v23 = vrot.slane %v5794_v27, 7  ;;  %v7765_v18 = vld [vmem:[%s13714_s4 + $0x14] sm:$0x7] }
 0x456   : > { %v5771_v40 = vor.u32 %v5770_v19, %v13065_v24  ;;  %v5790_v12 = vrot.slane %v5788_v63, 6  ;;  %v5804_v61 = vshll.u32 %v13069_v54, 16  ;;  %v13085_v56 = vrot.slane %v5502_v0, %v11465_v43 }
 0x457   : > { %v5800_v16 = vrot.slane %v5798_v58, 6  ;;  %v5781_v3 = vor.u32 %v5780_v55, %v5776_v15  ;;  %v13090_v38 = vrot.slane %v5503_v51, %v11465_v43 }
 0x458   : > { %v5772_v52 = vrot.slane %v5771_v40, 2  ;;  %v5791_v17 = vor.u32 %v5790_v12, %v5786_v59  ;;  %v5758_v40 = vshll.u32 %v14602_v49, 16 }
 0x459   : > { %v5801_v63 = vor.u32 %v5800_v16, %v5796_v23  ;;  %v5782_v27 = vrot.slane %v5781_v3, 2  ;;  %v5806_v16 = vrot.slane %v5804_v61, 7 }
 0x45a   : > { %v13103_v51 = vsel %vm11546_vm6, %v5772_v52, %v5776_v15  ;;  %v5792_v19 = vrot.slane %v5791_v17, 2  ;;  %v14631_v15 = vld [vmem:[#allocation22_spill] sm:$0xff] }
 0x45b   : > { %14630 = vst [vmem:[#allocation61_spill] sm:$0xff] %v13103_v51  ;;  %v5802_v12 = vrot.slane %v5801_v63, 2  ;;  %v13113_v0 = vsel %vm11546_vm6, %v5782_v27, %v5786_v59  ;;  %v6198_v3 = vcombine.low %v12742_v62, %v14631_v15  ;;  %v14632_v27 = vld [vmem:[#allocation94_spill] sm:$0xff]  ;;  %v14633_v62 = vld [vmem:[#allocation77_spill] sm:$0xff] }
 0x45c   : > { %8738 = vmatmul.mubr.msk.bf16.gmra.mrb[196].mxu1 %vm4450_vm15, %v5222_v48  ;;  %v13109_v48 = vand.u32 %v7765_v18, %v14502_v28  ;;  %v13123_v17 = vsel %vm11546_vm6, %v5792_v19, %v5796_v23  ;;  %v5963_v59 = vcombine.low %v13103_v51, %v13113_v0  ;;  %v13131_v18 = vrot.slane %v5758_v40, 7  ;;  %v14634_v19 = vld [vmem:[#allocation95_spill] sm:$0xff]  ;;  %v14635_v40 = vld [vmem:[#allocation104_spill] sm:$0xff] }
 0x45d   : > { %8743 = vmatprep.mubr.msk.bf16.mxu1 %vm4450_vm15, %v5433_v34  ;;  %v13119_v34 = vrot.slane %v5755_v6, 6  ;;  %v13127_v61 = vsel %vm11546_vm6, %v5802_v12, %v5806_v16  ;;  %v6199_v6 = vcombine.low %v14633_v62, %v14632_v27  ;;  %v13138_v15 = vrot.slane %v6198_v3, %v11465_v43  ;;  %v14636_v3 = vld [vmem:[#allocation112_spill] sm:$0xff]  ;;  %v14637_v62 = vld [vmem:[#allocation106_spill] sm:$0xff] }
 0x45e   : > { %v5964_v63 = vcombine.low %v13123_v17, %v13127_v61  ;;  %v13141_v23 = vrot.slane %v5963_v59, %v11465_v43  ;;  %v6215_v12 = vcombine.low %v14634_v19, %v12746_v60  ;;  %v6216_v16 = vcombine.low %v12750_v14, %v12800_v5  ;;  %v14638_v59 = vld [vmem:[#allocation10_spill] sm:$0xff]  ;;  %v14640_v5 = vld [vmem:[#allocation113_spill] sm:$0xff] }
 0x45f   : > { %v6232_v52 = vcombine.low %v14635_v40, %v12809_v41  ;;  %v13153_v27 = vrot.slane %v6199_v6, %v11465_v43  ;;  %v6233_v57 = vcombine.low %v14637_v62, %v14636_v3  ;;  %v6249_v36 = vcombine.low %v14639_v4, %v14638_v59  ;;  %v14643_v40 = vld [vmem:[#allocation25_spill] sm:$0xff]  ;;  %v14645_v62 = vld [vmem:[#allocation87_spill] sm:$0xff]  ;;  %v14646_v59 = vld [vmem:[#allocation114_spill] sm:$0xff] }
 0x460   : > { %v13150_v58 = vrot.slane %v5964_v63, %v11465_v43  ;;  %v13160_v60 = vrot.slane %v6215_v12, %v11465_v43  ;;  %v13163_v14 = vrot.slane %v6216_v16, %v11465_v43  ;;  %v14641_v63 = vld [vmem:[#allocation109_spill] sm:$0xff]  ;;  %v14642_v6 = vcombine.low %v13029_v22, %v13006_v53 }
 0x461   : > { %v13166_v41 = vrot.slane %v6232_v52, %v11465_v43  ;;  %v6250_v19 = vcombine.low %v14641_v63, %v14640_v5  ;;  %v13179_v16 = vrot.slane %v6233_v57, %v11465_v43  ;;  %v13182_v52 = vrot.slane %v6249_v36, %v11465_v43  ;;  %v14648_v63 = vld [vmem:[#allocation118_spill] sm:$0xff] }
 0x462   : > { %v14644_v3 = vcombine.low %v13040_v39, %v13032_v1  ;;  %v6266_v57 = vcombine.low %v14646_v59, %v14645_v62  ;;  %v7764_v5 = vrot.slane %v14602_v49, 9  ;;  %v14647_v1 = vld [vmem:[#allocation116_spill] sm:$0xff]  ;;  %v6148_v59 = vrot.slane %v12917_v45, 7 }
 0x463   : > { %v13192_v22 = vrot.slane %v6250_v19, %v11465_v43  ;;  %v6267_v39 = vcombine.low %v14647_v1, %v12945_v47  ;;  %v6300_v36 = vcombine.low %v12935_v11, %v12909_v20  ;;  %v6154_v20 = vrot.slane %v12921_v10, 7 }
 0x464   : > { %8744 = vmatmul.mubr.msk.bf16.vlgmr.msra.gmra.mrb[180].mxu1 %vm4450_vm15, %v14642_v6  ;;  %v6283_v6 = vcombine.low %v12927_v8, %v14648_v63  ;;  %v13209_v62 = vrot.slane %v6266_v57, %v11465_v43  ;;  %v5761_v57 = vor.u32 %v13131_v18, %v13119_v34  ;;  %v13228_v1 = vsel %vm12556_vm3, %v7764_v5, %v6148_v59 }
 0x465   : > { %8764 = vmatpush3.bf16.msra.mxu1 %v14643_v40  ;;  %8747 = vmatprep.mubr.msk.bf16.mxu1 %vm4450_vm15, %v14644_v3  ;;  %v14649_v40 = vld [vmem:[#allocation117_spill] sm:$0xff]  ;;  %v13215_v53 = vrot.slane %v6267_v39, %v11465_v43  ;;  %v6150_v63 = vrot.slane %v6148_v59, 2  ;;  %v6156_v18 = vrot.slane %v6154_v20, 2  ;;  %v6157_v5 = vrot.slane %v14608_v46, 7 }
 0x466   : > { %8785 = vmatprep.subr.bf16.mxu1 %v13109_v48  ;;  %v6284_v19 = vcombine.low %v14649_v40, %v12905_v21  ;;  %v13218_v47 = vrot.slane %v6283_v6, %v11465_v43  ;;  %v6151_v21 = vrot.slane %v14604_v9, 7  ;;  %v14650_v6 = vld [vmem:[#allocation119_spill] sm:$0xff]  ;;  %v6160_v59 = vrot.slane %v13069_v54, 7  ;;  %v14655_v54 = vld [vmem:[#allocation34_spill] sm:$0xff] }
 0x467   : > { %v6301_v40 = vcombine.low %v14650_v6, %v13228_v1  ;;  %v14651_v3 = vcombine.low %v13048_v7, %v13043_v37  ;;  %v14652_v39 = vcombine.low %v12144_v31, %v12181_v26  ;;  %v13252_v11 = vrot.slane %v6300_v36, %v11465_v43  ;;  %v14654_v7 = vld [vmem:[#allocation73_spill] sm:$0xff] }
 0x468   : > { %v13221_v8 = vrot.slane %v6284_v19, %v11465_v43  ;;  %v6153_v19 = vrot.slane %v6151_v21, 2  ;;  %v13239_v34 = vsel %vm12556_vm3, %v6150_v63, %v6151_v21  ;;  %v14653_v37 = vcombine.low %v13055_v33, %v13080_v32 }
 0x469   : > { %v5527_v6 = vrot.slane %v14652_v39, %v11465_v43  ;;  %v13255_v21 = vrot.slane %v6301_v40, %v11465_v43  ;;  %v13269_v31 = vsel %vm12556_vm3, %v6156_v18, %v6157_v5  ;;  %v6159_v26 = vrot.slane %v6157_v5, 2  ;;  %v14657_v39 = vld [vmem:[#allocation37_spill] sm:$0xff]  ;;  %v14658_v40 = vld [vmem:[#allocation59_spill] sm:$0xff] }
 0x46a   : > { %v13259_v63 = vsel %vm12556_vm3, %v6153_v19, %v6154_v20  ;;  %v5518_v20 = vcombine.low %v13085_v56, %v13090_v38  ;;  %v14656_v33 = vcombine.low %v12234_v44, %v12224_v30  ;;  %v5553_v19 = vcombine.low %v14658_v40, %v14657_v39  ;;  %v14659_v18 = vld [vmem:[#allocation81_spill] sm:$0xff] }
 0x46b   : > { %v6317_v36 = vcombine.low %v13239_v34, %v13259_v63  ;;  %v5554_v5 = vcombine.low %v14659_v18, %v14602_v49  ;;  %v6544_v44 = vcombine.low %v14604_v9, %v12921_v10  ;;  %v14660_v38 = vld [vmem:[#allocation33_spill] sm:$0xff]  ;;  %v14662_v18 = vld [vmem:[#allocation103_spill] sm:$0xff] }
 0x46c   : > { %8748 = vmatmul.mubr.msk.bf16.gmra.mrb[184].mxu1 %vm4450_vm15, %v14651_v3  ;;  %v5537_v3 = vcombine.low %v14655_v54, %v14654_v7  ;;  %v5534_v32 = vrot.slane %v14656_v33, %v11465_v43  ;;  %v5762_v7 = vrot.slane %v5761_v57, 2  ;;  %v13287_v54 = vsel %vm12556_vm3, %v6159_v26, %v6160_v59 }
 0x46d   : > { %8751 = vmatprep.mubr.msk.bf16.mxu1 %vm4450_vm15, %v14653_v37  ;;  %v6318_v30 = vcombine.low %v13269_v31, %v13287_v54  ;;  %v6545_v33 = vcombine.low %v14608_v46, %v14660_v38  ;;  %v13299_v39 = vcombine.high %v14660_v38, %v14660_v38  ;;  %v14661_v57 = vcombine.low %v12253_v42, %v12248_v2  ;;  %v14671_v37 = vld [vmem:[#allocation75_spill] sm:$0xff] }
 0x46e   : > { %v5551_v26 = vrot.slane %v5537_v3, %v11465_v43  ;;  %v13307_v40 = vrot.slane %v6317_v36, %v11465_v43  ;;  %v13311_v9 = vcombine.high %v14662_v18, %v14662_v18  ;;  %v13317_v10 = vrot.slane %v6544_v44, %v11465_v43  ;;  %v14670_v44 = vld [vmem:[#allocation74_spill] sm:$0xff] }
 0x46f   : > { %v5544_v59 = vrot.slane %v14661_v57, %v11465_v43  ;;  %v13314_v46 = vrot.slane %v6318_v30, %v11465_v43  ;;  %v13320_v56 = vrot.slane %v6545_v33, %v11465_v43  ;;  %v6561_v2 = vcombine.low %v13299_v39, %v14662_v18 }
 0x470   : > { %14664 = vst [vmem:[#allocation12_spill] sm:$0xff] %v13317_v10  ;;  %v5535_v42 = vcombine.low %v5527_v6, %v5534_v32  ;;  %v5561_v3 = vrot.slane %v5553_v19, %v11465_v43  ;;  %v5568_v36 = vrot.slane %v5554_v5, %v11465_v43  ;;  %v6562_v57 = vcombine.low %v13311_v9, %v13000_v50  ;;  %v14667_v19 = vld [vmem:[#allocation56_spill] sm:$0xff] }
 0x471   : > { %14663 = vst [vmem:[#allocation36_spill] sm:$0xff] %v13314_v46  ;;  %14665 = vst [vmem:[#allocation21_spill] sm:$0xff] %v13320_v56  ;;  %v13332_v30 = vsel %vm11546_vm6, %v5762_v7, %v13065_v24  ;;  %v13339_v32 = vrot.slane %v6561_v2, %v11465_v43  ;;  %v14668_v5 = vld [vmem:[#allocation68_spill] sm:$0xff]  ;;  %v6746_v7 = vshrl.u32 %v14660_v38, 16  ;;  %v5811_v12 = vcombine.low %v14671_v37, %v14670_v44 }
 0x472   : > { %v5810_v33 = vcombine.low %v14668_v5, %v14667_v19  ;;  %v6749_v6 = vshll.u32 %v14660_v38, 16  ;;  %v6755_v2 = vshll.u32 %v13299_v39, 16  ;;  %v5552_v4 = vcombine.low %v5544_v59, %v5551_v26 }
 0x473   : > { %14666 = vst [vmem:[#allocation13_spill] sm:$0xff] %v13339_v32  ;;  %v6748_v19 = vrot.slane %v6746_v7, 6  ;;  %v6759_v5 = vshrl.u32 %v13299_v39, 16  ;;  %v5569_v24 = vcombine.low %v5561_v3, %v5568_v36  ;;  %v6765_v10 = vshll.u32 %v14662_v18, 16 }
 0x474   : > { %8752 = vmatmul.mubr.msk.bf16.gmra.mrb[188].mxu1 %vm4450_vm15, %v5518_v20  ;;  %v13345_v20 = vrot.slane %v6562_v57, %v11465_v43  ;;  %v6751_v51 = vrot.slane %v6749_v6, 7  ;;  %v6757_v56 = vrot.slane %v6755_v2, 7  ;;  %v13362_v37 = vcombine.high %v13000_v50, %v13000_v50 }
 0x475   : > { %8755 = vmatprep.mubr.msk.bf16.mxu1 %vm4450_vm15, %v5535_v42  ;;  %v6817_v42 = vcombine.low %v13113_v0, %v13123_v17  ;;  %v6761_v44 = vrot.slane %v6759_v5, 6  ;;  %v6769_v45 = vshrl.u32 %v14662_v18, 16  ;;  %v6775_v0 = vshll.u32 %v13311_v9, 16 }
 0x476   : > { %14669 = vst [vmem:[#allocation47_spill] sm:$0xff] %v13345_v20  ;;  %v6752_v17 = vor.u32 %v6751_v51, %v6748_v19  ;;  %v6767_v59 = vrot.slane %v6765_v10, 7  ;;  %v6779_v26 = vshrl.u32 %v13311_v9, 16  ;;  %v6785_v7 = vshll.u32 %v13000_v50, 16 }
 0x477   : > { %v6762_v3 = vor.u32 %v6761_v44, %v6757_v56  ;;  %v6771_v36 = vrot.slane %v6769_v45, 6  ;;  %v6777_v6 = vrot.slane %v6775_v0, 7  ;;  %v6789_v2 = vshrl.u32 %v13000_v50, 16 }
 0x478   : > { %v6753_v57 = vrot.slane %v6752_v17, 2  ;;  %v6781_v20 = vrot.slane %v6779_v26, 6  ;;  %v6787_v5 = vrot.slane %v6785_v7, 7  ;;  %v6795_v10 = vshll.u32 %v13362_v37, 16  ;;  %v14672_v7 = vld [vmem:[#allocation71_spill] sm:$0xff] }
 0x479   : > { %v6763_v32 = vrot.slane %v6762_v3, 2  ;;  %v6772_v49 = vor.u32 %v6771_v36, %v6767_v59  ;;  %v6791_v51 = vrot.slane %v6789_v2, 6  ;;  %v5818_v19 = vrot.slane %v5810_v33, %v11465_v43  ;;  %v14673_v3 = vld [vmem:[#allocation38_spill] sm:$0xff] }
 0x47a   : > { %v5825_v44 = vrot.slane %v5811_v12, %v11465_v43  ;;  %v6758_v45 = vsel %vm11546_vm6, %v6753_v57, %v6757_v56  ;;  %v6782_v0 = vor.u32 %v6781_v20, %v6777_v6  ;;  %v5845_v36 = vcombine.low %v14673_v3, %v14672_v7 }
 0x47b   : > { %v6768_v17 = vsel %vm11546_vm6, %v6763_v32, %v6767_v59  ;;  %v6773_v26 = vrot.slane %v6772_v49, 2  ;;  %v6825_v2 = vrot.slane %v6817_v42, %v11465_v43  ;;  %v6797_v20 = vrot.slane %v6795_v10, 7  ;;  %v14675_v10 = vld [vmem:[#allocation48_spill] sm:$0xff] }
 0x47c   : > { %8756 = vmatmul.mubr.msk.bf16.gmra.mrb[192].mxu1 %vm4450_vm15, %v5552_v4  ;;  %v6818_v4 = vcombine.low %v13127_v61, %v6758_v45  ;;  %v6783_v46 = vrot.slane %v6782_v0, 2  ;;  %v5826_v57 = vcombine.low %v5818_v19, %v5825_v44  ;;  %v7042_v49 = vcombine.low %v13228_v1, %v13239_v34 }
 0x47d   : > { %8759 = vmatprep.mubr.msk.bf16.mxu1 %vm4450_vm15, %v5569_v24  ;;  %v6792_v24 = vor.u32 %v6791_v51, %v6787_v5  ;;  %v6778_v12 = vsel %vm11546_vm6, %v6773_v26, %v6777_v6  ;;  %v7799_v51 = vrot.slane %v14660_v38, 9  ;;  %v7019_v45 = vrot.slane %v13299_v39, 7 }
 0x47e   : > { %v6832_v33 = vrot.slane %v6818_v4, %v11465_v43  ;;  %v6788_v61 = vsel %vm11546_vm6, %v6783_v46, %v6787_v5  ;;  %v6834_v32 = vcombine.low %v6768_v17, %v6778_v12  ;;  %v14674_v6 = vcombine.low %v12958_v29, %v12961_v13  ;;  %v14676_v46 = vld [vmem:[#allocation83_spill] sm:$0xff] }
 0x47f   : > { %v6793_v56 = vrot.slane %v6792_v24, 2  ;;  %v5844_v5 = vcombine.low %v14676_v46, %v14675_v10  ;;  %v7051_v0 = vcombine.low %v13259_v63, %v13269_v31  ;;  %v7020_v55 = vsel %vm12556_vm3, %v7799_v51, %v7019_v45  ;;  %v7777_v63 = vld [vmem:[%s13714_s4 + $0x18] sm:$0x7]  ;;  %v14680_v51 = vld [vmem:[#allocation14_spill] sm:$0xff] }
 0x480   : > { %v13389_v59 = vcombine.low %v6825_v2, %v6832_v33  ;;  %v6842_v44 = vrot.slane %v6834_v32, %v11465_v43  ;;  %v7021_v38 = vrot.slane %v7019_v45, 2  ;;  %v7022_v39 = vrot.slane %v14662_v18, 7  ;;  %v14681_v10 = vld [vmem:[#allocation44_spill] sm:$0xff] }
 0x481   : > { %v6798_v42 = vsel %vm11546_vm6, %v6793_v56, %v6797_v20  ;;  %v7025_v29 = vrot.slane %v13311_v9, 7  ;;  %v5859_v13 = vrot.slane %v5845_v36, %v11465_v43  ;;  %v7052_v17 = vcombine.low %v13287_v54, %v7020_v55  ;;  %v14678_v56 = vld [vmem:[#allocation45_spill] sm:$0xff] }
 0x482   : > { %v6835_v19 = vcombine.low %v6788_v61, %v6798_v42  ;;  %v7023_v31 = vsel %vm12556_vm3, %v7021_v38, %v7022_v39  ;;  %v7024_v26 = vrot.slane %v7022_v39, 2  ;;  %v7028_v7 = vrot.slane %v13000_v50, 7  ;;  %v14677_v50 = vld [vmem:[#allocation8_spill] sm:$0xff]  ;;  %v14685_v38 = vld [vmem:[#allocation11_spill] sm:$0xff]  ;;  %v14686_v39 = vld [vmem:[#allocation9_spill] sm:$0xff] }
 0x483   : > { %v7027_v24 = vrot.slane %v7025_v29, 2  ;;  %v13421_v9 = vrot.slane %v7051_v0, %v11465_v43  ;;  %v13424_v3 = vrot.slane %v7052_v17, %v11465_v43  ;;  %v7031_v54 = vrot.slane %v13362_v37, 7  ;;  %v14679_v37 = vld [vmem:[#allocation16_spill] sm:$0xff] }
 0x484   : > { %8760 = vmatmul.mubr.msk.bf16.gmra.mrb[196].mxu1 %vm4450_vm15, %v14674_v6  ;;  %v6849_v4 = vrot.slane %v6835_v19, %v11465_v43  ;;  %v5852_v36 = vrot.slane %v5844_v5, %v11465_v43  ;;  %v7026_v2 = vsel %vm12556_vm3, %v7024_v26, %v7025_v29  ;;  %v7030_v12 = vrot.slane %v7028_v7, 2  ;;  %v14683_v5 = vld [vmem:[#allocation42_spill] sm:$0xff] }
 0x485   : > { %8765 = vmatprep.mubr.msk.bf16.mxu1 %vm4450_vm15, %v5826_v57  ;;  %v7029_v33 = vsel %vm12556_vm3, %v7027_v24, %v7028_v7  ;;  %v5862_v20 = vcombine.low %v14678_v56, %v14677_v50  ;;  %v6609_v57 = vand.u32 %v7777_v63, %v14502_v28  ;;  %v7067_v61 = vcombine.low %v13421_v9, %v13424_v3  ;;  %v14684_v19 = vld [vmem:[#allocation26_spill] sm:$0xff]  ;;  %v14689_v7 = vld [vmem:[#allocation57_spill] sm:$0xff]  ;;  %v14693_v56 = vld [vmem:[#allocation72_spill] sm:$0xff] }
 0x486   : > { %v13418_v18 = vcombine.low %v6842_v44, %v6849_v4  ;;  %v7068_v32 = vcombine.low %v7023_v31, %v7026_v2  ;;  %v5860_v42 = vcombine.low %v5852_v36, %v5859_v13  ;;  %v5879_v45 = vcombine.low %v14680_v51, %v14679_v37  ;;  %v14687_v31 = vld [vmem:[#allocation46_spill] sm:$0xff] }
 0x487   : > { %v7032_v6 = vsel %vm12556_vm3, %v7030_v12, %v7031_v54  ;;  %v14682_v46 = vcombine.low %v14610_v35, %v14681_v10  ;;  %v5861_v44 = vcombine.low %v14684_v19, %v14683_v5  ;;  %v5878_v25 = vcombine.low %v14686_v39, %v14685_v38  ;;  %v14688_v26 = vld [vmem:[#allocation18_spill] sm:$0xff]  ;;  %v14692_v12 = vld [vmem:[#allocation67_spill] sm:$0xff]  ;;  %v14695_v10 = vld [vmem:[#allocation53_spill] sm:$0xff] }
 0x488   : > { %v7069_v0 = vcombine.low %v7029_v33, %v7032_v6  ;;  %v13448_v55 = vrot.slane %v7068_v32, %v11465_v43  ;;  %v5876_v29 = vrot.slane %v5862_v20, %v11465_v43  ;;  %v5893_v13 = vrot.slane %v5879_v45, %v11465_v43  ;;  %v14690_v54 = vld [vmem:[#allocation62_spill] sm:$0xff]  ;;  %v14691_v33 = vld [vmem:[#allocation40_spill] sm:$0xff]  ;;  %v14694_v20 = vld [vmem:[#allocation51_spill] sm:$0xff] }
 0x489   : > { %v5869_v4 = vrot.slane %v5861_v44, %v11465_v43  ;;  %v5895_v24 = vcombine.low %v14688_v26, %v14687_v31  ;;  %v5896_v36 = vcombine.low %v14690_v54, %v14689_v7  ;;  %v5913_v50 = vcombine.low %v14692_v12, %v14691_v33  ;;  %v14697_v44 = vld [vmem:[#allocation85_spill] sm:$0xff]  ;;  %v14699_v39 = vld [vmem:[#allocation32_spill] sm:$0xff]  ;;  %v14704_v33 = vld [vmem:[#allocation102_spill] sm:$0xff] }
 0x48a   : > { %v13456_v35 = vrot.slane %v7069_v0, %v11465_v43  ;;  %v5912_v32 = vcombine.low %v14694_v20, %v14693_v56  ;;  %v5947_v0 = vcombine.low %v14697_v44, %v13332_v30  ;;  %v14698_v38 = vld [vmem:[#allocation41_spill] sm:$0xff]  ;;  %v14702_v54 = vld [vmem:[#allocation100_spill] sm:$0xff]  ;;  %v14727_v44 = vld [vmem:[#allocation58_spill] sm:$0xff]  ;;  %vm7278_vm6 = vcmask 56320  }
 0x48b   : > { %v5877_v63 = vcombine.low %v5869_v4, %v5876_v29  ;;  %v5910_v37 = vrot.slane %v5896_v36, %v11465_v43  ;;  %v5927_v51 = vrot.slane %v5913_v50, %v11465_v43  ;;  %v14700_v29 = vld [vmem:[#allocation24_spill] sm:$0xff]  ;;  %v14703_v36 = vld [vmem:[#allocation86_spill] sm:$0xff]  ;;  %v14705_v12 = vld [vmem:[#allocation101_spill] sm:$0xff] }
 0x48c   : > { %8766 = vmatmul.mubr.msk.bf16.vlgmr.msra.gmra.mrb[180].mxu1 %vm4450_vm15, %v14682_v46  ;;  %v7084_v17 = vcombine.low %v13448_v55, %v13456_v35  ;;  %v5920_v45 = vrot.slane %v5912_v32, %v11465_v43  ;;  %v14696_v46 = vld [vmem:[#allocation20_spill] sm:$0xff]  ;;  %v6165_v50 = vcombine.low %v14705_v12, %v14704_v33  ;;  %v14739_v33 = vld [vmem:[#allocation21_spill] sm:$0xff] }
 0x48d   : > { %8786 = vmatpush3.bf16.msra.mxu1 %v13109_v48  ;;  %8769 = vmatprep.mubr.msk.bf16.mxu1 %vm4450_vm15, %v5860_v42  ;;  %v5886_v48 = vrot.slane %v5878_v25, %v11465_v43  ;;  %v5903_v42 = vrot.slane %v5895_v24, %v11465_v43  ;;  %v5930_v5 = vcombine.low %v14696_v46, %v14695_v10 }
 0x48e   : > { %8807 = vmatprep.subr.bf16.mxu1 %v6609_v57  ;;  %v5928_v19 = vcombine.low %v5920_v45, %v5927_v51  ;;  %v5929_v25 = vcombine.low %v14699_v39, %v14698_v38  ;;  %v6179_v20 = vrot.slane %v6165_v50, %v11465_v43  ;;  %v14707_v45 = vld [vmem:[#allocation64_spill] sm:$0xff]  ;;  %v14710_v46 = vcombine.low %v13138_v15, %v13153_v27  ;;  %v14728_v38 = vld [vmem:[#allocation17_spill] sm:$0xff]  ;;  %v14729_v39 = vld [vmem:[#allocation23_spill] sm:$0xff] }
 0x48f   : > { %v5894_v2 = vcombine.low %v5886_v48, %v5893_v13  ;;  %v5911_v6 = vcombine.low %v5903_v42, %v5910_v37  ;;  %v14701_v13 = vld [vmem:[#allocation82_spill] sm:$0xff]  ;;  %v5944_v48 = vrot.slane %v5930_v5, %v11465_v43  ;;  %v14706_v42 = vcombine.low %v13141_v23, %v13150_v58  ;;  %v7788_v37 = vld [vmem:[%s13714_s4 + $0x1c] sm:$0x7]  ;;  %v14741_v50 = vld [vmem:[#allocation27_spill] sm:$0xff] }
 0x490   : > { %v5946_v4 = vcombine.low %v14701_v13, %v14700_v29  ;;  %v5937_v31 = vrot.slane %v5929_v25, %v11465_v43  ;;  %v6882_v51 = vand.u32 %v7788_v37, %v14502_v28  ;;  %v14711_v58 = vcombine.low %v13160_v60, %v13163_v14  ;;  %v14717_v14 = vld [vmem:[#allocation84_spill] sm:$0xff]  ;;  %v14731_v29 = vld [vmem:[#allocation5_spill] sm:$0xff] }
 0x491   : > { %v14712_v23 = vcombine.low %v13166_v41, %v13179_v16  ;;  %v14713_v5 = vcombine.low %v13182_v52, %v13192_v22  ;;  %v14714_v15 = vcombine.low %v13209_v62, %v13215_v53  ;;  %v14715_v27 = vcombine.low %v13218_v47, %v13221_v8  ;;  %v14718_v41 = vld [vmem:[#allocation30_spill] sm:$0xff]  ;;  %v14719_v52 = vld [vmem:[#allocation36_spill] sm:$0xff]  ;;  %v7800_v53 = vld [vmem:[%s13714_s4 + $0x20] sm:$0x7] }
 0x492   : > { %v5954_v26 = vrot.slane %v5946_v4, %v11465_v43  ;;  %v5945_v24 = vcombine.low %v5937_v31, %v5944_v48  ;;  %v14716_v60 = vcombine.low %v13252_v11, %v13255_v21  ;;  %v6528_v16 = vcombine.low %v14718_v41, %v14717_v14  ;;  %v14721_v47 = vld [vmem:[#allocation79_spill] sm:$0xff]  ;;  %v14722_v8 = vld [vmem:[#allocation92_spill] sm:$0xff]  ;;  %v14733_v48 = vld [vmem:[#allocation97_spill] sm:$0xff] }
 0x493   : > { %v14720_v22 = vcombine.low %v13307_v40, %v14719_v52  ;;  %v7116_v62 = vand.u32 %v7800_v53, %v14502_v28  ;;  %v6530_v11 = vcombine.low %v14722_v8, %v14721_v47  ;;  %v14723_v21 = vld [vmem:[#allocation88_spill] sm:$0xff]  ;;  %v14726_v40 = vld [vmem:[#allocation70_spill] sm:$0xff]  ;;  %v6532_v25 = vcombine.low %v14729_v39, %v14728_v38  ;;  %v14732_v4 = vld [vmem:[#allocation99_spill] sm:$0xff] }
 0x494   : > { %8770 = vmatmul.mubr.msk.bf16.gmra.mrb[184].mxu1 %vm4450_vm15, %v5877_v63  ;;  %v5961_v63 = vrot.slane %v5947_v0, %v11465_v43  ;;  %v6531_v0 = vcombine.low %v14727_v44, %v14726_v40  ;;  %v14730_v28 = vld [vmem:[#allocation96_spill] sm:$0xff]  ;;  %v14734_v31 = vld [vmem:[#allocation90_spill] sm:$0xff]  ;;  %v14755_v41 = vld [vmem:[#allocation29_spill] sm:$0xff] }
 0x495   : > { %8773 = vmatprep.mubr.msk.bf16.mxu1 %vm4450_vm15, %v5894_v2  ;;  %v6164_v2 = vcombine.low %v14703_v36, %v14702_v54  ;;  %v6533_v13 = vcombine.low %v14731_v29, %v14730_v28  ;;  %v14737_v54 = vld [vmem:[#allocation54_spill] sm:$0xff]  ;;  %v14758_v53 = vld [vmem:[#allocation49_spill] sm:$0xff]  ;;  %v14763_v40 = vld [vmem:[#allocation28_spill] sm:$0xff] }
 0x496   : > { %v5962_v7 = vcombine.low %v5954_v26, %v5961_v63  ;;  %v6534_v63 = vcombine.low %v14733_v48, %v14732_v4  ;;  %v14735_v26 = vld [vmem:[#allocation120_spill] sm:$0xff]  ;;  %v14765_v38 = vld [vmem:[#allocation107_spill] sm:$0xff] }
 0x497   : > { %v6172_v56 = vrot.slane %v6164_v2, %v11465_v43  ;;  %v14738_v2 = vld [vmem:[#allocation12_spill] sm:$0xff]  ;;  %v14770_v29 = vld [vmem:[#allocation111_spill] sm:$0xff] }
 0x498   : > { %v14740_v12 = vcombine.low %v14738_v2, %v14739_v33  ;;  %v14771_v4 = vld [vmem:[#allocation52_spill] sm:$0xff]  ;;  %v14772_v48 = vld [vmem:[#allocation115_spill] sm:$0xff] }
 0x499   : > { %v6180_v32 = vcombine.low %v6172_v56, %v6179_v20  ;;  %v14742_v56 = vld [vmem:[#allocation60_spill] sm:$0xff]  ;;  %v14777_v2 = vld [vmem:[#allocation63_spill] sm:$0xff] }
 0x49a   : > { %v6801_v20 = vcombine.low %v14742_v56, %v14741_v50 }
 0x49c   : > { %8774 = vmatmul.mubr.msk.bf16.gmra.mrb[188].mxu1 %vm4450_vm15, %v5911_v6  ;;  %v14708_v6 = vld [vmem:[#allocation80_spill] sm:$0xff] }
 0x49d   : > { %8777 = vmatprep.mubr.msk.bf16.mxu1 %vm4450_vm15, %v5928_v19  ;;  %v14709_v10 = vcombine.low %v14707_v45, %v14708_v6  ;;  %v14747_v45 = vld [vmem:[#allocation66_spill] sm:$0xff] }
 0x4a4   : > { %8778 = vmatmul.mubr.msk.bf16.gmra.mrb[192].mxu1 %vm4450_vm15, %v5945_v24  ;;  %v14736_v24 = vcombine.low %v14734_v31, %v14735_v26  ;;  %v14774_v31 = vld [vmem:[#allocation55_spill] sm:$0xff] }
 0x4a5   : > { %8781 = vmatprep.mubr.msk.bf16.mxu1 %vm4450_vm15, %v5962_v7 }
 0x4a6   : > { %v6542_v7 = vrot.slane %v14736_v24, %v11465_v43  ;;  %v14775_v24 = vld [vmem:[#allocation93_spill] sm:$0xff] }
 0x4a8   : > { %v6543_v36 = vcombine.low %v14737_v54, %v6542_v7  ;;  %v14776_v7 = vld [vmem:[#allocation50_spill] sm:$0xff] }
 0x4a9   : > { %v7041_v54 = vcombine.low %v14776_v7, %v14775_v24 }
 0x4ac   : > { %8782 = vmatmul.mubr.msk.bf16.gmra.mrb[196].mxu1 %vm4450_vm15, %v14706_v42  ;;  %v14744_v42 = vld [vmem:[#allocation47_spill] sm:$0xff] }
 0x4ad   : > { %8787 = vmatprep.mubr.msk.bf16.mxu1 %vm4450_vm15, %v6180_v32  ;;  %v14743_v32 = vld [vmem:[#allocation13_spill] sm:$0xff] }
 0x4ae   : > { %v14745_v37 = vcombine.low %v14743_v32, %v14744_v42 }
 0x4b4   : > { %8788 = vmatmul.mubr.msk.bf16.vlgmr.msra.gmra.mrb[180].mxu1 %vm4450_vm15, %v14709_v10  ;;  %v14748_v10 = vld [vmem:[#allocation6_spill] sm:$0xff] }
 0x4b5   : > { %8808 = vmatpush3.bf16.msra.mxu1 %v6609_v57  ;;  %8791 = vmatprep.mubr.msk.bf16.mxu1 %vm4450_vm15, %v14710_v46  ;;  %v14724_v57 = vld [vmem:[#allocation89_spill] sm:$0xff]  ;;  %v14749_v46 = vld [vmem:[#allocation39_spill] sm:$0xff] }
 0x4b6   : > { %8829 = vmatprep.subr.bf16.mxu1 %v6882_v51  ;;  %v14725_v19 = vcombine.low %v14723_v21, %v14724_v57  ;;  %v14761_v21 = vld [vmem:[#allocation19_spill] sm:$0xff] }
 0x4bc   : > { %8792 = vmatmul.mubr.msk.bf16.gmra.mrb[184].mxu1 %vm4450_vm15, %v14711_v58  ;;  %v14750_v58 = vcombine.low %v14748_v10, %v14749_v46 }
 0x4bd   : > { %8795 = vmatprep.mubr.msk.bf16.mxu1 %vm4450_vm15, %v14712_v23  ;;  %v14751_v23 = vld [vmem:[#allocation69_spill] sm:$0xff] }
 0x4c4   : > { %8796 = vmatmul.mubr.msk.bf16.gmra.mrb[188].mxu1 %vm4450_vm15, %v14713_v5  ;;  %v14752_v5 = vld [vmem:[#allocation15_spill] sm:$0xff] }
 0x4c5   : > { %8799 = vmatprep.mubr.msk.bf16.mxu1 %vm4450_vm15, %v14714_v15  ;;  %v6804_v15 = vcombine.low %v14752_v5, %v14751_v23 }
 0x4cc   : > { %8800 = vmatmul.mubr.msk.bf16.gmra.mrb[192].mxu1 %vm4450_vm15, %v14715_v27  ;;  %v14753_v27 = vld [vmem:[#allocation76_spill] sm:$0xff] }
 0x4cd   : > { %8803 = vmatprep.mubr.msk.bf16.mxu1 %vm4450_vm15, %v14716_v60  ;;  %v14754_v60 = vld [vmem:[#allocation65_spill] sm:$0xff] }
 0x4ce   : > { %v6805_v14 = vcombine.low %v14754_v60, %v14753_v27 }
 0x4d4   : > { %8804 = vmatmul.mubr.msk.bf16.gmra.mrb[196].mxu1 %vm4450_vm15, %v14720_v22  ;;  %v14757_v22 = vld [vmem:[#allocation31_spill] sm:$0xff] }
 0x4d5   : > { %8809 = vmatprep.mubr.msk.bf16.mxu1 %vm4450_vm15, %v6528_v16  ;;  %v14756_v16 = vld [vmem:[#allocation43_spill] sm:$0xff]  ;;  %v6807_v47 = vcombine.low %v14758_v53, %v14757_v22 }
 0x4d6   : > { %v6806_v52 = vcombine.low %v14756_v16, %v14755_v41 }
 0x4dc   : > { %8810 = vmatmul.mubr.msk.bf16.vlgmr.msra.gmra.mrb[180].mxu1 %vm4450_vm15, %v14725_v19  ;;  %v14762_v19 = vld [vmem:[#allocation105_spill] sm:$0xff] }
 0x4dd   : > { %8830 = vmatpush3.bf16.msra.mxu1 %v6882_v51  ;;  %8813 = vmatprep.mubr.msk.bf16.mxu1 %vm4450_vm15, %v6530_v11  ;;  %v14746_v51 = vld [vmem:[#allocation7_spill] sm:$0xff]  ;;  %v7035_v44 = vcombine.low %v14763_v40, %v14762_v19 }
 0x4de   : > { %8851 = vmatprep.subr.bf16.mxu1 %v7116_v62  ;;  %v6803_v6 = vcombine.low %v14747_v45, %v14746_v51 }
 0x4e4   : > { %8814 = vmatmul.mubr.msk.bf16.gmra.mrb[184].mxu1 %vm4450_vm15, %v6531_v0  ;;  %v14764_v0 = vld [vmem:[#allocation110_spill] sm:$0xff] }
 0x4e5   : > { %8817 = vmatprep.mubr.msk.bf16.mxu1 %vm4450_vm15, %v6532_v25  ;;  %v7037_v39 = vcombine.low %v14765_v38, %v14764_v0  ;;  %v14767_v25 = vld [vmem:[#allocation98_spill] sm:$0xff] }
 0x4ec   : > { %8818 = vmatmul.mubr.msk.bf16.gmra.mrb[188].mxu1 %vm4450_vm15, %v6533_v13 }
 0x4ed   : > { %8821 = vmatprep.mubr.msk.bf16.mxu1 %vm4450_vm15, %v6534_v63  ;;  %v7039_v63 = vcombine.low %v14772_v48, %v14771_v4 }
 0x4f4   : > { %8822 = vmatmul.mubr.msk.bf16.gmra.mrb[192].mxu1 %vm4450_vm15, %v6543_v36  ;;  %v7049_v36 = vrot.slane %v7042_v49, %v11465_v43 }
 0x4f5   : > { %8825 = vmatprep.mubr.msk.bf16.mxu1 %vm4450_vm15, %v14740_v12 }
 0x4f6   : > { %v7050_v33 = vcombine.low %v14777_v2, %v7049_v36 }
 0x4fc   : > { %8826 = vmatmul.mubr.msk.bf16.gmra.mrb[196].mxu1 %vm4450_vm15, %v14745_v37 }
 0x4fd   : > { %8831 = vmatprep.mubr.msk.bf16.mxu1 %vm4450_vm15, %v6801_v20 }
 0x504   : > { %8832 = vmatmul.mubr.msk.bf16.vlgmr.msra.gmra.mrb[180].mxu1 %vm4450_vm15, %v14750_v58 }
 0x505   : > { %8852 = vmatpush3.bf16.msra.mxu1 %v7116_v62  ;;  %8835 = vmatprep.mubr.msk.bf16.mxu1 %vm4450_vm15, %v6803_v6  ;;  %v14759_v62 = vld [vmem:[#allocation61_spill] sm:$0xff] }
 0x506   : > { %v14760_v8 = vcombine.low %v13332_v30, %v14759_v62  ;;  %v14766_v30 = vld [vmem:[#allocation91_spill] sm:$0xff] }
 0x507   : > { %v14768_v28 = vcombine.low %v14766_v30, %v14767_v25 }
 0x508   : > { %v6815_v11 = vrot.slane %v14760_v8, %v11465_v43  ;;  %v7811_v43 = vld [vmem:[%s13715_s5] ss:$0 sm:$0xff] }
 0x50a   : > { %v6816_v57 = vcombine.low %v14761_v21, %v6815_v11 }
 0x50c   : > { %8836 = vmatmul.mubr.msk.bf16.gmra.mrb[184].mxu1 %vm4450_vm15, %v6804_v15 }
 0x50d   : > { %8839 = vmatprep.mubr.msk.bf16.mxu1 %vm4450_vm15, %v6805_v14 }
 0x514   : > { %8840 = vmatmul.mubr.msk.bf16.gmra.mrb[188].mxu1 %vm4450_vm15, %v6806_v52 }
 0x515   : > { %8843 = vmatprep.mubr.msk.bf16.mxu1 %vm4450_vm15, %v6807_v47 }
 0x51c   : > { %8844 = vmatmul.mubr.msk.bf16.gmra.mrb[192].mxu1 %vm4450_vm15, %v6816_v57 }
 0x51d   : > { %8847 = vmatprep.mubr.msk.bf16.mxu1 %vm4450_vm15, %v13389_v59  ;;  %v14769_v59 = vld [vmem:[#allocation78_spill] sm:$0xff] }
 0x51e   : > { %v7038_v13 = vcombine.low %v14770_v29, %v14769_v59 }
 0x524   : > { %8848 = vmatmul.mubr.msk.bf16.gmra.mrb[196].mxu1 %vm4450_vm15, %v13418_v18  ;;  %v14773_v18 = vld [vmem:[#allocation35_spill] sm:$0xff] }
 0x525   : > { %8853 = vmatprep.mubr.msk.bf16.mxu1 %vm4450_vm15, %v7035_v44  ;;  %v7040_v26 = vcombine.low %v14774_v31, %v14773_v18 }
 0x52c   : > { %8854 = vmatmul.mubr.msk.bf16.vlgmr.msra.gmra.mrb[180].mxu1 %vm4450_vm15, %v14768_v28 }
 0x52d   : > { %8857 = vmatprep.mubr.msk.bf16.mxu1 %vm4450_vm15, %v7037_v39 }
 0x534   : > { %8858 = vmatmul.mubr.msk.bf16.gmra.mrb[184].mxu1 %vm4450_vm15, %v7038_v13 }
 0x535   : > { %8861 = vmatprep.mubr.msk.bf16.mxu1 %vm4450_vm15, %v7039_v63 }
 0x53c   : > { %8862 = vmatmul.mubr.msk.bf16.gmra.mrb[188].mxu1 %vm4450_vm15, %v7040_v26 }
 0x53d   : > { %8865 = vmatprep.mubr.msk.bf16.mxu1 %vm4450_vm15, %v7041_v54 }
 0x544   : > { %8866 = vmatmul.mubr.msk.bf16.gmra.mrb[192].mxu1 %vm4450_vm15, %v7050_v33 }
 0x545   : > { %8869 = vmatprep.mubr.msk.bf16.mxu1 %vm4450_vm15, %v7067_v61 }
 0x54c   : > { %8870 = vmatmul.mubr.msk.bf16.gmra.mrb[196].mxu1 %vm4450_vm15, %v7084_v17 }
 0x5ff   : > { %v8855_v1 = vpop.f32.mrb[180].mxu1 }
 0x600   : > { %v7260_v34 = vadd.f32 %v8855_v1, %v7811_v43  ;;  %v7152_v49 = vpop.f32.mrb[181].mxu1 }
 0x601   : > { %v7258_v9 = vadd.f32 %v7811_v43, %v7152_v49  ;;  %v8856_v3 = vpop.f32.mrb[182].mxu1 }
 0x602   : > { %7281 = vst.msk [vmem:[%s13659_s27 + $0x10] sm:$0xff] %vm7278_vm6, %v7260_v34  ;;  %v7261_v61 = vadd.f32 %v8856_v3, %v7811_v43  ;;  %v7155_v55 = vpop.f32.mrb[183].mxu1 }
 0x603   : > { %7279 = vst.msk [vmem:[%s13659_s27] sm:$0xff] %vm7278_vm6, %v7258_v9  ;;  %v7259_v35 = vadd.f32 %v7811_v43, %v7155_v55 }
 0x604   : > { %7282 = vst.msk [vmem:[%s13659_s27 + $0x18] sm:$0xff] %vm7278_vm6, %v7261_v61 }
 0x605   : > { %7280 = vst.msk [vmem:[%s13659_s27 + $0x8] sm:$0xff] %vm7278_vm6, %v7259_v35 }
 0x607   : > { %v8859_v17 = vpop.f32.mrb[184].mxu1 }
 0x608   : > { %v7264_v12 = vadd.f32 %v8859_v17, %v7811_v43  ;;  %v7168_v50 = vpop.f32.mrb[185].mxu1 }
 0x609   : > { %v7262_v56 = vadd.f32 %v7811_v43, %v7168_v50  ;;  %v8860_v20 = vpop.f32.mrb[186].mxu1 }
 0x60a   : > { %7285 = vst.msk [vmem:[%s13659_s27 + $0x30] sm:$0xff] %vm7278_vm6, %v7264_v12  ;;  %v7265_v32 = vadd.f32 %v8860_v20, %v7811_v43  ;;  %v7171_v42 = vpop.f32.mrb[187].mxu1 }
 0x60b   : > { %7283 = vst.msk [vmem:[%s13659_s27 + $0x20] sm:$0xff] %vm7278_vm6, %v7262_v56  ;;  %v7263_v37 = vadd.f32 %v7811_v43, %v7171_v42 }
 0x60c   : > { %7286 = vst.msk [vmem:[%s13659_s27 + $0x38] sm:$0xff] %vm7278_vm6, %v7265_v32 }
 0x60d   : > { %7284 = vst.msk [vmem:[%s13659_s27 + $0x28] sm:$0xff] %vm7278_vm6, %v7263_v37 }
 0x60f   : > { %v8863_v51 = vpop.f32.mrb[188].mxu1 }
 0x610   : > { %v7268_v45 = vadd.f32 %v8863_v51, %v7811_v43  ;;  %v7184_v6 = vpop.f32.mrb[189].mxu1 }
 0x611   : > { %v7266_v10 = vadd.f32 %v7811_v43, %v7184_v6  ;;  %v8864_v46 = vpop.f32.mrb[190].mxu1 }
 0x612   : > { %7289 = vst.msk [vmem:[%s13659_s27 + $0x50] sm:$0xff] %vm7278_vm6, %v7268_v45  ;;  %v7269_v58 = vadd.f32 %v8864_v46, %v7811_v43  ;;  %v7187_v23 = vpop.f32.mrb[191].mxu1 }
 0x613   : > { %7287 = vst.msk [vmem:[%s13659_s27 + $0x40] sm:$0xff] %vm7278_vm6, %v7266_v10  ;;  %v7267_v5 = vadd.f32 %v7811_v43, %v7187_v23 }
 0x614   : > { %7290 = vst.msk [vmem:[%s13659_s27 + $0x58] sm:$0xff] %vm7278_vm6, %v7269_v58 }
 0x615   : > { %7288 = vst.msk [vmem:[%s13659_s27 + $0x48] sm:$0xff] %vm7278_vm6, %v7267_v5 }
 0x617   : > { %v8867_v15 = vpop.f32.mrb[192].mxu1 }
 0x618   : > { %v7272_v27 = vadd.f32 %v8867_v15, %v7811_v43  ;;  %v7200_v60 = vpop.f32.mrb[193].mxu1 }
 0x619   : > { %v7270_v14 = vadd.f32 %v7811_v43, %v7200_v60  ;;  %v8868_v41 = vpop.f32.mrb[194].mxu1 }
 0x61a   : > { %7293 = vst.msk [vmem:[%s13659_s27 + $0x70] sm:$0xff] %vm7278_vm6, %v7272_v27  ;;  %v7273_v16 = vadd.f32 %v8868_v41, %v7811_v43  ;;  %v7203_v52 = vpop.f32.mrb[195].mxu1 }
 0x61b   : > { %7291 = vst.msk [vmem:[%s13659_s27 + $0x60] sm:$0xff] %vm7278_vm6, %v7270_v14  ;;  %v7271_v22 = vadd.f32 %v7811_v43, %v7203_v52 }
 0x61c   : > { %7294 = vst.msk [vmem:[%s13659_s27 + $0x78] sm:$0xff] %vm7278_vm6, %v7273_v16 }
 0x61d   : > { %7292 = vst.msk [vmem:[%s13659_s27 + $0x68] sm:$0xff] %vm7278_vm6, %v7271_v22 }
 0x61f   : > { %v8871_v53 = vpop.f32.mrb[196].mxu1 }
 0x620   : > { %v7276_v47 = vadd.f32 %v8871_v53, %v7811_v43  ;;  %v7216_v62 = vpop.f32.mrb[197].mxu1 }
 0x621   : > { %v7274_v8 = vadd.f32 %v7811_v43, %v7216_v62  ;;  %v8872_v11 = vpop.f32.mrb[198].mxu1 }
 0x622   : > { %7297 = vst.msk [vmem:[%s13659_s27 + $0x90] sm:$0xff] %vm7278_vm6, %v7276_v47  ;;  %v7277_v21 = vadd.f32 %v8872_v11, %v7811_v43  ;;  %v7219_v57 = vpop.f32.mrb[199].mxu1 }
 0x623   : > { %7295 = vst.msk [vmem:[%s13659_s27 + $0x80] sm:$0xff] %vm7278_vm6, %v7274_v8  ;;  %v7275_v19 = vadd.f32 %v7811_v43, %v7219_v57 }
 0x624   : > { %7298 = vst.msk [vmem:[%s13659_s27 + $0x98] sm:$0xff] %vm7278_vm6, %v7277_v21 }
 0x625   : > { %7296 = vst.msk [vmem:[%s13659_s27 + $0x88] sm:$0xff] %vm7278_vm6, %v7275_v19 }
 0x626 PF: > { %s17_s23 = sadd.s32 1, %s9114_s23   ;;  %s14778_s21 = smov %s9110_s22 }
 0x627   : > { %p14_p2 = scmp.ge.s32.totalorder %s17_s23, 7   ;;  %s14779_s22 = smov %s14781_s25 }
 0x629   :  { %16 = sbr.rel (!%p14_p2) target bundleno = 2 (0x2), region = 96 }
 0x630   :  { %7329 = vsyncpa [#allocation3], 1 }
 0x631   :  { %7331 = vsyncpa [#allocation3 + $0x1], 1 }

</bundles_post_ra>
